<compile_context>
chip_gen: v5e
topology: v5e:2x2
jax: 0.10.0
libtpu: 0.0.40
codegen_flags: <defaults>
</compile_context>

<pallas_src>
import functools

import jax
import jax.numpy as jnp
from jax import lax
from jax.experimental import pallas as pl
from jax.experimental.pallas import tpu as pltpu


def _fused_upconcat_conv_kernel(msi_ref, hsi_ref, w_ref, b_ref,
                                y_ref, sum_ref, sq_ref, xh_ref, xm_ref,
                                *, H, W, sx, C, COUT, PW):
    """Fused (row-upsampled hsi ++ msi) 3x3 conv + bias + ReLU + per-batch BN moments.

    msi_ref:  (1, H, W, C)   bf16  msi feature tile (one batch item)
    hsi_ref:  (1, h, W, C)   bf16  hsi tile, width already nearest-upsampled, rows still low-res
    w_ref:    (9*2C, C)      bf16  conv weight, taps stacked into the contraction dim
    b_ref:    (1, C)         f32   conv bias
    y_ref:    (1, H, W, C)   bf16  relu(conv) output tile
    sum_ref:  (1, 1, C)      f32   per-batch-item channel sum   (partial BN moment)
    sq_ref:   (1, 1, C)      f32   per-batch-item channel sumsq (partial BN moment)
    xh_ref/xm_ref: (H+2, PW, C) bf16 VMEM scratch, zero-bordered per-branch padded tiles
    """
    R = H + 2
    RPW = R * PW

    # Border-only zeroing: the interior is fully overwritten every grid step, and garbage in the
    # pad-column strip (cols >= W+2) never reaches a kept output (see wrap invariant below).
    zero_row = jnp.zeros((1, PW, C), xh_ref.dtype)
    zero_col = jnp.zeros((R, 1, C), xh_ref.dtype)
    for pad_ref in (xh_ref, xm_ref):
        pad_ref[pl.ds(0, 1), :, :] = zero_row          # top halo row
        pad_ref[pl.ds(H + 1, 1), :, :] = zero_row      # bottom halo row
        pad_ref[:, pl.ds(0, 1), :] = zero_col          # left halo col
        pad_ref[:, pl.ds(W + 1, 1), :] = zero_col      # right halo col

    # Interior stores at lane offset 0 (separate per-branch scratches -> no masked lane-offset
    # store).  The hsi rows are nearest-replicated in-kernel (leading-dim repeat, layout-safe).
    xh_ref[pl.ds(1, H), pl.ds(1, W), :] = jnp.repeat(hsi_ref[0], sx, axis=0)
    xm_ref[pl.ds(1, H), pl.ds(1, W), :] = msi_ref[0]

    # Flatten once; channel order [hsi, msi] matches cat([hsi_up, msi]) and the HWIO weight.
    # Rolls are done in f32 (well-supported sublane rotate path); values are bf16-exact either way.
    flat = jnp.concatenate(
        [xh_ref[...].reshape(RPW, C).astype(jnp.float32),
         xm_ref[...].reshape(RPW, C).astype(jnp.float32)], axis=1)      # (RPW, 2C)

    # K-stack the 9 taps: piece(ky,kx)[i] == flat[i + ky*PW + kx].  Wrap-around of the roll only
    # touches rows that are dropped below because PW >= W + 2 (asserted in the wrapper).
    pieces = []
    for ky in range(3):
        for kx in range(3):
            off = ky * PW + kx
            p = flat if off == 0 else pltpu.roll(flat, RPW - off, 0)
            pieces.append(p.astype(jnp.bfloat16))
    lhs = jnp.concatenate(pieces, axis=1)                               # (RPW, 9*2C) bf16

    acc = jnp.dot(lhs, w_ref[...], preferred_element_type=jnp.float32)  # (RPW, COUT) f32
    y = jnp.maximum(acc + b_ref[...], 0.0)                               # bias + ReLU in f32
    y3 = y.reshape(R, PW, COUT)[:H, :W, :]                               # drop halo / pad columns

    y_ref[0] = y3.astype(y_ref.dtype)                                    # bf16 writeback
    sum_ref[...] = jnp.sum(y3, axis=(0, 1)).reshape(1, 1, COUT)          # f32 BN partial moments
    sq_ref[...] = jnp.sum(y3 * y3, axis=(0, 1)).reshape(1, 1, COUT)


def up_concat_forward(msi_feat, hsi_feat, conv_w_oihw, conv_b, gamma, beta, eps=1e-5):
    """Forward: nearest-upsample hsi to msi size, concat, conv3x3+bias, ReLU, BatchNorm (train).

    msi_feat: (N, C, H, W), hsi_feat: (N, C, h, w) NCHW; conv_w_oihw: (C, 2C, 3, 3);
    conv_b/gamma/beta: (C,).  Returns (N, C, H, W) NCHW f32.
    """
    N, C, H, W = msi_feat.shape
    h, w = hsi_feat.shape[-2], hsi_feat.shape[-1]
    sx, sy = H // h, W // w
    assert H == h * sx and W == w * sy, "msi spatial size must be an integer multiple of hsi's"
    CIN, COUT = 2 * C, C
    KST = 9 * CIN
    PW = ((W + 2 + 15) // 16) * 16      # padded tile width: bf16 sublane-tile friendly
    assert PW >= W + 2                  # roll wrap-around must land only in dropped rows/cols

    # NCHW -> NHWC bf16.  hsi is transposed/cast at LOW resolution and only width-repeated here;
    # the row (sx) repeat happens inside the kernel.
    msi_nhwc = jnp.transpose(msi_feat, (0, 2, 3, 1)).astype(jnp.bfloat16)          # (N, H, W, C)
    hsi_low = jnp.transpose(hsi_feat, (0, 2, 3, 1)).astype(jnp.bfloat16)           # (N, h, w, C)
    hsi_wup = jnp.repeat(hsi_low, sy, axis=2)                                      # (N, h, W, C)
    # OIHW -> HWIO -> (9*2C, C): taps stacked into the matmul contraction dim.
    w_flat = jnp.transpose(conv_w_oihw, (2, 3, 1, 0)).reshape(KST, COUT).astype(jnp.bfloat16)
    b_row = conv_b.reshape(1, COUT).astype(jnp.float32)

    # Explicit scoped-VMEM budget (blocks are double-buffered); 56 MiB is safe on every
    # generation (v7x physical VMEM is 64 MiB; v5e/v6e have 128 MiB).
    est = (2 * (2 * H * W * C + 2 * h * W * C + 2 * H * W * COUT + 2 * KST * COUT)
           + 2 * (H + 2) * PW * C * 2
           + (H + 2) * PW * (KST * 6 + 2 * C * 4 + COUT * 8))
    vmem_limit = int(min(56 * 2 ** 20, max(32 * 2 ** 20, 2 * est)))

    kern = functools.partial(_fused_upconcat_conv_kernel,
                             H=H, W=W, sx=sx, C=C, COUT=COUT, PW=PW)

    y, sum_p, sq_p = pl.pallas_call(
        kern,
        out_shape=(
            jax.ShapeDtypeStruct((N, H, W, COUT), jnp.bfloat16),
            jax.ShapeDtypeStruct((N, 1, COUT), jnp.float32),
            jax.ShapeDtypeStruct((N, 1, COUT), jnp.float32),
        ),
        grid_spec=pltpu.PrefetchScalarGridSpec(
            num_scalar_prefetch=0,
            grid=(N,),
            in_specs=[
                pl.BlockSpec((1, H, W, C), lambda n: (n, 0, 0, 0)),
                pl.BlockSpec((1, h, W, C), lambda n: (n, 0, 0, 0)),
                pl.BlockSpec((KST, COUT), lambda n: (0, 0)),
                pl.BlockSpec((1, COUT), lambda n: (0, 0)),
            ],
            out_specs=[
                pl.BlockSpec((1, H, W, COUT), lambda n: (n, 0, 0, 0)),
                pl.BlockSpec((1, 1, COUT), lambda n: (n, 0, 0)),   # per-batch partial moments
                pl.BlockSpec((1, 1, COUT), lambda n: (n, 0, 0)),
            ],
            scratch_shapes=[
                pltpu.VMEM((H + 2, PW, C), jnp.bfloat16),   # padded hsi branch
                pltpu.VMEM((H + 2, PW, C), jnp.bfloat16),   # padded msi branch
            ],
        ),
        compiler_params=pltpu.CompilerParams(
            dimension_semantics=("parallel",),
            vmem_limit_bytes=vmem_limit,
        ),
    )(msi_nhwc, hsi_wup, w_flat, b_row)

    # BatchNorm2d (training mode, biased variance) from per-batch partial moments; the per-channel
    # affine is fused by XLA with the NHWC -> NCHW transpose (single extra pass over bf16 y).
    count = N * H * W
    mean = jnp.sum(sum_p, axis=0).reshape(COUT) / count
    var = jnp.maximum(jnp.sum(sq_p, axis=0).reshape(COUT) / count - mean * mean, 0.0)
    inv_std = lax.rsqrt(var + eps)
    scale = gamma * inv_std
    shift = beta - mean * scale
    out_nchw = (jnp.transpose(y, (0, 3, 1, 2)).astype(jnp.float32)
                * scale[None, :, None, None] + shift[None, :, None, None])
    return out_nchw


def _reference_forward(msi_feat, hsi_feat, conv_w_oihw, conv_b, gamma, beta,
                       eps=1e-5, operand_dtype=jnp.float32, store_dtype=jnp.float32):
    """Pure-JAX reference (NCHW, training-mode BN).

    operand_dtype=bf16 models the bf16 MXU operands; store_dtype=bf16 models the bf16 y writeback
    (BN moments are always computed from the f32 y, as in the kernel).
    """
    N, C, H, W = msi_feat.shape
    h, w = hsi_feat.shape[-2], hsi_feat.shape[-1]
    sx, sy = H // h, W // w
    hsi_up = jnp.repeat(jnp.repeat(hsi_feat, sx, axis=2), sy, axis=3)
    cat = jnp.concatenate([hsi_up, msi_feat], axis=1)
    cat = cat.astype(operand_dtype).astype(jnp.float32)
    wk = conv_w_oihw.astype(operand_dtype).astype(jnp.float32)
    conv = lax.conv_general_dilated(
        cat, wk, window_strides=(1, 1), padding=((1, 1), (1, 1)),
        dimension_numbers=("NCHW", "OIHW", "NCHW"))
    conv = conv + conv_b.reshape(1, C, 1, 1)
    y = jnp.maximum(conv, 0.0)
    mean = jnp.mean(y, axis=(0, 2, 3), keepdims=True)
    var = jnp.mean((y - mean) ** 2, axis=(0, 2, 3), keepdims=True)
    y_q = y.astype(store_dtype).astype(jnp.float32)          # models the bf16 y writeback
    y_hat = (y_q - mean) * lax.rsqrt(var + eps)
    return y_hat * gamma.reshape(1, C, 1, 1) + beta.reshape(1, C, 1, 1)


if __name__ == "__main__":
    key = jax.random.PRNGKey(0)
    k1, k2, k3, k4 = jax.random.split(key, 4)

    N, C, H, W = 2, 4, 16, 16   # msi spatial
    h, w = 8, 8                 # hsi spatial (2x2 nearest upsample)

    msi_feat = jax.random.normal(k1, (N, C, H, W), jnp.float32)
    hsi_feat = jax.random.normal(k2, (N, C, h, w), jnp.float32)
    conv_w = jax.random.normal(k3, (C, 2 * C, 3, 3), jnp.float32) * 0.1
    conv_b = jax.random.normal(k4, (C,), jnp.float32) * 0.1
    gamma = jnp.ones((C,), jnp.float32)   # BN weight init
    beta = jnp.zeros((C,), jnp.float32)   # BN bias init

    fwd = jax.jit(up_concat_forward)
    out = jax.block_until_ready(fwd(msi_feat, hsi_feat, conv_w, conv_b, gamma, beta))
    assert out.shape == (N, C, H, W)

    # Check 1: reference modelling the kernel's numerics (bf16 MXU operands + bf16 y writeback).
    # mean-abs is the tight bound; max-abs is loose because the kernel and the reference may round
    # a handful of y values to different adjacent bf16 levels (one-ulp boundary events).
    ref_mp = _reference_forward(msi_feat, hsi_feat, conv_w, conv_b, gamma, beta,
                                operand_dtype=jnp.bfloat16, store_dtype=jnp.bfloat16)
    d = jnp.abs(out - ref_mp)
    mean_err, max_err = float(jnp.mean(d)), float(jnp.max(d))
    assert mean_err < 2e-3, ("mean abs err vs bf16-modelled reference", mean_err)
    assert max_err < 6e-2, ("max abs err vs bf16-modelled reference", max_err)

    # Check 2: exact f32 module semantics (slack covers bf16 MXU operands + bf16 y storage).
    ref_f32 = _reference_forward(msi_feat, hsi_feat, conv_w, conv_b, gamma, beta)
    err_f32 = float(jnp.max(jnp.abs(out - ref_f32)))
    assert err_f32 < 9e-2, ("max abs err vs exact f32 reference", err_f32)

    print("KERNEL_OK")
</pallas_src>

<mosaic_0001>
module attributes {stable_mosaic.version = 11 : i64} {
  func.func @_fused_upconcat_conv_kernel(%arg0: i32, %arg1: memref<1x16x16x4xbf16, #tpu.memory_space<vmem>>, %arg2: memref<1x8x16x4xbf16, #tpu.memory_space<vmem>>, %arg3: memref<72x4xbf16, #tpu.memory_space<vmem>>, %arg4: memref<1x4xf32, #tpu.memory_space<vmem>>, %arg5: memref<1x16x16x4xbf16, #tpu.memory_space<vmem>>, %arg6: memref<1x1x4xf32, #tpu.memory_space<vmem>>, %arg7: memref<1x1x4xf32, #tpu.memory_space<vmem>>, %arg8: memref<18x32x4xbf16, #tpu.memory_space<vmem>>, %arg9: memref<18x32x4xbf16, #tpu.memory_space<vmem>>) attributes {dimension_semantics = [#tpu.dimension_semantics<parallel>], iteration_bounds = array<i64: 2>, scalar_prefetch = 0 : i64, scratch_operands = 2 : i64, tpu.core_type = #tpu.core_type<tc>, window_params = [{transform_indices = @transform_0, window_bounds = array<i64: 1, 16, 16, 4>}, {transform_indices = @transform_1, window_bounds = array<i64: 1, 8, 16, 4>}, {pipeline_mode = #tpu.pipeline_mode<synchronous>, transform_indices = @transform_2, window_bounds = array<i64: 72, 4>}, {pipeline_mode = #tpu.pipeline_mode<synchronous>, transform_indices = @transform_3, window_bounds = array<i64: 1, 4>}, {transform_indices = @transform_4, window_bounds = array<i64: 1, 16, 16, 4>}, {transform_indices = @transform_5, window_bounds = array<i64: 1, 1, 4>}, {transform_indices = @transform_6, window_bounds = array<i64: 1, 1, 4>}]} {
    %cst = arith.constant 0.000000e+00 : bf16
    %0 = vector.broadcast %cst : bf16 to vector<1x32x4xbf16>
    %cst_0 = arith.constant 0.000000e+00 : bf16
    %1 = vector.broadcast %cst_0 : bf16 to vector<18x1x4xbf16>
    %c0 = arith.constant 0 : index
    %c0_1 = arith.constant 0 : index
    %c0_2 = arith.constant 0 : index
    %2 = vector.load %arg8[%c0, %c0_1, %c0_2] : memref<18x32x4xbf16, #tpu.memory_space<vmem>>, vector<1x32x4xbf16>
    tpu.vector_store %arg8[%c0, %c0_1, %c0_2], %0 {strides = array<i32>} : memref<18x32x4xbf16, #tpu.memory_space<vmem>>, vector<1x32x4xbf16>,
    %c17 = arith.constant 17 : index
    %c0_3 = arith.constant 0 : index
    %c0_4 = arith.constant 0 : index
    %3 = vector.load %arg8[%c17, %c0_3, %c0_4] : memref<18x32x4xbf16, #tpu.memory_space<vmem>>, vector<1x32x4xbf16>
    tpu.vector_store %arg8[%c17, %c0_3, %c0_4], %0 {strides = array<i32>} : memref<18x32x4xbf16, #tpu.memory_space<vmem>>, vector<1x32x4xbf16>,
    %c0_5 = arith.constant 0 : index
    %c0_6 = arith.constant 0 : index
    %c0_7 = arith.constant 0 : index
    %4 = vector.load %arg8[%c0_5, %c0_6, %c0_7] : memref<18x32x4xbf16, #tpu.memory_space<vmem>>, vector<18x1x4xbf16>
    tpu.vector_store %arg8[%c0_5, %c0_6, %c0_7], %1 {strides = array<i32>} : memref<18x32x4xbf16, #tpu.memory_space<vmem>>, vector<18x1x4xbf16>,
    %c0_8 = arith.constant 0 : index
    %c17_9 = arith.constant 17 : index
    %c0_10 = arith.constant 0 : index
    %5 = vector.load %arg8[%c0_8, %c17_9, %c0_10] : memref<18x32x4xbf16, #tpu.memory_space<vmem>>, vector<18x1x4xbf16>
    tpu.vector_store %arg8[%c0_8, %c17_9, %c0_10], %1 {strides = array<i32>} : memref<18x32x4xbf16, #tpu.memory_space<vmem>>, vector<18x1x4xbf16>,
    %c0_11 = arith.constant 0 : index
    %c0_12 = arith.constant 0 : index
    %c0_13 = arith.constant 0 : index
    %6 = vector.load %arg9[%c0_11, %c0_12, %c0_13] : memref<18x32x4xbf16, #tpu.memory_space<vmem>>, vector<1x32x4xbf16>
    tpu.vector_store %arg9[%c0_11, %c0_12, %c0_13], %0 {strides = array<i32>} : memref<18x32x4xbf16, #tpu.memory_space<vmem>>, vector<1x32x4xbf16>,
    %c17_14 = arith.constant 17 : index
    %c0_15 = arith.constant 0 : index
    %c0_16 = arith.constant 0 : index
    %7 = vector.load %arg9[%c17_14, %c0_15, %c0_16] : memref<18x32x4xbf16, #tpu.memory_space<vmem>>, vector<1x32x4xbf16>
    tpu.vector_store %arg9[%c17_14, %c0_15, %c0_16], %0 {strides = array<i32>} : memref<18x32x4xbf16, #tpu.memory_space<vmem>>, vector<1x32x4xbf16>,
    %c0_17 = arith.constant 0 : index
    %c0_18 = arith.constant 0 : index
    %c0_19 = arith.constant 0 : index
    %8 = vector.load %arg9[%c0_17, %c0_18, %c0_19] : memref<18x32x4xbf16, #tpu.memory_space<vmem>>, vector<18x1x4xbf16>
    tpu.vector_store %arg9[%c0_17, %c0_18, %c0_19], %1 {strides = array<i32>} : memref<18x32x4xbf16, #tpu.memory_space<vmem>>, vector<18x1x4xbf16>,
    %c0_20 = arith.constant 0 : index
    %c17_21 = arith.constant 17 : index
    %c0_22 = arith.constant 0 : index
    %9 = vector.load %arg9[%c0_20, %c17_21, %c0_22] : memref<18x32x4xbf16, #tpu.memory_space<vmem>>, vector<18x1x4xbf16>
    tpu.vector_store %arg9[%c0_20, %c17_21, %c0_22], %1 {strides = array<i32>} : memref<18x32x4xbf16, #tpu.memory_space<vmem>>, vector<18x1x4xbf16>,
    %c0_23 = arith.constant 0 : index
    %c0_24 = arith.constant 0 : index
    %c0_25 = arith.constant 0 : index
    %c0_26 = arith.constant 0 : index
    %10 = vector.load %arg2[%c0_23, %c0_24, %c0_25, %c0_26] : memref<1x8x16x4xbf16, #tpu.memory_space<vmem>>, vector<1x8x16x4xbf16>
    %11 = vector.shape_cast %10 : vector<1x8x16x4xbf16> to vector<8x16x4xbf16>
    %12 = vector.shape_cast %11 : vector<8x16x4xbf16> to vector<8x1x16x4xbf16>
    %13 = vector.broadcast %12 : vector<8x1x16x4xbf16> to vector<8x2x16x4xbf16>
    %14 = vector.shape_cast %13 : vector<8x2x16x4xbf16> to vector<16x16x4xbf16>
    %c1 = arith.constant 1 : index
    %c1_27 = arith.constant 1 : index
    %c0_28 = arith.constant 0 : index
    %15 = vector.load %arg8[%c1, %c1_27, %c0_28] : memref<18x32x4xbf16, #tpu.memory_space<vmem>>, vector<16x16x4xbf16>
    tpu.vector_store %arg8[%c1, %c1_27, %c0_28], %14 {strides = array<i32>} : memref<18x32x4xbf16, #tpu.memory_space<vmem>>, vector<16x16x4xbf16>,
    %c0_29 = arith.constant 0 : index
    %c0_30 = arith.constant 0 : index
    %c0_31 = arith.constant 0 : index
    %c0_32 = arith.constant 0 : index
    %16 = vector.load %arg1[%c0_29, %c0_30, %c0_31, %c0_32] : memref<1x16x16x4xbf16, #tpu.memory_space<vmem>>, vector<1x16x16x4xbf16>
    %17 = vector.shape_cast %16 : vector<1x16x16x4xbf16> to vector<16x16x4xbf16>
    %c1_33 = arith.constant 1 : index
    %c1_34 = arith.constant 1 : index
    %c0_35 = arith.constant 0 : index
    %18 = vector.load %arg9[%c1_33, %c1_34, %c0_35] : memref<18x32x4xbf16, #tpu.memory_space<vmem>>, vector<16x16x4xbf16>
    tpu.vector_store %arg9[%c1_33, %c1_34, %c0_35], %17 {strides = array<i32>} : memref<18x32x4xbf16, #tpu.memory_space<vmem>>, vector<16x16x4xbf16>,
    %c0_36 = arith.constant 0 : index
    %c0_37 = arith.constant 0 : index
    %c0_38 = arith.constant 0 : index
    %19 = vector.load %arg8[%c0_36, %c0_37, %c0_38] : memref<18x32x4xbf16, #tpu.memory_space<vmem>>, vector<18x32x4xbf16>
    %20 = vector.shape_cast %19 : vector<18x32x4xbf16> to vector<576x4xbf16>
    %21 = arith.extf %20 : vector<576x4xbf16> to vector<576x4xf32>
    %c0_39 = arith.constant 0 : index
    %c0_40 = arith.constant 0 : index
    %c0_41 = arith.constant 0 : index
    %22 = vector.load %arg9[%c0_39, %c0_40, %c0_41] : memref<18x32x4xbf16, #tpu.memory_space<vmem>>, vector<18x32x4xbf16>
    %23 = vector.shape_cast %22 : vector<18x32x4xbf16> to vector<576x4xbf16>
    %24 = arith.extf %23 : vector<576x4xbf16> to vector<576x4xf32>
    %25 = tpu.concatenate %21, %24 in 1 : vector<576x4xf32>, vector<576x4xf32> -> vector<576x8xf32>
    %26 = arith.truncf %25 : vector<576x8xf32> to vector<576x8xbf16>
    %c575_i32 = arith.constant 575 : i32
    %27 = tpu.dynamic_rotate %25 by %c575_i32 dim 0 : vector<576x8xf32>, i32 -> vector<576x8xf32>
    %28 = arith.truncf %27 : vector<576x8xf32> to vector<576x8xbf16>
    %c574_i32 = arith.constant 574 : i32
    %29 = tpu.dynamic_rotate %25 by %c574_i32 dim 0 : vector<576x8xf32>, i32 -> vector<576x8xf32>
    %30 = arith.truncf %29 : vector<576x8xf32> to vector<576x8xbf16>
    %c544_i32 = arith.constant 544 : i32
    %31 = tpu.dynamic_rotate %25 by %c544_i32 dim 0 : vector<576x8xf32>, i32 -> vector<576x8xf32>
    %32 = arith.truncf %31 : vector<576x8xf32> to vector<576x8xbf16>
    %c543_i32 = arith.constant 543 : i32
    %33 = tpu.dynamic_rotate %25 by %c543_i32 dim 0 : vector<576x8xf32>, i32 -> vector<576x8xf32>
    %34 = arith.truncf %33 : vector<576x8xf32> to vector<576x8xbf16>
    %c542_i32 = arith.constant 542 : i32
    %35 = tpu.dynamic_rotate %25 by %c542_i32 dim 0 : vector<576x8xf32>, i32 -> vector<576x8xf32>
    %36 = arith.truncf %35 : vector<576x8xf32> to vector<576x8xbf16>
    %c512_i32 = arith.constant 512 : i32
    %37 = tpu.dynamic_rotate %25 by %c512_i32 dim 0 : vector<576x8xf32>, i32 -> vector<576x8xf32>
    %38 = arith.truncf %37 : vector<576x8xf32> to vector<576x8xbf16>
    %c511_i32 = arith.constant 511 : i32
    %39 = tpu.dynamic_rotate %25 by %c511_i32 dim 0 : vector<576x8xf32>, i32 -> vector<576x8xf32>
    %40 = arith.truncf %39 : vector<576x8xf32> to vector<576x8xbf16>
    %c510_i32 = arith.constant 510 : i32
    %41 = tpu.dynamic_rotate %25 by %c510_i32 dim 0 : vector<576x8xf32>, i32 -> vector<576x8xf32>
    %42 = arith.truncf %41 : vector<576x8xf32> to vector<576x8xbf16>
    %43 = tpu.concatenate %26, %28, %30, %32, %34, %36, %38, %40, %42 in 1 : vector<576x8xbf16>, vector<576x8xbf16>, vector<576x8xbf16>, vector<576x8xbf16>, vector<576x8xbf16>, vector<576x8xbf16>, vector<576x8xbf16>, vector<576x8xbf16>, vector<576x8xbf16> -> vector<576x72xbf16>
    %c0_42 = arith.constant 0 : index
    %c0_43 = arith.constant 0 : index
    %44 = vector.load %arg3[%c0_42, %c0_43] : memref<72x4xbf16, #tpu.memory_space<vmem>>, vector<72x4xbf16>
    %cst_44 = arith.constant dense<0.000000e+00> : vector<576x4xf32>
    %45 = tpu.matmul %43, %44, %cst_44 {dimension_numbers = #tpu.dot_dimension_numbers<[1], [0], [0], [1], [0, 0, 1, 1], [], []>} : vector<576x72xbf16>, vector<72x4xbf16>, vector<576x4xf32> -> vector<576x4xf32>
    %c0_45 = arith.constant 0 : index
    %c0_46 = arith.constant 0 : index
    %46 = vector.load %arg4[%c0_45, %c0_46] : memref<1x4xf32, #tpu.memory_space<vmem>>, vector<1x4xf32>
    %47 = vector.broadcast %46 : vector<1x4xf32> to vector<576x4xf32>
    %48 = arith.addf %45, %47 : vector<576x4xf32>
    %cst_47 = arith.constant 0.000000e+00 : f32
    %49 = vector.broadcast %cst_47 : f32 to vector<576x4xf32>
    %50 = arith.maximumf %48, %49 : vector<576x4xf32>
    %51 = vector.shape_cast %50 : vector<576x4xf32> to vector<18x32x4xf32>
    %52 = vector.extract_strided_slice %51 {offsets = [0, 0, 0], sizes = [16, 16, 4], strides = [1, 1, 1]} : vector<18x32x4xf32> to vector<16x16x4xf32>
    %53 = arith.truncf %52 : vector<16x16x4xf32> to vector<16x16x4xbf16>
    %c0_48 = arith.constant 0 : index
    %c0_49 = arith.constant 0 : index
    %c0_50 = arith.constant 0 : index
    %c0_51 = arith.constant 0 : index
    %54 = vector.load %arg5[%c0_48, %c0_49, %c0_50, %c0_51] : memref<1x16x16x4xbf16, #tpu.memory_space<vmem>>, vector<1x16x16x4xbf16>
    %55 = vector.shape_cast %54 : vector<1x16x16x4xbf16> to vector<16x16x4xbf16>
    %56 = vector.shape_cast %53 : vector<16x16x4xbf16> to vector<1x16x16x4xbf16>
    tpu.vector_store %arg5[%c0_48, %c0_49, %c0_50, %c0_51], %56 {strides = array<i32>} : memref<1x16x16x4xbf16, #tpu.memory_space<vmem>>, vector<1x16x16x4xbf16>,
    %cst_52 = arith.constant dense<0.000000e+00> : vector<4xf32>
    %57 = vector.multi_reduction <add>, %52, %cst_52 [0, 1] : vector<16x16x4xf32> to vector<4xf32>
    %58 = vector.shape_cast %57 : vector<4xf32> to vector<1x1x4xf32>
    %c0_53 = arith.constant 0 : index
    %c0_54 = arith.constant 0 : index
    %c0_55 = arith.constant 0 : index
    %59 = vector.load %arg6[%c0_53, %c0_54, %c0_55] : memref<1x1x4xf32, #tpu.memory_space<vmem>>, vector<1x1x4xf32>
    tpu.vector_store %arg6[%c0_53, %c0_54, %c0_55], %58 {strides = array<i32>} : memref<1x1x4xf32, #tpu.memory_space<vmem>>, vector<1x1x4xf32>,
    %60 = arith.mulf %52, %52 : vector<16x16x4xf32>
    %cst_56 = arith.constant dense<0.000000e+00> : vector<4xf32>
    %61 = vector.multi_reduction <add>, %60, %cst_56 [0, 1] : vector<16x16x4xf32> to vector<4xf32>
    %62 = vector.shape_cast %61 : vector<4xf32> to vector<1x1x4xf32>
    %c0_57 = arith.constant 0 : index
    %c0_58 = arith.constant 0 : index
    %c0_59 = arith.constant 0 : index
    %63 = vector.load %arg7[%c0_57, %c0_58, %c0_59] : memref<1x1x4xf32, #tpu.memory_space<vmem>>, vector<1x1x4xf32>
    tpu.vector_store %arg7[%c0_57, %c0_58, %c0_59], %62 {strides = array<i32>} : memref<1x1x4xf32, #tpu.memory_space<vmem>>, vector<1x1x4xf32>,
    return
  }
  func.func @transform_0(%arg0: i32) -> (i32, i32, i32, i32) {
    %c0_i32 = arith.constant 0 : i32
    %c0_i32_0 = arith.constant 0 : i32
    %c0_i32_1 = arith.constant 0 : i32
    %c0_i32_2 = arith.constant 0 : i32
    return %arg0, %c0_i32, %c0_i32_0, %c0_i32_1 : i32, i32, i32, i32
  }
  func.func @transform_1(%arg0: i32) -> (i32, i32, i32, i32) {
    %c0_i32 = arith.constant 0 : i32
    %c0_i32_0 = arith.constant 0 : i32
    %c0_i32_1 = arith.constant 0 : i32
    %c0_i32_2 = arith.constant 0 : i32
    return %arg0, %c0_i32, %c0_i32_0, %c0_i32_1 : i32, i32, i32, i32
  }
  func.func @transform_2(%arg0: i32) -> (i32, i32) {
    %c0_i32 = arith.constant 0 : i32
    %c0_i32_0 = arith.constant 0 : i32
    %c0_i32_1 = arith.constant 0 : i32
    return %c0_i32, %c0_i32_0 : i32, i32
  }
  func.func @transform_3(%arg0: i32) -> (i32, i32) {
    %c0_i32 = arith.constant 0 : i32
    %c0_i32_0 = arith.constant 0 : i32
    %c0_i32_1 = arith.constant 0 : i32
    return %c0_i32, %c0_i32_0 : i32, i32
  }
  func.func @transform_4(%arg0: i32) -> (i32, i32, i32, i32) {
    %c0_i32 = arith.constant 0 : i32
    %c0_i32_0 = arith.constant 0 : i32
    %c0_i32_1 = arith.constant 0 : i32
    %c0_i32_2 = arith.constant 0 : i32
    return %arg0, %c0_i32, %c0_i32_0, %c0_i32_1 : i32, i32, i32, i32
  }
  func.func @transform_5(%arg0: i32) -> (i32, i32, i32) {
    %c0_i32 = arith.constant 0 : i32
    %c0_i32_0 = arith.constant 0 : i32
    %c0_i32_1 = arith.constant 0 : i32
    return %arg0, %c0_i32, %c0_i32_0 : i32, i32, i32
  }
  func.func @transform_6(%arg0: i32) -> (i32, i32, i32) {
    %c0_i32 = arith.constant 0 : i32
    %c0_i32_0 = arith.constant 0 : i32
    %c0_i32_1 = arith.constant 0 : i32
    return %arg0, %c0_i32, %c0_i32_0 : i32, i32, i32
  }
}

</mosaic_0001>

<bundles_post_ra>
// kernel: up_concat_forward.1
= control target key start
LH: loop header
LB: loop body
LE: loop exit
PB: predicated region body
PF: predicated region fallthrough
CT: control target
= control target key end

     0   :  { %s5531_s21 = smov 0   ;;  %s9309_s0 = inlined_call_operand.vmem [shape: bf16[2,16,16,4], index: 0, kind: input, shape index: {}]   ;;  %s9310_s1 = inlined_call_operand.vmem [shape: bf16[2,8,16,4], index: 1, kind: input, shape index: {}]   ;;  %s9311_s2 = inlined_call_operand.vmem [shape: bf16[72,4], index: 2, kind: input, shape index: {}]   ;;  %s9312_s3 = inlined_call_operand.vmem [shape: f32[1,4], index: 3, kind: input, shape index: {}]   ;;  %s9313_s4 = inlined_call_operand.vmem [shape: bf16[2,16,16,4], index: 4, kind: output, shape index: {0}]   ;;  %s9314_s5 = inlined_call_operand.vmem [shape: f32[2,1,4], index: 5, kind: output, shape index: {1}]   ;;  %s9315_s6 = inlined_call_operand.vmem [shape: f32[2,1,4], index: 6, kind: output, shape index: {2}]  }
   0x1 LB: > { %s4833_s22 = sadd.s32 4294967295, %s5484_s21   ;;  %p4837_p0 = scmp.ge.s32.totalorder %s5484_s21, 1  ;;  %s5484_s21 = sphi %s5531_s21, %s17_s21  }
   0x2   : > { %p227_p1 = scmp.lt.s32.totalorder %s5484_s21, 3 }
   0x4   : > { %p228_p2 = pnand %p4837_p0, %p227_p1 }
   0x6   : > { %231 = sbr.rel (%p228_p2) target bundleno = 1270 (0x4f6), region = 36 }
   0xb   : > { %vm290_vm0 = vcmask 27648   ;;  %v5486_v0 = vmov 0   ;;  %p268_p3 = scmp.lt.s32.totalorder %s4833_s22, 1  ;;  %vm300_vm1 = vcmask 24576   ;;  %vm301_vm2 = vsmask.f32 256 }
   0xc   : > { %413 = vst.msk [vmem:[#allocation3] sm:$0xf] %vm290_vm0, %v5486_v0  ;;  %vm357_vm3 = vsmask.f32 7938  ;;  %v428_v1 = vld [vmem:[#allocation3 + $0x20] sm:$0x1]  ;;  %vm5554_vm4 = vmand %vm300_vm1, %vm301_vm2 }
   0xd   : > { %414 = vst.msk [vmem:[#allocation3 + $0x4] sm:$0xf] %vm290_vm0, %v5486_v0  ;;  %s10252_s22 = smov (!%p268_p3, %s4833_s22), 1  ;;  %vm546_vm5 = vsmask.f32 4368  ;;  %vm5588_vm6 = vmand %vm300_vm1, %vm357_vm3  ;;  %v429_v12 = vsel %vm5554_vm4, 0, %v428_v1 }
   0xe   : > { %291 = vst.msk [vmem:[#allocation2] sm:$0xf] %vm290_vm0, %v5486_v0  ;;  %s4898_s23 = sshll.u32 %s10252_s22, 7  ;;  %v5567_v3 = vld [vmem:[#allocation3 + $0x10] sm:$0x1]  ;;  %vm5620_vm7 = vmor %vm301_vm2, %vm546_vm5  ;;  %s5487_s27 = smov 4  }
   0xf   : > { %292 = vst.msk [vmem:[#allocation2 + $0x4] sm:$0xf] %vm290_vm0, %v5486_v0  ;;  %s5565_s26 = scalar_lea.vmem %s9309_s0, %s4898_s23  ;;  %v5575_v6 = vld [vmem:[#allocation3 + $0x28] sm:$0x1]  ;;  %v5577_v7 = vld [vmem:[#allocation3 + $0x18] sm:$0x1]  ;;  %vm5670_vm8 = vmand %vm290_vm0, %vm357_vm3  ;;  %s288_s16 = scalar_lea.vmem %s9315_s6, %s10252_s22 }
  0x10   : > { %293 = vst.msk [vmem:[#allocation2 + $0x8] sm:$0xf] %vm290_vm0, %v5486_v0  ;;  %v5572_v4 = vld [vmem:[%s5565_s26 + $0x8] sm:$0xf]  ;;  %v826_v5 = vld [vmem:[%s5565_s26 + $0xc] sm:$0xf] }
  0x11   : > { %294 = vst.msk [vmem:[#allocation2 + $0xc] sm:$0xf] %vm290_vm0, %v5486_v0  ;;  %v873_v9 = vshrl.u32 %v5572_v4, 16  ;;  %v881_v13 = vshrl.u32 %v826_v5, 16  ;;  %v884_v14 = vshll.u32 %v826_v5, 16  ;;  %v426_v17 = vsel %vm5554_vm4, 0, %v5567_v3 }
  0x12   : > { %296 = vst.msk [vmem:[#allocation2 + $0x110] sm:$0xf] %vm290_vm0, %v5486_v0  ;;  %v5594_v15 = vld [vmem:[#allocation3 + $0x30] sm:$0x1]  ;;  %v5600_v18 = vld [vmem:[%s5565_s26] sm:$0xf] }
  0x13   : > { %v422_v8 = vld [vmem:[#allocation3] sm:$0x1]  ;;  %297 = vst.msk [vmem:[#allocation2 + $0x114] sm:$0xf] %vm290_vm0, %v5486_v0  ;;  %v875_v16 = vrot.slane %v873_v9, 7  ;;  %v5604_v19 = vrot.slane %v881_v13, 7 }
  0x14   : > { %v423_v10 = vsel %vm5554_vm4, 0, %v422_v8  ;;  %298 = vst.msk [vmem:[#allocation2 + $0x118] sm:$0xf] %vm290_vm0, %v5486_v0  ;;  %v824_v20 = vld [vmem:[%s5565_s26 + $0x4] sm:$0xf]  ;;  %v856_v21 = vshrl.u32 %v5600_v18, 16 }
  0x15   : > { %424 = vst [vmem:[#allocation3] sm:$0x1] %v423_v10  ;;  %v879_v22 = vrot.slane %v875_v16, 4  ;;  %v864_v23 = vshrl.u32 %v824_v20, 16  ;;  %v483_v24 = vsel %vm5588_vm6, 0, %v5575_v6  ;;  %v480_v25 = vsel %vm5588_vm6, 0, %v5577_v7 }
  0x16   : > { %299 = vst.msk [vmem:[#allocation2 + $0x11c] sm:$0xf] %vm290_vm0, %v5486_v0  ;;  %v876_v27 = vshll.u32 %v5572_v4, 16  ;;  %v886_v28 = vor.u32 %v884_v14, %v5604_v19  ;;  %v858_v29 = vrot.slane %v856_v21, 7  ;;  %v867_v30 = vshll.u32 %v824_v20, 16  ;;  %s4899_s28 = sshll.u32 %s10252_s22, 6 }
  0x17   : > { %415 = vst.msk [vmem:[#allocation3 + $0x8] sm:$0xf] %vm290_vm0, %v5486_v0  ;;  %v5628_v31 = vrot.slane %v864_v23, 7  ;;  %v432_v32 = vsel %vm5554_vm4, 0, %v5594_v15  ;;  %v5634_v33 = vld [vmem:[%s5565_s26 + $0x10] sm:$0xf]  ;;  %s5945_s7 = scalar_lea.vmem %s9310_s1, %s4899_s28 }
  0x18   : > { %416 = vst.msk [vmem:[#allocation3 + $0xc] sm:$0xf] %vm290_vm0, %v5486_v0  ;;  %v862_v34 = vrot.slane %v858_v29, 4  ;;  %v828_v35 = vld [vmem:[%s5565_s26 + $0x14] sm:$0xf]  ;;  %v890_v36 = vshrl.u32 %v5634_v33, 16  ;;  %v887_v37 = vsel %vm5620_vm7, %v879_v22, %v886_v28  ;;  %v878_v61 = vor.u32 %v876_v27, %v875_v16 }
  0x19   : > { %418 = vst.msk [vmem:[#allocation3 + $0x110] sm:$0xf] %vm290_vm0, %v5486_v0  ;;  %v859_v38 = vshll.u32 %v5600_v18, 16  ;;  %v869_v39 = vor.u32 %v867_v30, %v5628_v31  ;;  %v898_v40 = vshrl.u32 %v828_v35, 16  ;;  %v888_v42 = vrot.slane %v5604_v19, 4  ;;  %s5488_s8 = smov 8  }
  0x1a   : > { %419 = vst.msk [vmem:[#allocation3 + $0x114] sm:$0xf] %vm290_vm0, %v5486_v0  ;;  %v892_v43 = vrot.slane %v890_v36, 7  ;;  %v901_v44 = vshll.u32 %v828_v35, 16  ;;  %v434_v49 = vld [vmem:[#allocation3 + $0x40] sm:$0x1] }
  0x1b   : > { %420 = vst.msk [vmem:[#allocation3 + $0x118] sm:$0xf] %vm290_vm0, %v5486_v0  ;;  %v870_v47 = vsel %vm5620_vm7, %v862_v34, %v869_v39  ;;  %v5651_v48 = vrot.slane %v898_v40, 7  ;;  %v871_v50 = vrot.slane %v5628_v31, 4  ;;  %v893_v55 = vshll.u32 %v5634_v33, 16  ;;  %s5489_s9 = smov 16  }
  0x1c   : > { %v5050_v41 = vld [vmem:[#allocation3] sm:$0xff]   ;;  %421 = vst.msk [vmem:[#allocation3 + $0x11c] sm:$0xf] %vm290_vm0, %v5486_v0  ;;  %v896_v52 = vrot.slane %v892_v43, 4  ;;  %v5660_v57 = vld [vmem:[%s5565_s26 + $0x18] sm:$0xf]  ;;  %v861_v7 = vor.u32 %v859_v38, %v858_v29 }
  0x1d   : > { %v5051_v45 = vunpack.c.l.bf16 %v5050_v41  ;;  %v5052_v46 = vunpack.c.h.bf16 %v5050_v41  ;;  %430 = vst [vmem:[#allocation3 + $0x20] sm:$0x1] %v429_v12  ;;  %v903_v56 = vor.u32 %v901_v44, %v5651_v48  ;;  %v435_v58 = vsel %vm5554_vm4, 0, %v434_v49  ;;  %v830_v59 = vld [vmem:[%s5565_s26 + $0x1c] sm:$0xf]  ;;  %s5490_s10 = smov 24  }
  0x1e   : > { %1186 = vst.msk [vmem:[#allocation3 + $0x24] sm:$0xf] %vm290_vm0, %v887_v37  ;;  %v476_v51 = vld [vmem:[#allocation3 + $0x8] sm:$0x1]  ;;  %v907_v60 = vshrl.u32 %v5660_v57, 16  ;;  %v915_v62 = vshrl.u32 %v830_v59, 16  ;;  %v895_v30 = vor.u32 %v893_v55, %v892_v43 }
  0x1f   : > { %v5296_v53 = vpack.i.bf16 %v5052_v46, %v5051_v45  ;;  %427 = vst [vmem:[#allocation3 + $0x10] sm:$0x1] %v426_v17  ;;  %v477_v54 = vsel %vm5588_vm6, 0, %v476_v51  ;;  %v918_v63 = vshll.u32 %v830_v59, 16  ;;  %v485_v0 = vld [vmem:[#allocation3 + $0x38] sm:$0x1]  ;;  %v904_v3 = vsel %vm5620_vm7, %v896_v52, %v903_v56 }
  0x20   : > { %1179 = vst.msk [vmem:[#allocation3 + $0x14] sm:$0xf] %vm290_vm0, %v870_v47  ;;  %v909_v4 = vrot.slane %v907_v60, 7  ;;  %v905_v5 = vrot.slane %v5651_v48, 4  ;;  %v488_v6 = vld [vmem:[#allocation3 + $0x48] sm:$0x1] }
  0x21   : > { %5297 = vrot.lane.b32.xlu0 %v5296_v53, %s5487_s27  ;;  %478 = vst [vmem:[#allocation3 + $0x8] sm:$0x1] %v477_v54  ;;  %v910_v8 = vshll.u32 %v5660_v57, 16  ;;  %v5678_v9 = vrot.slane %v915_v62, 7  ;;  %v5680_v10 = vld [vmem:[#allocation3 + $0x58] sm:$0x1] }
  0x22   : > { %484 = vst [vmem:[#allocation3 + $0x28] sm:$0x1] %v483_v24  ;;  %v913_v13 = vrot.slane %v909_v4, 4  ;;  %v486_v14 = vsel %vm5588_vm6, 0, %v485_v0  ;;  %v489_v17 = vsel %vm5588_vm6, 0, %v488_v6  ;;  %v492_v18 = vsel %vm5588_vm6, 0, %v5680_v10 }
  0x23   : > { %481 = vst [vmem:[#allocation3 + $0x18] sm:$0x1] %v480_v25  ;;  %v920_v16 = vor.u32 %v918_v63, %v5678_v9  ;;  %v832_v20 = vld [vmem:[%s5565_s26 + $0x24] sm:$0xf]  ;;  %v437_v27 = vld [vmem:[#allocation3 + $0x50] sm:$0x1]  ;;  %v912_v49 = vor.u32 %v910_v8, %v909_v4 }
  0x24   : > { %v1183_v12 = vld [vmem:[#allocation3 + $0x20] sm:$0xf]  ;;  %433 = vst [vmem:[#allocation3 + $0x30] sm:$0x1] %v432_v32  ;;  %v932_v22 = vshrl.u32 %v832_v20, 16  ;;  %v935_v23 = vshll.u32 %v832_v20, 16 }
  0x25   : > { %v1184_v15 = vsel %vm5670_vm8, %v878_v61, %v1183_v12  ;;  %1193 = vst.msk [vmem:[#allocation3 + $0x34] sm:$0xf] %vm290_vm0, %v904_v3  ;;  %v921_v25 = vsel %vm5620_vm7, %v913_v13, %v920_v16  ;;  %v5699_v28 = vld [vmem:[%s5565_s26 + $0x20] sm:$0xf]  ;;  %v922_v32 = vrot.slane %v5678_v9, 4  ;;  %v438_v38 = vsel %vm5554_vm4, 0, %v437_v27 }
  0x26   : > { %1185 = vst [vmem:[#allocation3 + $0x20] sm:$0xf] %v1184_v15  ;;  %v1176_v21 = vld [vmem:[#allocation3 + $0x10] sm:$0xf]  ;;  %v5702_v33 = vrot.slane %v932_v22, 7  ;;  %v924_v34 = vshrl.u32 %v5699_v28, 16 }
  0x27   : > { %v1177_v24 = vsel %vm5670_vm8, %v861_v7, %v1176_v21  ;;  %436 = vst [vmem:[#allocation3 + $0x40] sm:$0x1] %v435_v58  ;;  %v927_v39 = vshll.u32 %v5699_v28, 16  ;;  %v5727_v54 = vld [vmem:[%s5565_s26 + $0x28] sm:$0xf]  ;;  %vm1864_vm9 = vcmask 31744  }
  0x28   : > { %1178 = vst [vmem:[#allocation3 + $0x10] sm:$0xf] %v1177_v24  ;;  %v5228_v29 = vld [vmem:[#allocation3 + $0x8] sm:$0xff]   ;;  %v939_v43 = vrot.slane %v5702_v33, 4  ;;  %v5714_v44 = vrot.slane %v924_v34, 7  ;;  %v937_v45 = vor.u32 %v935_v23, %v5702_v33  ;;  %v944_v60 = vshll.u32 %v5727_v54, 16 }
  0x29   : > { %v5055_v35 = vunpack.c.l.bf16 %v5228_v29  ;;  %v5056_v36 = vunpack.c.h.bf16 %v5228_v29  ;;  %v1187_v37 = vld [vmem:[#allocation3 + $0x28] sm:$0x1]  ;;  %1200 = vst.msk [vmem:[#allocation3 + $0x44] sm:$0xf] %vm290_vm0, %v921_v25  ;;  %v834_v31 = vld [vmem:[%s5565_s26 + $0x2c] sm:$0xf] }
  0x2a   : > { %v1188_v40 = vsel %vm5554_vm4, %v888_v42, %v1187_v37  ;;  %v1180_v41 = vld [vmem:[#allocation3 + $0x18] sm:$0x1]  ;;  %487 = vst [vmem:[#allocation3 + $0x38] sm:$0x1] %v486_v14  ;;  %v440_v42 = vld [vmem:[#allocation3 + $0x60] sm:$0x1] }
  0x2b   : > { %v5301_v46 = vpack.i.bf16 %v5056_v36, %v5055_v35  ;;  %1189 = vst [vmem:[#allocation3 + $0x28] sm:$0x1] %v1188_v40  ;;  %v1181_v19 = vsel %vm5554_vm4, %v871_v50, %v1180_v41  ;;  %v1190_v47 = vld [vmem:[#allocation3 + $0x30] sm:$0xf]  ;;  %v930_v52 = vrot.slane %v5714_v44, 4  ;;  %v441_v53 = vsel %vm5554_vm4, 0, %v440_v42 }
  0x2c   : > { %1182 = vst [vmem:[#allocation3 + $0x18] sm:$0x1] %v1181_v19  ;;  %v1191_v51 = vsel %vm5670_vm8, %v895_v30, %v1190_v47  ;;  %v941_v50 = vshrl.u32 %v5727_v54, 16  ;;  %v949_v0 = vshrl.u32 %v834_v31, 16  ;;  %v952_v3 = vshll.u32 %v834_v31, 16  ;;  %s5491_s11 = smov 32  }
  0x2d   : > { %v5231_v55 = vld [vmem:[#allocation3 + $0x20] sm:$0xff]   ;;  %5302 = vrot.lane.b32.xlu0 %v5301_v46, %s5487_s27  ;;  %1192 = vst [vmem:[#allocation3 + $0x30] sm:$0xf] %v1191_v51  ;;  %v938_v59 = vsel %vm5620_vm7, %v930_v52, %v937_v45  ;;  %v443_v8 = vld [vmem:[#allocation3 + $0x70] sm:$0x1]  ;;  %s5492_s12 = smov 40  }
  0x2e   : > { %v5067_v56 = vunpack.c.l.bf16 %v5231_v55  ;;  %v5068_v57 = vunpack.c.h.bf16 %v5231_v55  ;;  %v1197_v58 = vld [vmem:[#allocation3 + $0x40] sm:$0xf]  ;;  %490 = vst [vmem:[#allocation3 + $0x48] sm:$0x1] %v489_v17  ;;  %v943_v63 = vrot.slane %v941_v50, 7  ;;  %v5738_v14 = vrot.slane %v949_v0, 7 }
  0x2f   : > { %v5229_v61 = vld [vmem:[#allocation3 + $0x10] sm:$0xff]   ;;  %v1198_v62 = vsel %vm5670_vm8, %v912_v49, %v1197_v58  ;;  %493 = vst [vmem:[#allocation3 + $0x58] sm:$0x1] %v492_v18  ;;  %v444_v18 = vsel %vm5554_vm4, 0, %v443_v8  ;;  %v494_v27 = vld [vmem:[#allocation3 + $0x68] sm:$0x1] }
  0x30   : > { %v5316_v4 = vpack.i.bf16 %v5068_v57, %v5067_v56  ;;  %v5059_v6 = vunpack.c.l.bf16 %v5229_v61  ;;  %v5060_v7 = vunpack.c.h.bf16 %v5229_v61  ;;  %1199 = vst [vmem:[#allocation3 + $0x40] sm:$0xf] %v1198_v62  ;;  %v835_v10 = vld [vmem:[%s5565_s26 + $0x30] sm:$0xf]  ;;  %v947_v13 = vrot.slane %v943_v63, 4  ;;  %s5493_s13 = smov 48  }
  0x31   : > { %v1194_v12 = vld [vmem:[#allocation3 + $0x38] sm:$0x1]  ;;  %439 = vst [vmem:[#allocation3 + $0x50] sm:$0x1] %v438_v38  ;;  %v836_v20 = vld [vmem:[%s5565_s26 + $0x34] sm:$0xf]  ;;  %v954_v24 = vor.u32 %v952_v3, %v5738_v14  ;;  %v929_v38 = vor.u32 %v927_v39, %v5714_v44 }
  0x32   : > { %5317 = vrot.lane.b32.xlu2 %v5316_v4, %s5487_s27  ;;  %v5306_v15 = vpack.i.bf16 %v5060_v7, %v5059_v6  ;;  %v5232_v16 = vld [vmem:[#allocation3 + $0x28] sm:$0xff]   ;;  %v1195_v17 = vsel %vm5554_vm4, %v905_v5, %v1194_v12  ;;  %1207 = vst.msk [vmem:[#allocation3 + $0x54] sm:$0xf] %vm290_vm0, %v938_v59  ;;  %v958_v25 = vshrl.u32 %v835_v10, 16  ;;  %v961_v5 = vshll.u32 %v835_v10, 16  ;;  %s5494_s14 = smov 56  }
  0x33   : > { %v5071_v21 = vunpack.c.l.bf16 %v5232_v16  ;;  %v5072_v22 = vunpack.c.h.bf16 %v5232_v16  ;;  %v5230_v23 = vld [vmem:[#allocation3 + $0x18] sm:$0xff]   ;;  %1196 = vst [vmem:[#allocation3 + $0x38] sm:$0x1] %v1195_v17  ;;  %v966_v34 = vshrl.u32 %v836_v20, 16  ;;  %v955_v40 = vsel %vm5620_vm7, %v947_v13, %v954_v24  ;;  %v500_v50 = vld [vmem:[#allocation3 + $0x88] sm:$0x1] }
  0x34   : > { %5307 = vrot.lane.b32.xlu1 %v5306_v15, %s5487_s27  ;;  %v5063_v48 = vunpack.c.l.bf16 %v5230_v23  ;;  %v5064_v29 = vunpack.c.h.bf16 %v5230_v23  ;;  %v5233_v30 = vld [vmem:[#allocation3 + $0x30] sm:$0xff]   ;;  %442 = vst [vmem:[#allocation3 + $0x60] sm:$0x1] %v441_v53  ;;  %v497_v41 = vld [vmem:[#allocation3 + $0x78] sm:$0x1]  ;;  %v960_v47 = vrot.slane %v958_v25, 7  ;;  %v946_v53 = vor.u32 %v944_v60, %v943_v63 }
  0x35   : > { %v5075_v35 = vunpack.c.l.bf16 %v5233_v30  ;;  %v5076_v36 = vunpack.c.h.bf16 %v5233_v30  ;;  %v1201_v37 = vld [vmem:[#allocation3 + $0x48] sm:$0x1]  ;;  %445 = vst [vmem:[#allocation3 + $0x70] sm:$0x1] %v444_v18  ;;  %v5321_v45 = vpack.i.bf16 %v5072_v22, %v5071_v21  ;;  %v5761_v49 = vrot.slane %v966_v34, 7  ;;  %s5495_s15 = smov 64  }
  0x36   : > { %v1202_v46 = vsel %vm5554_vm4, %v922_v32, %v1201_v37  ;;  %v1208_v19 = vld [vmem:[#allocation3 + $0x58] sm:$0x1]  ;;  %1214 = vst.msk [vmem:[#allocation3 + $0x64] sm:$0xf] %vm290_vm0, %v955_v40  ;;  %v969_v44 = vshll.u32 %v836_v20, 16  ;;  %v495_v9 = vsel %vm5588_vm6, 0, %v494_v27  ;;  %v5311_v51 = vpack.i.bf16 %v5064_v29, %v5063_v48 }
  0x37   : > { %v5326_v42 = vpack.i.bf16 %v5076_v36, %v5075_v35  ;;  %v5235_v28 = vld [vmem:[#allocation3 + $0x40] sm:$0xff]   ;;  %1203 = vst [vmem:[#allocation3 + $0x48] sm:$0x1] %v1202_v46  ;;  %v1209_v39 = vsel %vm5554_vm4, %v939_v43, %v1208_v19  ;;  %v964_v54 = vrot.slane %v960_v47, 4  ;;  %v963_v31 = vor.u32 %v961_v5, %v960_v47  ;;  %v838_v0 = vld [vmem:[%s5565_s26 + $0x3c] sm:$0xf] }
  0x38   : > { %v5083_v32 = vunpack.c.l.bf16 %v5235_v28  ;;  %1210 = vst [vmem:[#allocation3 + $0x58] sm:$0x1] %v1209_v39  ;;  %v1204_v52 = vld [vmem:[#allocation3 + $0x50] sm:$0xf]  ;;  %v971_v33 = vor.u32 %v969_v44, %v5761_v49  ;;  %v498_v43 = vsel %vm5588_vm6, 0, %v497_v41  ;;  %v5084_v56 = vunpack.c.h.bf16 %v5235_v28 }
  0x39   : > { %5327 = vrot.lane.b32.xlu0 %v5326_v42, %s5487_s27  ;;  %v1205_v55 = vsel %vm5670_vm8, %v929_v38, %v1204_v52  ;;  %496 = vst [vmem:[#allocation3 + $0x68] sm:$0x1] %v495_v9  ;;  %v956_v58 = vrot.slane %v5738_v14, 4  ;;  %v973_v59 = vrot.slane %v5761_v49, 4  ;;  %v501_v60 = vsel %vm5588_vm6, 0, %v500_v50 }
  0x3a   : > { %5322 = vrot.lane.b32.xlu2 %v5321_v45, %s5487_s27  ;;  %v5234_v57 = vld [vmem:[#allocation3 + $0x38] sm:$0xff]   ;;  %1206 = vst [vmem:[#allocation3 + $0x50] sm:$0xf] %v1205_v55  ;;  %v972_v63 = vsel %vm5620_vm7, %v964_v54, %v971_v33  ;;  %v983_v7 = vshrl.u32 %v838_v0, 16  ;;  %v986_v8 = vshll.u32 %v838_v0, 16  ;;  %v5336_v14 = vpack.i.bf16 %v5084_v56, %v5083_v32 }
  0x3b   : > { %v5079_v61 = vunpack.c.l.bf16 %v5234_v57  ;;  %v1211_v62 = vld [vmem:[#allocation3 + $0x60] sm:$0xf]  ;;  %499 = vst [vmem:[#allocation3 + $0x78] sm:$0x1] %v498_v43  ;;  %v5080_v3 = vunpack.c.h.bf16 %v5234_v57  ;;  %v837_v13 = vld [vmem:[%s5565_s26 + $0x38] sm:$0xf] }
  0x3c   : > { %5312 = vrot.lane.b32.xlu1 %v5311_v51, %s5487_s27  ;;  %v1212_v4 = vsel %vm5670_vm8, %v946_v53, %v1211_v62  ;;  %v1218_v6 = vld [vmem:[#allocation3 + $0x70] sm:$0xf]  ;;  %1221 = vst.msk [vmem:[#allocation3 + $0x74] sm:$0xf] %vm290_vm0, %v972_v63  ;;  %v446_v12 = vld [vmem:[#allocation3 + $0x80] sm:$0x1] }
  0x3d   : > { %1213 = vst [vmem:[#allocation3 + $0x60] sm:$0xf] %v1212_v4  ;;  %v1219_v10 = vsel %vm5670_vm8, %v963_v31, %v1218_v6  ;;  %v985_v16 = vrot.slane %v983_v7, 7  ;;  %v447_v17 = vsel %vm5554_vm4, 0, %v446_v12  ;;  %v975_v18 = vshrl.u32 %v837_v13, 16 }
  0x3e   : > { %v5236_v15 = vld [vmem:[#allocation3 + $0x48] sm:$0xff]   ;;  %1220 = vst [vmem:[#allocation3 + $0x70] sm:$0xf] %v1219_v10  ;;  %v978_v23 = vshll.u32 %v837_v13, 16  ;;  %v449_v24 = vld [vmem:[#allocation3 + $0x90] sm:$0x1]  ;;  %v5331_v25 = vpack.i.bf16 %v5080_v3, %v5079_v61 }
  0x3f   : > { %v5087_v20 = vunpack.c.l.bf16 %v5236_v15  ;;  %v5088_v21 = vunpack.c.h.bf16 %v5236_v15  ;;  %v5238_v22 = vld [vmem:[#allocation3 + $0x58] sm:$0xff]   ;;  %502 = vst [vmem:[#allocation3 + $0x88] sm:$0x1] %v501_v60  ;;  %v990_v48 = vrot.slane %v985_v16, 4  ;;  %v977_v29 = vrot.slane %v975_v18, 7 }
  0x40   : > { %v1215_v27 = vld [vmem:[#allocation3 + $0x68] sm:$0x1]  ;;  %448 = vst [vmem:[#allocation3 + $0x80] sm:$0x1] %v447_v17  ;;  %v988_v35 = vor.u32 %v986_v8, %v985_v16  ;;  %v450_v36 = vsel %vm5554_vm4, 0, %v449_v24  ;;  %v5095_v40 = vunpack.c.l.bf16 %v5238_v22  ;;  %v5096_v41 = vunpack.c.h.bf16 %v5238_v22 }
  0x41   : > { %v5341_v30 = vpack.i.bf16 %v5088_v21, %v5087_v20  ;;  %v5237_v5 = vld [vmem:[#allocation3 + $0x50] sm:$0xff]   ;;  %v1216_v34 = vsel %vm5554_vm4, %v956_v58, %v1215_v27  ;;  %v839_v37 = vld [vmem:[%s5565_s26 + $0x40] sm:$0xf]  ;;  %v840_v38 = vld [vmem:[%s5565_s26 + $0x44] sm:$0xf]  ;;  %v981_v42 = vrot.slane %v977_v29, 4  ;;  %v980_v9 = vor.u32 %v978_v23, %v977_v29 }
  0x42   : > { %5337 = vrot.lane.b32.xlu2 %v5336_v14, %s5487_s27  ;;  %v5091_v45 = vunpack.c.l.bf16 %v5237_v5  ;;  %v5092_v46 = vunpack.c.h.bf16 %v5237_v5  ;;  %1217 = vst [vmem:[#allocation3 + $0x68] sm:$0x1] %v1216_v34  ;;  %v1222_v19 = vld [vmem:[#allocation3 + $0x78] sm:$0x1]  ;;  %v452_v47 = vld [vmem:[#allocation3 + $0xa0] sm:$0x1]  ;;  %v5351_v43 = vpack.i.bf16 %v5096_v41, %v5095_v40 }
  0x43   : > { %5342 = vrot.lane.b32.xlu0 %v5341_v30, %s5487_s27  ;;  %v1223_v49 = vsel %vm5554_vm4, %v973_v59, %v1222_v19  ;;  %451 = vst [vmem:[#allocation3 + $0x90] sm:$0x1] %v450_v36  ;;  %v992_v28 = vshrl.u32 %v839_v37, 16  ;;  %v995_v39 = vshll.u32 %v839_v37, 16  ;;  %v1000_v51 = vshrl.u32 %v840_v38, 16 }
  0x44   : > { %5332 = vrot.lane.b32.xlu1 %v5331_v25, %s5487_s27  ;;  %v5239_v44 = vld [vmem:[#allocation3 + $0x60] sm:$0xff]   ;;  %1224 = vst [vmem:[#allocation3 + $0x78] sm:$0x1] %v1223_v49  ;;  %v1003_v32 = vshll.u32 %v840_v38, 16  ;;  %v453_v52 = vsel %vm5554_vm4, 0, %v452_v47  ;;  %v989_v55 = vsel %vm5620_vm7, %v981_v42, %v988_v35  ;;  %v5346_v3 = vpack.i.bf16 %v5092_v46, %v5091_v45 }
  0x45   : > { %v5099_v53 = vunpack.c.l.bf16 %v5239_v44  ;;  %v5100_v54 = vunpack.c.h.bf16 %v5239_v44  ;;  %v994_v31 = vrot.slane %v992_v28, 7  ;;  %454 = vst [vmem:[#allocation3 + $0xa0] sm:$0x1] %v453_v52  ;;  %v841_v33 = vld [vmem:[%s5565_s26 + $0x48] sm:$0xf]  ;;  %v5809_v56 = vrot.slane %v1000_v51, 7 }
  0x46   : > { %v1229_v50 = vld [vmem:[#allocation3 + $0x88] sm:$0x1]  ;;  %1228 = vst.msk [vmem:[#allocation3 + $0x84] sm:$0xf] %vm290_vm0, %v989_v55  ;;  %v1009_v57 = vshrl.u32 %v841_v33, 16  ;;  %v5241_v59 = vld [vmem:[#allocation3 + $0x70] sm:$0xff]  }
  0x47   : > { %v5356_v58 = vpack.i.bf16 %v5100_v54, %v5099_v53  ;;  %v1230_v60 = vsel %vm5554_vm4, %v990_v48, %v1229_v50  ;;  %v1225_v61 = vld [vmem:[#allocation3 + $0x80] sm:$0xf]  ;;  %v997_v62 = vor.u32 %v995_v39, %v994_v31  ;;  %v998_v63 = vrot.slane %v994_v31, 4  ;;  %v842_v0 = vld [vmem:[%s5565_s26 + $0x4c] sm:$0xf] }
  0x48   : > { %1231 = vst [vmem:[#allocation3 + $0x88] sm:$0x1] %v1230_v60  ;;  %v1226_v4 = vsel %vm5670_vm8, %v980_v9, %v1225_v61  ;;  %v1005_v6 = vor.u32 %v1003_v32, %v5809_v56  ;;  %v1011_v7 = vrot.slane %v1009_v57, 7  ;;  %v503_v8 = vld [vmem:[#allocation3 + $0x98] sm:$0x1]  ;;  %v1012_v12 = vshll.u32 %v841_v33, 16 }
  0x49   : > { %v5240_v10 = vld [vmem:[#allocation3 + $0x68] sm:$0xff]   ;;  %1227 = vst [vmem:[#allocation3 + $0x80] sm:$0xf] %v1226_v4  ;;  %v1017_v13 = vshrl.u32 %v842_v0, 16  ;;  %v1020_v14 = vshll.u32 %v842_v0, 16  ;;  %v5107_v15 = vunpack.c.l.bf16 %v5241_v59  ;;  %v5108_v16 = vunpack.c.h.bf16 %v5241_v59 }
  0x4a   : > { %5352 = vrot.lane.b32.xlu2 %v5351_v43, %s5487_s27  ;;  %v1006_v17 = vsel %vm5620_vm7, %v998_v63, %v1005_v6  ;;  %v1232_v18 = vld [vmem:[#allocation3 + $0x90] sm:$0xf]  ;;  %v1015_v20 = vrot.slane %v1011_v7, 4  ;;  %v506_v21 = vld [vmem:[#allocation3 + $0xa8] sm:$0x1]  ;;  %v1014_v24 = vor.u32 %v1012_v12, %v1011_v7  ;;  %v504_v27 = vsel %vm5588_vm6, 0, %v503_v8 }
  0x4b   : > { %5357 = vrot.lane.b32.xlu0 %v5356_v58, %s5487_s27  ;;  %v5242_v22 = vld [vmem:[#allocation3 + $0x78] sm:$0xff]   ;;  %v1233_v23 = vsel %vm5670_vm8, %v997_v62, %v1232_v18  ;;  %1235 = vst.msk [vmem:[#allocation3 + $0x94] sm:$0xf] %vm290_vm0, %v1006_v17  ;;  %v5824_v25 = vrot.slane %v1017_v13, 7  ;;  %v5103_v48 = vunpack.c.l.bf16 %v5240_v10  ;;  %v5104_v29 = vunpack.c.h.bf16 %v5240_v10  ;;  %v844_v46 = vld [vmem:[%s5565_s26 + $0x54] sm:$0xf] }
  0x4c   : > { %5347 = vrot.lane.b32.xlu1 %v5346_v3, %s5487_s27  ;;  %v5111_v30 = vunpack.c.l.bf16 %v5242_v22  ;;  %v5112_v5 = vunpack.c.h.bf16 %v5242_v22  ;;  %1234 = vst [vmem:[#allocation3 + $0x90] sm:$0xf] %v1233_v23  ;;  %v1239_v34 = vld [vmem:[#allocation3 + $0xa0] sm:$0xf]  ;;  %v507_v37 = vsel %vm5588_vm6, 0, %v506_v21  ;;  %v5366_v40 = vpack.i.bf16 %v5108_v16, %v5107_v15 }
  0x4d   : > { %v1022_v35 = vor.u32 %v1020_v14, %v5824_v25  ;;  %v1240_v36 = vsel %vm5670_vm8, %v1014_v24, %v1239_v34  ;;  %505 = vst [vmem:[#allocation3 + $0x98] sm:$0x1] %v504_v27  ;;  %v509_v38 = vld [vmem:[#allocation3 + $0xb8] sm:$0x1]  ;;  %v1007_v41 = vrot.slane %v5809_v56, 4  ;;  %v1034_v42 = vshrl.u32 %v844_v46, 16 }
  0x4e   : > { %1241 = vst [vmem:[#allocation3 + $0xa0] sm:$0xf] %v1240_v36  ;;  %v510_v45 = vsel %vm5588_vm6, 0, %v509_v38  ;;  %v5371_v19 = vpack.i.bf16 %v5112_v5, %v5111_v30  ;;  %v455_v28 = vld [vmem:[#allocation3 + $0xb0] sm:$0x1]  ;;  %v5361_v39 = vpack.i.bf16 %v5104_v29, %v5103_v48  ;;  %v1037_v33 = vshll.u32 %v844_v46, 16 }
  0x4f   : > { %v5244_v47 = vld [vmem:[#allocation3 + $0x88] sm:$0xff]   ;;  %v1023_v49 = vsel %vm5620_vm7, %v1015_v20, %v1022_v35  ;;  %508 = vst [vmem:[#allocation3 + $0xa8] sm:$0x1] %v507_v37  ;;  %v456_v9 = vsel %vm5554_vm4, 0, %v455_v28  ;;  %v843_v51 = vld [vmem:[%s5565_s26 + $0x50] sm:$0xf] }
  0x50   : > { %v5243_v44 = vld [vmem:[#allocation3 + $0x80] sm:$0xff]   ;;  %1242 = vst.msk [vmem:[#allocation3 + $0xa4] sm:$0xf] %vm290_vm0, %v1023_v49  ;;  %v5119_v32 = vunpack.c.l.bf16 %v5244_v47  ;;  %v5120_v52 = vunpack.c.h.bf16 %v5244_v47  ;;  %v1036_v53 = vrot.slane %v1034_v42, 7  ;;  %v1026_v54 = vshrl.u32 %v843_v51, 16 }
  0x51   : > { %511 = vst [vmem:[#allocation3 + $0xb8] sm:$0x1] %v510_v45  ;;  %v458_v55 = vld [vmem:[#allocation3 + $0xc0] sm:$0x1]  ;;  %v1029_v31 = vshll.u32 %v843_v51, 16  ;;  %v5115_v50 = vunpack.c.l.bf16 %v5243_v44  ;;  %v1024_v57 = vrot.slane %v5824_v25, 4  ;;  %v5116_v60 = vunpack.c.h.bf16 %v5243_v44 }
  0x52   : > { %5367 = vrot.lane.b32.xlu2 %v5366_v40, %s5487_s27  ;;  %457 = vst [vmem:[#allocation3 + $0xb0] sm:$0x1] %v456_v9  ;;  %v459_v43 = vsel %vm5554_vm4, 0, %v458_v55  ;;  %v1041_v58 = vrot.slane %v1036_v53, 4  ;;  %v1028_v59 = vrot.slane %v1026_v54, 7  ;;  %v1039_v0 = vor.u32 %v1037_v33, %v1036_v53 }
  0x53   : > { %5372 = vrot.lane.b32.xlu0 %v5371_v19, %s5487_s27  ;;  %v5245_v56 = vld [vmem:[#allocation3 + $0x90] sm:$0xff]   ;;  %460 = vst [vmem:[#allocation3 + $0xc0] sm:$0x1] %v459_v43  ;;  %v845_v3 = vld [vmem:[%s5565_s26 + $0x58] sm:$0xf]  ;;  %v5381_v6 = vpack.i.bf16 %v5120_v52, %v5119_v32  ;;  %v5376_v27 = vpack.i.bf16 %v5116_v60, %v5115_v50  ;;  %vm4294_vm12 = vcmask 1043456  }
  0x54   : > { %5362 = vrot.lane.b32.xlu1 %v5361_v39, %s5487_s27  ;;  %v5123_v61 = vunpack.c.l.bf16 %v5245_v56  ;;  %v5124_v62 = vunpack.c.h.bf16 %v5245_v56  ;;  %v1236_v63 = vld [vmem:[#allocation3 + $0x98] sm:$0x1]  ;;  %v846_v4 = vld [vmem:[%s5565_s26 + $0x5c] sm:$0xf]  ;;  %v1032_v8 = vrot.slane %v1028_v59, 4  ;;  %v1043_v10 = vshrl.u32 %v845_v3, 16 }
  0x55   : > { %v1237_v7 = vsel %vm5554_vm4, %v1007_v41, %v1236_v63  ;;  %v461_v12 = vld [vmem:[#allocation3 + $0xd0] sm:$0x1]  ;;  %v5855_v13 = vld [vmem:[%s5565_s26 + $0x60] sm:$0xf]  ;;  %v1031_v16 = vor.u32 %v1029_v31, %v1028_v59  ;;  %v1046_v17 = vshll.u32 %v845_v3, 16  ;;  %v1051_v18 = vshrl.u32 %v846_v4, 16 }
  0x56   : > { %v5386_v14 = vpack.i.bf16 %v5124_v62, %v5123_v61  ;;  %1238 = vst [vmem:[#allocation3 + $0x98] sm:$0x1] %v1237_v7  ;;  %v1243_v15 = vld [vmem:[#allocation3 + $0xa8] sm:$0x1]  ;;  %v1040_v22 = vsel %vm5620_vm7, %v1032_v8, %v1039_v0  ;;  %v1045_v23 = vrot.slane %v1043_v10, 7  ;;  %v1054_v24 = vshll.u32 %v846_v4, 16 }
  0x57   : > { %v5247_v20 = vld [vmem:[#allocation3 + $0xa0] sm:$0xff]   ;;  %v1244_v21 = vsel %vm5554_vm4, %v1024_v57, %v1243_v15  ;;  %v5862_v30 = vrot.slane %v1051_v18, 7  ;;  %1249 = vst.msk [vmem:[#allocation3 + $0xb4] sm:$0xf] %vm290_vm0, %v1040_v22  ;;  %v1060_v37 = vshrl.u32 %v5855_v13, 16  ;;  %v462_v46 = vsel %vm5554_vm4, 0, %v461_v12 }
  0x58   : > { %v848_v25 = vld [vmem:[%s5565_s26 + $0x64] sm:$0xf]  ;;  %v5131_v48 = vunpack.c.l.bf16 %v5247_v20  ;;  %1245 = vst [vmem:[#allocation3 + $0xa8] sm:$0x1] %v1244_v21  ;;  %v1250_v29 = vld [vmem:[#allocation3 + $0xb8] sm:$0x1]  ;;  %v1048_v35 = vor.u32 %v1046_v17, %v1045_v23  ;;  %v5132_v38 = vunpack.c.h.bf16 %v5247_v20 }
  0x59   : > { %v1251_v5 = vsel %vm5554_vm4, %v1041_v58, %v1250_v29  ;;  %v1246_v34 = vld [vmem:[#allocation3 + $0xb0] sm:$0xf]  ;;  %v1049_v36 = vrot.slane %v1045_v23, 4  ;;  %v1056_v41 = vor.u32 %v1054_v24, %v5862_v30  ;;  %v1062_v47 = vrot.slane %v1060_v37, 7  ;;  %v512_v44 = vld [vmem:[#allocation3 + $0xc8] sm:$0x1] }
  0x5a   : > { %5382 = vrot.lane.b32.xlu2 %v5381_v6, %s5487_s27  ;;  %1252 = vst [vmem:[#allocation3 + $0xb8] sm:$0x1] %v1251_v5  ;;  %v1247_v40 = vsel %vm5670_vm8, %v1031_v16, %v1246_v34  ;;  %v1253_v45 = vld [vmem:[#allocation3 + $0xc0] sm:$0xf]  ;;  %v1068_v49 = vshrl.u32 %v848_v25, 16  ;;  %v1071_v42 = vshll.u32 %v848_v25, 16  ;;  %v5396_v53 = vpack.i.bf16 %v5132_v38, %v5131_v48 }
  0x5b   : > { %5387 = vrot.lane.b32.xlu0 %v5386_v14, %s5487_s27  ;;  %1248 = vst [vmem:[#allocation3 + $0xb0] sm:$0xf] %v1247_v40  ;;  %v1254_v19 = vsel %vm5670_vm8, %v1048_v35, %v1253_v45  ;;  %v1057_v28 = vsel %vm5620_vm7, %v1049_v36, %v1056_v41  ;;  %v1063_v39 = vshll.u32 %v5855_v13, 16  ;;  %v1066_v51 = vrot.slane %v1062_v47, 4  ;;  %v515_v31 = vld [vmem:[#allocation3 + $0xd8] sm:$0x1] }
  0x5c   : > { %5377 = vrot.lane.b32.xlu1 %v5376_v27, %s5487_s27  ;;  %1255 = vst [vmem:[#allocation3 + $0xc0] sm:$0xf] %v1254_v19  ;;  %v5882_v32 = vrot.slane %v1068_v49, 7  ;;  %v513_v52 = vsel %vm5588_vm6, 0, %v512_v44  ;;  %v518_v33 = vld [vmem:[#allocation3 + $0xe8] sm:$0x1] }
  0x5d   : > { %v5246_v9 = vld [vmem:[#allocation3 + $0x98] sm:$0xff]   ;;  %1256 = vst.msk [vmem:[#allocation3 + $0xc4] sm:$0xf] %vm290_vm0, %v1057_v28  ;;  %v1058_v56 = vrot.slane %v5862_v30, 4  ;;  %v516_v57 = vsel %vm5588_vm6, 0, %v515_v31  ;;  %v519_v58 = vsel %vm5588_vm6, 0, %v518_v33  ;;  %v1065_v3 = vor.u32 %v1063_v39, %v1062_v47 }
  0x5e   : > { %v5127_v54 = vunpack.c.l.bf16 %v5246_v9  ;;  %v5128_v55 = vunpack.c.h.bf16 %v5246_v9  ;;  %463 = vst [vmem:[#allocation3 + $0xd0] sm:$0x1] %v462_v46  ;;  %v1073_v50 = vor.u32 %v1071_v42, %v5882_v32  ;;  %v850_v62 = vld [vmem:[%s5565_s26 + $0x6c] sm:$0xf]  ;;  %v464_v63 = vld [vmem:[#allocation3 + $0xe0] sm:$0x1] }
  0x5f   : > { %v5248_v43 = vld [vmem:[#allocation3 + $0xa8] sm:$0xff]   ;;  %514 = vst [vmem:[#allocation3 + $0xc8] sm:$0x1] %v513_v52  ;;  %v1085_v6 = vshrl.u32 %v850_v62, 16  ;;  %v465_v7 = vsel %vm5554_vm4, 0, %v464_v63  ;;  %v1088_v15 = vshll.u32 %v850_v62, 16 }
  0x60   : > { %v5391_v59 = vpack.i.bf16 %v5128_v55, %v5127_v54  ;;  %v5135_v60 = vunpack.c.l.bf16 %v5248_v43  ;;  %v5136_v61 = vunpack.c.h.bf16 %v5248_v43  ;;  %517 = vst [vmem:[#allocation3 + $0xd8] sm:$0x1] %v516_v57  ;;  %v1074_v4 = vsel %vm5620_vm7, %v1066_v51, %v1073_v50  ;;  %v849_v14 = vld [vmem:[%s5565_s26 + $0x68] sm:$0xf]  ;;  %v467_v21 = vld [vmem:[#allocation3 + $0xf0] sm:$0x1] }
  0x61   : > { %v5250_v0 = vld [vmem:[#allocation3 + $0xb8] sm:$0xff]   ;;  %520 = vst [vmem:[#allocation3 + $0xe8] sm:$0x1] %v519_v58  ;;  %v1087_v18 = vrot.slane %v1085_v6, 7  ;;  %v1077_v20 = vshrl.u32 %v849_v14, 16  ;;  %v1075_v24 = vrot.slane %v5882_v32, 4 }
  0x62   : > { %5397 = vrot.lane.b32.xlu2 %v5396_v53, %s5487_s27  ;;  %v5401_v8 = vpack.i.bf16 %v5136_v61, %v5135_v60  ;;  %v5143_v10 = vunpack.c.l.bf16 %v5250_v0  ;;  %v5144_v12 = vunpack.c.h.bf16 %v5250_v0  ;;  %v5249_v13 = vld [vmem:[#allocation3 + $0xb0] sm:$0xff]   ;;  %1263 = vst.msk [vmem:[#allocation3 + $0xd4] sm:$0xf] %vm290_vm0, %v1074_v4  ;;  %v1080_v25 = vshll.u32 %v849_v14, 16  ;;  %v470_v54 = vld [vmem:[#allocation3 + $0x100] sm:$0x1] }
  0x63   : > { %v5139_v16 = vunpack.c.l.bf16 %v5249_v13  ;;  %v5140_v17 = vunpack.c.h.bf16 %v5249_v13  ;;  %466 = vst [vmem:[#allocation3 + $0xe0] sm:$0x1] %v465_v7  ;;  %v468_v27 = vsel %vm5554_vm4, 0, %v467_v21  ;;  %v851_v48 = vld [vmem:[%s5565_s26 + $0x70] sm:$0xf]  ;;  %v1092_v35 = vrot.slane %v1087_v18, 4 }
  0x64   : > { %5392 = vrot.lane.b32.xlu1 %v5391_v59, %s5487_s27  ;;  %5402 = vrot.lane.b32.xlu0 %v5401_v8, %s5487_s27  ;;  %v5411_v22 = vpack.i.bf16 %v5144_v12, %v5143_v10  ;;  %v5251_v23 = vld [vmem:[#allocation3 + $0xc0] sm:$0xff]   ;;  %469 = vst [vmem:[#allocation3 + $0xf0] sm:$0x1] %v468_v27  ;;  %v1079_v38 = vrot.slane %v1077_v20, 7  ;;  %v1090_v40 = vor.u32 %v1088_v15, %v1087_v18  ;;  %v852_v41 = vld [vmem:[%s5565_s26 + $0x74] sm:$0xf] }
  0x65   : > { %v5406_v29 = vpack.i.bf16 %v5140_v17, %v5139_v16  ;;  %v5147_v30 = vunpack.c.l.bf16 %v5251_v23  ;;  %v5148_v5 = vunpack.c.h.bf16 %v5251_v23  ;;  %v1260_v34 = vld [vmem:[#allocation3 + $0xd0] sm:$0xf]  ;;  %v1094_v45 = vshrl.u32 %v851_v48, 16  ;;  %v853_v58 = vld [vmem:[%s5565_s26 + $0x78] sm:$0xf] }
  0x66   : > { %v1261_v36 = vsel %vm5670_vm8, %v1065_v3, %v1260_v34  ;;  %v1257_v37 = vld [vmem:[#allocation3 + $0xc8] sm:$0x1]  ;;  %v1097_v49 = vshll.u32 %v851_v48, 16  ;;  %v1102_v42 = vshrl.u32 %v852_v41, 16  ;;  %v1082_v44 = vor.u32 %v1080_v25, %v1079_v38  ;;  %v854_v59 = vld [vmem:[%s5565_s26 + $0x7c] sm:$0xf] }
  0x67   : > { %v5416_v46 = vpack.i.bf16 %v5148_v5, %v5147_v30  ;;  %1262 = vst [vmem:[#allocation3 + $0xd0] sm:$0xf] %v1261_v36  ;;  %v1258_v19 = vsel %vm5554_vm4, %v1058_v56, %v1257_v37  ;;  %v1264_v47 = vld [vmem:[#allocation3 + $0xd8] sm:$0x1]  ;;  %v1083_v9 = vrot.slane %v1079_v38, 4  ;;  %v1096_v51 = vrot.slane %v1094_v45, 7 }
  0x68   : > { %1259 = vst [vmem:[#allocation3 + $0xc8] sm:$0x1] %v1258_v19  ;;  %v1265_v28 = vsel %vm5554_vm4, %v1075_v24, %v1264_v47  ;;  %v1271_v39 = vld [vmem:[#allocation3 + $0xe8] sm:$0x1]  ;;  %v5916_v52 = vrot.slane %v1102_v42, 7  ;;  %v1105_v53 = vshll.u32 %v852_v41, 16 }
  0x69   : > { %1266 = vst [vmem:[#allocation3 + $0xd8] sm:$0x1] %v1265_v28  ;;  %v1272_v32 = vsel %vm5554_vm4, %v1092_v35, %v1271_v39  ;;  %v1091_v55 = vsel %vm5620_vm7, %v1083_v9, %v1090_v40  ;;  %v1099_v33 = vor.u32 %v1097_v49, %v1096_v51  ;;  %v1100_v43 = vrot.slane %v1096_v51, 4  ;;  %v521_v6 = vld [vmem:[#allocation3 + $0xf8] sm:$0x1] }
  0x6a   : > { %5412 = vrot.lane.b32.xlu2 %v5411_v22, %s5487_s27  ;;  %1273 = vst [vmem:[#allocation3 + $0xe8] sm:$0x1] %v1272_v32  ;;  %v1267_v31 = vld [vmem:[#allocation3 + $0xe0] sm:$0xf]  ;;  %v471_v50 = vsel %vm5554_vm4, 0, %v470_v54  ;;  %v1107_v57 = vor.u32 %v1105_v53, %v5916_v52  ;;  %v1111_v61 = vshrl.u32 %v853_v58, 16 }
  0x6b   : > { %v1268_v56 = vsel %vm5670_vm8, %v1082_v44, %v1267_v31  ;;  %1270 = vst.msk [vmem:[#allocation3 + $0xe4] sm:$0xf] %vm290_vm0, %v1091_v55  ;;  %v1274_v60 = vld [vmem:[#allocation3 + $0xf0] sm:$0xf]  ;;  %v1114_v62 = vshll.u32 %v853_v58, 16  ;;  %v1119_v3 = vshrl.u32 %v854_v59, 16 }
  0x6c   : > { %5407 = vrot.lane.b32.xlu1 %v5406_v29, %s5487_s27  ;;  %5417 = vrot.lane.b32.xlu0 %v5416_v46, %s5487_s27  ;;  %1269 = vst [vmem:[#allocation3 + $0xe0] sm:$0xf] %v1268_v56  ;;  %v1108_v63 = vsel %vm5620_vm7, %v1100_v43, %v1107_v57  ;;  %v1275_v0 = vsel %vm5670_vm8, %v1099_v33, %v1274_v60  ;;  %v1122_v4 = vshll.u32 %v854_v59, 16  ;;  %v1113_v8 = vrot.slane %v1111_v61, 7  ;;  %v524_v16 = vld [vmem:[#allocation3 + $0x108] sm:$0x1] }
  0x6d   : > { %472 = vst [vmem:[#allocation3 + $0x100] sm:$0x1] %v471_v50  ;;  %v522_v10 = vsel %vm5588_vm6, 0, %v521_v6  ;;  %v5938_v15 = vrot.slane %v1119_v3, 7  ;;  %v527_v23 = vld [vmem:[#allocation3 + $0x118] sm:$0x1] }
  0x6e   : > { %v5253_v7 = vld [vmem:[#allocation3 + $0xd0] sm:$0xff]   ;;  %1276 = vst [vmem:[#allocation3 + $0xf0] sm:$0xf] %v1275_v0  ;;  %v1116_v21 = vor.u32 %v1114_v62, %v1113_v8  ;;  %v1117_v22 = vrot.slane %v1113_v8, 4  ;;  %v309_v30 = vld [vmem:[#allocation2 + $0x20] sm:$0x1] }
  0x6f   : > { %v5155_v12 = vunpack.c.l.bf16 %v5253_v7  ;;  %v5156_v13 = vunpack.c.h.bf16 %v5253_v7  ;;  %v5252_v14 = vld [vmem:[#allocation3 + $0xc8] sm:$0xff]   ;;  %1277 = vst.msk [vmem:[#allocation3 + $0xf4] sm:$0xf] %vm290_vm0, %v1108_v63  ;;  %v1124_v29 = vor.u32 %v1122_v4, %v5938_v15  ;;  %v525_v36 = vsel %vm5588_vm6, 0, %v524_v16  ;;  %v530_v37 = vld [vmem:[%s5945_s7] sm:$0xf] }
  0x70   : > { %v5151_v17 = vunpack.c.l.bf16 %v5252_v14  ;;  %v5152_v18 = vunpack.c.h.bf16 %v5252_v14  ;;  %v5254_v20 = vld [vmem:[#allocation3 + $0xd8] sm:$0xff]   ;;  %523 = vst [vmem:[#allocation3 + $0xf8] sm:$0x1] %v522_v10  ;;  %v531_v38 = vld [vmem:[%s5945_s7 + $0x4] sm:$0xf]  ;;  %v528_v46 = vsel %vm5588_vm6, 0, %v527_v23 }
  0x71   : > { %v5426_v24 = vpack.i.bf16 %v5156_v13, %v5155_v12  ;;  %v5159_v25 = vunpack.c.l.bf16 %v5254_v20  ;;  %v5160_v27 = vunpack.c.h.bf16 %v5254_v20  ;;  %v5256_v48 = vld [vmem:[#allocation3 + $0xe8] sm:$0xff]   ;;  %v1125_v45 = vsel %vm5620_vm7, %v1117_v22, %v1124_v29  ;;  %526 = vst [vmem:[#allocation3 + $0x108] sm:$0x1] %v525_v36  ;;  %v473_v19 = vld [vmem:[#allocation3 + $0x110] sm:$0x1] }
  0x72   : > { %v5421_v5 = vpack.i.bf16 %v5152_v18, %v5151_v17  ;;  %v5167_v34 = vunpack.c.l.bf16 %v5256_v48  ;;  %v5168_v35 = vunpack.c.h.bf16 %v5256_v48  ;;  %1284 = vst.msk [vmem:[#allocation3 + $0x104] sm:$0xf] %vm290_vm0, %v1125_v45  ;;  %v1109_v28 = vrot.slane %v5916_v52, 4  ;;  %v365_v59 = vld [vmem:[#allocation2 + $0x28] sm:$0x1] }
  0x73   : > { %5427 = vrot.lane.b32.xlu2 %v5426_v24, %s5487_s27  ;;  %v5431_v40 = vpack.i.bf16 %v5160_v27, %v5159_v25  ;;  %v5255_v41 = vld [vmem:[#allocation3 + $0xe0] sm:$0xff]   ;;  %v310_v39 = vsel %vm5554_vm4, 0, %v309_v30  ;;  %529 = vst [vmem:[#allocation3 + $0x118] sm:$0x1] %v528_v46  ;;  %v549_v9 = vshrl.u32 %v530_v37, 16  ;;  %v557_v51 = vshrl.u32 %v531_v38, 16 }
  0x74   : > { %5422 = vrot.lane.b32.xlu1 %v5421_v5, %s5487_s27  ;;  %v5163_v47 = vunpack.c.l.bf16 %v5255_v41  ;;  %v5164_v49 = vunpack.c.h.bf16 %v5255_v41  ;;  %v1281_v42 = vld [vmem:[#allocation3 + $0x100] sm:$0xf]  ;;  %v5441_v32 = vpack.i.bf16 %v5168_v35, %v5167_v34  ;;  %v1126_v54 = vrot.slane %v5938_v15, 4  ;;  %311 = vst [vmem:[#allocation2 + $0x20] sm:$0x1] %v310_v39 }
  0x75   : > { %5432 = vrot.lane.b32.xlu0 %v5431_v40, %s5487_s27  ;;  %v1282_v44 = vsel %vm5670_vm8, %v1116_v21, %v1281_v42  ;;  %v560_v55 = vshll.u32 %v531_v38, 16  ;;  %v474_v52 = vsel %vm5554_vm4, 0, %v473_v19  ;;  %v551_v50 = vrot.slane %v549_v9, 7  ;;  %v315_v60 = vld [vmem:[#allocation2 + $0x40] sm:$0x1] }
  0x76   : > { %v5257_v53 = vld [vmem:[#allocation3 + $0xf0] sm:$0xff]   ;;  %1283 = vst [vmem:[#allocation3 + $0x100] sm:$0xf] %v1282_v44  ;;  %v5968_v56 = vrot.slane %v557_v51, 7  ;;  %v5436_v57 = vpack.i.bf16 %v5164_v49, %v5163_v47  ;;  %v552_v62 = vshll.u32 %v530_v37, 16  ;;  %v366_v6 = vsel %vm5588_vm6, 0, %v365_v59 }
  0x77   : > { %v5171_v31 = vunpack.c.l.bf16 %v5257_v53  ;;  %v5172_v33 = vunpack.c.h.bf16 %v5257_v53  ;;  %v1278_v43 = vld [vmem:[#allocation3 + $0xf8] sm:$0x1]  ;;  %475 = vst [vmem:[#allocation3 + $0x110] sm:$0x1] %v474_v52  ;;  %v555_v63 = vrot.slane %v551_v50, 4  ;;  %v316_v13 = vsel %vm5554_vm4, 0, %v315_v60 }
  0x78   : > { %v1279_v58 = vsel %vm5554_vm4, %v1109_v28, %v1278_v43  ;;  %v562_v0 = vor.u32 %v560_v55, %v5968_v56  ;;  %v5974_v3 = vld [vmem:[%s5945_s7 + $0x8] sm:$0xf]  ;;  %367 = vst [vmem:[#allocation2 + $0x28] sm:$0x1] %v366_v6  ;;  %v533_v12 = vld [vmem:[%s5945_s7 + $0xc] sm:$0xf]  ;;  %v5989_v17 = vor.u32 %v552_v62, %v551_v50 }
  0x79   : > { %v5446_v61 = vpack.i.bf16 %v5172_v33, %v5171_v31  ;;  %1280 = vst [vmem:[#allocation3 + $0xf8] sm:$0x1] %v1279_v58  ;;  %v1285_v4 = vld [vmem:[#allocation3 + $0x108] sm:$0x1]  ;;  %v566_v7 = vshrl.u32 %v5974_v3, 16  ;;  %v574_v15 = vshrl.u32 %v533_v12, 16 }
  0x7a   : > { %v1286_v8 = vsel %vm5554_vm4, %v1126_v54, %v1285_v4  ;;  %v563_v10 = vsel %vm5620_vm7, %v555_v63, %v562_v0  ;;  %v577_v18 = vshll.u32 %v533_v12, 16  ;;  %v303_v20 = vld [vmem:[#allocation2] sm:$0x1]  ;;  %v564_v24 = vrot.slane %v5968_v56, 4  ;;  %v5262_v25 = vld [vmem:[#allocation3 + $0x118] sm:$0xff]  }
  0x7b   : > { %5442 = vrot.lane.b32.xlu2 %v5441_v32, %s5487_s27  ;;  %1287 = vst [vmem:[#allocation3 + $0x108] sm:$0x1] %v1286_v8  ;;  %v568_v14 = vrot.slane %v566_v7, 7  ;;  %v718_v23 = vld [vmem:[#allocation2 + $0x20] sm:$0xf]  ;;  %v5997_v29 = vrot.slane %v574_v15, 7  ;;  %v5191_v46 = vunpack.c.l.bf16 %v5262_v25  ;;  %v5192_v39 = vunpack.c.h.bf16 %v5262_v25 }
  0x7c   : > { %5437 = vrot.lane.b32.xlu1 %v5436_v57, %s5487_s27  ;;  %721 = vst.msk [vmem:[#allocation2 + $0x24] sm:$0xf] %vm290_vm0, %v563_v10  ;;  %v719_v27 = vsel %vm5670_vm8, %v5989_v17, %v718_v23  ;;  %v304_v30 = vsel %vm5554_vm4, 0, %v303_v20  ;;  %v569_v35 = vshll.u32 %v5974_v3, 16  ;;  %v374_v36 = vld [vmem:[#allocation2 + $0x58] sm:$0x1] }
  0x7d   : > { %5447 = vrot.lane.b32.xlu0 %v5446_v61, %s5487_s27  ;;  %v5259_v16 = vld [vmem:[#allocation3 + $0x100] sm:$0xff]   ;;  %714 = vst.msk [vmem:[#allocation2 + $0x14] sm:$0xf] %vm290_vm0, %v563_v10  ;;  %v572_v48 = vrot.slane %v568_v14, 4  ;;  %v579_v40 = vor.u32 %v577_v18, %v5997_v29  ;;  %v375_v41 = vsel %vm5588_vm6, 0, %v374_v36  ;;  %v5471_v61 = vpack.i.bf16 %v5192_v39, %v5191_v46 }
  0x7e   : > { %v5179_v21 = vunpack.c.l.bf16 %v5259_v16  ;;  %v5180_v22 = vunpack.c.h.bf16 %v5259_v16  ;;  %317 = vst [vmem:[#allocation2 + $0x40] sm:$0x1] %v316_v13  ;;  %v6006_v45 = vld [vmem:[%s5945_s7 + $0x14] sm:$0xf]  ;;  %v306_v51 = vld [vmem:[#allocation2 + $0x10] sm:$0x1]  ;;  %v6021_v43 = vor.u32 %v569_v35, %v568_v14 }
  0x7f   : > { %720 = vst [vmem:[#allocation2 + $0x20] sm:$0xf] %v719_v27  ;;  %v5261_v19 = vld [vmem:[#allocation3 + $0x110] sm:$0xff]   ;;  %v722_v47 = vld [vmem:[#allocation2 + $0x28] sm:$0x1]  ;;  %v591_v49 = vshrl.u32 %v6006_v45, 16  ;;  %v580_v9 = vsel %vm5620_vm7, %v572_v48, %v579_v40 }
  0x80   : > { %v5456_v5 = vpack.i.bf16 %v5180_v22, %v5179_v21  ;;  %v5258_v34 = vld [vmem:[#allocation3 + $0xf8] sm:$0xff]   ;;  %305 = vst [vmem:[#allocation2] sm:$0x1] %v304_v30  ;;  %v723_v44 = vsel %vm5554_vm4, %v564_v24, %v722_v47  ;;  %v359_v32 = vld [vmem:[#allocation2 + $0x8] sm:$0x1]  ;;  %v307_v52 = vsel %vm5554_vm4, 0, %v306_v51  ;;  %v5187_v31 = vunpack.c.l.bf16 %v5261_v19 }
  0x81   : > { %v5175_v37 = vunpack.c.l.bf16 %v5258_v34  ;;  %v5176_v38 = vunpack.c.h.bf16 %v5258_v34  ;;  %376 = vst [vmem:[#allocation2 + $0x58] sm:$0x1] %v375_v41  ;;  %v6016_v55 = vrot.slane %v591_v49, 7  ;;  %v5188_v33 = vunpack.c.h.bf16 %v5261_v19  ;;  %v362_v50 = vld [vmem:[#allocation2 + $0x18] sm:$0x1] }
  0x82   : > { %v5260_v28 = vld [vmem:[#allocation3 + $0x108] sm:$0xff]   ;;  %724 = vst [vmem:[#allocation2 + $0x28] sm:$0x1] %v723_v44  ;;  %v360_v60 = vsel %vm5588_vm6, 0, %v359_v32  ;;  %v363_v63 = vsel %vm5588_vm6, 0, %v362_v50  ;;  %vm3561_vm13 = vcmask 64512  }
  0x83   : > { %5457 = vrot.lane.b32.xlu2 %v5456_v5, %s5487_s27  ;;  %v5451_v42 = vpack.i.bf16 %v5176_v38, %v5175_v37  ;;  %v5183_v53 = vunpack.c.l.bf16 %v5260_v28  ;;  %v5184_v54 = vunpack.c.h.bf16 %v5260_v28  ;;  %735 = vst.msk [vmem:[#allocation2 + $0x44] sm:$0xf] %vm290_vm0, %v580_v9  ;;  %v9318_v59 = vrot.slane %v6016_v55, 4  ;;  %v312_v0 = vld [vmem:[#allocation2 + $0x30] sm:$0x1] }
  0x84   : > { %728 = vst.msk [vmem:[#allocation2 + $0x34] sm:$0xf] %vm290_vm0, %v580_v9  ;;  %v5466_v3 = vpack.i.bf16 %v5188_v33, %v5187_v31  ;;  %v368_v6 = vld [vmem:[#allocation2 + $0x38] sm:$0x1]  ;;  %v324_v8 = vld [vmem:[#allocation2 + $0x70] sm:$0x1] }
  0x85   : > { %5452 = vrot.lane.b32.xlu1 %v5451_v42, %s5487_s27  ;;  %v5461_v57 = vpack.i.bf16 %v5184_v54, %v5183_v53  ;;  %v732_v58 = vld [vmem:[#allocation2 + $0x40] sm:$0xf]  ;;  %308 = vst [vmem:[#allocation2 + $0x10] sm:$0x1] %v307_v52  ;;  %v536_v10 = vld [vmem:[%s5945_s7 + $0x18] sm:$0xf] }
  0x86   : > { %v733_v62 = vsel %vm5670_vm8, %v6021_v43, %v732_v58  ;;  %361 = vst [vmem:[#allocation2 + $0x8] sm:$0x1] %v360_v60  ;;  %v537_v12 = vld [vmem:[%s5945_s7 + $0x1c] sm:$0xf]  ;;  %v325_v13 = vsel %vm5554_vm4, 0, %v324_v8  ;;  %v600_v14 = vshrl.u32 %v536_v10, 16 }
  0x87   : > { %5462 = vrot.lane.b32.xlu0 %v5461_v57, %s5487_s27  ;;  %734 = vst [vmem:[#allocation2 + $0x40] sm:$0xf] %v733_v62  ;;  %v313_v15 = vsel %vm5554_vm4, 0, %v312_v0  ;;  %v603_v16 = vshll.u32 %v536_v10, 16  ;;  %v608_v18 = vshrl.u32 %v537_v12, 16  ;;  %v369_v20 = vsel %vm5588_vm6, 0, %v368_v6 }
  0x88   : > { %v743_v4 = vld [vmem:[#allocation2 + $0x58] sm:$0x1]  ;;  %326 = vst [vmem:[#allocation2 + $0x70] sm:$0x1] %v325_v13  ;;  %v602_v21 = vrot.slane %v600_v14, 7  ;;  %v611_v22 = vshll.u32 %v537_v12, 16 }
  0x89   : > { %v744_v7 = vsel %vm5554_vm4, %v9318_v59, %v743_v4  ;;  %364 = vst [vmem:[#allocation2 + $0x18] sm:$0x1] %v363_v63  ;;  %v6048_v25 = vrot.slane %v608_v18, 7  ;;  %v383_v36 = vld [vmem:[#allocation2 + $0x88] sm:$0x1]  ;;  %v4906_v19 = vld [vmem:[#allocation2] sm:$0xff]  }
  0x8a   : > { %745 = vst [vmem:[#allocation2 + $0x58] sm:$0x1] %v744_v7  ;;  %v6053_v48 = vor.u32 %v603_v16, %v602_v21  ;;  %v606_v30 = vrot.slane %v602_v21, 4  ;;  %v384_v49 = vsel %vm5588_vm6, 0, %v383_v36  ;;  %v581_v42 = vrot.slane %v5997_v29, 4  ;;  %v5196_v13 = vld [vmem:[#allocation2 + $0x20] sm:$0xff]  }
  0x8b   : > { %5472 = vrot.lane.b32.xlu2 %v5471_v61, %s5487_s27  ;;  %314 = vst [vmem:[#allocation2 + $0x30] sm:$0x1] %v313_v15  ;;  %v613_v5 = vor.u32 %v611_v22, %v6048_v25  ;;  %v4907_v9 = vunpack.c.l.bf16 %v4906_v19  ;;  %v4908_v51 = vunpack.c.h.bf16 %v4906_v19  ;;  %v318_v32 = vld [vmem:[#allocation2 + $0x50] sm:$0x1]  ;;  %v333_v50 = vld [vmem:[#allocation2 + $0xa0] sm:$0x1]  ;;  %v4924_v21 = vunpack.c.h.bf16 %v5196_v13 }
  0x8c   : > { %v711_v23 = vld [vmem:[#allocation2 + $0x10] sm:$0xf]  ;;  %370 = vst [vmem:[#allocation2 + $0x38] sm:$0x1] %v369_v20  ;;  %v319_v29 = vsel %vm5554_vm4, 0, %v318_v32  ;;  %v6079_v54 = vpop.permute.xlu2 %5317  ;;  %v334_v57 = vsel %vm5554_vm4, 0, %v333_v50 }
  0x8d   : > { %5467 = vrot.lane.b32.xlu1 %v5466_v3, %s5487_s27  ;;  %v712_v27 = vsel %vm5670_vm8, %v5989_v17, %v711_v23  ;;  %v614_v34 = vsel %vm5620_vm7, %v606_v30, %v613_v5  ;;  %v371_v17 = vld [vmem:[#allocation2 + $0x48] sm:$0x1]  ;;  %385 = vst [vmem:[#allocation2 + $0x88] sm:$0x1] %v384_v49  ;;  %v9317_v0 = vrot.slane %v6048_v25, 4  ;;  %v5320_v22 = vunpack.i.h.bf16 %v6079_v54 }
  0x8e   : > { %713 = vst [vmem:[#allocation2 + $0x10] sm:$0xf] %v712_v27  ;;  %v372_v56 = vsel %vm5588_vm6, 0, %v371_v17  ;;  %v5193_v52 = vld [vmem:[#allocation2 + $0x8] sm:$0xff]   ;;  %v539_v19 = vld [vmem:[%s5945_s7 + $0x24] sm:$0xf]  ;;  %v5319_v49 = vunpack.i.l.bf16 %v6079_v54 }
  0x8f   : > { %v753_v35 = vld [vmem:[#allocation2 + $0x70] sm:$0xf]  ;;  %756 = vst.msk [vmem:[#allocation2 + $0x74] sm:$0xf] %vm290_vm0, %v614_v34  ;;  %v4911_v60 = vunpack.c.l.bf16 %v5193_v52  ;;  %v4912_v61 = vunpack.c.h.bf16 %v5193_v52  ;;  %v625_v54 = vshrl.u32 %v539_v19, 16  ;;  %vm3670_vm14 = vcmask 130048  }
  0x90   : > { %v754_v37 = vsel %vm5670_vm8, %v6053_v48, %v753_v35  ;;  %v715_v38 = vld [vmem:[#allocation2 + $0x18] sm:$0x1]  ;;  %763 = vst.msk [vmem:[#allocation2 + $0x84] sm:$0xf] %vm290_vm0, %v614_v34  ;;  %v538_v34 = vld [vmem:[%s5945_s7 + $0x20] sm:$0xf] }
  0x91   : > { %755 = vst [vmem:[#allocation2 + $0x70] sm:$0xf] %v754_v37  ;;  %v716_v41 = vsel %vm5554_vm4, %v564_v24, %v715_v38  ;;  %v2081_v24 = vlaneseq  ;;  %v5197_v35 = vld [vmem:[#allocation2 + $0x28] sm:$0xff]   ;;  %vm3743_vm15 = vcmask 195584   ;;  %vm3816_vm2 = vcmask 261120  }
  0x92   : > { %v725_v46 = vld [vmem:[#allocation2 + $0x30] sm:$0xf]  ;;  %717 = vst [vmem:[#allocation2 + $0x18] sm:$0x1] %v716_v41  ;;  %v395_v26 = vld [vmem:[#allocation2 + $0xc8] sm:$0x1] }
  0x93   : > { %v5298_v40 = vpop.permute.xlu0 %5297  ;;  %v726_v47 = vsel %vm5670_vm8, %v6021_v43, %v725_v46  ;;  %v729_v28 = vld [vmem:[#allocation2 + $0x38] sm:$0x1]  ;;  %373 = vst [vmem:[#allocation2 + $0x48] sm:$0x1] %v372_v56  ;;  %v6087_v43 = vshrl.u32 %v2081_v24, 7  ;;  %vm3962_vm3 = vcmask 392192  }
  0x94   : > { %727 = vst [vmem:[#allocation2 + $0x30] sm:$0xf] %v726_v47  ;;  %v5300_v39 = vunpack.i.h.bf16 %v5298_v40  ;;  %v5299_v44 = vunpack.i.l.bf16 %v5298_v40  ;;  %v730_v53 = vsel %vm5554_vm4, %v581_v42, %v729_v28  ;;  %v764_v3 = vld [vmem:[#allocation2 + $0x88] sm:$0x1]  ;;  %v6113_v23 = vpop.permute.xlu2 %5322  ;;  %v4923_v40 = vunpack.c.l.bf16 %v5196_v13 }
  0x95   : > { %731 = vst [vmem:[#allocation2 + $0x38] sm:$0x1] %v730_v53  ;;  %vm2083_vm10 = vcmp.lt.s32.totalorder %v6087_v43, 7  ;;  %v5194_v8 = vld [vmem:[#allocation2 + $0x10] sm:$0xff]   ;;  %v765_v10 = vsel %vm5554_vm4, %v9317_v0, %v764_v3  ;;  %v617_v47 = vshrl.u32 %v538_v34, 16  ;;  %v5324_v32 = vunpack.i.l.bf16 %v6113_v23 }
  0x96   : > { %320 = vst [vmem:[#allocation2 + $0x50] sm:$0x1] %v319_v29  ;;  %v6082_v31 = vsel %vm1864_vm9, %v4907_v9, %v5299_v44  ;;  %v6085_v33 = vsel %vm1864_vm9, %v4908_v51, %v5300_v39  ;;  %v4915_v20 = vunpack.c.l.bf16 %v5194_v8  ;;  %v4916_v36 = vunpack.c.h.bf16 %v5194_v8 }
  0x97   : > { %9598 = vst [vmem:[#allocation4_spill] sm:$0xff] %v6085_v33  ;;  %v9316_v62 = vrot.slane %v6082_v31, 1  ;;  %v2010_v63 = vrot.slane %v6085_v33, 1  ;;  %v6128_v39 = vsel %vm1864_vm9, %v4924_v21, %v5320_v22  ;;  %v620_v29 = vshll.u32 %v538_v34, 16 }
  0x98   : > { %335 = vst [vmem:[#allocation2 + $0xa0] sm:$0x1] %v334_v57  ;;  %v628_v21 = vshll.u32 %v539_v19, 16  ;;  %vm2300_vm11 = vcmp.lt.s32.totalorder %v6087_v43, 6  ;;  %vm4035_vm5 = vcmask 457728  }
  0x99   : > { %766 = vst [vmem:[#allocation2 + $0x88] sm:$0x1] %v765_v10  ;;  %v2154_v18 = vsel %vm2083_vm10, %v9316_v62, %v2010_v63  ;;  %v5195_v56 = vld [vmem:[#allocation2 + $0x18] sm:$0xff]  }
  0x9a   : > { %v736_v7 = vld [vmem:[#allocation2 + $0x48] sm:$0x1]  ;;  %v2156_v17 = vpack.c.bf16 %v2154_v18, %v2154_v18  ;;  %v4919_v52 = vunpack.c.l.bf16 %v5195_v56  ;;  %v4920_v3 = vunpack.c.h.bf16 %v5195_v56 }
  0x9b   : > { %v737_v12 = vsel %vm5554_vm4, %v581_v42, %v736_v7  ;;  %v4927_v42 = vunpack.c.l.bf16 %v5197_v35 }
  0x9c   : > { %738 = vst [vmem:[#allocation2 + $0x48] sm:$0x1] %v737_v12  ;;  %v2697_v9 = vunpack.c.l.b16 %v2156_v17  ;;  %v5325_v12 = vunpack.i.h.bf16 %v6113_v23  ;;  %v5338_v18 = vpop.permute.xlu2 %5337 }
  0x9d   : > { %v6147_v13 = vsel %vm1864_vm9, %v4927_v42, %v5324_v32 }
  0x9e   : > { %v2019_v17 = vrot.slane %v6147_v13, 1 }
  0x9f   : > { %v5303_v58 = vpop.permute.xlu0 %5302  ;;  %v774_v34 = vld [vmem:[#allocation2 + $0xa0] sm:$0xf] }
  0xa0   : > { %v5305_v4 = vunpack.i.h.bf16 %v5303_v58  ;;  %v5304_v6 = vunpack.i.l.bf16 %v5303_v58  ;;  %v619_v58 = vrot.slane %v617_v47, 7 }
  0xa2   : > { %v6102_v14 = vsel %vm1864_vm9, %v4911_v60, %v5304_v6  ;;  %v6105_v15 = vsel %vm1864_vm9, %v4912_v61, %v5305_v4  ;;  %v6139_v60 = vsel %vm1864_vm9, %v4923_v40, %v5319_v49  ;;  %v4928_v61 = vunpack.c.h.bf16 %v5197_v35  ;;  %v6167_v49 = vld [vmem:[#allocation2 + $0x58] sm:$0xff]  }
  0xa3   : > { %9599 = vst [vmem:[#allocation5_spill] sm:$0xff] %v6102_v14  ;;  %v2011_v16 = vrot.slane %v6102_v14, 1  ;;  %v2012_v30 = vrot.slane %v6105_v15, 1  ;;  %v2018_v6 = vrot.slane %v6128_v39, 1  ;;  %v2017_v22 = vrot.slane %v6139_v60, 1 }
  0xa4   : > { %9600 = vst [vmem:[#allocation6_spill] sm:$0xff] %v6105_v15  ;;  %v6165_v47 = vsel %vm1864_vm9, %v4928_v61, %v5325_v12  ;;  %v4951_v61 = vunpack.c.l.bf16 %v6167_v49 }
  0xa5   : > { %v2153_v5 = vsel %vm2083_vm10, %v2010_v63, %v2011_v16  ;;  %v2152_v24 = vsel %vm2083_vm10, %v2011_v16, %v2012_v30  ;;  %v5200_v16 = vld [vmem:[#allocation2 + $0x40] sm:$0xff]  }
  0xa6   : > { %v5308_v27 = vpop.permute.xlu1 %5307  ;;  %v2157_v46 = vpack.c.bf16 %v2153_v5, %v2153_v5  ;;  %v2158_v57 = vpack.c.bf16 %v2152_v24, %v2152_v24  ;;  %v6155_v5 = vor.u32 %v620_v29, %v619_v58  ;;  %v4939_v40 = vunpack.c.l.bf16 %v5200_v16 }
  0xa7   : > { %v5310_v37 = vunpack.i.h.bf16 %v5308_v27  ;;  %v5309_v38 = vunpack.i.l.bf16 %v5308_v27  ;;  %v4940_v29 = vunpack.c.h.bf16 %v5200_v16 }
  0xa8   : > { %v2698_v51 = vunpack.c.l.b16 %v2157_v46  ;;  %v5339_v46 = vunpack.i.l.bf16 %v5338_v18 }
  0xa9   : > { %v6120_v41 = vsel %vm1864_vm9, %v4915_v20, %v5309_v38  ;;  %v6131_v44 = vsel %vm1864_vm9, %v4916_v36, %v5310_v37  ;;  %v6149_v20 = vrot.slane %v625_v54, 7  ;;  %v623_v38 = vrot.slane %v619_v58, 4 }
  0xaa   : > { %v2013_v28 = vrot.slane %v6120_v41, 1  ;;  %v6136_v50 = vpack.c.b16 %v2698_v51, %v2697_v9  ;;  %v2014_v63 = vrot.slane %v6131_v44, 1  ;;  %v5198_v9 = vld [vmem:[#allocation2 + $0x30] sm:$0xff]   ;;  %v5340_v54 = vunpack.i.h.bf16 %v5338_v18 }
  0xab   : > { %v5328_v36 = vpop.permute.xlu0 %5327  ;;  %v630_v56 = vor.u32 %v628_v21, %v6149_v20  ;;  %v6182_v58 = vsel %vm1864_vm9, %v4939_v40, %v5339_v46  ;;  %v6202_v40 = vpop.permute.xlu2 %5352 }
  0xac   : > { %v2151_v53 = vsel %vm2083_vm10, %v2012_v30, %v2013_v28  ;;  %9601 = vst [vmem:[#allocation7_spill] sm:$0xff] %v6136_v50  ;;  %2805 = vrot.lane.b32.xlu0 %v6136_v50, %s5488_s8  ;;  %v2699_v30 = vunpack.c.l.b16 %v2158_v57  ;;  %v2150_v37 = vsel %vm2083_vm10, %v2013_v28, %v2014_v63  ;;  %v775_v28 = vsel %vm5670_vm8, %v6155_v5, %v774_v34 }
  0xad   : > { %v2159_v10 = vpack.c.bf16 %v2151_v53, %v2151_v53  ;;  %v2160_v32 = vpack.c.bf16 %v2150_v37, %v2150_v37  ;;  %776 = vst [vmem:[#allocation2 + $0xa0] sm:$0xf] %v775_v28  ;;  %v2020_v57 = vrot.slane %v6165_v47, 1  ;;  %v5329_v12 = vunpack.i.l.bf16 %v5328_v36 }
  0xae   : > { %v5313_v4 = vpop.permute.xlu1 %5312  ;;  %v2146_v34 = vsel %vm2083_vm10, %v2017_v22, %v2018_v6  ;;  %v6199_v37 = vsel %vm1864_vm9, %v4940_v29, %v5340_v54 }
  0xaf   : > { %v5315_v7 = vunpack.i.h.bf16 %v5313_v4  ;;  %v5314_v8 = vunpack.i.l.bf16 %v5313_v4  ;;  %v2700_v19 = vunpack.c.l.b16 %v2159_v10  ;;  %v534_v4 = vld [vmem:[%s5945_s7 + $0x10] sm:$0xf]  ;;  %v5330_v10 = vunpack.i.h.bf16 %v5328_v36  ;;  %9603 = vst [vmem:[#allocation9_spill] sm:$0xff] %v6199_v37  ;;  %v5201_v36 = vld [vmem:[#allocation2 + $0x48] sm:$0xff]  }
  0xb0   : > { %v2701_v18 = vunpack.c.l.b16 %v2160_v32  ;;  %v2164_v62 = vpack.c.bf16 %v2146_v34, %v2146_v34 }
  0xb1   : > { %v6153_v27 = vsel %vm1864_vm9, %v4919_v52, %v5314_v8  ;;  %v6158_v35 = vsel %vm1864_vm9, %v4920_v3, %v5315_v7  ;;  %v6176_v51 = vpack.c.b16 %v2700_v19, %v2699_v30  ;;  %v631_v52 = vsel %vm5620_vm7, %v623_v38, %v630_v56  ;;  %v739_v38 = vld [vmem:[#allocation2 + $0x50] sm:$0xf] }
  0xb2   : > { %v2015_v23 = vrot.slane %v6153_v27, 1  ;;  %v2016_v24 = vrot.slane %v6158_v35, 1  ;;  %777 = vst.msk [vmem:[#allocation2 + $0xa4] sm:$0xf] %vm290_vm0, %v631_v52  ;;  %v2145_v3 = vsel %vm2083_vm10, %v2018_v6, %v2019_v17  ;;  %v4931_v7 = vunpack.c.l.bf16 %v5198_v9 }
  0xb3   : > { %9602 = vst [vmem:[#allocation8_spill] sm:$0xff] %v6176_v51  ;;  %2807 = vrot.lane.b32.xlu1 %v6176_v51, %s5488_s8  ;;  %v4932_v8 = vunpack.c.h.bf16 %v5198_v9  ;;  %v583_v19 = vshrl.u32 %v534_v4, 16  ;;  %v2705_v59 = vunpack.c.l.b16 %v2164_v62  ;;  %v4952_v51 = vunpack.c.h.bf16 %v6167_v49 }
  0xb4   : > { %v2149_v42 = vsel %vm2083_vm10, %v2014_v63, %v2015_v23  ;;  %v5199_v63 = vld [vmem:[#allocation2 + $0x38] sm:$0xff]   ;;  %770 = vst.msk [vmem:[#allocation2 + $0x94] sm:$0xf] %vm290_vm0, %v631_v52  ;;  %v2147_v30 = vsel %vm2083_vm10, %v2016_v24, %v2017_v22  ;;  %v6211_v6 = vsel %vm1864_vm9, %v4931_v7, %v5329_v12  ;;  %v4943_v52 = vunpack.c.l.bf16 %v5201_v36 }
  0xb5   : > { %v2161_v53 = vpack.c.bf16 %v2149_v42, %v2149_v42  ;;  %v4935_v46 = vunpack.c.l.bf16 %v5199_v63  ;;  %v5354_v42 = vunpack.i.l.bf16 %v6202_v40  ;;  %v4936_v56 = vunpack.c.h.bf16 %v5199_v63  ;;  %v5343_v22 = vpop.permute.xlu0 %5342 }
  0xb6   : > { %v5333_v16 = vpop.permute.xlu1 %5332  ;;  %v6208_v32 = vsel %vm1864_vm9, %v4932_v8, %v5330_v10  ;;  %v2163_v29 = vpack.c.bf16 %v2147_v30, %v2147_v30  ;;  %v585_v0 = vrot.slane %v583_v19, 7  ;;  %v586_v8 = vshll.u32 %v534_v4, 16  ;;  %v321_v19 = vld [vmem:[#allocation2 + $0x60] sm:$0x1] }
  0xb7   : > { %v2702_v21 = vunpack.c.l.b16 %v2161_v53  ;;  %v5334_v28 = vunpack.i.l.bf16 %v5333_v16  ;;  %v2148_v53 = vsel %vm2083_vm10, %v2015_v23, %v2016_v24  ;;  %v5335_v54 = vunpack.i.h.bf16 %v5333_v16 }
  0xb8   : > { %v2162_v63 = vpack.c.bf16 %v2148_v53, %v2148_v53  ;;  %v5344_v7 = vunpack.i.l.bf16 %v5343_v22  ;;  %v2021_v23 = vrot.slane %v6211_v6, 1  ;;  %v6221_v16 = vor.u32 %v586_v8, %v585_v0  ;;  %v377_v8 = vld [vmem:[#allocation2 + $0x68] sm:$0x1] }
  0xb9   : > { %v6205_v9 = vpack.c.b16 %v2702_v21, %v2701_v18  ;;  %v2704_v18 = vunpack.c.l.b16 %v2163_v29  ;;  %v2165_v21 = vpack.c.bf16 %v2145_v3, %v2145_v3  ;;  %v6218_v10 = vsel %vm1864_vm9, %v4935_v46, %v5334_v28 }
  0xba   : > { %v2703_v12 = vunpack.c.l.b16 %v2162_v63  ;;  %v594_v30 = vshll.u32 %v6006_v45, 16  ;;  %v6225_v34 = vsel %vm1864_vm9, %v4951_v61, %v5354_v42  ;;  %v6228_v3 = vsel %vm1864_vm9, %v4936_v56, %v5335_v54  ;;  %v392_v56 = vld [vmem:[#allocation2 + $0xb8] sm:$0x1]  ;;  %v6246_v54 = vld [vmem:[%s5945_s7 + $0x2c] sm:$0xf] }
  0xbb   : > { %9604 = vst [vmem:[#allocation10_spill] sm:$0xff] %v6205_v9  ;;  %2809 = vrot.lane.b32.xlu2 %v6205_v9, %s5488_s8  ;;  %v2706_v24 = vunpack.c.l.b16 %v2165_v21  ;;  %v589_v46 = vrot.slane %v585_v0, 4  ;;  %v2022_v62 = vrot.slane %v6208_v32, 1  ;;  %v2023_v28 = vrot.slane %v6218_v10, 1 }
  0xbc   : > { %9605 = vst [vmem:[#allocation11_spill] sm:$0xff] %v6225_v34  ;;  %v6230_v4 = vpack.c.b16 %v2704_v18, %v2703_v12  ;;  %v4944_v53 = vunpack.c.h.bf16 %v5201_v36  ;;  %v5345_v29 = vunpack.i.h.bf16 %v5343_v22  ;;  %v6235_v45 = vsel %vm1864_vm9, %v4943_v52, %v5344_v7 }
  0xbd   : > { %9607 = vst [vmem:[#allocation13_spill] sm:$0xff] %v6235_v45  ;;  %v6239_v61 = vpack.c.b16 %v2706_v24, %v2705_v59  ;;  %v596_v42 = vor.u32 %v594_v30, %v6016_v55  ;;  %v740_v0 = vsel %vm5670_vm8, %v6221_v16, %v739_v38  ;;  %v2024_v36 = vrot.slane %v6228_v3, 1 }
  0xbe   : > { %9606 = vst [vmem:[#allocation12_spill] sm:$0xff] %v6230_v4  ;;  %2811 = vrot.lane.b32.xlu0 %v6230_v4, %s5488_s8  ;;  %v2143_v22 = vsel %vm2083_vm10, %v2020_v57, %v2021_v23  ;;  %v2144_v59 = vsel %vm2083_vm10, %v2019_v17, %v2020_v57  ;;  %v322_v38 = vsel %vm5554_vm4, 0, %v321_v19  ;;  %v2026_v52 = vrot.slane %v6199_v37, 1  ;;  %v5348_v24 = vpop.permute.xlu1 %5347 }
  0xbf   : > { %9608 = vst [vmem:[#allocation14_spill] sm:$0xff] %v6239_v61  ;;  %2813 = vrot.lane.b32.xlu1 %v6239_v61, %s5488_s8  ;;  %v597_v63 = vsel %vm5620_vm7, %v589_v46, %v596_v42  ;;  %v2166_v18 = vpack.c.bf16 %v2144_v59, %v2144_v59  ;;  %v2167_v21 = vpack.c.bf16 %v2143_v22, %v2143_v22  ;;  %v9319_v17 = vrot.slane %v6235_v45, 1 }
  0xc0   : > { %741 = vst [vmem:[#allocation2 + $0x50] sm:$0xf] %v740_v0  ;;  %v6267_v7 = vsel %vm1864_vm9, %v4944_v53, %v5345_v29  ;;  %v393_v57 = vsel %vm5588_vm6, 0, %v392_v56  ;;  %v642_v12 = vshrl.u32 %v6246_v54, 16  ;;  %v2141_v19 = vsel %vm2083_vm10, %v2022_v62, %v2023_v28  ;;  %v6279_v29 = vpop.permute.xlu2 %5367 }
  0xc1   : > { %323 = vst [vmem:[#allocation2 + $0x60] sm:$0x1] %v322_v38  ;;  %v2707_v30 = vunpack.c.l.b16 %v2166_v18  ;;  %v2708_v46 = vunpack.c.l.b16 %v2167_v21  ;;  %v2142_v53 = vsel %vm2083_vm10, %v2021_v23, %v2022_v62  ;;  %v2169_v56 = vpack.c.bf16 %v2141_v19, %v2141_v19  ;;  %v380_v19 = vld [vmem:[#allocation2 + $0x78] sm:$0x1] }
  0xc2   : > { %9609 = vst [vmem:[#allocation15_spill] sm:$0xff] %v6267_v7  ;;  %v6281_v42 = vrot.slane %v642_v12, 7  ;;  %v2168_v0 = vpack.c.bf16 %v2142_v53, %v2142_v53  ;;  %v9610_v22 = vrot.slane %v6182_v58, 1  ;;  %v378_v23 = vsel %vm5588_vm6, 0, %v377_v8 }
  0xc3   : > { %742 = vst.msk [vmem:[#allocation2 + $0x54] sm:$0xf] %vm290_vm0, %v597_v63  ;;  %v6287_v38 = vpack.c.b16 %v2708_v46, %v2707_v30  ;;  %v5350_v62 = vunpack.i.h.bf16 %v5348_v24  ;;  %v5349_v53 = vunpack.i.l.bf16 %v5348_v24 }
  0xc4   : > { %749 = vst.msk [vmem:[#allocation2 + $0x64] sm:$0xf] %vm290_vm0, %v597_v63  ;;  %v2139_v59 = vsel %vm2083_vm10, %v2024_v36, %v9610_v22  ;;  %v2140_v63 = vsel %vm2083_vm10, %v2023_v28, %v2024_v36  ;;  %v2709_v21 = vunpack.c.l.b16 %v2168_v0  ;;  %v2137_v28 = vsel %vm2083_vm10, %v2026_v52, %v9319_v17 }
  0xc5   : > { %394 = vst [vmem:[#allocation2 + $0xb8] sm:$0x1] %v393_v57  ;;  %v2171_v18 = vpack.c.bf16 %v2139_v59, %v2139_v59  ;;  %v2710_v57 = vunpack.c.l.b16 %v2169_v56  ;;  %v2170_v12 = vpack.c.bf16 %v2140_v63, %v2140_v63  ;;  %2815 = vrot.lane.b32.xlu2 %v6287_v38, %s5488_s8  ;;  %v9613_v56 = vmov %v9610_v22  ;;  %v342_v59 = vld [vmem:[#allocation2 + $0xd0] sm:$0x1] }
  0xc6   : > { %9611 = vst [vmem:[#allocation16_spill] sm:$0xff] %v6287_v38  ;;  %v2138_v24 = vsel %vm2083_vm10, %v9613_v56, %v2026_v52  ;;  %v2173_v22 = vpack.c.bf16 %v2137_v28, %v2137_v28  ;;  %v542_v63 = vld [vmem:[%s5945_s7 + $0x30] sm:$0xf]  ;;  %v543_v56 = vld [vmem:[%s5945_s7 + $0x34] sm:$0xf] }
  0xc7   : > { %379 = vst [vmem:[#allocation2 + $0x68] sm:$0x1] %v378_v23  ;;  %v2712_v46 = vunpack.c.l.b16 %v2171_v18  ;;  %v6300_v8 = vpack.c.b16 %v2710_v57, %v2709_v21  ;;  %v2711_v0 = vunpack.c.l.b16 %v2170_v12  ;;  %v2028_v18 = vrot.slane %v6267_v7, 1  ;;  %v389_v7 = vld [vmem:[#allocation2 + $0xa8] sm:$0x1] }
  0xc8   : > { %v746_v36 = vld [vmem:[#allocation2 + $0x60] sm:$0xf]  ;;  %v2172_v30 = vpack.c.bf16 %v2138_v24, %v2138_v24  ;;  %v381_v21 = vsel %vm5588_vm6, 0, %v380_v19  ;;  %v2714_v28 = vunpack.c.l.b16 %v2173_v22  ;;  %v6327_v24 = vpop.permute.xlu0 %5357 }
  0xc9   : > { %9612 = vst [vmem:[#allocation17_spill] sm:$0xff] %v6300_v8  ;;  %v747_v17 = vsel %vm5670_vm8, %v6221_v16, %v746_v36  ;;  %2817 = vrot.lane.b32.xlu0 %v6300_v8, %s5488_s8  ;;  %v6315_v52 = vpack.c.b16 %v2712_v46, %v2711_v0  ;;  %v343_v16 = vsel %vm5554_vm4, 0, %v342_v59  ;;  %v651_v36 = vshrl.u32 %v542_v63, 16  ;;  %v6339_v59 = vpop.permute.xlu2 %5382 }
  0xca   : > { %v5202_v23 = vld [vmem:[#allocation2 + $0x50] sm:$0xff]   ;;  %748 = vst [vmem:[#allocation2 + $0x60] sm:$0xf] %v747_v17  ;;  %v2713_v38 = vunpack.c.l.b16 %v2172_v30  ;;  %v9617_v46 = vrot.slane %v6281_v42, 4  ;;  %v654_v30 = vshll.u32 %v542_v63, 16  ;;  %v5355_v0 = vunpack.i.h.bf16 %v6202_v40 }
  0xcb   : > { %v4947_v57 = vunpack.c.l.bf16 %v5202_v23  ;;  %v4948_v12 = vunpack.c.h.bf16 %v5202_v23  ;;  %9614 = vst [vmem:[#allocation18_spill] sm:$0xff] %v6315_v52  ;;  %2819 = vrot.lane.b32.xlu1 %v6315_v52, %s5488_s8  ;;  %v9619_v63 = vrot.slane %v6016_v55, 4 }
  0xcc   : > { %v785_v50 = vld [vmem:[#allocation2 + $0xb8] sm:$0x1]  ;;  %382 = vst [vmem:[#allocation2 + $0x78] sm:$0x1] %v381_v21  ;;  %v6341_v21 = vpack.c.b16 %v2714_v28, %v2713_v38 }
  0xcd   : > { %v6322_v19 = vsel %vm1864_vm9, %v4948_v12, %v5350_v62  ;;  %v6325_v17 = vsel %vm1864_vm9, %v4947_v57, %v5349_v53  ;;  %v786_v49 = vsel %vm5554_vm4, %v9617_v46, %v785_v50  ;;  %344 = vst [vmem:[#allocation2 + $0xd0] sm:$0x1] %v343_v16  ;;  %v653_v50 = vrot.slane %v651_v36, 7 }
  0xce   : > { %9615 = vst [vmem:[#allocation19_spill] sm:$0xff] %v6322_v19  ;;  %v2030_v22 = vrot.slane %v6322_v19, 1  ;;  %v2029_v53 = vrot.slane %v6325_v17, 1  ;;  %v750_v23 = vld [vmem:[#allocation2 + $0x68] sm:$0x1]  ;;  %v659_v57 = vshrl.u32 %v543_v56, 16  ;;  %v5359_v16 = vunpack.i.l.bf16 %v6327_v24  ;;  %2821 = vrot.lane.b32.xlu2 %v6341_v21, %s5488_s8 }
  0xcf   : > { %9616 = vst [vmem:[#allocation20_spill] sm:$0xff] %v6325_v17  ;;  %v662_v12 = vshll.u32 %v543_v56, 16  ;;  %v751_v40 = vsel %vm5554_vm4, %v9619_v63, %v750_v23  ;;  %v657_v38 = vrot.slane %v653_v50, 4  ;;  %v9620_v56 = vrot.slane %v6235_v45, 1 }
  0xd0   : > { %787 = vst [vmem:[#allocation2 + $0xb8] sm:$0x1] %v786_v49  ;;  %v2135_v46 = vsel %vm2083_vm10, %v2028_v18, %v2029_v53  ;;  %v6352_v49 = vor.u32 %v654_v30, %v653_v50  ;;  %v6354_v28 = vrot.slane %v659_v57, 7  ;;  %v9621_v63 = vrot.slane %v6225_v34, 1  ;;  %v5206_v57 = vld [vmem:[#allocation2 + $0x70] sm:$0xff]   ;;  %v6395_v19 = vpop.permute.xlu0 %5372 }
  0xd1   : > { %9618 = vst [vmem:[#allocation21_spill] sm:$0xff] %v6341_v21  ;;  %v2136_v55 = vsel %vm2083_vm10, %v9620_v56, %v2028_v18  ;;  %v5204_v36 = vld [vmem:[#allocation2 + $0x60] sm:$0xff]   ;;  %v2175_v23 = vpack.c.bf16 %v2135_v46, %v2135_v46  ;;  %v2134_v30 = vsel %vm2083_vm10, %v2029_v53, %v2030_v22  ;;  %v6367_v50 = vsel %vm1864_vm9, %v4952_v51, %v5355_v0 }
  0xd2   : > { %752 = vst [vmem:[#allocation2 + $0x68] sm:$0x1] %v751_v40  ;;  %v2174_v62 = vpack.c.bf16 %v2136_v55, %v2136_v55  ;;  %v2133_v40 = vsel %vm2083_vm10, %v2030_v22, %v9621_v63  ;;  %v4955_v21 = vunpack.c.l.bf16 %v5204_v36  ;;  %v664_v8 = vor.u32 %v662_v12, %v6354_v28  ;;  %v327_v53 = vld [vmem:[#allocation2 + $0x80] sm:$0x1] }
  0xd3   : > { %9622 = vst [vmem:[#allocation22_spill] sm:$0xff] %v6367_v50  ;;  %v757_v52 = vld [vmem:[#allocation2 + $0x78] sm:$0x1]  ;;  %v2176_v18 = vpack.c.bf16 %v2134_v30, %v2134_v30  ;;  %v9623_v56 = vrot.slane %v6048_v25, 4  ;;  %v2716_v63 = vunpack.c.l.b16 %v2175_v23  ;;  %v2177_v4 = vpack.c.bf16 %v2133_v40, %v2133_v40  ;;  %v5363_v23 = vpop.permute.xlu1 %5362 }
  0xd4   : > { %v795_v55 = vld [vmem:[#allocation2 + $0xd0] sm:$0xf]  ;;  %v2715_v61 = vunpack.c.l.b16 %v2174_v62  ;;  %v6375_v22 = vsel %vm1864_vm9, %v4955_v21, %v5359_v16  ;;  %v665_v51 = vsel %vm5620_vm7, %v657_v38, %v664_v8  ;;  %v2032_v25 = vrot.slane %v6367_v50, 1  ;;  %v5209_v16 = vld [vmem:[#allocation2 + $0x88] sm:$0xff]  }
  0xd5   : > { %v758_v46 = vsel %vm5554_vm4, %v9623_v56, %v757_v52  ;;  %9624 = vst [vmem:[#allocation23_spill] sm:$0xff] %v6375_v22  ;;  %v796_v0 = vsel %vm5670_vm8, %v6352_v49, %v795_v55  ;;  %v4963_v12 = vunpack.c.l.bf16 %v5206_v57  ;;  %v4964_v52 = vunpack.c.h.bf16 %v5206_v57 }
  0xd6   : > { %759 = vst [vmem:[#allocation2 + $0x78] sm:$0x1] %v758_v46  ;;  %v5370_v62 = vunpack.i.h.bf16 %v6279_v29  ;;  %v5369_v21 = vunpack.i.l.bf16 %v6279_v29  ;;  %v5360_v40 = vunpack.i.h.bf16 %v6327_v24  ;;  %v6387_v8 = vpack.c.b16 %v2716_v63, %v2715_v61 }
  0xd7   : > { %797 = vst [vmem:[#allocation2 + $0xd0] sm:$0xf] %v796_v0  ;;  %v2717_v38 = vunpack.c.l.b16 %v2176_v18  ;;  %v4956_v30 = vunpack.c.h.bf16 %v5204_v36  ;;  %v2718_v57 = vunpack.c.l.b16 %v2177_v4  ;;  %v328_v55 = vsel %vm5554_vm4, 0, %v327_v53  ;;  %v6393_v0 = vpop.permute.xlu2 %5397  ;;  %v330_v53 = vld [vmem:[#allocation2 + $0x90] sm:$0x1] }
  0xd8   : > { %798 = vst.msk [vmem:[#allocation2 + $0xd4] sm:$0xf] %vm290_vm0, %v665_v51  ;;  %v5365_v24 = vunpack.i.h.bf16 %v5363_v23  ;;  %v5364_v50 = vunpack.i.l.bf16 %v5363_v23  ;;  %2823 = vrot.lane.b32.xlu0 %v6387_v8, %s5488_s8  ;;  %v4975_v61 = vunpack.c.l.bf16 %v5209_v16  ;;  %v4976_v36 = vunpack.c.h.bf16 %v5209_v16 }
  0xd9   : > { %9625 = vst [vmem:[#allocation24_spill] sm:$0xff] %v6387_v8  ;;  %v5205_v46 = vld [vmem:[#allocation2 + $0x68] sm:$0xff]   ;;  %v6400_v18 = vsel %vm1864_vm9, %v4964_v52, %v5370_v62  ;;  %v6403_v4 = vsel %vm1864_vm9, %v4963_v12, %v5369_v21  ;;  %v5385_v63 = vunpack.i.h.bf16 %v6339_v59  ;;  %v5384_v23 = vunpack.i.l.bf16 %v6339_v59 }
  0xda   : > { %805 = vst.msk [vmem:[#allocation2 + $0xe4] sm:$0xf] %vm290_vm0, %v665_v51  ;;  %v4959_v29 = vunpack.c.l.bf16 %v5205_v46  ;;  %v4960_v9 = vunpack.c.h.bf16 %v5205_v46  ;;  %v6406_v51 = vpack.c.b16 %v2718_v57, %v2717_v38  ;;  %v6410_v46 = vsel %vm1864_vm9, %v4956_v30, %v5360_v40 }
  0xdb   : > { %329 = vst [vmem:[#allocation2 + $0x80] sm:$0x1] %v328_v55  ;;  %v5374_v55 = vunpack.i.l.bf16 %v6395_v19  ;;  %v9630_v16 = vrot.slane %v6375_v22, 1  ;;  %v9633_v59 = vrot.slane %v6225_v34, 1  ;;  %v2038_v30 = vrot.slane %v6400_v18, 1  ;;  %v6445_v8 = vpop.permute.xlu1 %5377 }
  0xdc   : > { %9626 = vst [vmem:[#allocation25_spill] sm:$0xff] %v6400_v18  ;;  %v6418_v12 = vsel %vm1864_vm9, %v4960_v9, %v5365_v24  ;;  %v6421_v62 = vsel %vm1864_vm9, %v4959_v29, %v5364_v50  ;;  %2825 = vrot.lane.b32.xlu1 %v6406_v51, %s5488_s8  ;;  %v331_v9 = vsel %vm5554_vm4, 0, %v330_v53  ;;  %v2037_v50 = vrot.slane %v6403_v4, 1  ;;  %v6437_v24 = vld [vmem:[#allocation2 + $0xa0] sm:$0xff]  }
  0xdd   : > { %9627 = vst [vmem:[#allocation26_spill] sm:$0xff] %v6403_v4  ;;  %v5207_v56 = vld [vmem:[#allocation2 + $0x78] sm:$0xff]   ;;  %v2131_v52 = vsel %vm2083_vm10, %v2032_v25, %v9630_v16  ;;  %v2132_v40 = vsel %vm2083_vm10, %v9633_v59, %v2032_v25  ;;  %v6435_v29 = vsel %vm1864_vm9, %v4976_v36, %v5385_v63  ;;  %v6440_v25 = vsel %vm1864_vm9, %v4975_v61, %v5384_v23 }
  0xde   : > { %9628 = vst [vmem:[#allocation27_spill] sm:$0xff] %v6406_v51  ;;  %v4967_v21 = vunpack.c.l.bf16 %v5207_v56  ;;  %v2178_v57 = vpack.c.bf16 %v2132_v40, %v2132_v40  ;;  %v2179_v16 = vpack.c.bf16 %v2131_v52, %v2131_v52  ;;  %v401_v51 = vld [vmem:[#allocation2 + $0xe8] sm:$0x1]  ;;  %v2034_v59 = vrot.slane %v6410_v46, 1 }
  0xdf   : > { %9629 = vst [vmem:[#allocation28_spill] sm:$0xff] %v6410_v46  ;;  %v2036_v40 = vrot.slane %v6418_v12, 1  ;;  %v2035_v38 = vrot.slane %v6421_v62, 1  ;;  %v5400_v36 = vunpack.i.h.bf16 %v6393_v0  ;;  %v5399_v18 = vunpack.i.l.bf16 %v6393_v0  ;;  %v6458_v4 = vpop.permute.xlu2 %5412 }
  0xe0   : > { %9631 = vst [vmem:[#allocation29_spill] sm:$0xff] %v6418_v12  ;;  %v6449_v63 = vsel %vm1864_vm9, %v4967_v21, %v5374_v55  ;;  %v2719_v61 = vunpack.c.l.b16 %v2178_v57  ;;  %v5375_v12 = vunpack.i.h.bf16 %v6395_v19  ;;  %v5380_v55 = vunpack.i.h.bf16 %v6445_v8 }
  0xe1   : > { %9632 = vst [vmem:[#allocation30_spill] sm:$0xff] %v6421_v62  ;;  %v4968_v62 = vunpack.c.h.bf16 %v5207_v56  ;;  %v2720_v21 = vunpack.c.l.b16 %v2179_v16  ;;  %v402_v46 = vsel %vm5588_vm6, 0, %v401_v51  ;;  %v9635_v0 = vrot.slane %v6375_v22, 1 }
  0xe2   : > { %332 = vst [vmem:[#allocation2 + $0x90] sm:$0x1] %v331_v9  ;;  %v760_v53 = vld [vmem:[#allocation2 + $0x80] sm:$0xf]  ;;  %v4988_v9 = vunpack.c.h.bf16 %v6437_v24  ;;  %v2127_v56 = vsel %vm2083_vm10, %v2036_v40, %v2037_v50  ;;  %v2128_v51 = vsel %vm2083_vm10, %v2035_v38, %v2036_v40 }
  0xe3   : > { %9634 = vst [vmem:[#allocation31_spill] sm:$0xff] %v6449_v63  ;;  %v761_v52 = vsel %vm5670_vm8, %v6053_v48, %v760_v53  ;;  %v386_v48 = vld [vmem:[#allocation2 + $0x98] sm:$0x1]  ;;  %v2129_v53 = vsel %vm2083_vm10, %v2034_v59, %v2035_v38  ;;  %v2130_v19 = vsel %vm2083_vm10, %v9635_v0, %v2034_v59  ;;  %v2182_v34 = vpack.c.bf16 %v2128_v51, %v2128_v51 }
  0xe4   : > { %762 = vst [vmem:[#allocation2 + $0x80] sm:$0xf] %v761_v52  ;;  %v6472_v52 = vpack.c.b16 %v2720_v21, %v2719_v61  ;;  %v2180_v16 = vpack.c.bf16 %v2130_v19, %v2130_v19  ;;  %v2181_v23 = vpack.c.bf16 %v2129_v53, %v2129_v53  ;;  %v2183_v17 = vpack.c.bf16 %v2127_v56, %v2127_v56 }
  0xe5   : > { %403 = vst [vmem:[#allocation2 + $0xe8] sm:$0x1] %v402_v46  ;;  %v5379_v46 = vunpack.i.l.bf16 %v6445_v8  ;;  %v387_v22 = vsel %vm5588_vm6, 0, %v386_v48  ;;  %v6480_v59 = vsel %vm1864_vm9, %v4968_v62, %v5375_v12  ;;  %v9364_v8 = vrot.slane %v6354_v28, 4  ;;  %v351_v62 = vld [vmem:[#allocation2 + $0x100] sm:$0x1] }
  0xe6   : > { %9636 = vst [vmem:[#allocation32_spill] sm:$0xff] %v6472_v52  ;;  %2827 = vrot.lane.b32.xlu2 %v6472_v52, %s5488_s8  ;;  %v2721_v38 = vunpack.c.l.b16 %v2180_v16  ;;  %v2722_v40 = vunpack.c.l.b16 %v2181_v23  ;;  %v2723_v21 = vunpack.c.l.b16 %v2182_v34  ;;  %v2724_v48 = vunpack.c.l.b16 %v2183_v17  ;;  %v544_v16 = vld [vmem:[%s5945_s7 + $0x38] sm:$0xf] }
  0xe7   : > { %9637 = vst [vmem:[#allocation33_spill] sm:$0xff] %v6480_v59  ;;  %v9638_v53 = vrot.slane %v6449_v63, 1  ;;  %v390_v23 = vsel %vm5588_vm6, 0, %v389_v7  ;;  %v6502_v51 = vsel %vm1864_vm9, %v4988_v9, %v5400_v36  ;;  %v352_v7 = vsel %vm5554_vm4, 0, %v351_v62 }
  0xe8   : > { %388 = vst [vmem:[#allocation2 + $0x98] sm:$0x1] %v387_v22  ;;  %v6492_v19 = vpack.c.b16 %v2722_v40, %v2721_v38  ;;  %v6498_v17 = vpack.c.b16 %v2724_v48, %v2723_v21  ;;  %v545_v38 = vld [vmem:[%s5945_s7 + $0x3c] sm:$0xf]  ;;  %v9644_v48 = vunpack.c.l.bf16 %v6437_v24  ;;  %v5414_v24 = vunpack.i.l.bf16 %v6458_v4 }
  0xe9   : > { %v767_v57 = vld [vmem:[#allocation2 + $0x90] sm:$0xf]  ;;  %v2125_v12 = vsel %vm2083_vm10, %v2038_v30, %v9638_v53  ;;  %391 = vst [vmem:[#allocation2 + $0xa8] sm:$0x1] %v390_v23  ;;  %v6529_v53 = vpop.permute.xlu2 %5427  ;;  %v676_v23 = vshrl.u32 %v545_v38, 16 }
  0xea   : > { %v768_v61 = vsel %vm5670_vm8, %v6155_v5, %v767_v57  ;;  %9639 = vst [vmem:[#allocation34_spill] sm:$0xff] %v6492_v19  ;;  %v2126_v5 = vsel %vm2083_vm10, %v2037_v50, %v2038_v30  ;;  %v2185_v22 = vpack.c.bf16 %v2125_v12, %v2125_v12  ;;  %2829 = vrot.lane.b32.xlu0 %v6492_v19, %s5488_s8  ;;  %v632_v30 = vrot.slane %v6149_v20, 4 }
  0xeb   : > { %769 = vst [vmem:[#allocation2 + $0x90] sm:$0xf] %v768_v61  ;;  %v5208_v0 = vld [vmem:[#allocation2 + $0x80] sm:$0xff]   ;;  %v2184_v56 = vpack.c.bf16 %v2126_v5, %v2126_v5  ;;  %2831 = vrot.lane.b32.xlu1 %v6498_v17, %s5488_s8 }
  0xec   : > { %v4971_v57 = vunpack.c.l.bf16 %v5208_v0  ;;  %v4972_v34 = vunpack.c.h.bf16 %v5208_v0  ;;  %9640 = vst [vmem:[#allocation35_spill] sm:$0xff] %v6498_v17  ;;  %v806_v61 = vld [vmem:[#allocation2 + $0xe8] sm:$0x1]  ;;  %v2726_v50 = vunpack.c.l.b16 %v2185_v22  ;;  %v668_v22 = vshrl.u32 %v544_v16, 16 }
  0xed   : > { %9641 = vst [vmem:[#allocation36_spill] sm:$0xff] %v6502_v51  ;;  %v807_v36 = vsel %vm5554_vm4, %v9364_v8, %v806_v61  ;;  %v2725_v20 = vunpack.c.l.b16 %v2184_v56  ;;  %v5215_v56 = vld [vmem:[#allocation2 + $0xb8] sm:$0xff]   ;;  %v6539_v61 = vpop.permute.xlu0 %5387  ;;  %v9648_v17 = vrot.slane %v6440_v25, 1 }
  0xee   : > { %v6511_v40 = vsel %vm1864_vm9, %v4972_v34, %v5380_v55  ;;  %v6514_v21 = vsel %vm1864_vm9, %v4971_v57, %v5379_v46  ;;  %353 = vst [vmem:[#allocation2 + $0x100] sm:$0x1] %v352_v7  ;;  %v6526_v55 = vsel %vm1864_vm9, %v9644_v48, %v5399_v18  ;;  %v2040_v46 = vrot.slane %v6480_v59, 1 }
  0xef   : > { %9642 = vst [vmem:[#allocation37_spill] sm:$0xff] %v6511_v40  ;;  %v2041_v12 = vrot.slane %v6514_v21, 1  ;;  %v2042_v62 = vrot.slane %v6511_v40, 1  ;;  %v771_v0 = vld [vmem:[#allocation2 + $0x98] sm:$0x1]  ;;  %v6533_v5 = vpack.c.b16 %v2726_v50, %v2725_v20  ;;  %v671_v34 = vshll.u32 %v544_v16, 16 }
  0xf0   : > { %9643 = vst [vmem:[#allocation38_spill] sm:$0xff] %v6514_v21  ;;  %v772_v18 = vsel %vm5554_vm4, %v632_v30, %v771_v0  ;;  %v670_v7 = vrot.slane %v668_v22, 7  ;;  %v6543_v50 = vrot.slane %v676_v23, 7  ;;  %v5415_v48 = vunpack.i.h.bf16 %v6458_v4  ;;  %v778_v8 = vld [vmem:[#allocation2 + $0xa8] sm:$0x1] }
  0xf1   : > { %9645 = vst [vmem:[#allocation39_spill] sm:$0xff] %v6526_v55  ;;  %2833 = vrot.lane.b32.xlu2 %v6533_v5, %s5488_s8  ;;  %v2123_v0 = vsel %vm2083_vm10, %v2040_v46, %v2041_v12  ;;  %v9647_v16 = vrot.slane %v6449_v63, 1  ;;  %v5430_v22 = vunpack.i.h.bf16 %v6529_v53  ;;  %v2122_v20 = vsel %vm2083_vm10, %v2041_v12, %v2042_v62  ;;  %v6576_v63 = vpop.permute.xlu2 %5442 }
  0xf2   : > { %808 = vst [vmem:[#allocation2 + $0xe8] sm:$0x1] %v807_v36  ;;  %v679_v36 = vshll.u32 %v545_v38, 16  ;;  %v5210_v23 = vld [vmem:[#allocation2 + $0x90] sm:$0xff]   ;;  %v779_v38 = vsel %vm5554_vm4, %v632_v30, %v778_v8  ;;  %v4999_v9 = vunpack.c.l.bf16 %v5215_v56  ;;  %v5000_v57 = vunpack.c.h.bf16 %v5215_v56  ;;  %v5393_v56 = vpop.permute.xlu1 %5392 }
  0xf3   : > { %9646 = vst [vmem:[#allocation40_spill] sm:$0xff] %v6533_v5  ;;  %v6559_v5 = vor.u32 %v671_v34, %v670_v7  ;;  %v674_v4 = vrot.slane %v670_v7, 4  ;;  %v2187_v40 = vpack.c.bf16 %v2123_v0, %v2123_v0  ;;  %v336_v8 = vld [vmem:[#allocation2 + $0xb0] sm:$0x1]  ;;  %v4979_v21 = vunpack.c.l.bf16 %v5210_v23 }
  0xf4   : > { %773 = vst [vmem:[#allocation2 + $0x98] sm:$0x1] %v772_v18  ;;  %v2124_v18 = vsel %vm2083_vm10, %v9647_v16, %v2040_v46  ;;  %v2121_v46 = vsel %vm2083_vm10, %v2042_v62, %v9648_v17  ;;  %v681_v16 = vor.u32 %v679_v36, %v6543_v50  ;;  %v5218_v30 = vld [vmem:[#allocation2 + $0xd0] sm:$0xff]   ;;  %v5389_v12 = vunpack.i.l.bf16 %v6539_v61 }
  0xf5   : > { %780 = vst [vmem:[#allocation2 + $0xa8] sm:$0x1] %v779_v38  ;;  %v816_v19 = vld [vmem:[#allocation2 + $0x100] sm:$0xf]  ;;  %v2186_v52 = vpack.c.bf16 %v2124_v18, %v2124_v18  ;;  %v2188_v38 = vpack.c.bf16 %v2122_v20, %v2122_v20  ;;  %v2728_v7 = vunpack.c.l.b16 %v2187_v40  ;;  %v2189_v36 = vpack.c.bf16 %v2121_v46, %v2121_v46  ;;  %v540_v20 = vld [vmem:[%s5945_s7 + $0x28] sm:$0xf] }
  0xf6   : > { %v817_v34 = vsel %vm5670_vm8, %v6559_v5, %v816_v19  ;;  %v682_v17 = vsel %vm5620_vm7, %v674_v4, %v681_v16  ;;  %v6573_v0 = vsel %vm1864_vm9, %v4999_v9, %v5414_v24  ;;  %v5012_v18 = vunpack.c.h.bf16 %v5218_v30 }
  0xf7   : > { %818 = vst [vmem:[#allocation2 + $0x100] sm:$0xf] %v817_v34  ;;  %v2727_v62 = vunpack.c.l.b16 %v2186_v52  ;;  %v5429_v59 = vunpack.i.l.bf16 %v6529_v53  ;;  %v337_v19 = vsel %vm5554_vm4, 0, %v336_v8  ;;  %v6583_v4 = vsel %vm1864_vm9, %v5000_v57, %v5415_v48  ;;  %v5403_v57 = vpop.permute.xlu0 %5402 }
  0xf8   : > { %9649 = vst [vmem:[#allocation41_spill] sm:$0xff] %v6573_v0  ;;  %v5011_v52 = vunpack.c.l.bf16 %v5218_v30  ;;  %v4980_v40 = vunpack.c.h.bf16 %v5210_v23  ;;  %v5390_v9 = vunpack.i.h.bf16 %v6539_v61  ;;  %v6588_v53 = vsel %vm1864_vm9, %v4979_v21, %v5389_v12 }
  0xf9   : > { %819 = vst.msk [vmem:[#allocation2 + $0x104] sm:$0xf] %vm290_vm0, %v682_v17  ;;  %v6590_v24 = vpack.c.b16 %v2728_v7, %v2727_v62  ;;  %v2729_v46 = vunpack.c.l.b16 %v2188_v38  ;;  %v2730_v16 = vunpack.c.l.b16 %v2189_v36  ;;  %v5394_v37 = vunpack.i.l.bf16 %v5393_v56 }
  0xfa   : > { %9650 = vst [vmem:[#allocation42_spill] sm:$0xff] %v6583_v4  ;;  %v634_v48 = vshrl.u32 %v540_v20, 16  ;;  %v6594_v23 = vsel %vm1864_vm9, %v5012_v18, %v5430_v22  ;;  %v5395_v30 = vunpack.i.h.bf16 %v5393_v56  ;;  %v637_v21 = vshll.u32 %v540_v20, 16 }
  0xfb   : > { %v5211_v45 = vld [vmem:[#allocation2 + $0x98] sm:$0xff]   ;;  %812 = vst.msk [vmem:[#allocation2 + $0xf4] sm:$0xf] %vm290_vm0, %v682_v17  ;;  %2835 = vrot.lane.b32.xlu0 %v6590_v24, %s5488_s8  ;;  %v6599_v12 = vsel %vm1864_vm9, %v5011_v52, %v5429_v59  ;;  %v2045_v38 = vrot.slane %v6588_v53, 1  ;;  %v5405_v62 = vunpack.i.h.bf16 %v5403_v57  ;;  %v645_v7 = vshll.u32 %v6246_v54, 16  ;;  %v6640_v52 = vpop.permute.xlu2 %5457 }
  0xfc   : > { %9651 = vst [vmem:[#allocation43_spill] sm:$0xff] %v6590_v24  ;;  %v4983_v34 = vunpack.c.l.bf16 %v5211_v45  ;;  %v4984_v61 = vunpack.c.h.bf16 %v5211_v45  ;;  %v5213_v17 = vld [vmem:[#allocation2 + $0xa8] sm:$0xff]   ;;  %v6604_v36 = vsel %vm1864_vm9, %v4980_v40, %v5390_v9  ;;  %v6606_v18 = vpack.c.b16 %v2730_v16, %v2729_v46  ;;  %v6620_v9 = vpop.permute.xlu1 %5407 }
  0xfd   : > { %338 = vst [vmem:[#allocation2 + $0xb0] sm:$0x1] %v337_v19  ;;  %v4992_v22 = vunpack.c.h.bf16 %v5213_v17  ;;  %v636_v45 = vrot.slane %v634_v48, 7  ;;  %v4991_v20 = vunpack.c.l.bf16 %v5213_v17  ;;  %v5404_v59 = vunpack.i.l.bf16 %v5403_v57  ;;  %v339_v17 = vld [vmem:[#allocation2 + $0xc0] sm:$0x1] }
  0xfe   : > { %9652 = vst [vmem:[#allocation44_spill] sm:$0xff] %v6594_v23  ;;  %v6610_v19 = vsel %vm1864_vm9, %v4983_v34, %v5394_v37  ;;  %v6614_v8 = vsel %vm1864_vm9, %v4984_v61, %v5395_v30  ;;  %2837 = vrot.lane.b32.xlu1 %v6606_v18, %s5488_s8  ;;  %v2046_v46 = vrot.slane %v6604_v36, 1  ;;  %v647_v37 = vor.u32 %v645_v7, %v6281_v42 }
  0xff   : > { %9653 = vst [vmem:[#allocation45_spill] sm:$0xff] %v6599_v12  ;;  %v6618_v54 = vor.u32 %v637_v21, %v636_v45  ;;  %v640_v40 = vrot.slane %v636_v45, 4  ;;  %v9658_v34 = vrot.slane %v6435_v29, 1  ;;  %v9660_v61 = vrot.slane %v6440_v25, 1  ;;  %v6634_v21 = vld [vmem:[#allocation2 + $0xe8] sm:$0xff]  }
 0x100   : > { %9654 = vst [vmem:[#allocation46_spill] sm:$0xff] %v6604_v36  ;;  %v2047_v45 = vrot.slane %v6610_v19, 1  ;;  %v6638_v7 = vsel %vm1864_vm9, %v4992_v22, %v5405_v62  ;;  %v2048_v24 = vrot.slane %v6614_v8, 1  ;;  %v9690_v11 = vrot.slane %v6594_v23, 1 }
 0x101   : > { %9655 = vst [vmem:[#allocation47_spill] sm:$0xff] %v6606_v18  ;;  %v2119_v57 = vsel %vm2083_vm10, %v9658_v34, %v2045_v38  ;;  %v9659_v48 = vmov %v9658_v34  ;;  %v410_v18 = vld [vmem:[#allocation2 + $0x118] sm:$0x1]  ;;  %v648_v62 = vsel %vm5620_vm7, %v640_v40, %v647_v37  ;;  %vm4221_vm7 = vcmask 588800  }
 0x102   : > { %9656 = vst [vmem:[#allocation48_spill] sm:$0xff] %v6610_v19  ;;  %v2120_v30 = vsel %vm2083_vm10, %v9660_v61, %v9659_v48  ;;  %v6647_v48 = vsel %vm1864_vm9, %v4991_v20, %v5404_v59  ;;  %v2191_v22 = vpack.c.bf16 %v2119_v57, %v2119_v57  ;;  %v6659_v59 = vpop.permute.xlu0 %5417  ;;  %v2117_v37 = vsel %vm2083_vm10, %v2046_v46, %v2047_v45 }
 0x103   : > { %9657 = vst [vmem:[#allocation49_spill] sm:$0xff] %v6614_v8  ;;  %v2190_v56 = vpack.c.bf16 %v2120_v30, %v2120_v30  ;;  %v5023_v30 = vunpack.c.l.bf16 %v6634_v21  ;;  %v5024_v8 = vunpack.c.h.bf16 %v6634_v21  ;;  %v2051_v40 = vrot.slane %v6647_v48, 1 }
 0x104   : > { %v781_v16 = vld [vmem:[#allocation2 + $0xb0] sm:$0xf]  ;;  %9661 = vst [vmem:[#allocation50_spill] sm:$0xff] %v6647_v48  ;;  %v2118_v57 = vsel %vm2083_vm10, %v2045_v38, %v2046_v46  ;;  %v2193_v21 = vpack.c.bf16 %v2117_v37, %v2117_v37  ;;  %v9662_v19 = vrot.slane %v6526_v55, 1  ;;  %v2116_v61 = vsel %vm2083_vm10, %v2047_v45, %v2048_v24  ;;  %v398_v38 = vld [vmem:[#allocation2 + $0xd8] sm:$0x1] }
 0x105   : > { %v782_v34 = vsel %vm5670_vm8, %v6618_v54, %v781_v16  ;;  %v2731_v36 = vunpack.c.l.b16 %v2190_v56  ;;  %v340_v16 = vsel %vm5554_vm4, 0, %v339_v17  ;;  %784 = vst.msk [vmem:[#allocation2 + $0xb4] sm:$0xf] %vm290_vm0, %v648_v62  ;;  %v2732_v56 = vunpack.c.l.b16 %v2191_v22 }
 0x106   : > { %783 = vst [vmem:[#allocation2 + $0xb0] sm:$0xf] %v782_v34  ;;  %v411_v34 = vsel %vm5588_vm6, 0, %v410_v18  ;;  %v2192_v17 = vpack.c.bf16 %v2118_v57, %v2118_v57  ;;  %v2115_v18 = vsel %vm2083_vm10, %v2048_v24, %v9662_v19  ;;  %v396_v48 = vsel %vm5588_vm6, 0, %v395_v26  ;;  %v6683_v19 = vpop.permute.xlu1 %5422 }
 0x107   : > { %791 = vst.msk [vmem:[#allocation2 + $0xc4] sm:$0xf] %vm290_vm0, %v648_v62  ;;  %v6675_v20 = vpack.c.b16 %v2732_v56, %v2731_v36  ;;  %v2194_v62 = vpack.c.bf16 %v2116_v61, %v2116_v61  ;;  %v2195_v22 = vpack.c.bf16 %v2115_v18, %v2115_v18  ;;  %v5410_v46 = vunpack.i.h.bf16 %v6620_v9 }
 0x108   : > { %341 = vst [vmem:[#allocation2 + $0xc0] sm:$0x1] %v340_v16  ;;  %v5409_v16 = vunpack.i.l.bf16 %v6620_v9  ;;  %v2733_v37 = vunpack.c.l.b16 %v2192_v17  ;;  %v2734_v57 = vunpack.c.l.b16 %v2193_v21  ;;  %v9664_v45 = vrot.slane %v6502_v51, 1 }
 0x109   : > { %9663 = vst [vmem:[#allocation51_spill] sm:$0xff] %v6675_v20  ;;  %2839 = vrot.lane.b32.xlu2 %v6675_v20, %s5488_s8  ;;  %v2735_v24 = vunpack.c.l.b16 %v2194_v62  ;;  %v2736_v36 = vunpack.c.l.b16 %v2195_v22  ;;  %v9666_v26 = vrot.slane %v6526_v55, 1  ;;  %v399_v18 = vsel %vm5588_vm6, 0, %v398_v38  ;;  %v345_v62 = vld [vmem:[#allocation2 + $0xe0] sm:$0x1] }
 0x10a   : > { %412 = vst [vmem:[#allocation2 + $0x118] sm:$0x1] %v411_v34  ;;  %v2113_v61 = vsel %vm2083_vm10, %v9664_v45, %v2051_v40  ;;  %v9665_v34 = vmov %v9664_v45  ;;  %v6695_v56 = vpack.c.b16 %v2734_v57, %v2733_v37  ;;  %v9668_v22 = vunpack.i.h.bf16 %v6576_v63 }
 0x10b   : > { %397 = vst [vmem:[#allocation2 + $0xc8] sm:$0x1] %v396_v48  ;;  %v2114_v9 = vsel %vm2083_vm10, %v9666_v26, %v9665_v34  ;;  %v5224_v48 = vld [vmem:[#allocation2 + $0x100] sm:$0xff]   ;;  %v2197_v21 = vpack.c.bf16 %v2113_v61, %v2113_v61  ;;  %v6704_v55 = vpack.c.b16 %v2736_v36, %v2735_v24  ;;  %v9670_v34 = vrot.slane %v6638_v7, 1 }
 0x10c   : > { %9667 = vst [vmem:[#allocation52_spill] sm:$0xff] %v6695_v56  ;;  %v2196_v17 = vpack.c.bf16 %v2114_v9, %v2114_v9  ;;  %v6702_v45 = vsel %vm1864_vm9, %v5024_v8, %v9668_v22  ;;  %v5036_v20 = vunpack.c.h.bf16 %v5224_v48  ;;  %2841 = vrot.lane.b32.xlu0 %v6695_v56, %s5488_s8  ;;  %v9671_v8 = vunpack.i.l.bf16 %v6576_v63 }
 0x10d   : > { %v5214_v51 = vld [vmem:[#allocation2 + $0xb0] sm:$0xff]   ;;  %9669 = vst [vmem:[#allocation53_spill] sm:$0xff] %v6704_v55  ;;  %v2112_v37 = vsel %vm2083_vm10, %v2051_v40, %v9670_v34  ;;  %v2738_v26 = vunpack.c.l.b16 %v2197_v21  ;;  %v5035_v24 = vunpack.c.l.bf16 %v5224_v48  ;;  %2843 = vrot.lane.b32.xlu1 %v6704_v55, %s5488_s8  ;;  %v346_v40 = vsel %vm5554_vm4, 0, %v345_v62  ;;  %v6732_v48 = vpop.permute.xlu0 %5432 }
 0x10e   : > { %400 = vst [vmem:[#allocation2 + $0xd8] sm:$0x1] %v399_v18  ;;  %v4995_v57 = vunpack.c.l.bf16 %v5214_v51  ;;  %v4996_v61 = vunpack.c.h.bf16 %v5214_v51  ;;  %v2737_v38 = vunpack.c.l.b16 %v2196_v17  ;;  %v6715_v9 = vsel %vm1864_vm9, %v5023_v30, %v9671_v8 }
 0x10f   : > { %v788_v36 = vld [vmem:[#allocation2 + $0xc0] sm:$0xf]  ;;  %v2198_v18 = vpack.c.bf16 %v2112_v37, %v2112_v37  ;;  %347 = vst [vmem:[#allocation2 + $0xe0] sm:$0x1] %v346_v40  ;;  %v9675_v37 = vunpack.i.h.bf16 %v6640_v52  ;;  %v5420_v21 = vunpack.i.h.bf16 %v6659_v59  ;;  %v5425_v55 = vunpack.i.h.bf16 %v6683_v19 }
 0x110   : > { %v6722_v51 = vsel %vm1864_vm9, %v4996_v61, %v5410_v46  ;;  %v6725_v17 = vsel %vm1864_vm9, %v4995_v57, %v5409_v16  ;;  %v789_v63 = vsel %vm5670_vm8, %v6618_v54, %v788_v36  ;;  %v6730_v30 = vpack.c.b16 %v2738_v26, %v2737_v38  ;;  %v6746_v61 = vpop.permute.xlu2 %5472 }
 0x111   : > { %9672 = vst [vmem:[#allocation54_spill] sm:$0xff] %v6722_v51  ;;  %v2054_v62 = vrot.slane %v6722_v51, 1  ;;  %v2053_v46 = vrot.slane %v6725_v17, 1  ;;  %v6744_v57 = vsel %vm1864_vm9, %v5036_v20, %v9675_v37  ;;  %v9677_v26 = vrot.slane %v6281_v42, 4  ;;  %v348_v42 = vld [vmem:[#allocation2 + $0xf0] sm:$0x1] }
 0x112   : > { %9673 = vst [vmem:[#allocation55_spill] sm:$0xff] %v6725_v17  ;;  %v792_v38 = vld [vmem:[#allocation2 + $0xc8] sm:$0x1]  ;;  %2845 = vrot.lane.b32.xlu2 %v6730_v30, %s5488_s8  ;;  %v9678_v36 = vmov %v9670_v34  ;;  %v9680_v34 = vunpack.i.l.bf16 %v6640_v52  ;;  %v404_v52 = vld [vmem:[#allocation2 + $0xf8] sm:$0x1]  ;;  %v9683_v56 = vrot.slane %v6583_v4, 1 }
 0x113   : > { %9674 = vst [vmem:[#allocation56_spill] sm:$0xff] %v6730_v30  ;;  %v793_v8 = vsel %vm5554_vm4, %v9677_v26, %v792_v38  ;;  %v2111_v40 = vsel %vm2083_vm10, %v9678_v36, %v2053_v46  ;;  %v2110_v37 = vsel %vm2083_vm10, %v2053_v46, %v2054_v62  ;;  %v6769_v26 = vld [vmem:[#allocation2 + $0x118] sm:$0xff]   ;;  %v2739_v36 = vunpack.c.l.b16 %v2198_v18  ;;  %v6775_v46 = vpop.permute.xlu1 %5437 }
 0x114   : > { %790 = vst [vmem:[#allocation2 + $0xc0] sm:$0xf] %v789_v63  ;;  %v9679_v63 = vrot.slane %v6573_v0, 1  ;;  %v6767_v38 = vsel %vm1864_vm9, %v5035_v24, %v9680_v34  ;;  %v2199_v16 = vpack.c.bf16 %v2111_v40, %v2111_v40  ;;  %v2200_v22 = vpack.c.bf16 %v2110_v37, %v2110_v37 }
 0x115   : > { %9676 = vst [vmem:[#allocation57_spill] sm:$0xff] %v6744_v57  ;;  %v799_v54 = vld [vmem:[#allocation2 + $0xd8] sm:$0x1]  ;;  %v5475_v30 = vunpack.i.h.bf16 %v6746_v61  ;;  %v9682_v24 = vrot.slane %v6354_v28, 4  ;;  %v5048_v37 = vunpack.c.h.bf16 %v6769_v26  ;;  %v349_v28 = vsel %vm5554_vm4, 0, %v348_v42 }
 0x116   : > { %v2109_v20 = vsel %vm2083_vm10, %v2054_v62, %v9679_v63  ;;  %9681 = vst [vmem:[#allocation58_spill] sm:$0xff] %v6767_v38  ;;  %v5419_v63 = vunpack.i.l.bf16 %v6659_v59  ;;  %v2741_v18 = vunpack.c.l.b16 %v2200_v22  ;;  %v802_v59 = vld [vmem:[#allocation2 + $0xe0] sm:$0xf]  ;;  %v9684_v62 = vrot.slane %v6573_v0, 1 }
 0x117   : > { %794 = vst [vmem:[#allocation2 + $0xc8] sm:$0x1] %v793_v8  ;;  %v800_v34 = vsel %vm5554_vm4, %v9682_v24, %v799_v54  ;;  %v2740_v8 = vunpack.c.l.b16 %v2199_v16  ;;  %v2201_v40 = vpack.c.bf16 %v2109_v20, %v2109_v20  ;;  %v803_v20 = vsel %vm5670_vm8, %v6352_v49, %v802_v59 }
 0x118   : > { %801 = vst [vmem:[#allocation2 + $0xd8] sm:$0x1] %v800_v34  ;;  %v2108_v51 = vsel %vm2083_vm10, %v9684_v62, %v9683_v56  ;;  %v405_v24 = vsel %vm5588_vm6, 0, %v404_v52  ;;  %v407_v34 = vld [vmem:[#allocation2 + $0x108] sm:$0x1]  ;;  %v5424_v56 = vunpack.i.l.bf16 %v6683_v19  ;;  %v5435_v62 = vunpack.i.h.bf16 %v6732_v48 }
 0x119   : > { %v6791_v16 = vpack.c.b16 %v2740_v8, %v2739_v36  ;;  %v2742_v22 = vunpack.c.l.b16 %v2201_v40  ;;  %350 = vst [vmem:[#allocation2 + $0xf0] sm:$0x1] %v349_v28  ;;  %v5434_v42 = vunpack.i.l.bf16 %v6732_v48  ;;  %v5440_v49 = vunpack.i.h.bf16 %v6775_v46  ;;  %v6806_v40 = vpop.permute.xlu0 %5447 }
 0x11a   : > { %804 = vst [vmem:[#allocation2 + $0xe0] sm:$0xf] %v803_v20  ;;  %v2202_v8 = vpack.c.bf16 %v2108_v51, %v2108_v51  ;;  %v5439_v48 = vunpack.i.l.bf16 %v6775_v46  ;;  %v408_v28 = vsel %vm5588_vm6, 0, %v407_v34  ;;  %v9691_v46 = vrot.slane %v6599_v12, 1 }
 0x11b   : > { %v5216_v54 = vld [vmem:[#allocation2 + $0xc0] sm:$0xff]   ;;  %9685 = vst [vmem:[#allocation59_spill] sm:$0xff] %v6791_v16  ;;  %2847 = vrot.lane.b32.xlu0 %v6791_v16, %s5488_s8  ;;  %v6803_v36 = vpack.c.b16 %v2742_v22, %v2741_v18  ;;  %v354_v18 = vld [vmem:[#allocation2 + $0x110] sm:$0x1]  ;;  %v6820_v22 = vsel %vm1864_vm9, %v5048_v37, %v5475_v30  ;;  %v683_v34 = vrot.slane %v6543_v50, 4  ;;  %v9694_v50 = vrot.slane %v6583_v4, 1 }
 0x11c   : > { %v5003_v0 = vunpack.c.l.bf16 %v5216_v54  ;;  %v5004_v17 = vunpack.c.h.bf16 %v5216_v54  ;;  %406 = vst [vmem:[#allocation2 + $0xf8] sm:$0x1] %v405_v24  ;;  %v2102_v20 = vsel %vm2083_vm10, %v9691_v46, %v9690_v11  ;;  %v2743_v24 = vunpack.c.l.b16 %v2202_v8 }
 0x11d   : > { %9686 = vst [vmem:[#allocation60_spill] sm:$0xff] %v6803_v36  ;;  %2849 = vrot.lane.b32.xlu1 %v6803_v36, %s5488_s8  ;;  %v6842_v36 = vpop.permute.xlu1 %5452  ;;  %vm4108_vm6 = vcmask 523264  }
 0x11e   : > { %v6809_v52 = vsel %vm1864_vm9, %v5004_v17, %v5420_v21  ;;  %v6812_v19 = vsel %vm1864_vm9, %v5003_v0, %v5419_v63  ;;  %v5217_v59 = vld [vmem:[#allocation2 + $0xc8] sm:$0xff]   ;;  %9689 = vst [vmem:[#allocation63_spill] sm:$0xff] %v6820_v22 }
 0x11f   : > { %9687 = vst [vmem:[#allocation61_spill] sm:$0xff] %v6809_v52  ;;  %v2057_v54 = vrot.slane %v6812_v19, 1  ;;  %v5007_v17 = vunpack.c.l.bf16 %v5217_v59  ;;  %v5008_v21 = vunpack.c.h.bf16 %v5217_v59  ;;  %v2058_v30 = vrot.slane %v6809_v52, 1  ;;  %v5219_v37 = vld [vmem:[#allocation2 + $0xd8] sm:$0xff]  }
 0x120   : > { %9688 = vst [vmem:[#allocation62_spill] sm:$0xff] %v6812_v19  ;;  %v5015_v63 = vunpack.c.l.bf16 %v5219_v37  ;;  %v5016_v0 = vunpack.c.h.bf16 %v5219_v37 }
 0x121   : > { %409 = vst [vmem:[#allocation2 + $0x108] sm:$0x1] %v408_v28  ;;  %v355_v28 = vsel %vm5554_vm4, 0, %v354_v18  ;;  %v6837_v59 = vsel %vm1864_vm9, %v5008_v21, %v5425_v55  ;;  %v6840_v51 = vsel %vm1864_vm9, %v5007_v17, %v5424_v56  ;;  %v5220_v46 = vld [vmem:[#allocation2 + $0xe0] sm:$0xff]   ;;  %v2107_v18 = vsel %vm2083_vm10, %v9694_v50, %v2057_v54  ;;  %v809_v55 = vld [vmem:[#allocation2 + $0xf0] sm:$0xf] }
 0x122   : > { %9692 = vst [vmem:[#allocation64_spill] sm:$0xff] %v6837_v59  ;;  %v2060_v11 = vrot.slane %v6837_v59, 1  ;;  %v2059_v8 = vrot.slane %v6840_v51, 1  ;;  %v2208_v21 = vpack.c.bf16 %v2102_v20, %v2102_v20  ;;  %v6851_v56 = vsel %vm1864_vm9, %v5016_v0, %v5435_v62 }
 0x123   : > { %9693 = vst [vmem:[#allocation65_spill] sm:$0xff] %v6840_v51  ;;  %v6854_v17 = vsel %vm1864_vm9, %v5015_v63, %v5434_v42  ;;  %v5019_v37 = vunpack.c.l.bf16 %v5220_v46  ;;  %v2106_v59 = vsel %vm2083_vm10, %v2057_v54, %v2058_v30  ;;  %v2203_v0 = vpack.c.bf16 %v2107_v18, %v2107_v18  ;;  %v813_v63 = vld [vmem:[#allocation2 + $0xf8] sm:$0x1] }
 0x124   : > { %356 = vst [vmem:[#allocation2 + $0x110] sm:$0x1] %v355_v28  ;;  %v5020_v28 = vunpack.c.h.bf16 %v5220_v46  ;;  %v2063_v16 = vrot.slane %v6854_v17, 1  ;;  %v810_v42 = vsel %vm5670_vm8, %v6559_v5, %v809_v55  ;;  %v2064_v20 = vrot.slane %v6851_v56, 1 }
 0x125   : > { %9695 = vst [vmem:[#allocation66_spill] sm:$0xff] %v6854_v17  ;;  %v6865_v62 = vsel %vm1864_vm9, %v5019_v37, %v5439_v48  ;;  %v2749_v52 = vunpack.c.l.b16 %v2208_v21  ;;  %v2744_v51 = vunpack.c.l.b16 %v2203_v0  ;;  %v2204_v48 = vpack.c.bf16 %v2106_v59, %v2106_v59 }
 0x126   : > { %v6862_v50 = vsel %vm1864_vm9, %v5020_v28, %v5440_v49  ;;  %9697 = vst [vmem:[#allocation68_spill] sm:$0xff] %v6865_v62  ;;  %v2065_v46 = vrot.slane %v6865_v62, 1  ;;  %v2105_v49 = vsel %vm2083_vm10, %v2058_v30, %v2059_v8  ;;  %v9698_v18 = vrot.slane %v6599_v12, 1 }
 0x127   : > { %9696 = vst [vmem:[#allocation67_spill] sm:$0xff] %v6862_v50  ;;  %v2066_v54 = vrot.slane %v6862_v50, 1  ;;  %v2205_v55 = vpack.c.bf16 %v2105_v49, %v2105_v49  ;;  %v2104_v37 = vsel %vm2083_vm10, %v2059_v8, %v2060_v11  ;;  %v6883_v21 = vpack.c.b16 %v2744_v51, %v2743_v24 }
 0x128   : > { %811 = vst [vmem:[#allocation2 + $0xf0] sm:$0xf] %v810_v42  ;;  %v2103_v1 = vsel %vm2083_vm10, %v2060_v11, %v9698_v18  ;;  %v820_v5 = vld [vmem:[#allocation2 + $0x108] sm:$0x1]  ;;  %v814_v42 = vsel %vm5554_vm4, %v683_v34, %v813_v63  ;;  %v2745_v0 = vunpack.c.l.b16 %v2204_v48  ;;  %v2206_v50 = vpack.c.bf16 %v2104_v37, %v2104_v37 }
 0x129   : > { %v2207_v28 = vpack.c.bf16 %v2103_v1, %v2103_v1  ;;  %9699 = vst [vmem:[#allocation69_spill] sm:$0xff] %v6883_v21  ;;  %v9700_v30 = vrot.slane %v6594_v23, 1  ;;  %v2746_v18 = vunpack.c.l.b16 %v2205_v55  ;;  %v821_v11 = vsel %vm5554_vm4, %v683_v34, %v820_v5  ;;  %2851 = vrot.lane.b32.xlu2 %v6883_v21, %s5488_s8 }
 0x12a   : > { %815 = vst [vmem:[#allocation2 + $0xf8] sm:$0x1] %v814_v42  ;;  %v2747_v51 = vunpack.c.l.b16 %v2206_v50  ;;  %v2099_v24 = vsel %vm2083_vm10, %v2064_v20, %v2065_v46  ;;  %v2100_v63 = vsel %vm2083_vm10, %v2063_v16, %v2064_v20  ;;  %v9701_v48 = vrot.slane %v6715_v9, 1 }
 0x12b   : > { %v2101_v59 = vsel %vm2083_vm10, %v9700_v30, %v2063_v16  ;;  %v2748_v62 = vunpack.c.l.b16 %v2207_v28  ;;  %v5226_v8 = vld [vmem:[#allocation2 + $0x110] sm:$0xff]   ;;  %822 = vst [vmem:[#allocation2 + $0x108] sm:$0x1] %v821_v11  ;;  %v6901_v55 = vpack.c.b16 %v2746_v18, %v2745_v0  ;;  %v2210_v34 = vpack.c.bf16 %v2100_v63, %v2100_v63  ;;  %v5463_v0 = vpop.permute.xlu0 %5462 }
 0x12c   : > { %v2209_v49 = vpack.c.bf16 %v2101_v59, %v2101_v59  ;;  %v2097_v1 = vsel %vm2083_vm10, %v2066_v54, %v9701_v48  ;;  %v2211_v5 = vpack.c.bf16 %v2099_v24, %v2099_v24  ;;  %v2098_v50 = vsel %vm2083_vm10, %v2065_v46, %v2066_v54  ;;  %v5468_v59 = vpop.permute.xlu1 %5467 }
 0x12d   : > { %9702 = vst [vmem:[#allocation70_spill] sm:$0xff] %v6901_v55  ;;  %v6903_v28 = vpack.c.b16 %v2748_v62, %v2747_v51  ;;  %v2213_v42 = vpack.c.bf16 %v2097_v1, %v2097_v1  ;;  %v5043_v30 = vunpack.c.l.bf16 %v5226_v8  ;;  %2853 = vrot.lane.b32.xlu0 %v6901_v55, %s5488_s8  ;;  %v2751_v18 = vunpack.c.l.b16 %v2210_v34 }
 0x12e   : > { %v2750_v2 = vunpack.c.l.b16 %v2209_v49  ;;  %v2752_v62 = vunpack.c.l.b16 %v2211_v5  ;;  %v2212_v49 = vpack.c.bf16 %v2098_v50, %v2098_v50  ;;  %v5044_v24 = vunpack.c.h.bf16 %v5226_v8 }
 0x12f   : > { %v5222_v37 = vld [vmem:[#allocation2 + $0xf0] sm:$0xff]   ;;  %9703 = vst [vmem:[#allocation71_spill] sm:$0xff] %v6903_v28  ;;  %2855 = vrot.lane.b32.xlu1 %v6903_v28, %s5488_s8  ;;  %v2754_v51 = vunpack.c.l.b16 %v2213_v42  ;;  %v9705_v54 = vunpack.i.h.bf16 %v6806_v40  ;;  %v9706_v63 = vunpack.i.l.bf16 %v6806_v40  ;;  %v5470_v1 = vunpack.i.h.bf16 %v5468_v59 }
 0x130   : > { %v5027_v16 = vunpack.c.l.bf16 %v5222_v37  ;;  %v5028_v20 = vunpack.c.h.bf16 %v5222_v37  ;;  %v6909_v11 = vpack.c.b16 %v2750_v2, %v2749_v52  ;;  %v5469_v2 = vunpack.i.l.bf16 %v5468_v59 }
 0x131   : > { %v5223_v52 = vld [vmem:[#allocation2 + $0xf8] sm:$0xff]   ;;  %v9707_v34 = vunpack.i.l.bf16 %v6746_v61  ;;  %v9708_v5 = vunpack.c.l.bf16 %v6769_v26  ;;  %v5465_v50 = vunpack.i.h.bf16 %v5463_v0  ;;  %v5464_v42 = vunpack.i.l.bf16 %v5463_v0 }
 0x132   : > { %9704 = vst [vmem:[#allocation72_spill] sm:$0xff] %v6909_v11  ;;  %v6916_v46 = vsel %vm1864_vm9, %v5028_v20, %v9705_v54  ;;  %v6921_v48 = vsel %vm1864_vm9, %v5027_v16, %v9706_v63  ;;  %v5031_v20 = vunpack.c.l.bf16 %v5223_v52  ;;  %v5032_v54 = vunpack.c.h.bf16 %v5223_v52  ;;  %v5225_v40 = vld [vmem:[#allocation2 + $0x108] sm:$0xff]   ;;  %2857 = vrot.lane.b32.xlu2 %v6909_v11, %s5488_s8 }
 0x133   : > { %v6928_v37 = vsel %vm1864_vm9, %v9708_v5, %v9707_v34  ;;  %v2070_v8 = vrot.slane %v6916_v46, 1  ;;  %v6931_v28 = vpack.c.b16 %v2752_v62, %v2751_v18  ;;  %v2753_v16 = vunpack.c.l.b16 %v2212_v49 }
 0x134   : > { %9709 = vst [vmem:[#allocation73_spill] sm:$0xff] %v6928_v37  ;;  %v2069_v63 = vrot.slane %v6921_v48, 1  ;;  %v5039_v61 = vunpack.c.l.bf16 %v5225_v40  ;;  %v5040_v26 = vunpack.c.h.bf16 %v5225_v40  ;;  %v6937_v59 = vsel %vm1864_vm9, %v5044_v24, %v5470_v1 }
 0x135   : > { %9710 = vst [vmem:[#allocation74_spill] sm:$0xff] %v6931_v28  ;;  %v9712_v34 = vunpack.i.h.bf16 %v6842_v36  ;;  %v9714_v52 = vunpack.i.l.bf16 %v6842_v36  ;;  %v6949_v62 = vpack.c.b16 %v2754_v51, %v2753_v16  ;;  %v6952_v49 = vsel %vm1864_vm9, %v5043_v30, %v5469_v2  ;;  %2859 = vrot.lane.b32.xlu0 %v6931_v28, %s5488_s8 }
 0x136   : > { %9711 = vst [vmem:[#allocation75_spill] sm:$0xff] %v6937_v59  ;;  %v2074_v24 = vrot.slane %v6744_v57, 1  ;;  %v2073_v1 = vrot.slane %v6767_v38, 1  ;;  %v6964_v51 = vsel %vm1864_vm9, %v5039_v61, %v5464_v42  ;;  %v2079_v30 = vrot.slane %v6928_v37, 1 }
 0x137   : > { %v6942_v0 = vsel %vm1864_vm9, %v5032_v54, %v9712_v34  ;;  %v6947_v18 = vsel %vm1864_vm9, %v5031_v20, %v9714_v52  ;;  %9716 = vst [vmem:[#allocation78_spill] sm:$0xff] %v6949_v62  ;;  %v2080_v54 = vrot.slane %v6820_v22, 1  ;;  %v6961_v20 = vsel %vm1864_vm9, %v5040_v26, %v5465_v50  ;;  %2861 = vrot.lane.b32.xlu1 %v6949_v62, %s5488_s8 }
 0x138   : > { %9713 = vst [vmem:[#allocation76_spill] sm:$0xff] %v6942_v0  ;;  %v2071_v40 = vrot.slane %v6947_v18, 1  ;;  %v2072_v36 = vrot.slane %v6942_v0, 1  ;;  %v2075_v2 = vrot.slane %v6964_v51, 1  ;;  %v2078_v16 = vrot.slane %v6937_v59, 1 }
 0x139   : > { %9715 = vst [vmem:[#allocation77_spill] sm:$0xff] %v6947_v18  ;;  %v2077_v34 = vrot.slane %v6952_v49, 1  ;;  %v2076_v50 = vrot.slane %v6961_v20, 1  ;;  %v9720_v26 = vrot.slane %v6702_v45, 1  ;;  %v9722_v52 = vrot.slane %v6715_v9, 1 }
 0x13a   : > { %9717 = vst [vmem:[#allocation79_spill] sm:$0xff] %v6952_v49  ;;  %v2093_v62 = vsel %vm2083_vm10, %v2070_v8, %v2071_v40  ;;  %v2094_v55 = vsel %vm2083_vm10, %v2069_v63, %v2070_v8  ;;  %v2092_v37 = vsel %vm2083_vm10, %v2071_v40, %v2072_v36  ;;  %v2089_v59 = vsel %vm2083_vm10, %v2074_v24, %v2075_v2 }
 0x13b   : > { %9718 = vst [vmem:[#allocation80_spill] sm:$0xff] %v6961_v20  ;;  %v2095_v42 = vsel %vm2083_vm10, %v9720_v26, %v2069_v63  ;;  %v9721_v61 = vmov %v9720_v26  ;;  %v2217_v21 = vpack.c.bf16 %v2093_v62, %v2093_v62  ;;  %v2216_v22 = vpack.c.bf16 %v2094_v55, %v2094_v55 }
 0x13c   : > { %9719 = vst [vmem:[#allocation81_spill] sm:$0xff] %v6964_v51  ;;  %v2096_v5 = vsel %vm2083_vm10, %v9722_v52, %v9721_v61  ;;  %v2215_v11 = vpack.c.bf16 %v2095_v42, %v2095_v42  ;;  %v2091_v26 = vsel %vm2083_vm10, %v2072_v36, %v2073_v1  ;;  %v2218_v20 = vpack.c.bf16 %v2092_v37, %v2092_v37 }
 0x13d   : > { %v2214_v28 = vpack.c.bf16 %v2096_v5, %v2096_v5  ;;  %v2758_v49 = vunpack.c.l.b16 %v2217_v21  ;;  %v2757_v5 = vunpack.c.l.b16 %v2216_v22  ;;  %v2219_v42 = vpack.c.bf16 %v2091_v26, %v2091_v26 }
 0x13e   : > { %v2756_v52 = vunpack.c.l.b16 %v2215_v11  ;;  %v2090_v8 = vsel %vm2083_vm10, %v2073_v1, %v2074_v24  ;;  %v2221_v63 = vpack.c.bf16 %v2089_v59, %v2089_v59  ;;  %v2759_v62 = vunpack.c.l.b16 %v2218_v20  ;;  %v7009_v24 = vpop.permute.xlu2 %2809 }
 0x13f   : > { %v2755_v61 = vunpack.c.l.b16 %v2214_v28  ;;  %v2220_v51 = vpack.c.bf16 %v2090_v8, %v2090_v8  ;;  %v2087_v40 = vsel %vm2083_vm10, %v2076_v50, %v2077_v34  ;;  %v7001_v36 = vpack.c.b16 %v2758_v49, %v2757_v5  ;;  %9725 = vst [vmem:[#allocation84_spill] sm:$0xff] %v7009_v24 }
 0x140   : > { %v2760_v57 = vunpack.c.l.b16 %v2219_v42  ;;  %v2762_v28 = vunpack.c.l.b16 %v2221_v63  ;;  %v2088_v21 = vsel %vm2083_vm10, %v2075_v2, %v2076_v50  ;;  %v2223_v37 = vpack.c.bf16 %v2087_v40, %v2087_v40 }
 0x141   : > { %v6997_v55 = vpack.c.b16 %v2756_v52, %v2755_v61  ;;  %9724 = vst [vmem:[#allocation83_spill] sm:$0xff] %v7001_v36  ;;  %v2761_v22 = vunpack.c.l.b16 %v2220_v51  ;;  %v2222_v11 = vpack.c.bf16 %v2088_v21, %v2088_v21  ;;  %v2085_v59 = vsel %vm2083_vm10, %v2078_v16, %v2079_v30  ;;  %2865 = vrot.lane.b32.xlu0 %v7001_v36, %s5488_s8 }
 0x142   : > { %v2230_v1 = vrot.slane %v6102_v14, 2  ;;  %v7014_v49 = vpack.c.b16 %v2760_v57, %v2759_v62  ;;  %v2086_v20 = vsel %vm2083_vm10, %v2077_v34, %v2078_v16  ;;  %v2225_v2 = vpack.c.bf16 %v2085_v59, %v2085_v59 }
 0x143   : > { %9723 = vst [vmem:[#allocation82_spill] sm:$0xff] %v6997_v55  ;;  %2863 = vrot.lane.b32.xlu2 %v6997_v55, %s5488_s8  ;;  %v2231_v51 = vrot.slane %v6105_v15, 2  ;;  %v2763_v50 = vunpack.c.l.b16 %v2222_v11  ;;  %v2764_v26 = vunpack.c.l.b16 %v2223_v37  ;;  %v2224_v61 = vpack.c.bf16 %v2086_v20, %v2086_v20  ;;  %v9749_v55 = vld [vmem:[#allocation19_spill] sm:$0xff] }
 0x144   : > { %9726 = vst [vmem:[#allocation85_spill] sm:$0xff] %v7014_v49  ;;  %v2232_v52 = vrot.slane %v6120_v41, 2  ;;  %2867 = vrot.lane.b32.xlu1 %v7014_v49, %s5488_s8  ;;  %v2766_v5 = vunpack.c.l.b16 %v2225_v2  ;;  %v2084_v42 = vsel %vm2083_vm10, %v2079_v30, %v2080_v54  ;;  %v9727_v57 = vrot.slane %v6082_v31, 1 }
 0x145   : > { %v7028_v34 = vpack.c.b16 %v2762_v28, %v2761_v22  ;;  %v2765_v8 = vunpack.c.l.b16 %v2224_v61  ;;  %v2234_v63 = vrot.slane %v6153_v27, 2  ;;  %v7031_v62 = vpack.c.b16 %v2764_v26, %v2763_v50 }
 0x146   : > { %v2155_v16 = vsel %vm2083_vm10, %v2080_v54, %v9727_v57  ;;  %v2226_v40 = vpack.c.bf16 %v2084_v42, %v2084_v42  ;;  %v9730_v11 = vrot.slane %v6085_v33, 2  ;;  %v9732_v54 = vrot.slane %v6082_v31, 2 }
 0x147   : > { %9728 = vst [vmem:[#allocation86_spill] sm:$0xff] %v7028_v34  ;;  %v2227_v21 = vpack.c.bf16 %v2155_v16, %v2155_v16  ;;  %v2233_v22 = vrot.slane %v6131_v44, 2  ;;  %v7045_v59 = vpack.c.b16 %v2766_v5, %v2765_v8  ;;  %v2368_v2 = vsel %vm2300_vm11, %v2231_v51, %v2232_v52 }
 0x148   : > { %9729 = vst [vmem:[#allocation87_spill] sm:$0xff] %v7031_v62  ;;  %v2370_v30 = vsel %vm2300_vm11, %v9730_v11, %v2230_v1  ;;  %v9731_v37 = vmov %v9730_v11  ;;  %v2236_v50 = vrot.slane %v6139_v60, 2  ;;  %v2235_v26 = vrot.slane %v6158_v35, 2 }
 0x149   : > { %v2371_v28 = vsel %vm2300_vm11, %v9732_v54, %v9731_v37  ;;  %9733 = vst [vmem:[#allocation88_spill] sm:$0xff] %v7045_v59  ;;  %v2374_v20 = vpack.c.bf16 %v2370_v30, %v2370_v30  ;;  %v2369_v61 = vsel %vm2300_vm11, %v2230_v1, %v2231_v51  ;;  %2871 = vrot.lane.b32.xlu0 %v7031_v62, %s5488_s8  ;;  %v2237_v8 = vrot.slane %v6128_v39, 2  ;;  %v7061_v54 = vpop.permute.xlu2 %2815 }
 0x14a   : > { %v2373_v42 = vpack.c.bf16 %v2371_v28, %v2371_v28  ;;  %v2375_v5 = vpack.c.bf16 %v2369_v61, %v2369_v61  ;;  %v2376_v57 = vpack.c.bf16 %v2368_v2, %v2368_v2  ;;  %v2366_v16 = vsel %vm2300_vm11, %v2233_v22, %v2234_v63  ;;  %9734 = vst [vmem:[#allocation89_spill] sm:$0xff] %v7061_v54 }
 0x14b   : > { %2869 = vrot.lane.b32.xlu2 %v7028_v34, %s5488_s8  ;;  %v2238_v11 = vrot.slane %v6147_v13, 2  ;;  %v2767_v30 = vunpack.c.l.b16 %v2226_v40  ;;  %v2768_v37 = vunpack.c.l.b16 %v2227_v21  ;;  %v2239_v24 = vrot.slane %v6165_v47, 2 }
 0x14c   : > { %2873 = vrot.lane.b32.xlu1 %v7045_v59, %s5488_s8  ;;  %v2950_v1 = vunpack.c.l.b16 %v2374_v20  ;;  %v2367_v51 = vsel %vm2300_vm11, %v2232_v52, %v2233_v22  ;;  %v2241_v28 = vrot.slane %v6208_v32, 2  ;;  %v2240_v2 = vrot.slane %v6211_v6, 2 }
 0x14d   : > { %v2378_v61 = vpack.c.bf16 %v2366_v16, %v2366_v16  ;;  %v2364_v40 = vsel %vm2300_vm11, %v2235_v26, %v2236_v50  ;;  %v2949_v21 = vunpack.c.l.b16 %v2373_v42  ;;  %v2951_v62 = vunpack.c.l.b16 %v2375_v5 }
 0x14e   : > { %v2952_v54 = vunpack.c.l.b16 %v2376_v57  ;;  %v2365_v34 = vsel %vm2300_vm11, %v2234_v63, %v2235_v26  ;;  %v7074_v49 = vpack.c.b16 %v2768_v37, %v2767_v30  ;;  %v2377_v20 = vpack.c.bf16 %v2367_v51, %v2367_v51  ;;  %v7097_v51 = vpop.permute.xlu1 %2807 }
 0x14f   : > { %v2362_v52 = vsel %vm2300_vm11, %v2237_v8, %v2238_v11  ;;  %v2363_v22 = vsel %vm2300_vm11, %v2236_v50, %v2237_v8  ;;  %v2242_v16 = vrot.slane %v6218_v10, 2  ;;  %v7081_v59 = vpack.c.b16 %v2950_v1, %v2949_v21  ;;  %v7090_v8 = vpop.permute.xlu0 %2805  ;;  %9739 = vst [vmem:[#allocation94_spill] sm:$0xff] %v7097_v51 }
 0x150   : > { %9735 = vst [vmem:[#allocation90_spill] sm:$0xff] %v7074_v49  ;;  %v2379_v36 = vpack.c.bf16 %v2365_v34, %v2365_v34  ;;  %v2380_v42 = vpack.c.bf16 %v2364_v40, %v2364_v40  ;;  %v2954_v5 = vunpack.c.l.b16 %v2378_v61  ;;  %v2244_v63 = vrot.slane %v6182_v58, 2 }
 0x151   : > { %9736 = vst [vmem:[#allocation91_spill] sm:$0xff] %v7081_v59  ;;  %3057 = vrot.lane.b32.xlu0 %v7081_v59, %s5489_s9  ;;  %v7088_v26 = vpack.c.b16 %v2952_v54, %v2951_v62  ;;  %v2381_v57 = vpack.c.bf16 %v2363_v22, %v2363_v22  ;;  %v2382_v50 = vpack.c.bf16 %v2362_v52, %v2362_v52  ;;  %v2243_v30 = vrot.slane %v6228_v3, 2  ;;  %v7105_v21 = vpop.permute.xlu2 %2821 }
 0x152   : > { %9738 = vst [vmem:[#allocation93_spill] sm:$0xff] %v7090_v8  ;;  %v2953_v34 = vunpack.c.l.b16 %v2377_v20  ;;  %v2360_v37 = vsel %vm2300_vm11, %v2239_v24, %v2240_v2  ;;  %v2361_v1 = vsel %vm2300_vm11, %v2238_v11, %v2239_v24  ;;  %v2955_v62 = vunpack.c.l.b16 %v2379_v36 }
 0x153   : > { %2875 = vrot.lane.b32.xlu2 %v7074_v49, %s5488_s8  ;;  %9737 = vst [vmem:[#allocation92_spill] sm:$0xff] %v7088_v26  ;;  %v2956_v54 = vunpack.c.l.b16 %v2380_v42  ;;  %v2358_v61 = vsel %vm2300_vm11, %v2241_v28, %v2242_v16  ;;  %v2359_v20 = vsel %vm2300_vm11, %v2240_v2, %v2241_v28  ;;  %v2957_v52 = vunpack.c.l.b16 %v2381_v57  ;;  %v9745_v49 = vld [vmem:[#allocation15_spill] sm:$0xff]  ;;  %v9746_v2 = vld [vmem:[#allocation20_spill] sm:$0xff] }
 0x154   : > { %3059 = vrot.lane.b32.xlu1 %v7088_v26, %s5489_s9  ;;  %v7103_v40 = vpack.c.b16 %v2954_v5, %v2953_v34  ;;  %9741 = vst [vmem:[#allocation96_spill] sm:$0xff] %v7105_v21  ;;  %v2958_v22 = vunpack.c.l.b16 %v2382_v50  ;;  %v2383_v24 = vpack.c.bf16 %v2361_v1, %v2361_v1  ;;  %v2384_v11 = vpack.c.bf16 %v2360_v37, %v2360_v37  ;;  %v9742_v26 = vld [vmem:[#allocation9_spill] sm:$0xff] }
 0x155   : > { %v2385_v59 = vpack.c.bf16 %v2359_v20, %v2359_v20  ;;  %v2386_v51 = vpack.c.bf16 %v2358_v61, %v2358_v61  ;;  %v2356_v36 = vsel %vm2300_vm11, %v2243_v30, %v2244_v63  ;;  %v2357_v42 = vsel %vm2300_vm11, %v2242_v16, %v2243_v30  ;;  %v9743_v34 = vld [vmem:[#allocation13_spill] sm:$0xff] }
 0x156   : > { %9740 = vst [vmem:[#allocation95_spill] sm:$0xff] %v7103_v40  ;;  %v2245_v5 = vrot.slane %v9742_v26, 2  ;;  %v2246_v8 = vrot.slane %v9743_v34, 2  ;;  %v7115_v21 = vpack.c.b16 %v2956_v54, %v2955_v62  ;;  %v2247_v28 = vrot.slane %v9745_v49, 2  ;;  %v9748_v62 = vld [vmem:[#allocation11_spill] sm:$0xff] }
 0x157   : > { %v2248_v57 = vrot.slane %v9746_v2, 2  ;;  %v7123_v50 = vpack.c.b16 %v2958_v22, %v2957_v52  ;;  %v2387_v37 = vpack.c.bf16 %v2357_v42, %v2357_v42  ;;  %v2388_v16 = vpack.c.bf16 %v2356_v36, %v2356_v36  ;;  %v7133_v22 = vpop.permute.xlu0 %2811  ;;  %v9753_v42 = vld [vmem:[#allocation23_spill] sm:$0xff] }
 0x158   : > { %9744 = vst [vmem:[#allocation9_spill] sm:$0xff] %v7115_v21  ;;  %v2959_v30 = vunpack.c.l.b16 %v2383_v24  ;;  %v2960_v1 = vunpack.c.l.b16 %v2384_v11  ;;  %v2961_v61 = vunpack.c.l.b16 %v2385_v59  ;;  %v2962_v20 = vunpack.c.l.b16 %v2386_v51  ;;  %v7139_v51 = vpop.permute.xlu1 %2813  ;;  %v9752_v11 = vld [vmem:[#allocation22_spill] sm:$0xff] }
 0x159   : > { %3063 = vrot.lane.b32.xlu0 %v7115_v21, %s5489_s9  ;;  %9747 = vst [vmem:[#allocation13_spill] sm:$0xff] %v7123_v50  ;;  %v2250_v54 = vrot.slane %v9748_v62, 2  ;;  %v2249_v15 = vrot.slane %v9749_v55, 2  ;;  %v2355_v52 = vsel %vm2300_vm11, %v2244_v63, %v2245_v5  ;;  %v2352_v24 = vsel %vm2300_vm11, %v2247_v28, %v2248_v57 }
 0x15a   : > { %9750 = vst [vmem:[#allocation15_spill] sm:$0xff] %v7133_v22  ;;  %v2353_v59 = vsel %vm2300_vm11, %v2246_v8, %v2247_v28  ;;  %v2251_v36 = vrot.slane %v9752_v11, 2  ;;  %v2963_v21 = vunpack.c.l.b16 %v2387_v37  ;;  %v2964_v14 = vunpack.c.l.b16 %v2388_v16  ;;  %v7147_v22 = vpop.permute.xlu2 %2827 }
 0x15b   : > { %3061 = vrot.lane.b32.xlu2 %v7103_v40, %s5489_s9  ;;  %v2354_v40 = vsel %vm2300_vm11, %v2245_v5, %v2246_v8  ;;  %9751 = vst [vmem:[#allocation97_spill] sm:$0xff] %v7139_v51  ;;  %v7143_v33 = vpack.c.b16 %v2960_v1, %v2959_v30  ;;  %v7145_v62 = vpack.c.b16 %v2962_v20, %v2961_v61  ;;  %v9758_v30 = vld [vmem:[#allocation28_spill] sm:$0xff]  ;;  %v9759_v61 = vld [vmem:[#allocation30_spill] sm:$0xff]  ;;  %vm3889_vm4 = vcmask 326656  }
 0x15c   : > { %3065 = vrot.lane.b32.xlu1 %v7123_v50, %s5489_s9  ;;  %v2252_v50 = vrot.slane %v9753_v42, 2  ;;  %v2389_v63 = vpack.c.bf16 %v2355_v52, %v2355_v52  ;;  %v2390_v5 = vpack.c.bf16 %v2354_v40, %v2354_v40  ;;  %9756 = vst [vmem:[#allocation98_spill] sm:$0xff] %v7147_v22  ;;  %v2391_v55 = vpack.c.bf16 %v2353_v59, %v2353_v59  ;;  %v9760_v22 = vld [vmem:[#allocation26_spill] sm:$0xff] }
 0x15d   : > { %9754 = vst [vmem:[#allocation22_spill] sm:$0xff] %v7143_v33  ;;  %v2392_v2 = vpack.c.bf16 %v2352_v24, %v2352_v24  ;;  %v2350_v8 = vsel %vm2300_vm11, %v2249_v15, %v2250_v54  ;;  %v2351_v28 = vsel %vm2300_vm11, %v2248_v57, %v2249_v15  ;;  %v7157_v37 = vpack.c.b16 %v2964_v14, %v2963_v21  ;;  %v9761_v14 = vld [vmem:[#allocation29_spill] sm:$0xff] }
 0x15e   : > { %9755 = vst [vmem:[#allocation23_spill] sm:$0xff] %v7145_v62  ;;  %v2393_v16 = vpack.c.bf16 %v2351_v28, %v2351_v28  ;;  %v2394_v40 = vpack.c.bf16 %v2350_v8, %v2350_v8  ;;  %v2253_v1 = vrot.slane %v9758_v30, 2  ;;  %v2254_v20 = vrot.slane %v9759_v61, 2 }
 0x15f   : > { %9757 = vst [vmem:[#allocation99_spill] sm:$0xff] %v7157_v37  ;;  %v2965_v52 = vunpack.c.l.b16 %v2389_v63  ;;  %v2966_v24 = vunpack.c.l.b16 %v2390_v5  ;;  %v2967_v15 = vunpack.c.l.b16 %v2391_v55  ;;  %v2968_v57 = vunpack.c.l.b16 %v2392_v2 }
 0x160   : > { %v2348_v59 = vsel %vm2300_vm11, %v2251_v36, %v2252_v50  ;;  %v2256_v51 = vrot.slane %v9760_v22, 2  ;;  %v2255_v21 = vrot.slane %v9761_v14, 2  ;;  %v2349_v8 = vsel %vm2300_vm11, %v2250_v54, %v2251_v36  ;;  %v7175_v2 = vpop.permute.xlu1 %2819  ;;  %v9766_v14 = vld [vmem:[#allocation25_spill] sm:$0xff] }
 0x161   : > { %3069 = vrot.lane.b32.xlu0 %v7145_v62, %s5489_s9  ;;  %v2969_v28 = vunpack.c.l.b16 %v2393_v16  ;;  %v2970_v62 = vunpack.c.l.b16 %v2394_v40  ;;  %v7171_v63 = vpack.c.b16 %v2966_v24, %v2965_v52  ;;  %v2395_v5 = vpack.c.bf16 %v2349_v8, %v2349_v8  ;;  %9764 = vst [vmem:[#allocation101_spill] sm:$0xff] %v7175_v2  ;;  %v9768_v24 = vld [vmem:[#allocation31_spill] sm:$0xff] }
 0x162   : > { %v2346_v55 = vsel %vm2300_vm11, %v2253_v1, %v2254_v20  ;;  %v7177_v61 = vpack.c.b16 %v2968_v57, %v2967_v15  ;;  %v2347_v22 = vsel %vm2300_vm11, %v2252_v50, %v2253_v1  ;;  %v2257_v54 = vrot.slane %v9766_v14, 2  ;;  %v7184_v36 = vpop.permute.xlu2 %2833 }
 0x163   : > { %3067 = vrot.lane.b32.xlu2 %v7143_v33, %s5489_s9  ;;  %v7169_v33 = vpop.permute.xlu0 %2817  ;;  %9763 = vst [vmem:[#allocation100_spill] sm:$0xff] %v7171_v63  ;;  %v2397_v16 = vpack.c.bf16 %v2347_v22, %v2347_v22  ;;  %v2398_v40 = vpack.c.bf16 %v2346_v55, %v2346_v55  ;;  %v2344_v52 = vsel %vm2300_vm11, %v2255_v21, %v2256_v51  ;;  %v2971_v57 = vunpack.c.l.b16 %v2395_v5  ;;  %v9771_v55 = vld [vmem:[#allocation38_spill] sm:$0xff] }
 0x164   : > { %3071 = vrot.lane.b32.xlu1 %v7157_v37, %s5489_s9  ;;  %9762 = vst [vmem:[#allocation28_spill] sm:$0xff] %v7169_v33  ;;  %v2396_v37 = vpack.c.bf16 %v2348_v59, %v2348_v59  ;;  %v2258_v59 = vrot.slane %v9768_v24, 2  ;;  %v7191_v15 = vpack.c.b16 %v2970_v62, %v2969_v28  ;;  %v2345_v50 = vsel %vm2300_vm11, %v2254_v20, %v2255_v21  ;;  %v9772_v21 = vld [vmem:[#allocation37_spill] sm:$0xff] }
 0x165   : > { %9765 = vst [vmem:[#allocation102_spill] sm:$0xff] %v7177_v61  ;;  %v2400_v1 = vpack.c.bf16 %v2344_v52, %v2344_v52  ;;  %v2399_v2 = vpack.c.bf16 %v2345_v50, %v2345_v50  ;;  %v2260_v33 = vrot.slane %v9771_v55, 2  ;;  %v2974_v24 = vunpack.c.l.b16 %v2398_v40 }
 0x166   : > { %9767 = vst [vmem:[#allocation25_spill] sm:$0xff] %v7184_v36  ;;  %v2972_v8 = vunpack.c.l.b16 %v2396_v37  ;;  %v9770_v36 = vld [vmem:[#allocation33_spill] sm:$0xff]  ;;  %v2342_v20 = vsel %vm2300_vm11, %v2257_v54, %v2258_v59  ;;  %v2343_v37 = vsel %vm2300_vm11, %v2256_v51, %v2257_v54  ;;  %v2261_v5 = vrot.slane %v9772_v21, 2 }
 0x167   : > { %9769 = vst [vmem:[#allocation103_spill] sm:$0xff] %v7191_v15  ;;  %v2259_v22 = vrot.slane %v9770_v36, 2  ;;  %v2975_v62 = vunpack.c.l.b16 %v2399_v2  ;;  %v2976_v28 = vunpack.c.l.b16 %v2400_v1  ;;  %v2401_v50 = vpack.c.bf16 %v2343_v37, %v2343_v37 }
 0x168   : > { %v7205_v52 = vpack.c.b16 %v2972_v8, %v2971_v57  ;;  %v2402_v55 = vpack.c.bf16 %v2342_v20, %v2342_v20  ;;  %v7217_v51 = vpop.permute.xlu1 %2825  ;;  %v2263_v54 = vrot.slane %v6435_v29, 2 }
 0x169   : > { %3075 = vrot.lane.b32.xlu0 %v7177_v61, %s5489_s9  ;;  %v2262_v61 = vrot.slane %v6440_v25, 2  ;;  %v2341_v2 = vsel %vm2300_vm11, %v2258_v59, %v2259_v22  ;;  %9776 = vst [vmem:[#allocation106_spill] sm:$0xff] %v7217_v51  ;;  %v2977_v1 = vunpack.c.l.b16 %v2401_v50  ;;  %v2264_v59 = vrot.slane %v6588_v53, 2  ;;  %v9779_v50 = vld [vmem:[#allocation46_spill] sm:$0xff] }
 0x16a   : > { %9773 = vst [vmem:[#allocation37_spill] sm:$0xff] %v7205_v52  ;;  %v2978_v57 = vunpack.c.l.b16 %v2402_v55  ;;  %v7224_v8 = vpop.permute.xlu2 %2839  ;;  %v2339_v51 = vsel %vm2300_vm11, %v2260_v33, %v2261_v5  ;;  %v2265_v55 = vrot.slane %v9779_v50, 2 }
 0x16b   : > { %3073 = vrot.lane.b32.xlu2 %v7171_v63, %s5489_s9  ;;  %v2973_v63 = vunpack.c.l.b16 %v2397_v16  ;;  %v2340_v16 = vsel %vm2300_vm11, %v2259_v22, %v2260_v33  ;;  %v7211_v40 = vpop.permute.xlu0 %2823  ;;  %9778 = vst [vmem:[#allocation108_spill] sm:$0xff] %v7224_v8  ;;  %v2338_v37 = vsel %vm2300_vm11, %v2261_v5, %v2262_v61  ;;  %v9783_v33 = vld [vmem:[#allocation39_spill] sm:$0xff] }
 0x16c   : > { %3077 = vrot.lane.b32.xlu1 %v7191_v15, %s5489_s9  ;;  %9775 = vst [vmem:[#allocation105_spill] sm:$0xff] %v7211_v40  ;;  %v2404_v20 = vpack.c.bf16 %v2340_v16, %v2340_v16  ;;  %v9780_v40 = vld [vmem:[#allocation48_spill] sm:$0xff]  ;;  %v2268_v5 = vrot.slane %v9783_v33, 2 }
 0x16d   : > { %v7207_v36 = vpack.c.b16 %v2974_v24, %v2973_v63  ;;  %v7222_v63 = vpack.c.b16 %v2976_v28, %v2975_v62  ;;  %v2403_v24 = vpack.c.bf16 %v2341_v2, %v2341_v2  ;;  %v2406_v62 = vpack.c.bf16 %v2338_v37, %v2338_v37 }
 0x16e   : > { %v2980_v28 = vunpack.c.l.b16 %v2404_v20  ;;  %v2405_v2 = vpack.c.bf16 %v2339_v51, %v2339_v51  ;;  %v2266_v8 = vrot.slane %v9780_v40, 2  ;;  %v9784_v20 = vld [vmem:[#allocation49_spill] sm:$0xff] }
 0x16f   : > { %9774 = vst [vmem:[#allocation104_spill] sm:$0xff] %v7207_v36  ;;  %v2979_v22 = vunpack.c.l.b16 %v2403_v24  ;;  %v2982_v16 = vunpack.c.l.b16 %v2406_v62  ;;  %v2337_v24 = vsel %vm2300_vm11, %v2262_v61, %v2263_v54  ;;  %v2267_v51 = vrot.slane %v9784_v20, 2 }
 0x170   : > { %9777 = vst [vmem:[#allocation107_spill] sm:$0xff] %v7222_v63  ;;  %v2407_v37 = vpack.c.bf16 %v2337_v24, %v2337_v24  ;;  %v9788_v24 = vld [vmem:[#allocation36_spill] sm:$0xff] }
 0x171   : > { %3081 = vrot.lane.b32.xlu0 %v7207_v36, %s5489_s9  ;;  %v7235_v36 = vpack.c.b16 %v2978_v57, %v2977_v1  ;;  %v7237_v15 = vpack.c.b16 %v2980_v28, %v2979_v22  ;;  %v2334_v57 = vsel %vm2300_vm11, %v2265_v55, %v2266_v8  ;;  %v2335_v28 = vsel %vm2300_vm11, %v2264_v59, %v2265_v55 }
 0x172   : > { %v2983_v61 = vunpack.c.l.b16 %v2407_v37  ;;  %v2333_v37 = vsel %vm2300_vm11, %v2266_v8, %v2267_v51 }
 0x173   : > { %3079 = vrot.lane.b32.xlu2 %v7205_v52, %s5489_s9  ;;  %9781 = vst [vmem:[#allocation46_spill] sm:$0xff] %v7235_v36  ;;  %v2981_v52 = vunpack.c.l.b16 %v2405_v2  ;;  %v7253_v22 = vpop.permute.xlu0 %2829  ;;  %v7257_v2 = vpop.permute.xlu1 %2831  ;;  %v2411_v55 = vpack.c.bf16 %v2333_v37, %v2333_v37 }
 0x174   : > { %3083 = vrot.lane.b32.xlu1 %v7222_v63, %s5489_s9  ;;  %9782 = vst [vmem:[#allocation109_spill] sm:$0xff] %v7237_v15  ;;  %v2336_v63 = vsel %vm2300_vm11, %v2263_v54, %v2264_v59 }
 0x175   : > { %v2408_v62 = vpack.c.bf16 %v2336_v63, %v2336_v63  ;;  %v7249_v1 = vpack.c.b16 %v2982_v16, %v2981_v52  ;;  %9786 = vst [vmem:[#allocation111_spill] sm:$0xff] %v7253_v22  ;;  %v2409_v63 = vpack.c.bf16 %v2335_v28, %v2335_v28  ;;  %v7262_v52 = vpop.permute.xlu2 %2845  ;;  %v2410_v16 = vpack.c.bf16 %v2334_v57, %v2334_v57 }
 0x176   : > { %9787 = vst [vmem:[#allocation112_spill] sm:$0xff] %v7257_v2  ;;  %v2271_v28 = vrot.slane %v6638_v7, 2 }
 0x177   : > { %9785 = vst [vmem:[#allocation110_spill] sm:$0xff] %v7249_v1  ;;  %v2984_v54 = vunpack.c.l.b16 %v2408_v62  ;;  %v9790_v62 = vld [vmem:[#allocation50_spill] sm:$0xff]  ;;  %v2985_v59 = vunpack.c.l.b16 %v2409_v63 }
 0x178   : > { %9789 = vst [vmem:[#allocation113_spill] sm:$0xff] %v7262_v52  ;;  %v2270_v22 = vrot.slane %v9790_v62, 2  ;;  %v2987_v52 = vunpack.c.l.b16 %v2411_v55  ;;  %v9796_v63 = vld [vmem:[#allocation54_spill] sm:$0xff] }
 0x179   : > { %3087 = vrot.lane.b32.xlu0 %v7237_v15, %s5489_s9  ;;  %v2269_v15 = vrot.slane %v9788_v24, 2  ;;  %v7269_v33 = vpack.c.b16 %v2984_v54, %v2983_v61  ;;  %v9792_v24 = vld [vmem:[#allocation55_spill] sm:$0xff]  ;;  %v9795_v61 = vld [vmem:[#allocation41_spill] sm:$0xff] }
 0x17a   : > { %v2272_v20 = vrot.slane %v9792_v24, 2  ;;  %v2274_v54 = vrot.slane %v9795_v61, 2 }
 0x17b   : > { %3085 = vrot.lane.b32.xlu2 %v7235_v36, %s5489_s9  ;;  %v2332_v36 = vsel %vm2300_vm11, %v2267_v51, %v2268_v5  ;;  %9791 = vst [vmem:[#allocation50_spill] sm:$0xff] %v7269_v33  ;;  %v2330_v51 = vsel %vm2300_vm11, %v2269_v15, %v2270_v22  ;;  %v7295_v55 = vpop.permute.xlu1 %2837 }
 0x17c   : > { %3089 = vrot.lane.b32.xlu1 %v7249_v1, %s5489_s9  ;;  %v2412_v2 = vpack.c.bf16 %v2332_v36, %v2332_v36  ;;  %v2986_v1 = vunpack.c.l.b16 %v2410_v16  ;;  %v2331_v36 = vsel %vm2300_vm11, %v2268_v5, %v2269_v15  ;;  %v2273_v16 = vrot.slane %v9796_v63, 2  ;;  %9798 = vst [vmem:[#allocation115_spill] sm:$0xff] %v7295_v55 }
 0x17d   : > { %v2414_v37 = vpack.c.bf16 %v2330_v51, %v2330_v51  ;;  %v2276_v51 = vrot.slane %v6812_v19, 2 }
 0x17e   : > { %v2988_v57 = vunpack.c.l.b16 %v2412_v2  ;;  %v7275_v40 = vpack.c.b16 %v2986_v1, %v2985_v59  ;;  %v2413_v2 = vpack.c.bf16 %v2331_v36, %v2331_v36  ;;  %v2328_v1 = vsel %vm2300_vm11, %v2271_v28, %v2272_v20  ;;  %v7293_v59 = vpop.permute.xlu0 %2835 }
 0x17f   : > { %9797 = vst [vmem:[#allocation54_spill] sm:$0xff] %v7293_v59  ;;  %v2990_v5 = vunpack.c.l.b16 %v2414_v37  ;;  %v2416_v36 = vpack.c.bf16 %v2328_v1, %v2328_v1  ;;  %v2326_v61 = vsel %vm2300_vm11, %v2273_v16, %v2274_v54  ;;  %v9801_v1 = vld [vmem:[#allocation61_spill] sm:$0xff] }
 0x180   : > { %9793 = vst [vmem:[#allocation55_spill] sm:$0xff] %v7275_v40  ;;  %v7277_v8 = vpack.c.b16 %v2988_v57, %v2987_v52  ;;  %v2329_v52 = vsel %vm2300_vm11, %v2270_v22, %v2271_v28  ;;  %v2989_v15 = vunpack.c.l.b16 %v2413_v2  ;;  %v2275_v57 = vrot.slane %v6583_v4, 2  ;;  %v9802_v59 = vld [vmem:[#allocation65_spill] sm:$0xff] }
 0x181   : > { %3093 = vrot.lane.b32.xlu0 %v7275_v40, %s5489_s9  ;;  %v2415_v40 = vpack.c.bf16 %v2329_v52, %v2329_v52  ;;  %v2327_v22 = vsel %vm2300_vm11, %v2272_v20, %v2273_v16  ;;  %v2992_v2 = vunpack.c.l.b16 %v2416_v36  ;;  %v2418_v52 = vpack.c.bf16 %v2326_v61, %v2326_v61 }
 0x182   : > { %9794 = vst [vmem:[#allocation114_spill] sm:$0xff] %v7277_v8  ;;  %v2417_v37 = vpack.c.bf16 %v2327_v22, %v2327_v22  ;;  %v2277_v55 = vrot.slane %v9801_v1, 2  ;;  %v2324_v4 = vsel %vm2300_vm11, %v2275_v57, %v2276_v51  ;;  %v2280_v20 = vrot.slane %v6599_v12, 2 }
 0x183   : > { %3091 = vrot.lane.b32.xlu2 %v7269_v33, %s5489_s9  ;;  %v7299_v33 = vpack.c.b16 %v2990_v5, %v2989_v15  ;;  %v2991_v28 = vunpack.c.l.b16 %v2415_v40  ;;  %v2278_v15 = vrot.slane %v9802_v59, 2  ;;  %v2994_v19 = vunpack.c.l.b16 %v2418_v52  ;;  %v9804_v40 = vld [vmem:[#allocation64_spill] sm:$0xff]  ;;  %v7331_v12 = vpop.permute.xlu1 %2843 }
 0x184   : > { %3095 = vrot.lane.b32.xlu1 %v7277_v8, %s5489_s9  ;;  %v7301_v8 = vpop.permute.xlu2 %2851  ;;  %v2279_v16 = vrot.slane %v9804_v40, 2  ;;  %v2325_v61 = vsel %vm2300_vm11, %v2274_v54, %v2275_v57  ;;  %v2420_v36 = vpack.c.bf16 %v2324_v4, %v2324_v4  ;;  %9807 = vst [vmem:[#allocation118_spill] sm:$0xff] %v7331_v12  ;;  %v2281_v4 = vrot.slane %v6594_v23, 2 }
 0x185   : > { %9799 = vst [vmem:[#allocation116_spill] sm:$0xff] %v7299_v33  ;;  %v7311_v5 = vpack.c.b16 %v2992_v2, %v2991_v28  ;;  %v2419_v28 = vpack.c.bf16 %v2325_v61, %v2325_v61  ;;  %v2282_v57 = vrot.slane %v6854_v17, 2 }
 0x186   : > { %9800 = vst [vmem:[#allocation117_spill] sm:$0xff] %v7301_v8  ;;  %v2993_v8 = vunpack.c.l.b16 %v2417_v37  ;;  %v2996_v2 = vunpack.c.l.b16 %v2420_v36  ;;  %v2322_v37 = vsel %vm2300_vm11, %v2277_v55, %v2278_v15  ;;  %v7325_v52 = vpop.permute.xlu0 %2841  ;;  %v2320_v54 = vsel %vm2300_vm11, %v2279_v16, %v2280_v20 }
 0x187   : > { %9803 = vst [vmem:[#allocation61_spill] sm:$0xff] %v7311_v5 }
 0x188   : > { %v7321_v22 = vpack.c.b16 %v2994_v19, %v2993_v8  ;;  %9806 = vst [vmem:[#allocation64_spill] sm:$0xff] %v7325_v52  ;;  %v2422_v8 = vpack.c.bf16 %v2322_v37, %v2322_v37  ;;  %v2424_v52 = vpack.c.bf16 %v2320_v54, %v2320_v54 }
 0x189   : > { %3099 = vrot.lane.b32.xlu0 %v7311_v5, %s5489_s9  ;;  %v2323_v5 = vsel %vm2300_vm11, %v2276_v51, %v2277_v55 }
 0x18a   : > { %9805 = vst [vmem:[#allocation65_spill] sm:$0xff] %v7321_v22  ;;  %v2421_v19 = vpack.c.bf16 %v2323_v5, %v2323_v5  ;;  %v2998_v51 = vunpack.c.l.b16 %v2422_v8  ;;  %v9810_v5 = vld [vmem:[#allocation68_spill] sm:$0xff]  ;;  %v3000_v23 = vunpack.c.l.b16 %v2424_v52 }
 0x18b   : > { %3097 = vrot.lane.b32.xlu2 %v7299_v33, %s5489_s9  ;;  %v2995_v33 = vunpack.c.l.b16 %v2419_v28  ;;  %v2321_v28 = vsel %vm2300_vm11, %v2278_v15, %v2279_v16  ;;  %v2284_v37 = vrot.slane %v9810_v5, 2  ;;  %v2318_v15 = vsel %vm2300_vm11, %v2281_v4, %v2282_v57 }
 0x18c   : > { %3101 = vrot.lane.b32.xlu1 %v7321_v22, %s5489_s9  ;;  %v7339_v36 = vpop.permute.xlu2 %2857  ;;  %v2997_v55 = vunpack.c.l.b16 %v2421_v19  ;;  %v2423_v12 = vpack.c.bf16 %v2321_v28, %v2321_v28  ;;  %v2283_v22 = vrot.slane %v6851_v56, 2  ;;  %v2319_v16 = vsel %vm2300_vm11, %v2280_v20, %v2281_v4  ;;  %v9812_v19 = vld [vmem:[#allocation67_spill] sm:$0xff] }
 0x18d   : > { %v7337_v61 = vpack.c.b16 %v2996_v2, %v2995_v33  ;;  %9809 = vst [vmem:[#allocation120_spill] sm:$0xff] %v7339_v36  ;;  %v2286_v2 = vrot.slane %v6715_v9, 2  ;;  %v2285_v8 = vrot.slane %v9812_v19, 2  ;;  %v2425_v28 = vpack.c.bf16 %v2319_v16, %v2319_v16 }
 0x18e   : > { %v7347_v17 = vpack.c.b16 %v2998_v51, %v2997_v55  ;;  %v2999_v33 = vunpack.c.l.b16 %v2423_v12  ;;  %v2426_v52 = vpack.c.bf16 %v2318_v15, %v2318_v15  ;;  %v2316_v12 = vsel %vm2300_vm11, %v2283_v22, %v2284_v37  ;;  %v7365_v4 = vpop.permute.xlu0 %2847 }
 0x18f   : > { %9808 = vst [vmem:[#allocation119_spill] sm:$0xff] %v7337_v61  ;;  %v3001_v55 = vunpack.c.l.b16 %v2425_v28  ;;  %v2317_v20 = vsel %vm2300_vm11, %v2282_v57, %v2283_v22  ;;  %v2428_v15 = vpack.c.bf16 %v2316_v12, %v2316_v12  ;;  %v2314_v16 = vsel %vm2300_vm11, %v2285_v8, %v2286_v2 }
 0x190   : > { %9811 = vst [vmem:[#allocation68_spill] sm:$0xff] %v7347_v17  ;;  %v7357_v54 = vpack.c.b16 %v3000_v23, %v2999_v33  ;;  %v3002_v51 = vunpack.c.l.b16 %v2426_v52  ;;  %v2427_v36 = vpack.c.bf16 %v2317_v20, %v2317_v20  ;;  %v2287_v23 = vrot.slane %v6702_v45, 2 }
 0x191   : > { %3105 = vrot.lane.b32.xlu0 %v7347_v17, %s5489_s9  ;;  %9814 = vst [vmem:[#allocation121_spill] sm:$0xff] %v7365_v4  ;;  %v2315_v22 = vsel %vm2300_vm11, %v2284_v37, %v2285_v8  ;;  %v2430_v57 = vpack.c.bf16 %v2314_v16, %v2314_v16  ;;  %v3004_v20 = vunpack.c.l.b16 %v2428_v15  ;;  %v2290_v12 = vrot.slane %v6947_v18, 2 }
 0x192   : > { %9813 = vst [vmem:[#allocation67_spill] sm:$0xff] %v7357_v54  ;;  %v7370_v33 = vpack.c.b16 %v3002_v51, %v3001_v55  ;;  %v3003_v52 = vunpack.c.l.b16 %v2427_v36  ;;  %v2289_v55 = vrot.slane %v6916_v46, 2  ;;  %v2313_v37 = vsel %vm2300_vm11, %v2286_v2, %v2287_v23 }
 0x193   : > { %3103 = vrot.lane.b32.xlu2 %v7337_v61, %s5489_s9  ;;  %v7367_v61 = vpop.permute.xlu1 %2849  ;;  %v3006_v51 = vunpack.c.l.b16 %v2430_v57  ;;  %v2291_v8 = vrot.slane %v6942_v0, 2  ;;  %v2431_v16 = vpack.c.bf16 %v2313_v37, %v2313_v37 }
 0x194   : > { %3107 = vrot.lane.b32.xlu1 %v7357_v54, %s5489_s9  ;;  %9815 = vst [vmem:[#allocation122_spill] sm:$0xff] %v7367_v61  ;;  %v2288_v54 = vrot.slane %v6921_v48, 2  ;;  %v2429_v61 = vpack.c.bf16 %v2315_v22, %v2315_v22  ;;  %v7383_v4 = vpack.c.b16 %v3004_v20, %v3003_v52  ;;  %v9821_v20 = vld [vmem:[#allocation57_spill] sm:$0xff] }
 0x195   : > { %9816 = vst [vmem:[#allocation123_spill] sm:$0xff] %v7370_v33  ;;  %v3007_v52 = vunpack.c.l.b16 %v2431_v16  ;;  %v2309_v16 = vsel %vm2300_vm11, %v2290_v12, %v2291_v8 }
 0x196   : > { %9818 = vst [vmem:[#allocation125_spill] sm:$0xff] %v7383_v4  ;;  %v3005_v17 = vunpack.c.l.b16 %v2429_v61  ;;  %v2312_v36 = vsel %vm2300_vm11, %v2287_v23, %v2288_v54  ;;  %v2310_v61 = vsel %vm2300_vm11, %v2289_v55, %v2290_v12  ;;  %v2311_v2 = vsel %vm2300_vm11, %v2288_v54, %v2289_v55 }
 0x197   : > { %v2432_v22 = vpack.c.bf16 %v2312_v36, %v2312_v36  ;;  %v2434_v37 = vpack.c.bf16 %v2310_v61, %v2310_v61 }
 0x198   : > { %v7393_v15 = vpack.c.b16 %v3006_v51, %v3005_v17  ;;  %v2433_v17 = vpack.c.bf16 %v2311_v2, %v2311_v2 }
 0x199   : > { %3111 = vrot.lane.b32.xlu0 %v7383_v4, %s5489_s9  ;;  %v3008_v57 = vunpack.c.l.b16 %v2432_v22  ;;  %v9825_v22 = vld [vmem:[#allocation81_spill] sm:$0xff]  ;;  %v3010_v2 = vunpack.c.l.b16 %v2434_v37 }
 0x19a   : > { %9819 = vst [vmem:[#allocation126_spill] sm:$0xff] %v7393_v15  ;;  %v2294_v54 = vrot.slane %v9825_v22, 2  ;;  %v3009_v55 = vunpack.c.l.b16 %v2433_v17 }
 0x19b   : > { %3109 = vrot.lane.b32.xlu2 %v7370_v33, %s5489_s9  ;;  %v2293_v33 = vrot.slane %v9821_v20, 2  ;;  %v7408_v36 = vpack.c.b16 %v3008_v57, %v3007_v52  ;;  %v9827_v52 = vld [vmem:[#allocation79_spill] sm:$0xff] }
 0x19c   : > { %3113 = vrot.lane.b32.xlu1 %v7393_v15, %s5489_s9  ;;  %v2296_v57 = vrot.slane %v9827_v52, 2  ;;  %v7419_v0 = vpack.c.b16 %v3010_v2, %v3009_v55 }
 0x19d   : > { %v7375_v28 = vpop.permute.xlu2 %2863  ;;  %9824 = vst [vmem:[#allocation130_spill] sm:$0xff] %v7408_v36  ;;  %v2306_v12 = vsel %vm2300_vm11, %v2293_v33, %v2294_v54 }
 0x19e   : > { %9817 = vst [vmem:[#allocation124_spill] sm:$0xff] %v7375_v28  ;;  %v2292_v28 = vrot.slane %v6767_v38, 2 }
 0x19f   : > { %v7401_v23 = vpop.permute.xlu0 %2853  ;;  %9828 = vst [vmem:[#allocation81_spill] sm:$0xff] %v7419_v0 }
 0x1a0   : > { %9820 = vst [vmem:[#allocation127_spill] sm:$0xff] %v7401_v23  ;;  %v2308_v15 = vsel %vm2300_vm11, %v2291_v8, %v2292_v28  ;;  %v2435_v23 = vpack.c.bf16 %v2309_v16, %v2309_v16  ;;  %v2307_v8 = vsel %vm2300_vm11, %v2292_v28, %v2293_v33  ;;  %v2438_v16 = vpack.c.bf16 %v2306_v12, %v2306_v12  ;;  %v9833_v28 = vld [vmem:[#allocation73_spill] sm:$0xff] }
 0x1a1   : > { %v7406_v51 = vpop.permute.xlu1 %2855  ;;  %v2436_v38 = vpack.c.bf16 %v2308_v15, %v2308_v15  ;;  %v9830_v15 = vld [vmem:[#allocation75_spill] sm:$0xff]  ;;  %3117 = vrot.lane.b32.xlu0 %v7419_v0, %s5489_s9  ;;  %v2437_v37 = vpack.c.bf16 %v2307_v8, %v2307_v8 }
 0x1a2   : > { %9823 = vst [vmem:[#allocation129_spill] sm:$0xff] %v7406_v51  ;;  %v3011_v61 = vunpack.c.l.b16 %v2435_v23  ;;  %v2297_v17 = vrot.slane %v9830_v15, 2  ;;  %v3014_v2 = vunpack.c.l.b16 %v2438_v16  ;;  %v1942_v16 = vpack.c.bf16 %v6131_v44, %v6131_v44 }
 0x1a3   : > { %3115 = vrot.lane.b32.xlu2 %v7408_v36, %s5489_s9  ;;  %v3012_v20 = vunpack.c.l.b16 %v2436_v38  ;;  %v3013_v55 = vunpack.c.l.b16 %v2437_v37 }
 0x1a5   : > { %v7404_v4 = vpop.permute.xlu2 %2869  ;;  %v7421_v18 = vpack.c.b16 %v3012_v20, %v3011_v61  ;;  %v2298_v20 = vrot.slane %v9833_v28, 2  ;;  %v7444_v15 = vpack.c.b16 %v3014_v2, %v3013_v55 }
 0x1a6   : > { %9822 = vst [vmem:[#allocation128_spill] sm:$0xff] %v7404_v4  ;;  %v9826_v4 = vld [vmem:[#allocation80_spill] sm:$0xff] }
 0x1a7   : > { %v2295_v51 = vrot.slane %v9826_v4, 2  ;;  %9829 = vst [vmem:[#allocation80_spill] sm:$0xff] %v7421_v18  ;;  %v7430_v36 = vpop.permute.xlu0 %2859  ;;  %3119 = vrot.lane.b32.xlu1 %v7421_v18, %s5489_s9  ;;  %v2303_v18 = vsel %vm2300_vm11, %v2296_v57, %v2297_v17 }
 0x1a8   : > { %9831 = vst [vmem:[#allocation131_spill] sm:$0xff] %v7430_v36  ;;  %v9835_v36 = vld [vmem:[#allocation63_spill] sm:$0xff] }
 0x1a9   : > { %v2304_v23 = vsel %vm2300_vm11, %v2295_v51, %v2296_v57  ;;  %v2305_v33 = vsel %vm2300_vm11, %v2294_v54, %v2295_v51  ;;  %v7441_v61 = vpop.permute.xlu1 %2861  ;;  %v2299_v0 = vrot.slane %v9835_v36, 2  ;;  %v2441_v54 = vpack.c.bf16 %v2303_v18, %v2303_v18 }
 0x1aa   : > { %9834 = vst [vmem:[#allocation73_spill] sm:$0xff] %v7441_v61  ;;  %v2439_v12 = vpack.c.bf16 %v2305_v33, %v2305_v33  ;;  %v2440_v8 = vpack.c.bf16 %v2304_v23, %v2304_v23  ;;  %v1941_v23 = vpack.c.bf16 %v6120_v41, %v6120_v41  ;;  %v9837_v18 = vrot.slane %v6082_v31, 2  ;;  %v9946_v61 = vld [vmem:[#allocation35_spill] sm:$0xff] }
 0x1ab   : > { %3121 = vrot.lane.b32.xlu2 %v7444_v15, %s5489_s9  ;;  %v3017_v55 = vunpack.c.l.b16 %v2441_v54  ;;  %v2301_v57 = vsel %vm2300_vm11, %v2298_v20, %v2299_v0  ;;  %v1944_v41 = vpack.c.bf16 %v6158_v35, %v6158_v35  ;;  %v1945_v35 = vpack.c.bf16 %v6139_v60, %v6139_v60 }
 0x1ac   : > { %v3015_v52 = vunpack.c.l.b16 %v2439_v12  ;;  %v3016_v51 = vunpack.c.l.b16 %v2440_v8  ;;  %v2521_v54 = vunpack.c.l.b16 %v1941_v23  ;;  %v1948_v23 = vpack.c.bf16 %v6165_v47, %v6165_v47 }
 0x1ad   : > { %v7434_v38 = vpop.permute.xlu2 %2875 }
 0x1ae   : > { %9832 = vst [vmem:[#allocation132_spill] sm:$0xff] %v7434_v38  ;;  %v2302_v38 = vsel %vm2300_vm11, %v2297_v17, %v2298_v20  ;;  %v7456_v33 = vpack.c.b16 %v3016_v51, %v3015_v52  ;;  %v2372_v17 = vsel %vm2300_vm11, %v2299_v0, %v9837_v18  ;;  %v1943_v52 = vpack.c.bf16 %v6153_v27, %v6153_v27 }
 0x1af   : > { %v2442_v37 = vpack.c.bf16 %v2302_v38, %v2302_v38  ;;  %v2443_v38 = vpack.c.bf16 %v2301_v57, %v2301_v57  ;;  %v2444_v20 = vpack.c.bf16 %v2372_v17, %v2372_v17  ;;  %v2522_v51 = vunpack.c.l.b16 %v1942_v16 }
 0x1b0   : > { %9836 = vst [vmem:[#allocation63_spill] sm:$0xff] %v7456_v33  ;;  %3123 = vrot.lane.b32.xlu0 %v7456_v33, %s5489_s9  ;;  %v2524_v57 = vunpack.c.l.b16 %v1944_v41  ;;  %v2523_v18 = vunpack.c.l.b16 %v1943_v52  ;;  %v1946_v27 = vpack.c.bf16 %v6128_v39, %v6128_v39  ;;  %v1947_v16 = vpack.c.bf16 %v6147_v13, %v6147_v13  ;;  %v10015_v33 = vld [vmem:[#allocation107_spill] sm:$0xff] }
 0x1b1   : > { %v3018_v2 = vunpack.c.l.b16 %v2442_v37  ;;  %v3019_v37 = vunpack.c.l.b16 %v2443_v38  ;;  %v3020_v43 = vunpack.c.l.b16 %v2444_v20  ;;  %v2525_v17 = vunpack.c.l.b16 %v1945_v35 }
 0x1b2   : > { %v7498_v39 = vpack.c.b16 %v2524_v57, %v2523_v18  ;;  %v2526_v38 = vunpack.c.l.b16 %v1946_v27  ;;  %v1949_v41 = vpack.c.bf16 %v6211_v6, %v6211_v6  ;;  %v1950_v13 = vpack.c.bf16 %v6208_v32, %v6208_v32 }
 0x1b3   : > { %v7472_v12 = vpack.c.b16 %v3018_v2, %v3017_v55  ;;  %v7474_v8 = vpop.permute.xlu0 %2865  ;;  %v7484_v55 = vpack.c.b16 %v3020_v43, %v3019_v37  ;;  %v7486_v2 = vpack.c.b16 %v2522_v51, %v2521_v54  ;;  %v2527_v52 = vunpack.c.l.b16 %v1947_v16 }
 0x1b4   : > { %9840 = vst [vmem:[#allocation135_spill] sm:$0xff] %v7474_v8  ;;  %v2528_v20 = vunpack.c.l.b16 %v1948_v23  ;;  %v1951_v54 = vpack.c.bf16 %v6218_v10, %v6218_v10  ;;  %v7512_v37 = vpack.c.b16 %v2526_v38, %v2525_v17  ;;  %v2529_v43 = vunpack.c.l.b16 %v1949_v41  ;;  %v9869_v8 = vld [vmem:[#allocation38_spill] sm:$0xff] }
 0x1b5   : > { %v7466_v44 = vpop.permute.xlu2 %3061  ;;  %9839 = vst [vmem:[#allocation134_spill] sm:$0xff] %v7472_v12  ;;  %3125 = vrot.lane.b32.xlu1 %v7472_v12, %s5489_s9  ;;  %3127 = vrot.lane.b32.xlu2 %v7484_v55, %s5489_s9  ;;  %v2530_v35 = vunpack.c.l.b16 %v1950_v13  ;;  %v1952_v6 = vpack.c.bf16 %v6228_v3, %v6228_v3  ;;  %v1953_v57 = vpack.c.bf16 %v6182_v58, %v6182_v58  ;;  %v9850_v13 = vld [vmem:[#allocation20_spill] sm:$0xff]  ;;  %v9962_v12 = vld [vmem:[#allocation59_spill] sm:$0xff]  ;;  %s8590_s9 = scalar_lea.vmem %s9313_s4, %s4898_s23 }
 0x1b6   : > { %9838 = vst [vmem:[#allocation133_spill] sm:$0xff] %v7466_v44  ;;  %v7478_v0 = vpop.permute.xlu1 %2867  ;;  %v7516_v32 = vpack.c.b16 %v2528_v20, %v2527_v52  ;;  %v1954_v18 = vpack.c.bf16 %v9742_v26, %v9742_v26  ;;  %v2531_v27 = vunpack.c.l.b16 %v1951_v54  ;;  %v1955_v23 = vpack.c.bf16 %v9743_v34, %v9743_v34  ;;  %v9852_v34 = vld [vmem:[#allocation19_spill] sm:$0xff] }
 0x1b7   : > { %9841 = vst [vmem:[#allocation136_spill] sm:$0xff] %v7478_v0  ;;  %v7528_v16 = vpack.c.b16 %v2530_v35, %v2529_v43  ;;  %v2532_v3 = vunpack.c.l.b16 %v1952_v6  ;;  %v1956_v58 = vpack.c.bf16 %v9745_v49, %v9745_v49  ;;  %v2533_v26 = vunpack.c.l.b16 %v1953_v57  ;;  %v9854_v6 = vld [vmem:[#allocation11_spill] sm:$0xff] }
 0x1b8   : > { %9842 = vst [vmem:[#allocation137_spill] sm:$0xff] %v7484_v55  ;;  %3129 = vrot.lane.b32.xlu0 %v7486_v2, %s5490_s10  ;;  %v2534_v38 = vunpack.c.l.b16 %v1954_v18  ;;  %v1957_v52 = vpack.c.bf16 %v9850_v13, %v9850_v13  ;;  %v2535_v54 = vunpack.c.l.b16 %v1955_v23  ;;  %v1958_v35 = vpack.c.bf16 %v9852_v34, %v9852_v34  ;;  %v9858_v34 = vld [vmem:[#allocation30_spill] sm:$0xff]  ;;  %v9947_v55 = vld [vmem:[#allocation40_spill] sm:$0xff] }
 0x1b9   : > { %9843 = vst [vmem:[#allocation138_spill] sm:$0xff] %v7486_v2  ;;  %v7542_v20 = vpack.c.b16 %v2532_v3, %v2531_v27  ;;  %v2536_v43 = vunpack.c.l.b16 %v1956_v58  ;;  %v1959_v57 = vpack.c.bf16 %v9854_v6, %v9854_v6  ;;  %v1960_v18 = vpack.c.bf16 %v9752_v11, %v9752_v11 }
 0x1ba   : > { %9845 = vst [vmem:[#allocation140_spill] sm:$0xff] %v7498_v39  ;;  %v7546_v49 = vpack.c.b16 %v2534_v38, %v2533_v26  ;;  %v2538_v23 = vunpack.c.l.b16 %v1958_v35  ;;  %v1961_v58 = vpack.c.bf16 %v9753_v42, %v9753_v42  ;;  %v1962_v26 = vpack.c.bf16 %v9758_v30, %v9758_v30  ;;  %v9860_v42 = vld [vmem:[#allocation29_spill] sm:$0xff] }
 0x1bb   : > { %v7504_v47 = vpop.permute.xlu0 %2871  ;;  %9848 = vst [vmem:[#allocation143_spill] sm:$0xff] %v7512_v37  ;;  %v7558_v3 = vpack.c.b16 %v2536_v43, %v2535_v54  ;;  %v2539_v11 = vunpack.c.l.b16 %v1959_v57  ;;  %v2540_v13 = vunpack.c.l.b16 %v1960_v18  ;;  %v1963_v54 = vpack.c.bf16 %v9858_v34, %v9858_v34 }
 0x1bc   : > { %9846 = vst [vmem:[#allocation141_spill] sm:$0xff] %v7504_v47  ;;  %v2541_v35 = vunpack.c.l.b16 %v1961_v58  ;;  %v2542_v6 = vunpack.c.l.b16 %v1962_v26  ;;  %v1964_v47 = vpack.c.bf16 %v9860_v42, %v9860_v42  ;;  %v1966_v18 = vpack.c.bf16 %v9766_v14, %v9766_v14  ;;  %v9865_v26 = vld [vmem:[#allocation31_spill] sm:$0xff] }
 0x1bd   : > { %v7496_v60 = vpop.permute.xlu2 %3067  ;;  %3131 = vrot.lane.b32.xlu1 %v7498_v39, %s5490_s10  ;;  %3133 = vrot.lane.b32.xlu2 %v7512_v37, %s5490_s10  ;;  %9851 = vst [vmem:[#allocation20_spill] sm:$0xff] %v7542_v20  ;;  %v7576_v30 = vpack.c.b16 %v2540_v13, %v2539_v11  ;;  %v2543_v0 = vunpack.c.l.b16 %v1963_v54  ;;  %v1967_v11 = vpack.c.bf16 %v9865_v26, %v9865_v26  ;;  %v9866_v13 = vld [vmem:[#allocation33_spill] sm:$0xff] }
 0x1be   : > { %9844 = vst [vmem:[#allocation139_spill] sm:$0xff] %v7496_v60  ;;  %v7508_v51 = vpop.permute.xlu1 %2873  ;;  %v2544_v58 = vunpack.c.l.b16 %v1964_v47  ;;  %v2546_v42 = vunpack.c.l.b16 %v1966_v18  ;;  %v1970_v26 = vpack.c.bf16 %v9772_v21, %v9772_v21  ;;  %v1972_v18 = vpack.c.bf16 %v6435_v29, %v6435_v29  ;;  %v9981_v39 = vld [vmem:[#allocation85_spill] sm:$0xff] }
 0x1bf   : > { %9847 = vst [vmem:[#allocation142_spill] sm:$0xff] %v7508_v51  ;;  %v2537_v51 = vunpack.c.l.b16 %v1957_v52  ;;  %v2547_v47 = vunpack.c.l.b16 %v1967_v11 }
 0x1c0   : > { %3135 = vrot.lane.b32.xlu0 %v7516_v32, %s5490_s10  ;;  %9853 = vst [vmem:[#allocation19_spill] sm:$0xff] %v7546_v49  ;;  %v2550_v21 = vunpack.c.l.b16 %v1970_v26 }
 0x1c1   : > { %v7572_v43 = vpack.c.b16 %v2538_v23, %v2537_v51  ;;  %9861 = vst [vmem:[#allocation29_spill] sm:$0xff] %v7576_v30  ;;  %v7588_v23 = vpack.c.b16 %v2542_v6, %v2541_v35  ;;  %v1969_v35 = vpack.c.bf16 %v9869_v8, %v9869_v8  ;;  %v7602_v6 = vpack.c.b16 %v2544_v58, %v2543_v0 }
 0x1c2   : > { %v1973_v58 = vpack.c.bf16 %v6588_v53, %v6588_v53  ;;  %v9876_v53 = vld [vmem:[#allocation49_spill] sm:$0xff] }
 0x1c3   : > { %v7534_v17 = vpop.permute.xlu0 %3057  ;;  %9859 = vst [vmem:[#allocation30_spill] sm:$0xff] %v7572_v43 }
 0x1c4   : > { %9864 = vst [vmem:[#allocation147_spill] sm:$0xff] %v7588_v23 }
 0x1c5   : > { %v7526_v10 = vpop.permute.xlu2 %3073  ;;  %3137 = vrot.lane.b32.xlu1 %v7528_v16, %s5490_s10  ;;  %3139 = vrot.lane.b32.xlu2 %v7542_v20, %s5490_s10 }
 0x1c6   : > { %9849 = vst [vmem:[#allocation144_spill] sm:$0xff] %v7526_v10  ;;  %v7538_v41 = vpop.permute.xlu1 %3059  ;;  %v9862_v10 = vld [vmem:[#allocation26_spill] sm:$0xff] }
 0x1c7   : > { %v1965_v57 = vpack.c.bf16 %v9862_v10, %v9862_v10  ;;  %v1968_v10 = vpack.c.bf16 %v9866_v13, %v9866_v13 }
 0x1c8   : > { %3141 = vrot.lane.b32.xlu0 %v7546_v49, %s5490_s10 }
 0x1c9   : > { %v2545_v14 = vunpack.c.l.b16 %v1965_v57  ;;  %v1971_v57 = vpack.c.bf16 %v6440_v25, %v6440_v25  ;;  %v1974_v25 = vpack.c.bf16 %v9779_v50, %v9779_v50 }
 0x1cb   : > { %v7564_v38 = vpop.permute.xlu0 %3063  ;;  %v7606_v13 = vpack.c.b16 %v2546_v42, %v2545_v14  ;;  %v2551_v29 = vunpack.c.l.b16 %v1971_v57  ;;  %v9875_v42 = vld [vmem:[#allocation48_spill] sm:$0xff]  ;;  %v2554_v26 = vunpack.c.l.b16 %v1974_v25  ;;  %v1979_v25 = vpack.c.bf16 %v9790_v62, %v9790_v62 }
 0x1cc   : > { %9856 = vst [vmem:[#allocation145_spill] sm:$0xff] %v7564_v38  ;;  %v1982_v62 = vpack.c.bf16 %v9796_v63, %v9796_v63  ;;  %v9979_v38 = vld [vmem:[#allocation83_spill] sm:$0xff] }
 0x1cd   : > { %v7556_v27 = vpop.permute.xlu2 %3079  ;;  %3143 = vrot.lane.b32.xlu1 %v7558_v3, %s5490_s10  ;;  %3145 = vrot.lane.b32.xlu2 %v7572_v43, %s5490_s10  ;;  %9870 = vst [vmem:[#allocation38_spill] sm:$0xff] %v7606_v13  ;;  %v10008_v43 = vld [vmem:[#allocation102_spill] sm:$0xff] }
 0x1ce   : > { %9855 = vst [vmem:[#allocation11_spill] sm:$0xff] %v7556_v27  ;;  %v7568_v52 = vpop.permute.xlu1 %3065  ;;  %v9950_v27 = vld [vmem:[#allocation43_spill] sm:$0xff] }
 0x1cf   : > { %9857 = vst [vmem:[#allocation146_spill] sm:$0xff] %v7568_v52  ;;  %v9952_v52 = vld [vmem:[#allocation47_spill] sm:$0xff] }
 0x1d0   : > { %3147 = vrot.lane.b32.xlu0 %v7576_v30, %s5490_s10 }
 0x1d3   : > { %v7594_v34 = vpop.permute.xlu0 %3069 }
 0x1d4   : > { %9867 = vst [vmem:[#allocation31_spill] sm:$0xff] %v7594_v34  ;;  %v9878_v34 = vld [vmem:[#allocation39_spill] sm:$0xff] }
 0x1d5   : > { %v7586_v51 = vpop.permute.xlu2 %3085  ;;  %3149 = vrot.lane.b32.xlu1 %v7588_v23, %s5490_s10  ;;  %3151 = vrot.lane.b32.xlu2 %v7602_v6, %s5490_s10  ;;  %v1977_v57 = vpack.c.bf16 %v9878_v34, %v9878_v34  ;;  %v1980_v34 = vpack.c.bf16 %v6638_v7, %v6638_v7 }
 0x1d6   : > { %9863 = vst [vmem:[#allocation26_spill] sm:$0xff] %v7586_v51  ;;  %v7598_v54 = vpop.permute.xlu1 %3071  ;;  %v2548_v51 = vunpack.c.l.b16 %v1968_v10  ;;  %v2552_v10 = vunpack.c.l.b16 %v1972_v18  ;;  %v9879_v18 = vld [vmem:[#allocation36_spill] sm:$0xff] }
 0x1d7   : > { %9868 = vst [vmem:[#allocation33_spill] sm:$0xff] %v7598_v54  ;;  %v2549_v54 = vunpack.c.l.b16 %v1969_v35  ;;  %v1978_v60 = vpack.c.bf16 %v9879_v18, %v9879_v18  ;;  %v9885_v18 = vld [vmem:[#allocation41_spill] sm:$0xff] }
 0x1d8   : > { %3153 = vrot.lane.b32.xlu0 %v7606_v13, %s5490_s10  ;;  %v7618_v0 = vpack.c.b16 %v2548_v51, %v2547_v47  ;;  %v1975_v51 = vpack.c.bf16 %v9875_v42, %v9875_v42  ;;  %v2553_v47 = vunpack.c.l.b16 %v1973_v58  ;;  %v7636_v50 = vpack.c.b16 %v2552_v10, %v2551_v29 }
 0x1d9   : > { %v7632_v35 = vpack.c.b16 %v2550_v21, %v2549_v54  ;;  %v2557_v10 = vunpack.c.l.b16 %v1977_v57  ;;  %v2558_v42 = vunpack.c.l.b16 %v1978_v60  ;;  %v1983_v60 = vpack.c.bf16 %v9885_v18, %v9885_v18  ;;  %v9886_v57 = vld [vmem:[#allocation42_spill] sm:$0xff] }
 0x1da   : > { %9872 = vst [vmem:[#allocation149_spill] sm:$0xff] %v7618_v0  ;;  %v2555_v23 = vunpack.c.l.b16 %v1975_v51  ;;  %v7648_v21 = vpack.c.b16 %v2554_v26, %v2553_v47  ;;  %v1981_v47 = vpack.c.bf16 %v9792_v24, %v9792_v24 }
 0x1db   : > { %v7624_v11 = vpop.permute.xlu0 %3075  ;;  %9877 = vst [vmem:[#allocation48_spill] sm:$0xff] %v7636_v50  ;;  %v7666_v7 = vpack.c.b16 %v2558_v42, %v2557_v10  ;;  %v2563_v10 = vunpack.c.l.b16 %v1983_v60 }
 0x1dc   : > { %9873 = vst [vmem:[#allocation150_spill] sm:$0xff] %v7624_v11  ;;  %v10013_v11 = vld [vmem:[#allocation104_spill] sm:$0xff] }
 0x1dd   : > { %v7616_v8 = vpop.permute.xlu2 %3091  ;;  %3155 = vrot.lane.b32.xlu1 %v7618_v0, %s5490_s10  ;;  %3157 = vrot.lane.b32.xlu2 %v7632_v35, %s5490_s10  ;;  %9884 = vst [vmem:[#allocation153_spill] sm:$0xff] %v7666_v7 }
 0x1de   : > { %9871 = vst [vmem:[#allocation148_spill] sm:$0xff] %v7616_v8  ;;  %v7628_v14 = vpop.permute.xlu1 %3077  ;;  %v1976_v8 = vpack.c.bf16 %v9876_v53, %v9876_v53  ;;  %v2560_v53 = vunpack.c.l.b16 %v1980_v34 }
 0x1df   : > { %9874 = vst [vmem:[#allocation151_spill] sm:$0xff] %v7628_v14 }
 0x1e0   : > { %3159 = vrot.lane.b32.xlu0 %v7636_v50, %s5490_s10  ;;  %v2556_v58 = vunpack.c.l.b16 %v1976_v8  ;;  %v2559_v8 = vunpack.c.l.b16 %v1979_v25  ;;  %v1986_v25 = vpack.c.bf16 %v9801_v1, %v9801_v1  ;;  %v1988_v1 = vpack.c.bf16 %v9804_v40, %v9804_v40  ;;  %v9991_v50 = vld [vmem:[#allocation7_spill] sm:$0xff] }
 0x1e2   : > { %v7662_v26 = vpack.c.b16 %v2556_v58, %v2555_v23  ;;  %v7676_v24 = vpack.c.b16 %v2560_v53, %v2559_v8  ;;  %v2562_v23 = vunpack.c.l.b16 %v1982_v62  ;;  %v9888_v58 = vld [vmem:[#allocation62_spill] sm:$0xff]  ;;  %v1987_v8 = vpack.c.bf16 %v9802_v59, %v9802_v59 }
 0x1e3   : > { %v7654_v29 = vpop.permute.xlu0 %3081  ;;  %v1985_v63 = vpack.c.bf16 %v9888_v58, %v9888_v58 }
 0x1e4   : > { %9881 = vst [vmem:[#allocation39_spill] sm:$0xff] %v7654_v29  ;;  %v1984_v29 = vpack.c.bf16 %v9886_v57, %v9886_v57  ;;  %v2566_v57 = vunpack.c.l.b16 %v1986_v25 }
 0x1e5   : > { %v7646_v54 = vpop.permute.xlu2 %3097  ;;  %3161 = vrot.lane.b32.xlu1 %v7648_v21, %s5490_s10  ;;  %9883 = vst [vmem:[#allocation152_spill] sm:$0xff] %v7662_v26  ;;  %3163 = vrot.lane.b32.xlu2 %v7662_v26, %s5490_s10  ;;  %v2565_v62 = vunpack.c.l.b16 %v1985_v63  ;;  %v1992_v63 = vpack.c.bf16 %v6851_v56, %v6851_v56 }
 0x1e6   : > { %9880 = vst [vmem:[#allocation49_spill] sm:$0xff] %v7646_v54  ;;  %v7658_v51 = vpop.permute.xlu1 %3083  ;;  %v2564_v42 = vunpack.c.l.b16 %v1984_v29  ;;  %v9893_v29 = vld [vmem:[#allocation45_spill] sm:$0xff] }
 0x1e7   : > { %9882 = vst [vmem:[#allocation36_spill] sm:$0xff] %v7658_v51  ;;  %v2561_v51 = vunpack.c.l.b16 %v1981_v47  ;;  %v1989_v60 = vpack.c.bf16 %v9893_v29, %v9893_v29  ;;  %v7706_v59 = vpack.c.b16 %v2566_v57, %v2565_v62  ;;  %v1994_v62 = vpack.c.bf16 %v9812_v19, %v9812_v19 }
 0x1e8   : > { %3165 = vrot.lane.b32.xlu0 %v7666_v7, %s5490_s10  ;;  %9887 = vst [vmem:[#allocation41_spill] sm:$0xff] %v7676_v24  ;;  %v7696_v58 = vpack.c.b16 %v2564_v42, %v2563_v10  ;;  %v2572_v29 = vunpack.c.l.b16 %v1992_v63  ;;  %v9956_v7 = vld [vmem:[#allocation52_spill] sm:$0xff] }
 0x1e9   : > { %v7692_v53 = vpack.c.b16 %v2562_v23, %v2561_v51  ;;  %9895 = vst [vmem:[#allocation45_spill] sm:$0xff] %v7706_v59  ;;  %v2568_v51 = vunpack.c.l.b16 %v1988_v1  ;;  %v9896_v23 = vld [vmem:[#allocation66_spill] sm:$0xff]  ;;  %v2569_v25 = vunpack.c.l.b16 %v1989_v60  ;;  %v1995_v60 = vpack.c.bf16 %v6715_v9, %v6715_v9 }
 0x1ea   : > { %9892 = vst [vmem:[#allocation155_spill] sm:$0xff] %v7696_v58  ;;  %v1991_v40 = vpack.c.bf16 %v9896_v23, %v9896_v23  ;;  %v1996_v23 = vpack.c.bf16 %v6702_v45, %v6702_v45 }
 0x1eb   : > { %v7682_v34 = vpop.permute.xlu0 %3087  ;;  %v2575_v9 = vunpack.c.l.b16 %v1995_v60  ;;  %v9907_v60 = vld [vmem:[#allocation58_spill] sm:$0xff] }
 0x1ec   : > { %9889 = vst [vmem:[#allocation42_spill] sm:$0xff] %v7682_v34  ;;  %v9894_v34 = vld [vmem:[#allocation44_spill] sm:$0xff]  ;;  %v2571_v56 = vunpack.c.l.b16 %v1991_v40  ;;  %v2576_v40 = vunpack.c.l.b16 %v1996_v23  ;;  %v2001_v23 = vpack.c.bf16 %v9907_v60, %v9907_v60 }
 0x1ed   : > { %v7684_v18 = vpop.permute.xlu2 %3103  ;;  %3167 = vrot.lane.b32.xlu1 %v7676_v24, %s5490_s10  ;;  %3169 = vrot.lane.b32.xlu2 %v7692_v53, %s5490_s10  ;;  %v9908_v24 = vld [vmem:[#allocation57_spill] sm:$0xff] }
 0x1ee   : > { %9890 = vst [vmem:[#allocation62_spill] sm:$0xff] %v7684_v18  ;;  %v7688_v47 = vpop.permute.xlu1 %3089  ;;  %v1990_v18 = vpack.c.bf16 %v9894_v34, %v9894_v34  ;;  %v7736_v19 = vpack.c.b16 %v2572_v29, %v2571_v56  ;;  %v9904_v56 = vld [vmem:[#allocation76_spill] sm:$0xff] }
 0x1ef   : > { %9891 = vst [vmem:[#allocation154_spill] sm:$0xff] %v7688_v47  ;;  %v2567_v47 = vunpack.c.l.b16 %v1987_v8  ;;  %v1993_v8 = vpack.c.bf16 %v9810_v5, %v9810_v5 }
 0x1f0   : > { %3171 = vrot.lane.b32.xlu0 %v7696_v58, %s5490_s10  ;;  %v2570_v10 = vunpack.c.l.b16 %v1990_v18  ;;  %9900 = vst [vmem:[#allocation157_spill] sm:$0xff] %v7736_v19 }
 0x1f1   : > { %v7724_v1 = vpack.c.b16 %v2568_v51, %v2567_v47  ;;  %v2573_v5 = vunpack.c.l.b16 %v1993_v8  ;;  %v1997_v47 = vpack.c.bf16 %v6921_v48, %v6921_v48  ;;  %v1998_v51 = vpack.c.bf16 %v6916_v46, %v6916_v46  ;;  %v9903_v8 = vld [vmem:[#allocation77_spill] sm:$0xff] }
 0x1f2   : > { %v7726_v18 = vpack.c.b16 %v2570_v10, %v2569_v25  ;;  %v2000_v48 = vpack.c.bf16 %v9904_v56, %v9904_v56  ;;  %v7754_v46 = vpack.c.b16 %v2576_v40, %v2575_v9  ;;  %v2004_v40 = vpack.c.bf16 %v9826_v4, %v9826_v4 }
 0x1f3   : > { %v7712_v42 = vpop.permute.xlu0 %3093  ;;  %v2577_v25 = vunpack.c.l.b16 %v1997_v47  ;;  %v2578_v10 = vunpack.c.l.b16 %v1998_v51  ;;  %v2007_v4 = vpack.c.bf16 %v9833_v28, %v9833_v28 }
 0x1f4   : > { %9899 = vst [vmem:[#allocation156_spill] sm:$0xff] %v7726_v18  ;;  %v2580_v9 = vunpack.c.l.b16 %v2000_v48 }
 0x1f5   : > { %3173 = vrot.lane.b32.xlu1 %v7706_v59, %s5490_s10  ;;  %v7716_v34 = vpop.permute.xlu2 %3109  ;;  %3175 = vrot.lane.b32.xlu2 %v7724_v1, %s5490_s10  ;;  %9906 = vst [vmem:[#allocation76_spill] sm:$0xff] %v7754_v46  ;;  %v7768_v47 = vpack.c.b16 %v2578_v10, %v2577_v25 }
 0x1f6   : > { %9897 = vst [vmem:[#allocation44_spill] sm:$0xff] %v7716_v34  ;;  %v7722_v57 = vpop.permute.xlu1 %3095  ;;  %v2574_v34 = vunpack.c.l.b16 %v1994_v62  ;;  %v1999_v62 = vpack.c.bf16 %v9903_v8, %v9903_v8  ;;  %v2581_v8 = vunpack.c.l.b16 %v2001_v23 }
 0x1f7   : > { %9898 = vst [vmem:[#allocation66_spill] sm:$0xff] %v7722_v57 }
 0x1f8   : > { %3177 = vrot.lane.b32.xlu0 %v7726_v18, %s5490_s10  ;;  %v7746_v63 = vpack.c.b16 %v2574_v34, %v2573_v5  ;;  %v2003_v5 = vpack.c.bf16 %v9825_v22, %v9825_v22  ;;  %9910 = vst [vmem:[#allocation57_spill] sm:$0xff] %v7768_v47  ;;  %v2579_v51 = vunpack.c.l.b16 %v1999_v62  ;;  %v9912_v22 = vld [vmem:[#allocation79_spill] sm:$0xff]  ;;  %v10016_v18 = vld [vmem:[#allocation46_spill] sm:$0xff] }
 0x1fa   : > { %9902 = vst [vmem:[#allocation159_spill] sm:$0xff] %v7746_v63  ;;  %v2583_v56 = vunpack.c.l.b16 %v2003_v5  ;;  %v7774_v60 = vpack.c.b16 %v2580_v9, %v2579_v51  ;;  %v9917_v5 = vld [vmem:[#allocation4_spill] sm:$0xff] }
 0x1fb   : > { %v7744_v45 = vpop.permute.xlu0 %3099  ;;  %v1938_v51 = vpack.c.bf16 %v9917_v5, %v9917_v5 }
 0x1fc   : > { %9901 = vst [vmem:[#allocation158_spill] sm:$0xff] %v7744_v45  ;;  %v2002_v45 = vpack.c.bf16 %v9908_v24, %v9908_v24 }
 0x1fd   : > { %3179 = vrot.lane.b32.xlu1 %v7736_v19, %s5490_s10  ;;  %v7752_v29 = vpop.permute.xlu2 %3115  ;;  %3181 = vrot.lane.b32.xlu2 %v7746_v63, %s5490_s10  ;;  %9911 = vst [vmem:[#allocation160_spill] sm:$0xff] %v7774_v60 }
 0x1fe   : > { %9905 = vst [vmem:[#allocation77_spill] sm:$0xff] %v7752_v29  ;;  %v7760_v34 = vpop.permute.xlu1 %3101  ;;  %v2582_v24 = vunpack.c.l.b16 %v2002_v45  ;;  %v2005_v29 = vpack.c.bf16 %v9912_v22, %v9912_v22  ;;  %v2008_v45 = vpack.c.bf16 %v9835_v36, %v9835_v36 }
 0x1ff   : > { %9909 = vst [vmem:[#allocation58_spill] sm:$0xff] %v7760_v34  ;;  %v2584_v34 = vunpack.c.l.b16 %v2004_v40  ;;  %v2587_v40 = vunpack.c.l.b16 %v2007_v4 }
 0x200   : > { %3183 = vrot.lane.b32.xlu0 %v7754_v46, %s5490_s10  ;;  %v9913_v46 = vld [vmem:[#allocation75_spill] sm:$0xff]  ;;  %v7782_v62 = vpack.c.b16 %v2582_v24, %v2581_v8  ;;  %v2585_v9 = vunpack.c.l.b16 %v2005_v29  ;;  %v2588_v8 = vunpack.c.l.b16 %v2008_v45  ;;  %v9918_v24 = vld [vmem:[#allocation5_spill] sm:$0xff] }
 0x201   : > { %v2006_v25 = vpack.c.bf16 %v9913_v46, %v9913_v46  ;;  %v1937_v46 = vpack.c.bf16 %v6082_v31, %v6082_v31  ;;  %v7800_v28 = vpack.c.b16 %v2584_v34, %v2583_v56  ;;  %v1939_v22 = vpack.c.bf16 %v9918_v24, %v9918_v24 }
 0x202   : > { %v2518_v31 = vunpack.c.l.b16 %v1938_v51  ;;  %v7810_v5 = vpack.c.b16 %v2588_v8, %v2587_v40  ;;  %v9931_v40 = vld [vmem:[#allocation16_spill] sm:$0xff] }
 0x203   : > { %v7780_v10 = vpop.permute.xlu0 %3105  ;;  %v2586_v36 = vunpack.c.l.b16 %v2006_v25  ;;  %v2519_v56 = vunpack.c.l.b16 %v1939_v22  ;;  %v9934_v22 = vld [vmem:[#allocation17_spill] sm:$0xff] }
 0x204   : > { %9914 = vst [vmem:[#allocation79_spill] sm:$0xff] %v7780_v10 }
 0x205   : > { %3185 = vrot.lane.b32.xlu1 %v7768_v47, %s5490_s10  ;;  %3187 = vrot.lane.b32.xlu2 %v7774_v60, %s5490_s10  ;;  %v7790_v48 = vpop.permute.xlu2 %3121  ;;  %v7808_v47 = vpack.c.b16 %v2586_v36, %v2585_v9  ;;  %9921 = vst [vmem:[#allocation5_spill] sm:$0xff] %v7810_v5  ;;  %v9930_v36 = vld [vmem:[#allocation14_spill] sm:$0xff] }
 0x206   : > { %9915 = vst [vmem:[#allocation75_spill] sm:$0xff] %v7790_v48  ;;  %v7792_v23 = vpop.permute.xlu1 %3107  ;;  %v9919_v48 = vld [vmem:[#allocation6_spill] sm:$0xff] }
 0x207   : > { %9916 = vst [vmem:[#allocation161_spill] sm:$0xff] %v7792_v23  ;;  %v2517_v23 = vunpack.c.l.b16 %v1937_v46  ;;  %v1940_v10 = vpack.c.bf16 %v9919_v48, %v9919_v48  ;;  %v9925_v46 = vld [vmem:[#allocation10_spill] sm:$0xff] }
 0x208   : > { %3189 = vrot.lane.b32.xlu0 %v7782_v62, %s5490_s10  ;;  %9920 = vst [vmem:[#allocation4_spill] sm:$0xff] %v7808_v47 }
 0x209   : > { %v7818_v34 = vpack.c.b16 %v2518_v31, %v2517_v23  ;;  %v2520_v25 = vunpack.c.l.b16 %v1940_v10  ;;  %v9928_v10 = vld [vmem:[#allocation12_spill] sm:$0xff] }
 0x20b   : > { %v7814_v29 = vpop.permute.xlu0 %3111  ;;  %v7826_v48 = vpack.c.b16 %v2520_v25, %v2519_v56  ;;  %v9936_v56 = vld [vmem:[#allocation18_spill] sm:$0xff]  ;;  %v9937_v25 = vld [vmem:[#allocation21_spill] sm:$0xff] }
 0x20c   : > { %9922 = vst [vmem:[#allocation6_spill] sm:$0xff] %v7814_v29  ;;  %v9964_v29 = vld [vmem:[#allocation60_spill] sm:$0xff] }
 0x20d   : > { %3191 = vrot.lane.b32.xlu1 %v7800_v28, %s5490_s10  ;;  %3193 = vrot.lane.b32.xlu2 %v7808_v47, %s5490_s10 }
 0x20e   : > { %v7822_v45 = vpop.permute.xlu1 %3113 }
 0x20f   : > { %v7820_v4 = vpop.permute.xlu2 %3127  ;;  %9924 = vst [vmem:[#allocation163_spill] sm:$0xff] %v7822_v45  ;;  %v9944_v45 = vld [vmem:[#allocation34_spill] sm:$0xff] }
 0x210   : > { %3195 = vrot.lane.b32.xlu0 %v7810_v5, %s5490_s10  ;;  %9923 = vst [vmem:[#allocation162_spill] sm:$0xff] %v7820_v4 }
 0x213   : > { %v7834_v51 = vpop.permute.xlu0 %3117 }
 0x214   : > { %9927 = vst [vmem:[#allocation165_spill] sm:$0xff] %v7834_v51 }
 0x215   : > { %3197 = vrot.lane.b32.xlu1 %v7818_v34, %s5490_s10  ;;  %3199 = vrot.lane.b32.xlu2 %v7826_v48, %s5490_s10 }
 0x217   : > { %v7832_v23 = vpop.permute.xlu2 %3133 }
 0x218   : > { %3201 = vrot.lane.b32.xlu0 %v9925_v46, %s5491_s11  ;;  %9926 = vst [vmem:[#allocation164_spill] sm:$0xff] %v7832_v23  ;;  %v10025_v23 = vld [vmem:[#allocation55_spill] sm:$0xff] }
 0x219   : > { %v7838_v9 = vpop.permute.xlu1 %3119 }
 0x21a   : > { %9929 = vst [vmem:[#allocation166_spill] sm:$0xff] %v7838_v9 }
 0x21d   : > { %3203 = vrot.lane.b32.xlu1 %v9928_v10, %s5491_s11  ;;  %3205 = vrot.lane.b32.xlu2 %v9930_v36, %s5491_s11  ;;  %v9939_v10 = vld [vmem:[#allocation24_spill] sm:$0xff] }
 0x21f   : > { %v7844_v8 = vpop.permute.xlu2 %3139 }
 0x220   : > { %3207 = vrot.lane.b32.xlu0 %v9931_v40, %s5491_s11  ;;  %9932 = vst [vmem:[#allocation14_spill] sm:$0xff] %v7844_v8 }
 0x222   : > { %v7846_v24 = vpop.permute.xlu0 %3123 }
 0x223   : > { %9933 = vst [vmem:[#allocation16_spill] sm:$0xff] %v7846_v24  ;;  %v9940_v24 = vld [vmem:[#allocation27_spill] sm:$0xff] }
 0x225   : > { %3209 = vrot.lane.b32.xlu1 %v9934_v22, %s5491_s11  ;;  %3211 = vrot.lane.b32.xlu2 %v9936_v56, %s5491_s11 }
 0x227   : > { %v7850_v31 = vpop.permute.xlu1 %3125  ;;  %v7856_v4 = vpop.permute.xlu2 %3145 }
 0x228   : > { %9935 = vst [vmem:[#allocation17_spill] sm:$0xff] %v7850_v31  ;;  %3213 = vrot.lane.b32.xlu0 %v9937_v25, %s5491_s11  ;;  %v9941_v31 = vld [vmem:[#allocation32_spill] sm:$0xff] }
 0x229   : > { %9938 = vst [vmem:[#allocation18_spill] sm:$0xff] %v7856_v4 }
 0x22a   : > { %v7858_v9 = vpop.permute.xlu0 %3129 }
 0x22d   : > { %3215 = vrot.lane.b32.xlu1 %v9939_v10, %s5491_s11  ;;  %3217 = vrot.lane.b32.xlu2 %v9940_v24, %s5491_s11 }
 0x22f   : > { %v7862_v46 = vpop.permute.xlu1 %3131  ;;  %v7868_v51 = vpop.permute.xlu2 %3151 }
 0x230   : > { %3219 = vrot.lane.b32.xlu0 %v9941_v31, %s5491_s11  ;;  %9942 = vst [vmem:[#allocation21_spill] sm:$0xff] %v7868_v51 }
 0x232   : > { %v7870_v8 = vpop.permute.xlu0 %3135 }
 0x233   : > { %9943 = vst [vmem:[#allocation24_spill] sm:$0xff] %v7870_v8 }
 0x235   : > { %3221 = vrot.lane.b32.xlu1 %v9944_v45, %s5491_s11  ;;  %3223 = vrot.lane.b32.xlu2 %v9946_v61, %s5491_s11  ;;  %v9953_v45 = vld [vmem:[#allocation51_spill] sm:$0xff] }
 0x237   : > { %v7874_v4 = vpop.permute.xlu1 %3137  ;;  %v7880_v63 = vpop.permute.xlu2 %3157 }
 0x238   : > { %9945 = vst [vmem:[#allocation167_spill] sm:$0xff] %v7874_v4  ;;  %3225 = vrot.lane.b32.xlu0 %v9947_v55, %s5491_s11 }
 0x239   : > { %9948 = vst [vmem:[#allocation35_spill] sm:$0xff] %v7880_v63 }
 0x23a   : > { %v7882_v5 = vpop.permute.xlu0 %3141 }
 0x23b   : > { %9949 = vst [vmem:[#allocation40_spill] sm:$0xff] %v7882_v5  ;;  %v9958_v5 = vld [vmem:[#allocation53_spill] sm:$0xff] }
 0x23d   : > { %3227 = vrot.lane.b32.xlu1 %v9950_v27, %s5491_s11  ;;  %3229 = vrot.lane.b32.xlu2 %v9952_v52, %s5491_s11 }
 0x23f   : > { %v7886_v51 = vpop.permute.xlu1 %3143  ;;  %v7892_v4 = vpop.permute.xlu2 %3163 }
 0x240   : > { %9951 = vst [vmem:[#allocation43_spill] sm:$0xff] %v7886_v51  ;;  %3231 = vrot.lane.b32.xlu0 %v9953_v45, %s5491_s11  ;;  %v9959_v51 = vld [vmem:[#allocation56_spill] sm:$0xff] }
 0x241   : > { %9954 = vst [vmem:[#allocation47_spill] sm:$0xff] %v7892_v4 }
 0x242   : > { %v7894_v54 = vpop.permute.xlu0 %3147 }
 0x243   : > { %9955 = vst [vmem:[#allocation168_spill] sm:$0xff] %v7894_v54 }
 0x245   : > { %3233 = vrot.lane.b32.xlu1 %v9956_v7, %s5491_s11  ;;  %3235 = vrot.lane.b32.xlu2 %v9958_v5, %s5491_s11  ;;  %v9965_v7 = vld [vmem:[#allocation69_spill] sm:$0xff] }
 0x247   : > { %v7898_v63 = vpop.permute.xlu1 %3149  ;;  %v7904_v31 = vpop.permute.xlu2 %3169 }
 0x248   : > { %9957 = vst [vmem:[#allocation169_spill] sm:$0xff] %v7898_v63  ;;  %3237 = vrot.lane.b32.xlu0 %v9959_v51, %s5491_s11  ;;  %v9968_v51 = vld [vmem:[#allocation70_spill] sm:$0xff] }
 0x249   : > { %9960 = vst [vmem:[#allocation170_spill] sm:$0xff] %v7904_v31  ;;  %v9973_v63 = vld [vmem:[#allocation74_spill] sm:$0xff] }
 0x24a   : > { %v7906_v30 = vpop.permute.xlu0 %3153 }
 0x24b   : > { %9961 = vst [vmem:[#allocation171_spill] sm:$0xff] %v7906_v30  ;;  %v9970_v30 = vld [vmem:[#allocation71_spill] sm:$0xff] }
 0x24d   : > { %3239 = vrot.lane.b32.xlu1 %v9962_v12, %s5491_s11  ;;  %3241 = vrot.lane.b32.xlu2 %v9964_v29, %s5491_s11  ;;  %v9971_v12 = vld [vmem:[#allocation72_spill] sm:$0xff] }
 0x24f   : > { %v7910_v4 = vpop.permute.xlu1 %3155  ;;  %v7916_v19 = vpop.permute.xlu2 %3175 }
 0x250   : > { %9963 = vst [vmem:[#allocation172_spill] sm:$0xff] %v7910_v4  ;;  %3243 = vrot.lane.b32.xlu0 %v9965_v7, %s5491_s11 }
 0x251   : > { %9966 = vst [vmem:[#allocation60_spill] sm:$0xff] %v7916_v19 }
 0x252   : > { %v7918_v5 = vpop.permute.xlu0 %3159 }
 0x253   : > { %9967 = vst [vmem:[#allocation69_spill] sm:$0xff] %v7918_v5  ;;  %v9975_v5 = vld [vmem:[#allocation78_spill] sm:$0xff] }
 0x255   : > { %3245 = vrot.lane.b32.xlu1 %v9968_v51, %s5491_s11  ;;  %3247 = vrot.lane.b32.xlu2 %v9970_v30, %s5491_s11 }
 0x257   : > { %v7922_v31 = vpop.permute.xlu1 %3161  ;;  %v7928_v4 = vpop.permute.xlu2 %3181 }
 0x258   : > { %9969 = vst [vmem:[#allocation70_spill] sm:$0xff] %v7922_v31  ;;  %3249 = vrot.lane.b32.xlu0 %v9971_v12, %s5491_s11  ;;  %v9976_v31 = vld [vmem:[#allocation82_spill] sm:$0xff] }
 0x259   : > { %9972 = vst [vmem:[#allocation71_spill] sm:$0xff] %v7928_v4 }
 0x25a   : > { %v7930_v47 = vpop.permute.xlu0 %3165 }
 0x25d   : > { %3251 = vrot.lane.b32.xlu1 %v9973_v63, %s5491_s11  ;;  %3253 = vrot.lane.b32.xlu2 %v9975_v5, %s5491_s11  ;;  %v9982_v63 = vld [vmem:[#allocation86_spill] sm:$0xff] }
 0x25f   : > { %v7934_v19 = vpop.permute.xlu1 %3167  ;;  %v7940_v14 = vpop.permute.xlu2 %3187 }
 0x260   : > { %9974 = vst [vmem:[#allocation173_spill] sm:$0xff] %v7934_v19  ;;  %3255 = vrot.lane.b32.xlu0 %v9976_v31, %s5491_s11  ;;  %v9985_v31 = vld [vmem:[#allocation87_spill] sm:$0xff] }
 0x261   : > { %9977 = vst [vmem:[#allocation174_spill] sm:$0xff] %v7940_v14 }
 0x262   : > { %v7942_v8 = vpop.permute.xlu0 %3171 }
 0x263   : > { %9978 = vst [vmem:[#allocation175_spill] sm:$0xff] %v7942_v8  ;;  %v9987_v8 = vld [vmem:[#allocation88_spill] sm:$0xff] }
 0x265   : > { %3257 = vrot.lane.b32.xlu1 %v9979_v38, %s5491_s11  ;;  %3259 = vrot.lane.b32.xlu2 %v9981_v39, %s5491_s11  ;;  %v9988_v38 = vld [vmem:[#allocation90_spill] sm:$0xff] }
 0x267   : > { %v7946_v4 = vpop.permute.xlu1 %3173  ;;  %v7952_v45 = vpop.permute.xlu2 %3193 }
 0x268   : > { %9980 = vst [vmem:[#allocation176_spill] sm:$0xff] %v7946_v4  ;;  %3261 = vrot.lane.b32.xlu0 %v9982_v63, %s5491_s11 }
 0x269   : > { %9983 = vst [vmem:[#allocation85_spill] sm:$0xff] %v7952_v45 }
 0x26a   : > { %v7954_v5 = vpop.permute.xlu0 %3177 }
 0x26b   : > { %9984 = vst [vmem:[#allocation86_spill] sm:$0xff] %v7954_v5  ;;  %v9993_v5 = vld [vmem:[#allocation8_spill] sm:$0xff] }
 0x26d   : > { %3263 = vrot.lane.b32.xlu1 %v9985_v31, %s5491_s11  ;;  %3265 = vrot.lane.b32.xlu2 %v9987_v8, %s5491_s11 }
 0x26f   : > { %v7958_v14 = vpop.permute.xlu1 %3179  ;;  %v7964_v4 = vpop.permute.xlu2 %3199 }
 0x270   : > { %9986 = vst [vmem:[#allocation177_spill] sm:$0xff] %v7958_v14  ;;  %3267 = vrot.lane.b32.xlu0 %v9988_v38, %s5491_s11  ;;  %v9994_v14 = vld [vmem:[#allocation95_spill] sm:$0xff] }
 0x271   : > { %9989 = vst [vmem:[#allocation178_spill] sm:$0xff] %v7964_v4  ;;  %v9997_v4 = vld [vmem:[#allocation9_spill] sm:$0xff] }
 0x272   : > { %v7966_v24 = vpop.permute.xlu0 %3183 }
 0x273   : > { %9990 = vst [vmem:[#allocation179_spill] sm:$0xff] %v7966_v24 }
 0x275   : > { %3269 = vrot.lane.b32.xlu1 %v9991_v50, %s5491_s11  ;;  %3271 = vrot.lane.b32.xlu2 %v9993_v5, %s5491_s11  ;;  %v9999_v50 = vld [vmem:[#allocation13_spill] sm:$0xff] }
 0x277   : > { %v7970_v45 = vpop.permute.xlu1 %3185  ;;  %v7976_v8 = vpop.permute.xlu2 %3205 }
 0x278   : > { %9992 = vst [vmem:[#allocation180_spill] sm:$0xff] %v7970_v45  ;;  %3273 = vrot.lane.b32.xlu0 %v9994_v14, %s5492_s12  ;;  %v10000_v45 = vld [vmem:[#allocation22_spill] sm:$0xff]  ;;  %v10003_v14 = vld [vmem:[#allocation23_spill] sm:$0xff] }
 0x279   : > { %9995 = vst [vmem:[#allocation181_spill] sm:$0xff] %v7976_v8 }
 0x27a   : > { %v7978_v19 = vpop.permute.xlu0 %3189 }
 0x27b   : > { %9996 = vst [vmem:[#allocation182_spill] sm:$0xff] %v7978_v19  ;;  %v10005_v19 = vld [vmem:[#allocation99_spill] sm:$0xff] }
 0x27d   : > { %3275 = vrot.lane.b32.xlu1 %v9997_v4, %s5492_s12  ;;  %3277 = vrot.lane.b32.xlu2 %v9999_v50, %s5492_s12 }
 0x27f   : > { %v7982_v38 = vpop.permute.xlu1 %3191  ;;  %v7988_v5 = vpop.permute.xlu2 %3211 }
 0x280   : > { %9998 = vst [vmem:[#allocation183_spill] sm:$0xff] %v7982_v38  ;;  %3279 = vrot.lane.b32.xlu0 %v10000_v45, %s5492_s12  ;;  %v10006_v38 = vld [vmem:[#allocation100_spill] sm:$0xff] }
 0x281   : > { %10001 = vst [vmem:[#allocation13_spill] sm:$0xff] %v7988_v5 }
 0x282   : > { %v7990_v24 = vpop.permute.xlu0 %3195 }
 0x283   : > { %10002 = vst [vmem:[#allocation22_spill] sm:$0xff] %v7990_v24  ;;  %v10009_v24 = vld [vmem:[#allocation103_spill] sm:$0xff] }
 0x285   : > { %3281 = vrot.lane.b32.xlu1 %v10003_v14, %s5492_s12  ;;  %3283 = vrot.lane.b32.xlu2 %v10005_v19, %s5492_s12 }
 0x287   : > { %v7994_v57 = vpop.permute.xlu1 %3197  ;;  %v8000_v4 = vpop.permute.xlu2 %3217 }
 0x288   : > { %10004 = vst [vmem:[#allocation23_spill] sm:$0xff] %v7994_v57  ;;  %3285 = vrot.lane.b32.xlu0 %v10006_v38, %s5492_s12  ;;  %v10010_v57 = vld [vmem:[#allocation37_spill] sm:$0xff] }
 0x289   : > { %10007 = vst [vmem:[#allocation99_spill] sm:$0xff] %v8000_v4 }
 0x28a   : > { %v8002_v26 = vpop.permute.xlu0 %3201 }
 0x28d   : > { %3287 = vrot.lane.b32.xlu1 %v10008_v43, %s5492_s12  ;;  %3289 = vrot.lane.b32.xlu2 %v10009_v24, %s5492_s12 }
 0x28f   : > { %v8006_v5 = vpop.permute.xlu1 %3203  ;;  %v8012_v12 = vpop.permute.xlu2 %3223 }
 0x290   : > { %3291 = vrot.lane.b32.xlu0 %v10010_v57, %s5492_s12  ;;  %10011 = vst [vmem:[#allocation100_spill] sm:$0xff] %v8012_v12  ;;  %v10019_v57 = vld [vmem:[#allocation109_spill] sm:$0xff] }
 0x292   : > { %v8014_v54 = vpop.permute.xlu0 %3207 }
 0x293   : > { %10012 = vst [vmem:[#allocation102_spill] sm:$0xff] %v8014_v54  ;;  %v10021_v54 = vld [vmem:[#allocation110_spill] sm:$0xff] }
 0x295   : > { %3293 = vrot.lane.b32.xlu1 %v10013_v11, %s5492_s12  ;;  %3295 = vrot.lane.b32.xlu2 %v10015_v33, %s5492_s12  ;;  %v10022_v11 = vld [vmem:[#allocation50_spill] sm:$0xff] }
 0x297   : > { %v8018_v4 = vpop.permute.xlu1 %3209  ;;  %v8024_v8 = vpop.permute.xlu2 %3229 }
 0x298   : > { %10014 = vst [vmem:[#allocation184_spill] sm:$0xff] %v8018_v4  ;;  %3297 = vrot.lane.b32.xlu0 %v10016_v18, %s5492_s12 }
 0x299   : > { %10017 = vst [vmem:[#allocation107_spill] sm:$0xff] %v8024_v8 }
 0x29a   : > { %v8026_v24 = vpop.permute.xlu0 %3213 }
 0x29b   : > { %10018 = vst [vmem:[#allocation46_spill] sm:$0xff] %v8026_v24  ;;  %v10027_v24 = vld [vmem:[#allocation114_spill] sm:$0xff] }
 0x29d   : > { %3299 = vrot.lane.b32.xlu1 %v10019_v57, %s5492_s12  ;;  %3301 = vrot.lane.b32.xlu2 %v10021_v54, %s5492_s12 }
 0x29f   : > { %v8030_v12 = vpop.permute.xlu1 %3215  ;;  %v8036_v4 = vpop.permute.xlu2 %3235 }
 0x2a0   : > { %10020 = vst [vmem:[#allocation109_spill] sm:$0xff] %v8030_v12  ;;  %3303 = vrot.lane.b32.xlu0 %v10022_v11, %s5492_s12  ;;  %v10028_v12 = vld [vmem:[#allocation116_spill] sm:$0xff]  ;;  %v10031_v11 = vld [vmem:[#allocation61_spill] sm:$0xff] }
 0x2a1   : > { %10023 = vst [vmem:[#allocation110_spill] sm:$0xff] %v8036_v4 }
 0x2a2   : > { %v8038_v31 = vpop.permute.xlu0 %3219 }
 0x2a3   : > { %10024 = vst [vmem:[#allocation185_spill] sm:$0xff] %v8038_v31  ;;  %v10033_v31 = vld [vmem:[#allocation65_spill] sm:$0xff] }
 0x2a5   : > { %3305 = vrot.lane.b32.xlu1 %v10025_v23, %s5492_s12  ;;  %3307 = vrot.lane.b32.xlu2 %v10027_v24, %s5492_s12 }
 0x2a7   : > { %v8042_v8 = vpop.permute.xlu1 %3221  ;;  %v8048_v44 = vpop.permute.xlu2 %3241 }
 0x2a8   : > { %10026 = vst [vmem:[#allocation186_spill] sm:$0xff] %v8042_v8  ;;  %3309 = vrot.lane.b32.xlu0 %v10028_v12, %s5492_s12 }
 0x2a9   : > { %10029 = vst [vmem:[#allocation187_spill] sm:$0xff] %v8048_v44 }
 0x2aa   : > { %v8050_v2 = vpop.permute.xlu0 %3225 }
 0x2ab   : > { %10030 = vst [vmem:[#allocation188_spill] sm:$0xff] %v8050_v2 }
 0x2ad   : > { %3311 = vrot.lane.b32.xlu1 %v10031_v11, %s5492_s12  ;;  %3313 = vrot.lane.b32.xlu2 %v10033_v31, %s5492_s12  ;;  %v10037_v11 = vld [vmem:[#allocation119_spill] sm:$0xff] }
 0x2af   : > { %v8054_v4 = vpop.permute.xlu1 %3227  ;;  %v8060_v24 = vpop.permute.xlu2 %3247 }
 0x2b0   : > { %10032 = vst [vmem:[#allocation189_spill] sm:$0xff] %v8054_v4  ;;  %3345 = vrot.lane.b32.xlu0 %v7512_v37, %s5493_s13  ;;  %v10042_v37 = vld [vmem:[#allocation123_spill] sm:$0xff] }
 0x2b1   : > { %10034 = vst [vmem:[#allocation65_spill] sm:$0xff] %v8060_v24  ;;  %v10039_v24 = vld [vmem:[#allocation68_spill] sm:$0xff] }
 0x2b2   : > { %v8062_v23 = vpop.permute.xlu0 %3231 }
 0x2b3   : > { %10035 = vst [vmem:[#allocation190_spill] sm:$0xff] %v8062_v23 }
 0x2b5   : > { %3417 = vrot.lane.b32.xlu1 %v9930_v36, %s5494_s14  ;;  %3489 = vrot.lane.b32.xlu2 %v9999_v50, %s5495_s15  ;;  %v10040_v36 = vld [vmem:[#allocation67_spill] sm:$0xff] }
 0x2b7   : > { %v8066_v12 = vpop.permute.xlu1 %3233  ;;  %v8072_v4 = vpop.permute.xlu2 %3253 }
 0x2b8   : > { %10036 = vst [vmem:[#allocation191_spill] sm:$0xff] %v8066_v12  ;;  %3315 = vrot.lane.b32.xlu0 %v10037_v11, %s5492_s12 }
 0x2b9   : > { %10038 = vst [vmem:[#allocation119_spill] sm:$0xff] %v8072_v4 }
 0x2ba   : > { %v8074_v2 = vpop.permute.xlu0 %3237 }
 0x2bd   : > { %3317 = vrot.lane.b32.xlu1 %v10039_v24, %s5492_s12  ;;  %3319 = vrot.lane.b32.xlu2 %v10040_v36, %s5492_s12 }
 0x2bf   : > { %v8078_v23 = vpop.permute.xlu1 %3239  ;;  %v8084_v12 = vpop.permute.xlu2 %3259 }
 0x2c0   : > { %3347 = vrot.lane.b32.xlu0 %v7516_v32, %s5493_s13  ;;  %10041 = vst [vmem:[#allocation68_spill] sm:$0xff] %v8084_v12 }
 0x2c2   : > { %v8086_v50 = vpop.permute.xlu0 %3243 }
 0x2c5   : > { %3419 = vrot.lane.b32.xlu1 %v9931_v40, %s5494_s14  ;;  %3491 = vrot.lane.b32.xlu2 %v10000_v45, %s5495_s15 }
 0x2c7   : > { %v8090_v4 = vpop.permute.xlu1 %3245  ;;  %v8096_v44 = vpop.permute.xlu2 %3265 }
 0x2c8   : > { %3321 = vrot.lane.b32.xlu0 %v10042_v37, %s5492_s12  ;;  %10043 = vst [vmem:[#allocation67_spill] sm:$0xff] %v8096_v44 }
 0x2ca   : > { %v8098_v8 = vpop.permute.xlu0 %3249 }
 0x2cb   : > { %10044 = vst [vmem:[#allocation123_spill] sm:$0xff] %v8098_v8 }
 0x2cd   : > { %3381 = vrot.lane.b32.xlu1 %v7692_v53, %s5493_s13  ;;  %3453 = vrot.lane.b32.xlu2 %v9964_v29, %s5494_s14 }
 0x2cf   : > { %v8102_v12 = vpop.permute.xlu1 %3251  ;;  %v8108_v40 = vpop.permute.xlu2 %3271 }
 0x2d0   : > { %10045 = vst [vmem:[#allocation192_spill] sm:$0xff] %v8102_v12  ;;  %3349 = vrot.lane.b32.xlu0 %v7528_v16, %s5493_s13 }
 0x2d1   : > { %10046 = vst [vmem:[#allocation193_spill] sm:$0xff] %v8108_v40 }
 0x2d2   : > { %v8110_v45 = vpop.permute.xlu0 %3255 }
 0x2d5   : > { %3363 = vrot.lane.b32.xlu1 %v7602_v6, %s5493_s13  ;;  %3525 = vrot.lane.b32.xlu2 %v10033_v31, %s5495_s15 }
 0x2d7   : > { %v8114_v44 = vpop.permute.xlu1 %3257  ;;  %v8120_v12 = vpop.permute.xlu2 %3277 }
 0x2d8   : > { %3421 = vrot.lane.b32.xlu0 %v9934_v22, %s5494_s14 }
 0x2da   : > { %v8122_v29 = vpop.permute.xlu0 %3261 }
 0x2dd   : > { %3435 = vrot.lane.b32.xlu1 %v9946_v61, %s5494_s14  ;;  %3493 = vrot.lane.b32.xlu2 %v10003_v14, %s5495_s15 }
 0x2df   : > { %v8126_v40 = vpop.permute.xlu1 %3263  ;;  %v8132_v8 = vpop.permute.xlu2 %3283 }
 0x2e0   : > { %10047 = vst [vmem:[#allocation194_spill] sm:$0xff] %v8126_v40  ;;  %3507 = vrot.lane.b32.xlu0 %v10015_v33, %s5495_s15 }
 0x2e2   : > { %v8134_v31 = vpop.permute.xlu0 %3267 }
 0x2e3   : > { %10048 = vst [vmem:[#allocation195_spill] sm:$0xff] %v8134_v31 }
 0x2e5   : > { %3383 = vrot.lane.b32.xlu1 %v7696_v58, %s5493_s13  ;;  %3455 = vrot.lane.b32.xlu2 %v9965_v7, %s5494_s14  ;;  %v4904_v58 = vld [vmem:[%s9311_s2 + $0x18] sm:$0xff] }
 0x2e7   : > { %v8138_v22 = vpop.permute.xlu1 %3269  ;;  %v8144_v61 = vpop.permute.xlu2 %3289 }
 0x2e8   : > { %10049 = vst [vmem:[#allocation196_spill] sm:$0xff] %v8138_v22  ;;  %3351 = vrot.lane.b32.xlu0 %v7542_v20, %s5493_s13 }
 0x2e9   : > { %10050 = vst [vmem:[#allocation197_spill] sm:$0xff] %v8144_v61  ;;  %v4189_v61 = vld [vmem:[%s9311_s2 + $0x20] sm:$0xf] }
 0x2ea   : > { %v8146_v14 = vpop.permute.xlu0 %3273 }
 0x2ed   : > { %3365 = vrot.lane.b32.xlu1 %v7606_v13, %s5493_s13  ;;  %3527 = vrot.lane.b32.xlu2 %v10037_v11, %s5495_s15  ;;  %v4211_v11 = vunpack.c.l.b16 %v4189_v61 }
 0x2ef   : > { %v8150_v33 = vpop.permute.xlu1 %3275  ;;  %v8156_v22 = vpop.permute.xlu2 %3295  ;;  %v4216_v40 = vpack.c.b16 %v4211_v11, %v4211_v11  ;;  %v10053_v11 = vld [vmem:[#allocation80_spill] sm:$0xff] }
 0x2f0   : > { %3423 = vrot.lane.b32.xlu0 %v9936_v56, %s5494_s14 }
 0x2f1   : > { %v4296_v20 = vsel %vm4294_vm12, %v4216_v40, 0 }
 0x2f2   : > { %v8158_v7 = vpop.permute.xlu0 %3279  ;;  %4301 = vmatpush.bf16.msra.mxu0 %v4296_v20  ;;  %5264 = vmatpush.bf16.msra.mxu2 %v4296_v20 }
 0x2f3   : > { %5263 = vmatpush.bf16.msra.mxu1 %v4296_v20  ;;  %5265 = vmatpush.bf16.msra.mxu3 %v4296_v20 }
 0x2f5   : > { %3437 = vrot.lane.b32.xlu1 %v9947_v55, %s5494_s14  ;;  %3495 = vrot.lane.b32.xlu2 %v10005_v19, %s5495_s15  ;;  %v10051_v55 = vld [vmem:[#allocation130_spill] sm:$0xff] }
 0x2f6   : > { %4302 = vmatpush.bf16.msra.mxu0 %v4904_v58  ;;  %5267 = vmatpush.bf16.msra.mxu2 %v4904_v58 }
 0x2f7   : > { %v8162_v31 = vpop.permute.xlu1 %3281  ;;  %v8171_v56 = vpop.permute.xlu2 %3301  ;;  %5266 = vmatpush.bf16.msra.mxu1 %v4904_v58  ;;  %5268 = vmatpush.bf16.msra.mxu3 %v4904_v58  ;;  %v4901_v58 = vld [vmem:[%s9311_s2] sm:$0xff] }
 0x2f8   : > { %3509 = vrot.lane.b32.xlu0 %v10016_v18, %s5495_s15  ;;  %v4903_v18 = vld [vmem:[%s9311_s2 + $0x10] sm:$0xff] }
 0x2fa   : > { %v8173_v13 = vpop.permute.xlu0 %3285  ;;  %4303 = vmatpush.bf16.msra.mxu0 %v4903_v18  ;;  %5270 = vmatpush.bf16.msra.mxu2 %v4903_v18 }
 0x2fb   : > { %5269 = vmatpush.bf16.msra.mxu1 %v4903_v18  ;;  %5271 = vmatpush.bf16.msra.mxu3 %v4903_v18 }
 0x2fd   : > { %3327 = vrot.lane.b32.xlu1 %v10051_v55, %s5492_s12  ;;  %3399 = vrot.lane.b32.xlu2 %v7774_v60, %s5493_s13 }
 0x2ff   : > { %v8180_v19 = vpop.permute.xlu1 %3287  ;;  %v8189_v40 = vpop.permute.xlu2 %3307 }
 0x300   : > { %3471 = vrot.lane.b32.xlu0 %v9981_v39, %s5494_s14  ;;  %10052 = vst [vmem:[#allocation130_spill] sm:$0xff] %v8189_v40  ;;  %v4902_v39 = vld [vmem:[%s9311_s2 + $0x8] sm:$0xff] }
 0x301   : > { %4304 = vmatpush.bf16.msra.mxu0 %v4902_v39  ;;  %5273 = vmatpush.bf16.msra.mxu2 %v4902_v39 }
 0x302   : > { %v8191_v61 = vpop.permute.xlu0 %3291  ;;  %5272 = vmatpush.bf16.msra.mxu1 %v4902_v39  ;;  %5274 = vmatpush.bf16.msra.mxu3 %v4902_v39 }
 0x305   : > { %3385 = vrot.lane.b32.xlu1 %v7706_v59, %s5493_s13  ;;  %3543 = vrot.lane.b32.xlu2 %v10053_v11, %s5495_s15 }
 0x306   : > { %4305 = vmatpush.bf16.msra.mxu0 %v4901_v58  ;;  %5276 = vmatpush.bf16.msra.mxu2 %v4901_v58 }
 0x307   : > { %v8198_v20 = vpop.permute.xlu1 %3293  ;;  %v8207_v40 = vpop.permute.xlu2 %3313  ;;  %5275 = vmatpush.bf16.msra.mxu1 %v4901_v58  ;;  %5277 = vmatpush.bf16.msra.mxu3 %v4901_v58 }
 0x308   : > { %3457 = vrot.lane.b32.xlu0 %v9968_v51, %s5494_s14 }
 0x30a   : > { %v8209_v59 = vpop.permute.xlu0 %3297 }
 0x30d   : > { %3353 = vrot.lane.b32.xlu1 %v7546_v49, %s5493_s13  ;;  %3367 = vrot.lane.b32.xlu2 %v7618_v0, %s5493_s13 }
 0x30f   : > { %v8213_v18 = vpop.permute.xlu1 %3299  ;;  %v3490_v51 = vpop.permute.xlu2 %3489 }
 0x310   : > { %3529 = vrot.lane.b32.xlu0 %v10039_v24, %s5495_s15 }
 0x312   : > { %v8219_v60 = vpop.permute.xlu0 %3303 }
 0x313   : > { %10054 = vst [vmem:[#allocation80_spill] sm:$0xff] %v8219_v60  ;;  %v10056_v60 = vld [vmem:[#allocation93_spill] sm:$0xff] }
 0x315   : > { %3425 = vrot.lane.b32.xlu1 %v9937_v25, %s5494_s14  ;;  %3439 = vrot.lane.b32.xlu2 %v9950_v27, %s5494_s14  ;;  %v3564_v25 = vsel %vm3561_vm13, %v7818_v34, %v10056_v60 }
 0x316   : > { %v3672_v27 = vsel %vm3670_vm14, %v3564_v25, %v7534_v17 }
 0x317   : > { %v8223_v39 = vpop.permute.xlu1 %3305  ;;  %v8229_v58 = vpop.permute.xlu2 %3319 }
 0x318   : > { %10055 = vst [vmem:[#allocation198_spill] sm:$0xff] %v8223_v39  ;;  %3497 = vrot.lane.b32.xlu0 %v10006_v38, %s5495_s15  ;;  %v10057_v38 = vld [vmem:[#allocation81_spill] sm:$0xff]  ;;  %v3745_v39 = vsel %vm3743_vm15, %v3672_v27, %v7858_v9 }
 0x31a   : > { %v3310_v49 = vpop.permute.xlu0 %3309 }
 0x31d   : > { %3511 = vrot.lane.b32.xlu1 %v10019_v57, %s5495_s15  ;;  %3329 = vrot.lane.b32.xlu2 %v10057_v38, %s5492_s12  ;;  %v3818_v57 = vsel %vm3816_vm2, %v3745_v39, %v8002_v26 }
 0x31e   : > { %v3891_v17 = vsel %vm3889_vm4, %v3818_v57, %v8146_v14  ;;  %v10058_v57 = vld [vmem:[#allocation94_spill] sm:$0xff] }
 0x31f   : > { %v8233_v24 = vpop.permute.xlu1 %3311  ;;  %v3492_v60 = vpop.permute.xlu2 %3491 }
 0x320   : > { %3401 = vrot.lane.b32.xlu0 %v7782_v62, %s5493_s13 }
 0x322   : > { %v3346_v25 = vpop.permute.xlu0 %3345 }
 0x323   : > { %v3964_v0 = vsel %vm3962_vm3, %v3891_v17, %v3346_v25 }
 0x325   : > { %3473 = vrot.lane.b32.xlu1 %v9982_v63, %s5494_s14  ;;  %3387 = vrot.lane.b32.xlu2 %v7724_v1, %s5493_s13 }
 0x327   : > { %v3418_v9 = vpop.permute.xlu1 %3417  ;;  %v3454_v14 = vpop.permute.xlu2 %3453 }
 0x328   : > { %v4037_v27 = vsel %vm4035_vm5, %v3964_v0, %v3418_v9  ;;  %3545 = vrot.lane.b32.xlu0 %v7444_v15, %s5495_s15  ;;  %v3567_v0 = vsel %vm3561_vm13, %v7826_v48, %v10058_v57 }
 0x329   : > { %v4110_v26 = vsel %vm4108_vm6, %v4037_v27, %v3490_v51  ;;  %v3674_v51 = vsel %vm3670_vm14, %v3567_v0, %v7538_v41 }
 0x32a   : > { %4860 = vmatmul.msk.bf16.vlgmr.msra.gmra.mxu0 %vm4221_vm7, %v4110_v26  ;;  %v8260_v63 = vpop.permute.xlu0 %3315  ;;  %v3747_v17 = vsel %vm3743_vm15, %v3674_v51, %v7862_v46 }
 0x32d   : > { %3459 = vrot.lane.b32.xlu1 %v9970_v30, %s5494_s14  ;;  %3355 = vrot.lane.b32.xlu2 %v7558_v3, %s5493_s13  ;;  %v3820_v30 = vsel %vm3816_vm2, %v3747_v17, %v8006_v5  ;;  %v10059_v5 = vld [vmem:[#allocation64_spill] sm:$0xff] }
 0x32e   : > { %v3893_v9 = vsel %vm3889_vm4, %v3820_v30, %v8150_v33  ;;  %v3618_v33 = vsel %vm3561_vm13, %v7648_v21, %v10059_v5  ;;  %v10066_v5 = vld [vmem:[#allocation156_spill] sm:$0xff] }
 0x32f   : > { %v8264_v39 = vpop.permute.xlu1 %3317  ;;  %v3526_v25 = vpop.permute.xlu2 %3525  ;;  %v3708_v0 = vsel %vm3670_vm14, %v3618_v33, %v7712_v42 }
 0x330   : > { %3369 = vrot.lane.b32.xlu0 %v7632_v35, %s5493_s13 }
 0x332   : > { %v3348_v27 = vpop.permute.xlu0 %3347 }
 0x333   : > { %v3966_v41 = vsel %vm3962_vm3, %v3893_v9, %v3348_v27 }
 0x335   : > { %3531 = vrot.lane.b32.xlu1 %v10040_v36, %s5495_s15  ;;  %3427 = vrot.lane.b32.xlu2 %v9939_v10, %s5494_s14  ;;  %v3781_v10 = vsel %vm3743_vm15, %v3708_v0, %v7930_v47 }
 0x337   : > { %v3420_v26 = vpop.permute.xlu1 %3419  ;;  %v3494_v36 = vpop.permute.xlu2 %3493 }
 0x338   : > { %v4039_v57 = vsel %vm4035_vm5, %v3966_v41, %v3420_v26  ;;  %3441 = vrot.lane.b32.xlu0 %v9952_v52, %s5494_s14  ;;  %v10063_v26 = vld [vmem:[#allocation164_spill] sm:$0xff] }
 0x339   : > { %v4112_v46 = vsel %vm4108_vm6, %v4039_v57, %v3492_v60  ;;  %v3854_v60 = vsel %vm3816_vm2, %v3781_v10, %v8074_v2  ;;  %v10060_v2 = vld [vmem:[#allocation84_spill] sm:$0xff]  ;;  %v10065_v57 = vld [vmem:[#allocation181_spill] sm:$0xff] }
 0x33a   : > { %4861 = vmatmul.msk.bf16.gmra.mxu0 %vm4221_vm7, %v4112_v46  ;;  %v8296_v51 = vpop.permute.xlu0 %3321  ;;  %v3927_v52 = vsel %vm3889_vm4, %v3854_v60, %v3310_v49  ;;  %v10061_v49 = vld [vmem:[#allocation138_spill] sm:$0xff] }
 0x33b   : > { %v3570_v27 = vsel %vm3561_vm13, %v10061_v49, %v10060_v2  ;;  %v10069_v2 = vld [vmem:[#allocation150_spill] sm:$0xff] }
 0x33d   : > { %3499 = vrot.lane.b32.xlu1 %v10008_v43, %s5495_s15  ;;  %3513 = vrot.lane.b32.xlu2 %v10021_v54, %s5495_s15  ;;  %v10062_v54 = vld [vmem:[#allocation133_spill] sm:$0xff] }
 0x33f   : > { %v3382_v17 = vpop.permute.xlu1 %3381  ;;  %v3456_v47 = vpop.permute.xlu2 %3455 }
 0x340   : > { %v4000_v30 = vsel %vm3962_vm3, %v3927_v52, %v3382_v17  ;;  %3331 = vrot.lane.b32.xlu0 %v10053_v11, %s5492_s12  ;;  %v10064_v11 = vld [vmem:[#allocation87_spill] sm:$0xff] }
 0x341   : > { %v4073_v42 = vsel %vm4035_vm5, %v4000_v30, %v3454_v14  ;;  %v3676_v14 = vsel %vm3670_vm14, %v3570_v27, %v10062_v54  ;;  %v10067_v52 = vld [vmem:[#allocation63_spill] sm:$0xff]  ;;  %v10068_v30 = vld [vmem:[#allocation105_spill] sm:$0xff] }
 0x342   : > { %v4146_v9 = vsel %vm4108_vm6, %v4073_v42, %v3526_v25  ;;  %v3350_v43 = vpop.permute.xlu0 %3349  ;;  %v3749_v25 = vsel %vm3743_vm15, %v3676_v14, %v10063_v26  ;;  %v3591_v42 = vsel %vm3561_vm13, %v7558_v3, %v10068_v30  ;;  %v10071_v14 = vld [vmem:[#allocation185_spill] sm:$0xff] }
 0x343   : > { %4878 = vmatmul.msk.bf16.vlgmr.msra.gmra.mxu2 %vm4221_vm7, %v4146_v9  ;;  %v3822_v46 = vsel %vm3816_vm2, %v3749_v25, %v10065_v57  ;;  %v3690_v27 = vsel %vm3670_vm14, %v3591_v42, %v10069_v2  ;;  %v10072_v25 = vld [vmem:[#allocation72_spill] sm:$0xff] }
 0x344   : > { %v3895_v33 = vsel %vm3889_vm4, %v3822_v46, %v8120_v12  ;;  %v10070_v12 = vld [vmem:[#allocation168_spill] sm:$0xff] }
 0x345   : > { %3403 = vrot.lane.b32.xlu1 %v7800_v28, %s5493_s13  ;;  %3475 = vrot.lane.b32.xlu2 %v10064_v11, %s5494_s14  ;;  %v3968_v10 = vsel %vm3962_vm3, %v3895_v33, %v3350_v43  ;;  %v3763_v43 = vsel %vm3743_vm15, %v3690_v27, %v10070_v12  ;;  %v10074_v11 = vld [vmem:[#allocation118_spill] sm:$0xff]  ;;  %v10075_v57 = vld [vmem:[#allocation152_spill] sm:$0xff] }
 0x346   : > { %v3836_v26 = vsel %vm3816_vm2, %v3763_v43, %v10071_v14  ;;  %v3621_v46 = vsel %vm3561_vm13, %v10075_v57, %v10074_v11  ;;  %v10080_v11 = vld [vmem:[#allocation51_spill] sm:$0xff] }
 0x347   : > { %v3364_v41 = vpop.permute.xlu1 %3363  ;;  %v3528_v0 = vpop.permute.xlu2 %3527  ;;  %v3909_v3 = vsel %vm3889_vm4, %v3836_v26, %v8191_v61  ;;  %v10078_v61 = vld [vmem:[#allocation48_spill] sm:$0xff] }
 0x348   : > { %3389 = vrot.lane.b32.xlu0 %v10066_v5, %s5493_s13  ;;  %v3982_v33 = vsel %vm3962_vm3, %v3909_v3, %v3364_v41 }
 0x34a   : > { %v3422_v60 = vpop.permute.xlu0 %3421 }
 0x34b   : > { %v4041_v17 = vsel %vm4035_vm5, %v3968_v10, %v3422_v60  ;;  %v10076_v60 = vld [vmem:[#allocation66_spill] sm:$0xff] }
 0x34c   : > { %v4114_v9 = vsel %vm4108_vm6, %v4041_v17, %v3494_v36  ;;  %v10073_v36 = vld [vmem:[#allocation30_spill] sm:$0xff]  ;;  %v3710_v17 = vsel %vm3670_vm14, %v3621_v46, %v10076_v60  ;;  %v10082_v46 = vld [vmem:[#allocation140_spill] sm:$0xff] }
 0x34d   : > { %3547 = vrot.lane.b32.xlu1 %v10067_v52, %s5495_s15  ;;  %4862 = vmatmul.msk.bf16.gmra.mxu0 %vm4221_vm7, %v4114_v9  ;;  %v10077_v9 = vld [vmem:[#allocation173_spill] sm:$0xff] }
 0x34e   : > { %3461 = vrot.lane.b32.xlu2 %v10072_v25, %s5494_s14  ;;  %v3783_v2 = vsel %vm3743_vm15, %v3710_v17, %v10077_v9  ;;  %v10079_v25 = vld [vmem:[#allocation27_spill] sm:$0xff]  ;;  %v10084_v17 = vld [vmem:[#allocation24_spill] sm:$0xff] }
 0x34f   : > { %v3436_v54 = vpop.permute.xlu1 %3435  ;;  %v3496_v10 = vpop.permute.xlu2 %3495  ;;  %v3856_v12 = vsel %vm3816_vm2, %v3783_v2, %v8078_v23  ;;  %v10087_v2 = vld [vmem:[#allocation50_spill] sm:$0xff] }
 0x350   : > { %3357 = vrot.lane.b32.xlu0 %v10073_v36, %s5493_s13  ;;  %v4055_v30 = vsel %vm4035_vm5, %v3982_v33, %v3436_v54  ;;  %v3929_v41 = vsel %vm3889_vm4, %v3856_v12, %v8233_v24  ;;  %v10081_v24 = vld [vmem:[#allocation15_spill] sm:$0xff] }
 0x351   : > { %v3573_v33 = vsel %vm3561_vm13, %v10082_v46, %v10081_v24 }
 0x352   : > { %v3508_v42 = vpop.permute.xlu0 %3507 }
 0x353   : > { %v4128_v27 = vsel %vm4108_vm6, %v4055_v30, %v3508_v42  ;;  %v10085_v30 = vld [vmem:[#allocation103_spill] sm:$0xff]  ;;  %v10086_v42 = vld [vmem:[#allocation102_spill] sm:$0xff] }
 0x354   : > { %4869 = vmatmul.msk.bf16.vlgmr.msra.gmra.mxu1 %vm4221_vm7, %v4128_v27 }
 0x355   : > { %3371 = vrot.lane.b32.xlu1 %v10078_v61, %s5493_s13 }
 0x356   : > { %3533 = vrot.lane.b32.xlu2 %v10042_v37, %s5495_s15  ;;  %v10083_v37 = vld [vmem:[#allocation145_spill] sm:$0xff] }
 0x357   : > { %v3384_v43 = vpop.permute.xlu1 %3383  ;;  %v3400_v3 = vpop.permute.xlu2 %3399 }
 0x358   : > { %v4002_v54 = vsel %vm3962_vm3, %v3929_v41, %v3384_v43  ;;  %3429 = vrot.lane.b32.xlu0 %v10079_v25, %s5494_s14 }
 0x359   : > { %v4075_v14 = vsel %vm4035_vm5, %v4002_v54, %v3456_v47  ;;  %v3678_v47 = vsel %vm3670_vm14, %v3573_v33, %v10083_v37  ;;  %v10091_v37 = vld [vmem:[#allocation186_spill] sm:$0xff] }
 0x35a   : > { %v4148_v26 = vsel %vm4108_vm6, %v4075_v14, %v3528_v0  ;;  %v3352_v23 = vpop.permute.xlu0 %3351  ;;  %v3751_v0 = vsel %vm3743_vm15, %v3678_v47, %v10084_v17  ;;  %v10088_v14 = vld [vmem:[#allocation106_spill] sm:$0xff]  ;;  %v10092_v47 = vld [vmem:[#allocation4_spill] sm:$0xff] }
 0x35b   : > { %4879 = vmatmul.msk.bf16.gmra.mxu2 %vm4221_vm7, %v4148_v26  ;;  %v3824_v9 = vsel %vm3816_vm2, %v3751_v0, %v10086_v42  ;;  %v3594_v26 = vsel %vm3561_vm13, %v10073_v36, %v10088_v14 }
 0x35c   : > { %v3897_v27 = vsel %vm3889_vm4, %v3824_v9, %v8158_v7  ;;  %v10090_v7 = vld [vmem:[#allocation169_spill] sm:$0xff]  ;;  %v10094_v9 = vld [vmem:[#allocation131_spill] sm:$0xff] }
 0x35d   : > { %3443 = vrot.lane.b32.xlu1 %v10080_v11, %s5494_s14  ;;  %v3970_v41 = vsel %vm3962_vm3, %v3897_v27, %v3352_v23  ;;  %v10089_v11 = vld [vmem:[#allocation151_spill] sm:$0xff] }
 0x35e   : > { %3501 = vrot.lane.b32.xlu2 %v10085_v30, %s5495_s15  ;;  %v3692_v24 = vsel %vm3670_vm14, %v3594_v26, %v10089_v11  ;;  %v10098_v11 = vld [vmem:[#allocation134_spill] sm:$0xff] }
 0x35f   : > { %v3366_v60 = vpop.permute.xlu1 %3365  ;;  %v3544_v12 = vpop.permute.xlu2 %3543  ;;  %v3765_v23 = vsel %vm3743_vm15, %v3692_v24, %v10090_v7  ;;  %v10099_v24 = vld [vmem:[#allocation74_spill] sm:$0xff] }
 0x360   : > { %3515 = vrot.lane.b32.xlu0 %v10087_v2, %s5495_s15  ;;  %v10095_v2 = vld [vmem:[#allocation157_spill] sm:$0xff] }
 0x361   : > { %v3645_v27 = vsel %vm3561_vm13, %v10095_v2, %v10094_v9  ;;  %v10104_v9 = vld [vmem:[#allocation153_spill] sm:$0xff] }
 0x362   : > { %v3424_v43 = vpop.permute.xlu0 %3423 }
 0x363   : > { %v4043_v54 = vsel %vm4035_vm5, %v3970_v41, %v3424_v43  ;;  %v10096_v43 = vld [vmem:[#allocation6_spill] sm:$0xff] }
 0x364   : > { %v4116_v25 = vsel %vm4108_vm6, %v4043_v54, %v3496_v10  ;;  %v10093_v10 = vld [vmem:[#allocation88_spill] sm:$0xff]  ;;  %v10097_v54 = vld [vmem:[#allocation179_spill] sm:$0xff] }
 0x365   : > { %3333 = vrot.lane.b32.xlu1 %v7444_v15, %s5492_s12  ;;  %4863 = vmatmul.msk.bf16.gmra.mxu0 %vm4221_vm7, %v4116_v25  ;;  %v3838_v15 = vsel %vm3816_vm2, %v3765_v23, %v10091_v37  ;;  %v10100_v37 = vld [vmem:[#allocation29_spill] sm:$0xff] }
 0x366   : > { %3405 = vrot.lane.b32.xlu2 %v10092_v47, %s5493_s13  ;;  %v3911_v36 = vsel %vm3889_vm4, %v3838_v15, %v8198_v20  ;;  %v3726_v20 = vsel %vm3670_vm14, %v3645_v27, %v10096_v43  ;;  %v10105_v27 = vld [vmem:[#allocation49_spill] sm:$0xff]  ;;  %v10106_v43 = vld [vmem:[#allocation170_spill] sm:$0xff] }
 0x367   : > { %v3438_v33 = vpop.permute.xlu1 %3437  ;;  %v3984_v17 = vsel %vm3962_vm3, %v3911_v36, %v3366_v60  ;;  %v3368_v0 = vpop.permute.xlu2 %3367  ;;  %v3799_v60 = vsel %vm3743_vm15, %v3726_v20, %v10097_v54 }
 0x368   : > { %3477 = vrot.lane.b32.xlu0 %v10093_v10, %s5494_s14  ;;  %v4057_v30 = vsel %vm4035_vm5, %v3984_v17, %v3438_v33  ;;  %v3872_v26 = vsel %vm3816_vm2, %v3799_v60, %v8110_v45  ;;  %v10101_v10 = vld [vmem:[#allocation125_spill] sm:$0xff]  ;;  %v10108_v60 = vld [vmem:[#allocation52_spill] sm:$0xff] }
 0x36a   : > { %v3510_v42 = vpop.permute.xlu0 %3509 }
 0x36b   : > { %v4130_v41 = vsel %vm4108_vm6, %v4057_v30, %v3510_v42  ;;  %v10103_v42 = vld [vmem:[#allocation113_spill] sm:$0xff] }
 0x36c   : > { %4870 = vmatmul.msk.bf16.gmra.mxu1 %vm4221_vm7, %v4130_v41 }
 0x36d   : > { %3391 = vrot.lane.b32.xlu1 %v10095_v2, %s5493_s13  ;;  %v3624_v2 = vsel %vm3561_vm13, %v10104_v9, %v10103_v42  ;;  %v10112_v42 = vld [vmem:[#allocation143_spill] sm:$0xff] }
 0x36e   : > { %3549 = vrot.lane.b32.xlu2 %v10098_v11, %s5495_s15 }
 0x36f   : > { %v3328_v14 = vpop.permute.xlu1 %3327  ;;  %v3440_v33 = vpop.permute.xlu2 %3439 }
 0x370   : > { %v3945_v25 = vsel %vm3889_vm4, %v3872_v26, %v3328_v14  ;;  %3463 = vrot.lane.b32.xlu0 %v10099_v24, %s5494_s14  ;;  %v10109_v26 = vld [vmem:[#allocation37_spill] sm:$0xff] }
 0x371   : > { %v4018_v7 = vsel %vm3962_vm3, %v3945_v25, %v3400_v3  ;;  %v10102_v3 = vld [vmem:[#allocation32_spill] sm:$0xff] }
 0x372   : > { %v3472_v23 = vpop.permute.xlu0 %3471 }
 0x373   : > { %v4091_v15 = vsel %vm4035_vm5, %v4018_v7, %v3472_v23 }
 0x374   : > { %v4164_v36 = vsel %vm4108_vm6, %v4091_v15, %v3544_v12  ;;  %v3712_v12 = vsel %vm3670_vm14, %v3624_v2, %v10105_v27  ;;  %v10110_v15 = vld [vmem:[#allocation55_spill] sm:$0xff] }
 0x375   : > { %3359 = vrot.lane.b32.xlu1 %v10100_v37, %s5493_s13  ;;  %4887 = vmatmul.msk.bf16.vlgmr.msra.gmra.mxu3 %vm4221_vm7, %v4164_v36  ;;  %v3785_v20 = vsel %vm3743_vm15, %v3712_v12, %v10106_v43  ;;  %v10114_v12 = vld [vmem:[#allocation167_spill] sm:$0xff] }
 0x376   : > { %3373 = vrot.lane.b32.xlu2 %v7648_v21, %s5493_s13  ;;  %v10107_v21 = vld [vmem:[#allocation187_spill] sm:$0xff] }
 0x377   : > { %v3386_v45 = vpop.permute.xlu1 %3385  ;;  %v3330_v17 = vpop.permute.xlu2 %3329  ;;  %v3858_v54 = vsel %vm3816_vm2, %v3785_v20, %v10107_v21  ;;  %v10116_v21 = vld [vmem:[#allocation184_spill] sm:$0xff] }
 0x378   : > { %3535 = vrot.lane.b32.xlu0 %v10101_v10, %s5495_s15  ;;  %v3931_v14 = vsel %vm3889_vm4, %v3858_v54, %v8207_v40  ;;  %v10113_v40 = vld [vmem:[#allocation146_spill] sm:$0xff] }
 0x379   : > { %v4004_v25 = vsel %vm3962_vm3, %v3931_v14, %v3386_v45 }
 0x37a   : > { %v3458_v30 = vpop.permute.xlu0 %3457 }
 0x37b   : > { %v4077_v7 = vsel %vm4035_vm5, %v4004_v25, %v3458_v30  ;;  %v10115_v30 = vld [vmem:[#allocation98_spill] sm:$0xff]  ;;  %v10118_v25 = vld [vmem:[#allocation5_spill] sm:$0xff] }
 0x37c   : > { %v3597_v20 = vsel %vm3561_vm13, %v10100_v37, %v10115_v30 }
 0x37d   : > { %3431 = vrot.lane.b32.xlu1 %v10102_v3, %s5494_s14  ;;  %v10111_v3 = vld [vmem:[#allocation97_spill] sm:$0xff] }
 0x37e   : > { %3445 = vrot.lane.b32.xlu2 %v10108_v60, %s5494_s14  ;;  %v3576_v2 = vsel %vm3561_vm13, %v10112_v42, %v10111_v3  ;;  %v10117_v60 = vld [vmem:[#allocation11_spill] sm:$0xff] }
 0x37f   : > { %v3354_v41 = vpop.permute.xlu1 %3353  ;;  %v8462_v24 = vpop.permute.xlu2 %3387  ;;  %v3680_v27 = vsel %vm3670_vm14, %v3576_v2, %v10113_v40  ;;  %v3694_v14 = vsel %vm3670_vm14, %v3597_v20, %v10117_v60  ;;  %v10124_v20 = vld [vmem:[#allocation73_spill] sm:$0xff]  ;;  %v10126_v60 = vld [vmem:[#allocation78_spill] sm:$0xff] }
 0x380   : > { %3503 = vrot.lane.b32.xlu0 %v10109_v26, %s5495_s15  ;;  %v3753_v43 = vsel %vm3743_vm15, %v3680_v27, %v10114_v12 }
 0x381   : > { %v3826_v54 = vsel %vm3816_vm2, %v3753_v43, %v10116_v21 }
 0x382   : > { %v3530_v23 = vpop.permute.xlu0 %3529  ;;  %v3899_v26 = vsel %vm3889_vm4, %v3826_v54, %v8162_v31  ;;  %v10121_v31 = vld [vmem:[#allocation90_spill] sm:$0xff]  ;;  %v10125_v54 = vld [vmem:[#allocation163_spill] sm:$0xff] }
 0x383   : > { %v4150_v36 = vsel %vm4108_vm6, %v4077_v7, %v3530_v23  ;;  %v10119_v7 = vld [vmem:[#allocation21_spill] sm:$0xff]  ;;  %v3972_v37 = vsel %vm3962_vm3, %v3899_v26, %v3354_v41 }
 0x384   : > { %4880 = vmatmul.msk.bf16.gmra.mxu2 %vm4221_vm7, %v4150_v36  ;;  %v3767_v23 = vsel %vm3743_vm15, %v3694_v14, %v10119_v7  ;;  %v10120_v36 = vld [vmem:[#allocation100_spill] sm:$0xff] }
 0x385   : > { %3517 = vrot.lane.b32.xlu1 %v10110_v15, %s5495_s15  ;;  %v3840_v3 = vsel %vm3816_vm2, %v3767_v23, %v10120_v36  ;;  %v10127_v14 = vld [vmem:[#allocation180_spill] sm:$0xff] }
 0x386   : > { %3335 = vrot.lane.b32.xlu2 %v10067_v52, %s5492_s12  ;;  %v3913_v2 = vsel %vm3889_vm4, %v3840_v3, %v8156_v22  ;;  %v10123_v22 = vld [vmem:[#allocation137_spill] sm:$0xff]  ;;  %v10128_v3 = vld [vmem:[#allocation147_spill] sm:$0xff] }
 0x387   : > { %v3426_v45 = vpop.permute.xlu1 %3425  ;;  %v8492_v15 = vpop.permute.xlu2 %3355  ;;  %v3986_v27 = vsel %vm3962_vm3, %v3913_v2, %v3368_v0 }
 0x388   : > { %3407 = vrot.lane.b32.xlu0 %v10118_v25, %s5493_s13  ;;  %v4045_v52 = vsel %vm4035_vm5, %v3972_v37, %v3426_v45  ;;  %v4059_v41 = vsel %vm4035_vm5, %v3986_v27, %v3440_v33  ;;  %v10122_v45 = vld [vmem:[#allocation159_spill] sm:$0xff]  ;;  %v10131_v27 = vld [vmem:[#allocation41_spill] sm:$0xff] }
 0x389   : > { %v3648_v0 = vsel %vm3561_vm13, %v10122_v45, %v10124_v20  ;;  %v10135_v20 = vld [vmem:[#allocation175_spill] sm:$0xff] }
 0x38a   : > { %v3498_v42 = vpop.permute.xlu0 %3497  ;;  %v3728_v33 = vsel %vm3670_vm14, %v3648_v0, %v10125_v54 }
 0x38b   : > { %v4118_v40 = vsel %vm4108_vm6, %v4045_v52, %v3498_v42  ;;  %v3801_v26 = vsel %vm3743_vm15, %v3728_v33, %v10127_v14 }
 0x38c   : > { %4864 = vmatmul.msk.bf16.gmra.mxu0 %vm4221_vm7, %v4118_v40  ;;  %v3874_v7 = vsel %vm3816_vm2, %v3801_v26, %v8114_v44  ;;  %v10130_v40 = vld [vmem:[#allocation121_spill] sm:$0xff]  ;;  %v10136_v26 = vld [vmem:[#allocation104_spill] sm:$0xff] }
 0x38d   : > { %3479 = vrot.lane.b32.xlu1 %v10121_v31, %s5494_s14  ;;  %v3947_v37 = vsel %vm3889_vm4, %v3874_v7, %v3330_v17  ;;  %v10129_v31 = vld [vmem:[#allocation126_spill] sm:$0xff] }
 0x38e   : > { %3393 = vrot.lane.b32.xlu2 %v10122_v45, %s5493_s13  ;;  %v10134_v45 = vld [vmem:[#allocation53_spill] sm:$0xff] }
 0x38f   : > { %v3512_v12 = vpop.permute.xlu1 %3511  ;;  %v3428_v30 = vpop.permute.xlu2 %3427 }
 0x390   : > { %v4132_v43 = vsel %vm4108_vm6, %v4059_v41, %v3512_v12  ;;  %3551 = vrot.lane.b32.xlu0 %v10123_v22, %s5495_s15  ;;  %v3627_v41 = vsel %vm3561_vm13, %v10131_v27, %v10130_v40  ;;  %v10132_v12 = vld [vmem:[#allocation34_spill] sm:$0xff] }
 0x391   : > { %4871 = vmatmul.msk.bf16.gmra.mxu1 %vm4221_vm7, %v4132_v43 }
 0x392   : > { %v3402_v21 = vpop.permute.xlu0 %3401 }
 0x393   : > { %v4020_v36 = vsel %vm3962_vm3, %v3947_v37, %v3402_v21 }
 0x395   : > { %3465 = vrot.lane.b32.xlu1 %v10126_v60, %s5494_s14  ;;  %v8551_v60 = vld [vmem:[%s9312_s3] ss:$0 sm:$0xff] }
 0x396   : > { %3361 = vrot.lane.b32.xlu2 %v10128_v3, %s5493_s13 }
 0x397   : > { %v3474_v23 = vpop.permute.xlu1 %3473  ;;  %v3514_v52 = vpop.permute.xlu2 %3513 }
 0x398   : > { %3375 = vrot.lane.b32.xlu0 %v10075_v57, %s5493_s13  ;;  %v4093_v2 = vsel %vm4035_vm5, %v4020_v36, %v3474_v23  ;;  %v10133_v57 = vld [vmem:[#allocation158_spill] sm:$0xff]  ;;  %v10137_v23 = vld [vmem:[#allocation111_spill] sm:$0xff] }
 0x399   : > { %v3714_v43 = vsel %vm3670_vm14, %v3627_v41, %v10133_v57  ;;  %v3600_v37 = vsel %vm3561_vm13, %v10128_v3, %v10137_v23  ;;  %v10139_v41 = vld [vmem:[#allocation89_spill] sm:$0xff]  ;;  %v10141_v3 = vld [vmem:[#allocation114_spill] sm:$0xff] }
 0x39a   : > { %v3546_v42 = vpop.permute.xlu0 %3545  ;;  %v3787_v0 = vsel %vm3743_vm15, %v3714_v43, %v10135_v20 }
 0x39b   : > { %v4166_v44 = vsel %vm4108_vm6, %v4093_v2, %v3546_v42  ;;  %v3860_v54 = vsel %vm3816_vm2, %v3787_v0, %v8086_v50  ;;  %v10138_v2 = vld [vmem:[#allocation39_spill] sm:$0xff] }
 0x39c   : > { %4888 = vmatmul.msk.bf16.gmra.mxu3 %vm4221_vm7, %v4166_v44  ;;  %v3933_v14 = vsel %vm3889_vm4, %v3860_v54, %v8260_v63  ;;  %v3696_v44 = vsel %vm3670_vm14, %v3600_v37, %v10138_v2  ;;  %v10144_v54 = vld [vmem:[#allocation14_spill] sm:$0xff] }
 0x39d   : > { %3537 = vrot.lane.b32.xlu1 %v10129_v31, %s5495_s15  ;;  %v4006_v7 = vsel %vm3962_vm3, %v3933_v14, %v8462_v24  ;;  %v3579_v24 = vsel %vm3561_vm13, %v7516_v32, %v10139_v41 }
 0x39e   : > { %3433 = vrot.lane.b32.xlu2 %v10132_v12, %s5494_s14  ;;  %v10140_v12 = vld [vmem:[#allocation171_spill] sm:$0xff] }
 0x39f   : > { %v3460_v17 = vpop.permute.xlu1 %3459  ;;  %v8544_v21 = vpop.permute.xlu2 %3475  ;;  %v3769_v57 = vsel %vm3743_vm15, %v3696_v44, %v10140_v12 }
 0x3a0   : > { %3447 = vrot.lane.b32.xlu0 %v10134_v45, %s5494_s14  ;;  %v4079_v50 = vsel %vm4035_vm5, %v4006_v7, %v3460_v17  ;;  %v10142_v17 = vld [vmem:[#allocation139_spill] sm:$0xff]  ;;  %v10143_v45 = vld [vmem:[#allocation188_spill] sm:$0xff]  ;;  %v10145_v7 = vld [vmem:[#allocation13_spill] sm:$0xff] }
 0x3a1   : > { %v3682_v43 = vsel %vm3670_vm14, %v3579_v24, %v10142_v17  ;;  %v3842_v20 = vsel %vm3816_vm2, %v3769_v57, %v10143_v45  ;;  %v10147_v17 = vld [vmem:[#allocation124_spill] sm:$0xff] }
 0x3a2   : > { %v3370_v33 = vpop.permute.xlu0 %3369  ;;  %v3755_v32 = vsel %vm3743_vm15, %v3682_v43, %v10144_v54  ;;  %v3915_v14 = vsel %vm3889_vm4, %v3842_v20, %v8209_v59  ;;  %v10148_v43 = vld [vmem:[#allocation76_spill] sm:$0xff]  ;;  %v10149_v20 = vld [vmem:[#allocation77_spill] sm:$0xff] }
 0x3a3   : > { %v3828_v23 = vsel %vm3816_vm2, %v3755_v32, %v10145_v7  ;;  %v3988_v37 = vsel %vm3962_vm3, %v3915_v14, %v3370_v33  ;;  %v10150_v14 = vld [vmem:[#allocation174_spill] sm:$0xff] }
 0x3a5   : > { %3505 = vrot.lane.b32.xlu1 %v10136_v26, %s5495_s15 }
 0x3a6   : > { %3519 = vrot.lane.b32.xlu2 %v10141_v3, %s5495_s15 }
 0x3a7   : > { %v3532_v36 = vpop.permute.xlu1 %3531  ;;  %v4307_v42 = vpop.f32.mrf.mxu0 }
 0x3a8   : > { %v4308_v63 = vadd.f32 %v8551_v60, %v4307_v42  ;;  %v4152_v40 = vsel %vm4108_vm6, %v4079_v50, %v3532_v36  ;;  %3337 = vrot.lane.b32.xlu0 %v10098_v11, %s5492_s12  ;;  %v3462_v26 = vpop.permute.xlu2 %3461  ;;  %v3901_v36 = vsel %vm3889_vm4, %v3828_v23, %v8132_v8 }
 0x3a9   : > { %4881 = vmatmul.msk.bf16.gmra.mxu2 %vm4221_vm7, %v4152_v40  ;;  %v3974_v42 = vsel %vm3962_vm3, %v3901_v36, %v8492_v15 }
 0x3aa   : > { %v4447_v0 = vmax.f32 %v4308_v63, 0.0  ;;  %v3442_v50 = vpop.permute.xlu0 %3441  ;;  %v4047_v44 = vsel %vm4035_vm5, %v3974_v42, %v3428_v30 }
 0x3ab   : > { %v4061_v59 = vsel %vm4035_vm5, %v3988_v37, %v3442_v50  ;;  %v10151_v50 = vld [vmem:[#allocation122_spill] sm:$0xff] }
 0x3ac   : > { %v4479_v11 = vpack.c.bf16 %v4447_v0, %v4447_v0  ;;  %v4134_v2 = vsel %vm4108_vm6, %v4061_v59, %v3514_v52  ;;  %v10146_v52 = vld [vmem:[#allocation7_spill] sm:$0xff]  ;;  %v4543_v41 = vsel %vm1864_vm9, %v4447_v0, 0.0  ;;  %v3630_v36 = vsel %vm3561_vm13, %v7692_v53, %v10151_v50  ;;  %v10152_v59 = vld [vmem:[#allocation68_spill] sm:$0xff]  ;;  %v10162_v50 = vld [vmem:[#allocation46_spill] sm:$0xff] }
 0x3ad   : > { %3409 = vrot.lane.b32.xlu1 %v7818_v34, %s5493_s13  ;;  %4872 = vmatmul.msk.bf16.gmra.mxu1 %vm4221_vm7, %v4134_v2  ;;  %v4614_v34 = vmul.f32 %v4447_v0, %v4447_v0  ;;  %v10153_v2 = vld [vmem:[#allocation58_spill] sm:$0xff] }
 0x3ae   : > { %4511 = vst.msk [vmem:[%s8590_s9] sm:$0xf] %vm290_vm0, %v4479_v11  ;;  %3323 = vrot.lane.b32.xlu2 %v10101_v10, %s5492_s12  ;;  %v3651_v10 = vsel %vm3561_vm13, %v10148_v43, %v10147_v17 }
 0x3af   : > { %v3500_v33 = vpop.permute.xlu1 %3499  ;;  %v4309_v63 = vpop.f32.mrf.mxu0  ;;  %v3730_v54 = vsel %vm3670_vm14, %v3651_v10, %v10149_v20  ;;  %v4646_v32 = vsel %vm1864_vm9, %v4614_v34, 0.0  ;;  %v10156_v34 = vld [vmem:[#allocation82_spill] sm:$0xff]  ;;  %v10158_v20 = vld [vmem:[#allocation116_spill] sm:$0xff] }
 0x3b0   : > { %v4310_v8 = vadd.f32 %v8551_v60, %v4309_v63  ;;  %v4120_v40 = vsel %vm4108_vm6, %v4047_v44, %v3500_v33  ;;  %3481 = vrot.lane.b32.xlu0 %v10146_v52, %s5494_s14  ;;  %v3534_v30 = vpop.permute.xlu2 %3533  ;;  %v3803_v7 = vsel %vm3743_vm15, %v3730_v54, %v10150_v14  ;;  %v3716_v44 = vsel %vm3670_vm14, %v3630_v36, %v10153_v2  ;;  %v10154_v63 = vld [vmem:[#allocation91_spill] sm:$0xff] }
 0x3b1   : > { %4865 = vmatmul.msk.bf16.gmra.mxu0 %vm4221_vm7, %v4120_v40  ;;  %v3876_v42 = vsel %vm3816_vm2, %v3803_v7, %v10152_v59  ;;  %v10161_v7 = vld [vmem:[#allocation40_spill] sm:$0xff] }
 0x3b2   : > { %v4448_v15 = vmax.f32 %v4310_v8, 0.0  ;;  %v3332_v3 = vpop.permute.xlu0 %3331  ;;  %v10155_v8 = vld [vmem:[#allocation176_spill] sm:$0xff] }
 0x3b3   : > { %v3949_v33 = vsel %vm3889_vm4, %v3876_v42, %v3332_v3  ;;  %v3789_v40 = vsel %vm3743_vm15, %v3716_v44, %v10155_v8  ;;  %v10163_v8 = vld [vmem:[#allocation112_spill] sm:$0xff] }
 0x3b4   : > { %v4480_v24 = vpack.c.bf16 %v4448_v15, %v4448_v15  ;;  %v4544_v12 = vsel %vm1864_vm9, %v4448_v15, 0.0  ;;  %v4615_v57 = vmul.f32 %v4448_v15, %v4448_v15  ;;  %v3862_v53 = vsel %vm3816_vm2, %v3789_v40, %v8090_v4  ;;  %v10164_v40 = vld [vmem:[#allocation36_spill] sm:$0xff] }
 0x3b5   : > { %v8619_v45 = vadd.f32 %v4544_v12, %v4543_v41  ;;  %3395 = vrot.lane.b32.xlu1 %v10148_v43, %s5493_s13  ;;  %v3935_v52 = vsel %vm3889_vm4, %v3862_v53, %v8264_v39  ;;  %v10157_v39 = vld [vmem:[#allocation56_spill] sm:$0xff] }
 0x3b6   : > { %4512 = vst.msk [vmem:[%s8590_s9 + $0x4] sm:$0xf] %vm290_vm0, %v4480_v24  ;;  %v4647_v0 = vsel %vm1864_vm9, %v4615_v57, 0.0  ;;  %3553 = vrot.lane.b32.xlu2 %v10154_v63, %s5495_s15 }
 0x3b7   : > { %v8631_v23 = vadd.f32 %v4647_v0, %v4646_v32  ;;  %v3404_v37 = vpop.permute.xlu1 %3403  ;;  %v4312_v11 = vpop.f32.mrf.mxu0  ;;  %v10160_v0 = vld [vmem:[#allocation31_spill] sm:$0xff] }
 0x3b8   : > { %3467 = vrot.lane.b32.xlu0 %v10156_v34, %s5494_s14  ;;  %v3502_v15 = vpop.permute.xlu2 %3501  ;;  %v4022_v41 = vsel %vm3962_vm3, %v3949_v33, %v3404_v37 }
 0x3b9   : > { %v4095_v43 = vsel %vm4035_vm5, %v4022_v41, %v8544_v21  ;;  %v10165_v41 = vld [vmem:[#allocation172_spill] sm:$0xff] }
 0x3ba   : > { %v3390_v24 = vpop.permute.xlu0 %3389 }
 0x3bb   : > { %v4008_v12 = vsel %vm3962_vm3, %v3935_v52, %v3390_v24 }
 0x3bc   : > { %v4081_v57 = vsel %vm4035_vm5, %v4008_v12, %v3462_v26 }
 0x3bd   : > { %3377 = vrot.lane.b32.xlu1 %v10104_v9, %s5493_s13  ;;  %v4154_v4 = vsel %vm4108_vm6, %v4081_v57, %v3534_v30  ;;  %v10159_v30 = vld [vmem:[#allocation28_spill] sm:$0xff] }
 0x3be   : > { %4882 = vmatmul.msk.bf16.gmra.mxu2 %vm4221_vm7, %v4154_v4  ;;  %3539 = vrot.lane.b32.xlu2 %v10051_v55, %s5495_s15  ;;  %v3582_v54 = vsel %vm3561_vm13, %v7528_v16, %v10159_v30 }
 0x3bf   : > { %v3548_v3 = vpop.permute.xlu1 %3547  ;;  %v4313_v17 = vpop.f32.mrf.mxu0  ;;  %v3684_v14 = vsel %vm3670_vm14, %v3582_v54, %v10160_v0 }
 0x3c0   : > { %v4168_v10 = vsel %vm4108_vm6, %v4095_v43, %v3548_v3  ;;  %3449 = vrot.lane.b32.xlu0 %v10157_v39, %s5494_s14  ;;  %v8666_v9 = vpop.permute.xlu2 %3405  ;;  %v3757_v37 = vsel %vm3743_vm15, %v3684_v14, %v10161_v7 }
 0x3c1   : > { %4889 = vmatmul.msk.bf16.gmra.mxu3 %vm4221_vm7, %v4168_v10  ;;  %v3830_v36 = vsel %vm3816_vm2, %v3757_v37, %v10162_v50  ;;  %v10169_v37 = vld [vmem:[#allocation135_spill] sm:$0xff]  ;;  %v10170_v50 = vld [vmem:[#allocation92_spill] sm:$0xff] }
 0x3c2   : > { %v3358_v26 = vpop.permute.xlu0 %3357  ;;  %v3903_v16 = vsel %vm3889_vm4, %v3830_v36, %v8173_v13 }
 0x3c3   : > { %v3976_v2 = vsel %vm3962_vm3, %v3903_v16, %v3358_v26 }
 0x3c5   : > { %3521 = vrot.lane.b32.xlu1 %v10158_v20, %s5495_s15  ;;  %v10168_v20 = vld [vmem:[#allocation57_spill] sm:$0xff] }
 0x3c6   : > { %v4379_v21 = vpop.f32.mrf.mxu2  ;;  %3339 = vrot.lane.b32.xlu2 %v10123_v22, %s5492_s12  ;;  %v3603_v22 = vsel %vm3561_vm13, %v7602_v6, %v10163_v8 }
 0x3c7   : > { %v4380_v32 = vadd.f32 %v8551_v60, %v4379_v21  ;;  %v3372_v55 = vpop.permute.xlu1 %3371  ;;  %v3698_v34 = vsel %vm3670_vm14, %v3603_v22, %v10164_v40 }
 0x3c8   : > { %3411 = vrot.lane.b32.xlu0 %v7826_v48, %s5493_s13  ;;  %v8690_v42 = vpop.permute.xlu2 %3549  ;;  %v3771_v24 = vsel %vm3743_vm15, %v3698_v34, %v10165_v41 }
 0x3c9   : > { %v8678_v11 = vmax.f32 %v4380_v32, 0.0 }
 0x3ca   : > { %v3430_v44 = vpop.permute.xlu0 %3429  ;;  %v4315_v33 = vpop.f32.mrf.mxu0 }
 0x3cb   : > { %v4497_v59 = vpack.c.bf16 %v8678_v11, %v8678_v11  ;;  %v4049_v13 = vsel %vm4035_vm5, %v3976_v2, %v3430_v44  ;;  %v4316_v48 = vadd.f32 %v8551_v60, %v4315_v33 }
 0x3cc   : > { %v4122_v52 = vsel %vm4108_vm6, %v4049_v13, %v3502_v15  ;;  %v10167_v15 = vld [vmem:[#allocation8_spill] sm:$0xff] }
 0x3cd   : > { %4529 = vst.msk [vmem:[%s8590_s9 + $0x48] sm:$0xf] %vm290_vm0, %v4497_v59  ;;  %3325 = vrot.lane.b32.xlu1 %v10129_v31, %s5492_s12  ;;  %v4449_v57 = vmax.f32 %v4316_v48, 0.0  ;;  %4866 = vmatmul.msk.bf16.gmra.mxu0 %vm4221_vm7, %v4122_v52  ;;  %v10166_v31 = vld [vmem:[#allocation189_spill] sm:$0xff] }
 0x3ce   : > { %v4381_v53 = vpop.f32.mrf.mxu2  ;;  %v3844_v3 = vsel %vm3816_vm2, %v3771_v24, %v10166_v31  ;;  %3483 = vrot.lane.b32.xlu2 %v10167_v15, %s5494_s14  ;;  %v10171_v59 = vld [vmem:[#allocation165_spill] sm:$0xff] }
 0x3cf   : > { %v4382_v6 = vadd.f32 %v8551_v60, %v4381_v53  ;;  %v3444_v12 = vpop.permute.xlu1 %3443  ;;  %v4481_v43 = vpack.c.bf16 %v4449_v57, %v4449_v57  ;;  %v4546_v4 = vsel %vm1864_vm9, %v4449_v57, 0.0  ;;  %v4616_v10 = vmul.f32 %v4449_v57, %v4449_v57  ;;  %v10173_v53 = vld [vmem:[#allocation83_spill] sm:$0xff] }
 0x3d0   : > { %v3917_v39 = vsel %vm3889_vm4, %v3844_v3, %v8213_v18  ;;  %v4547_v26 = vadd.f32 %v4546_v4, %v8619_v45  ;;  %3397 = vrot.lane.b32.xlu0 %v10168_v20, %s5493_s13  ;;  %v8727_v32 = vpop.permute.xlu2 %3373  ;;  %v10174_v4 = vld [vmem:[#allocation10_spill] sm:$0xff] }
 0x3d1   : > { %v8711_v17 = vmax.f32 %v4382_v6, 0.0  ;;  %v3990_v21 = vsel %vm3962_vm3, %v3917_v39, %v3372_v55  ;;  %4513 = vst.msk [vmem:[%s8590_s9 + $0x8] sm:$0xf] %vm290_vm0, %v4481_v43  ;;  %v4649_v54 = vsel %vm1864_vm9, %v4616_v10, 0.0  ;;  %v4344_v0 = vpop.f32.mrf.mxu1  ;;  %v3654_v55 = vsel %vm3561_vm13, %v10168_v20, %v10169_v37  ;;  %v10176_v39 = vld [vmem:[#allocation117_spill] sm:$0xff] }
 0x3d2   : > { %v4063_v14 = vsel %vm4035_vm5, %v3990_v21, %v3444_v12  ;;  %v4650_v18 = vadd.f32 %v4649_v54, %v8631_v23  ;;  %v3516_v45 = vpop.permute.xlu0 %3515  ;;  %v4317_v7 = vpop.f32.mrf.mxu0  ;;  %v3732_v2 = vsel %vm3670_vm14, %v3654_v55, %v10171_v59  ;;  %v10172_v23 = vld [vmem:[#allocation182_spill] sm:$0xff] }
 0x3d3   : > { %v4498_v30 = vpack.c.bf16 %v8711_v17, %v8711_v17  ;;  %v4318_v36 = vadd.f32 %v8551_v60, %v4317_v7  ;;  %v4136_v16 = vsel %vm4108_vm6, %v4063_v14, %v3516_v45  ;;  %v3805_v44 = vsel %vm3743_vm15, %v3732_v2, %v10172_v23  ;;  %v10178_v21 = vld [vmem:[#allocation62_spill] sm:$0xff]  ;;  %v10180_v14 = vld [vmem:[#allocation65_spill] sm:$0xff] }
 0x3d4   : > { %4873 = vmatmul.msk.bf16.gmra.mxu1 %vm4221_vm7, %v4136_v16  ;;  %v3878_v22 = vsel %vm3816_vm2, %v3805_v44, %v8122_v29  ;;  %v10182_v23 = vld [vmem:[#allocation101_spill] sm:$0xff]  ;;  %v10183_v44 = vld [vmem:[#allocation20_spill] sm:$0xff] }
 0x3d5   : > { %4530 = vst.msk [vmem:[%s8590_s9 + $0x4c] sm:$0xf] %vm290_vm0, %v4498_v30  ;;  %3555 = vrot.lane.b32.xlu1 %v10170_v50, %s5495_s15  ;;  %v4450_v8 = vmax.f32 %v4318_v36, 0.0 }
 0x3d6   : > { %3469 = vrot.lane.b32.xlu2 %v10173_v53, %s5494_s14  ;;  %v10186_v53 = vld [vmem:[#allocation25_spill] sm:$0xff] }
 0x3d7   : > { %v3334_v33 = vpop.permute.xlu1 %3333  ;;  %v4482_v48 = vpack.c.bf16 %v4450_v8, %v4450_v8  ;;  %v4548_v40 = vsel %vm1864_vm9, %v4450_v8, 0.0  ;;  %v4617_v34 = vmul.f32 %v4450_v8, %v4450_v8  ;;  %v10184_v8 = vld [vmem:[#allocation33_spill] sm:$0xff] }
 0x3d8   : > { %v3951_v13 = vsel %vm3889_vm4, %v3878_v22, %v3334_v33  ;;  %v8751_v52 = vadd.f32 %v4548_v40, %v4547_v26  ;;  %3541 = vrot.lane.b32.xlu0 %v10057_v38, %s5495_s15  ;;  %v8758_v24 = vpop.permute.xlu2 %3445  ;;  %v10177_v26 = vld [vmem:[#allocation155_spill] sm:$0xff] }
 0x3d9   : > { %4514 = vst.msk [vmem:[%s8590_s9 + $0xc] sm:$0xf] %vm290_vm0, %v4482_v48  ;;  %v4651_v41 = vsel %vm1864_vm9, %v4617_v34, 0.0  ;;  %v4345_v29 = vpop.f32.mrf.mxu1  ;;  %v4024_v12 = vsel %vm3962_vm3, %v3951_v13, %v8666_v9  ;;  %v10185_v48 = vld [vmem:[#allocation43_spill] sm:$0xff] }
 0x3da   : > { %v8760_v6 = vadd.f32 %v4651_v41, %v4650_v18  ;;  %v3478_v57 = vpop.permute.xlu0 %3477  ;;  %v10187_v41 = vld [vmem:[#allocation38_spill] sm:$0xff] }
 0x3db   : > { %v4097_v31 = vsel %vm4035_vm5, %v4024_v12, %v3478_v57  ;;  %v3606_v29 = vsel %vm3561_vm13, %v10187_v41, %v10186_v53  ;;  %v10188_v12 = vld [vmem:[#allocation109_spill] sm:$0xff] }
 0x3dc   : > { %v4170_v38 = vsel %vm4108_vm6, %v4097_v31, %v8690_v42  ;;  %v3633_v42 = vsel %vm3561_vm13, %v10177_v26, %v10176_v39  ;;  %v10189_v31 = vld [vmem:[#allocation9_spill] sm:$0xff]  ;;  %v10192_v26 = vld [vmem:[#allocation107_spill] sm:$0xff] }
 0x3dd   : > { %3341 = vrot.lane.b32.xlu1 %v10154_v63, %s5492_s12  ;;  %4890 = vmatmul.msk.bf16.gmra.mxu3 %vm4221_vm7, %v4170_v38  ;;  %v10175_v63 = vld [vmem:[#allocation95_spill] sm:$0xff]  ;;  %v3718_v30 = vsel %vm3670_vm14, %v3633_v42, %v10178_v21 }
 0x3de   : > { %v4384_v3 = vpop.f32.mrf.mxu2  ;;  %3413 = vrot.lane.b32.xlu2 %v10061_v49, %s5493_s13  ;;  %v10179_v49 = vld [vmem:[#allocation60_spill] sm:$0xff] }
 0x3df   : > { %v3392_v43 = vpop.permute.xlu1 %3391  ;;  %v3791_v0 = vsel %vm3743_vm15, %v3718_v30, %v10179_v49  ;;  %v10190_v3 = vld [vmem:[#allocation26_spill] sm:$0xff]  ;;  %v10193_v30 = vld [vmem:[#allocation59_spill] sm:$0xff] }
 0x3e0   : > { %3485 = vrot.lane.b32.xlu0 %v10174_v4, %s5494_s14  ;;  %v8774_v9 = vpop.permute.xlu2 %3335  ;;  %v3864_v18 = vsel %vm3816_vm2, %v3791_v0, %v10180_v14  ;;  %v3700_v38 = vsel %vm3670_vm14, %v3606_v29, %v10190_v3  ;;  %v10191_v4 = vld [vmem:[#allocation35_spill] sm:$0xff] }
 0x3e1   : > { %v3937_v45 = vsel %vm3889_vm4, %v3864_v18, %v8229_v58 }
 0x3e2   : > { %v3464_v10 = vpop.permute.xlu0 %3463  ;;  %v4320_v15 = vpop.f32.mrf.mxu0  ;;  %v4010_v7 = vsel %vm3962_vm3, %v3937_v45, %v3392_v43 }
 0x3e3   : > { %v4083_v36 = vsel %vm4035_vm5, %v4010_v7, %v3464_v10  ;;  %v3773_v10 = vsel %vm3743_vm15, %v3700_v38, %v10191_v4  ;;  %v10194_v7 = vld [vmem:[#allocation61_spill] sm:$0xff] }
 0x3e4   : > { %v3846_v42 = vsel %vm3816_vm2, %v3773_v10, %v10192_v26  ;;  %v10203_v10 = vld [vmem:[#allocation86_spill] sm:$0xff] }
 0x3e5   : > { %3557 = vrot.lane.b32.xlu1 %v10175_v63, %s5495_s15 }
 0x3e6   : > { %v4385_v20 = vpop.f32.mrf.mxu2  ;;  %3343 = vrot.lane.b32.xlu2 %v10170_v50, %s5492_s12  ;;  %v10181_v50 = vld [vmem:[#allocation12_spill] sm:$0xff] }
 0x3e7   : > { %v3360_v54 = vpop.permute.xlu1 %3359 }
 0x3e8   : > { %3415 = vrot.lane.b32.xlu0 %v10082_v46, %s5493_s13  ;;  %v8794_v37 = vpop.permute.xlu2 %3393  ;;  %v3585_v46 = vsel %vm3561_vm13, %v10183_v44, %v10182_v23  ;;  %v10199_v44 = vld [vmem:[#allocation194_spill] sm:$0xff] }
 0x3e9   : > { %v4347_v55 = vpop.f32.mrf.mxu1  ;;  %v3686_v22 = vsel %vm3670_vm14, %v3585_v46, %v10184_v8 }
 0x3ea   : > { %v4348_v16 = vadd.f32 %v8551_v60, %v4347_v55  ;;  %v3536_v59 = vpop.permute.xlu0 %3535  ;;  %v4321_v2 = vpop.f32.mrf.mxu0  ;;  %v3759_v40 = vsel %vm3743_vm15, %v3686_v22, %v10185_v48 }
 0x3eb   : > { %v4156_v58 = vsel %vm4108_vm6, %v4083_v36, %v3536_v59  ;;  %v3832_v57 = vsel %vm3816_vm2, %v3759_v40, %v10188_v12  ;;  %v10195_v36 = vld [vmem:[#allocation136_spill] sm:$0xff]  ;;  %v10197_v2 = vld [vmem:[#allocation166_spill] sm:$0xff] }
 0x3ec   : > { %v8804_v33 = vmax.f32 %v4348_v16, 0.0  ;;  %4883 = vmatmul.msk.bf16.gmra.mxu2 %vm4221_vm7, %v4156_v58  ;;  %v3905_v43 = vsel %vm3889_vm4, %v3832_v57, %v8180_v19  ;;  %v10196_v16 = vld [vmem:[#allocation160_spill] sm:$0xff]  ;;  %v10198_v58 = vld [vmem:[#allocation183_spill] sm:$0xff] }
 0x3ed   : > { %3487 = vrot.lane.b32.xlu1 %v10181_v50, %s5494_s14  ;;  %v3978_v15 = vsel %vm3962_vm3, %v3905_v43, %v3360_v54  ;;  %v10200_v57 = vld [vmem:[#allocation127_spill] sm:$0xff] }
 0x3ee   : > { %v4489_v34 = vpack.c.bf16 %v8804_v33, %v8804_v33  ;;  %3559 = vrot.lane.b32.xlu2 %v10189_v31, %s5495_s15  ;;  %v10201_v31 = vld [vmem:[#allocation45_spill] sm:$0xff] }
 0x3ef   : > { %v3432_v13 = vpop.permute.xlu1 %3431  ;;  %v3636_v3 = vsel %vm3561_vm13, %v10201_v31, %v10200_v57  ;;  %v10214_v31 = vld [vmem:[#allocation18_spill] sm:$0xff] }
 0x3f0   : > { %4521 = vst.msk [vmem:[%s8590_s9 + $0x28] sm:$0xf] %vm290_vm0, %v4489_v34  ;;  %3379 = vrot.lane.b32.xlu0 %v10131_v27, %s5493_s13  ;;  %v8831_v63 = vpop.permute.xlu2 %3361  ;;  %v4051_v20 = vsel %vm4035_vm5, %v3978_v15, %v3432_v13  ;;  %v3919_v27 = vsel %vm3889_vm4, %v3846_v42, %v8171_v56  ;;  %s285_s13 = scalar_lea.vmem %s9314_s5, %s10252_s22 }
 0x3f1   : > { %v4349_v39 = vpop.f32.mrf.mxu1  ;;  %v3992_v49 = vsel %vm3962_vm3, %v3919_v27, %v8727_v32  ;;  %v10205_v27 = vld [vmem:[#allocation54_spill] sm:$0xff] }
 0x3f2   : > { %v4350_v19 = vadd.f32 %v8551_v60, %v4349_v39  ;;  %v3504_v21 = vpop.permute.xlu0 %3503  ;;  %v4065_v14 = vsel %vm4035_vm5, %v3992_v49, %v8758_v24  ;;  %v3657_v24 = vsel %vm3561_vm13, %v10196_v16, %v10195_v36 }
 0x3f3   : > { %v4124_v54 = vsel %vm4108_vm6, %v4051_v20, %v3504_v21  ;;  %v3734_v50 = vsel %vm3670_vm14, %v3657_v24, %v10197_v2  ;;  %v10204_v20 = vld [vmem:[#allocation123_spill] sm:$0xff]  ;;  %v10208_v2 = vld [vmem:[#allocation69_spill] sm:$0xff] }
 0x3f4   : > { %v8844_v0 = vmax.f32 %v4350_v19, 0.0  ;;  %4867 = vmatmul.msk.bf16.gmra.mxu0 %vm4221_vm7, %v4124_v54  ;;  %v3807_v23 = vsel %vm3743_vm15, %v3734_v50, %v10198_v58 }
 0x3f5   : > { %3451 = vrot.lane.b32.xlu1 %v10193_v30, %s5494_s14  ;;  %v3880_v46 = vsel %vm3816_vm2, %v3807_v23, %v10199_v44  ;;  %v10206_v30 = vld [vmem:[#allocation149_spill] sm:$0xff] }
 0x3f6   : > { %v4490_v45 = vpack.c.bf16 %v8844_v0, %v8844_v0  ;;  %3523 = vrot.lane.b32.xlu2 %v10194_v7, %s5495_s15  ;;  %v3953_v22 = vsel %vm3889_vm4, %v3880_v46, %v8774_v9  ;;  %v10202_v9 = vld [vmem:[#allocation79_spill] sm:$0xff]  ;;  %v3609_v54 = vsel %vm3561_vm13, %v10206_v30, %v10205_v27  ;;  %v10209_v46 = vld [vmem:[#allocation96_spill] sm:$0xff] }
 0x3f7   : > { %v3518_v18 = vpop.permute.xlu1 %3517  ;;  %v3720_v43 = vsel %vm3670_vm14, %v3636_v3, %v10202_v9 }
 0x3f8   : > { %v4138_v56 = vsel %vm4108_vm6, %v4065_v14, %v3518_v18  ;;  %4522 = vst.msk [vmem:[%s8590_s9 + $0x2c] sm:$0xf] %vm290_vm0, %v4490_v45  ;;  %v4416_v32 = vpop.f32.mrf.mxu3  ;;  %v8857_v55 = vpop.permute.xlu2 %3433  ;;  %v3793_v15 = vsel %vm3743_vm15, %v3720_v43, %v10203_v10  ;;  %v10215_v10 = vld [vmem:[#allocation99_spill] sm:$0xff] }
 0x3f9   : > { %4874 = vmatmul.msk.bf16.gmra.mxu1 %vm4221_vm7, %v4138_v56  ;;  %v3866_v19 = vsel %vm3816_vm2, %v3793_v15, %v10204_v20  ;;  %v10207_v56 = vld [vmem:[#allocation42_spill] sm:$0xff]  ;;  %v10216_v20 = vld [vmem:[#allocation197_spill] sm:$0xff] }
 0x3fa   : > { %v3408_v59 = vpop.permute.xlu0 %3407  ;;  %v3939_v49 = vsel %vm3889_vm4, %v3866_v19, %v8296_v51  ;;  %v3702_v7 = vsel %vm3670_vm14, %v3609_v54, %v10207_v56 }
 0x3fb   : > { %v4026_v13 = vsel %vm3962_vm3, %v3953_v22, %v3408_v59  ;;  %v4012_v32 = vsel %vm3962_vm3, %v3939_v49, %v8794_v37  ;;  %v3775_v50 = vsel %vm3743_vm15, %v3702_v7, %v10208_v2  ;;  %v10211_v22 = vld [vmem:[#allocation190_spill] sm:$0xff]  ;;  %v10219_v2 = vld [vmem:[#allocation85_spill] sm:$0xff] }
 0x3ff   : > { %v3480_v8 = vpop.permute.xlu1 %3479 }
 0x400   : > { %v4417_v48 = vpop.f32.mrf.mxu3  ;;  %v3520_v40 = vpop.permute.xlu2 %3519  ;;  %v4099_v53 = vsel %vm4035_vm5, %v4026_v13, %v3480_v8  ;;  %v10210_v8 = vld [vmem:[#allocation19_spill] sm:$0xff]  ;;  %v3848_v13 = vsel %vm3816_vm2, %v3775_v50, %v10211_v22 }
 0x401   : > { %v3588_v37 = vsel %vm3561_vm13, %v10210_v8, %v10209_v46 }
 0x402   : > { %v3552_v34 = vpop.permute.xlu0 %3551 }
 0x403   : > { %v4172_v41 = vsel %vm4108_vm6, %v4099_v53, %v3552_v34  ;;  %v10212_v53 = vld [vmem:[#allocation144_spill] sm:$0xff] }
 0x404   : > { %4891 = vmatmul.msk.bf16.gmra.mxu3 %vm4221_vm7, %v4172_v41  ;;  %v10213_v41 = vld [vmem:[#allocation80_spill] sm:$0xff] }
 0x407   : > { %v3466_v29 = vpop.permute.xlu1 %3465  ;;  %v4387_v12 = vpop.f32.mrf.mxu2 }
 0x408   : > { %v4388_v38 = vadd.f32 %v8551_v60, %v4387_v12  ;;  %v8887_v21 = vpop.permute.xlu2 %3323  ;;  %v4085_v16 = vsel %vm4035_vm5, %v4012_v32, %v3466_v29  ;;  %v3921_v29 = vsel %vm3889_vm4, %v3848_v13, %v10213_v41 }
 0x409   : > { %v4323_v4 = vpop.f32.mrf.mxu0 }
 0x40a   : > { %v8882_v39 = vmax.f32 %v4388_v38, 0.0  ;;  %v4324_v26 = vadd.f32 %v8551_v60, %v4323_v4  ;;  %v3376_v42 = vpop.permute.xlu0 %3375 }
 0x40b   : > { %v3994_v38 = vsel %vm3962_vm3, %v3921_v29, %v3376_v42  ;;  %v10221_v29 = vld [vmem:[#allocation129_spill] sm:$0xff] }
 0x40c   : > { %v4499_v14 = vpack.c.bf16 %v8882_v39, %v8882_v39  ;;  %v4451_v18 = vmax.f32 %v4324_v26, 0.0 }
 0x40e   : > { %v4352_v45 = vpop.f32.mrf.mxu1  ;;  %4531 = vst.msk [vmem:[%s8590_s9 + $0x50] sm:$0xf] %vm290_vm0, %v4499_v14  ;;  %v4483_v24 = vpack.c.bf16 %v4451_v18, %v4451_v18  ;;  %v4550_v51 = vsel %vm1864_vm9, %v4451_v18, 0.0  ;;  %v4618_v59 = vmul.f32 %v4451_v18, %v4451_v18 }
 0x40f   : > { %v3538_v36 = vpop.permute.xlu1 %3537  ;;  %v4551_v58 = vadd.f32 %v4550_v51, %v8751_v52  ;;  %v4389_v44 = vpop.f32.mrf.mxu2  ;;  %v3688_v52 = vsel %vm3670_vm14, %v3588_v37, %v10212_v53  ;;  %v10218_v51 = vld [vmem:[#allocation75_spill] sm:$0xff] }
 0x410   : > { %v4158_v23 = vsel %vm4108_vm6, %v4085_v16, %v3538_v36  ;;  %4515 = vst.msk [vmem:[%s8590_s9 + $0x10] sm:$0xf] %vm290_vm0, %v4483_v24  ;;  %v4653_v48 = vsel %vm1864_vm9, %v4618_v59, 0.0  ;;  %v4390_v34 = vadd.f32 %v8551_v60, %v4389_v44  ;;  %v3761_v3 = vsel %vm3743_vm15, %v3688_v52, %v10214_v31  ;;  %v3554_v54 = vpop.permute.xlu2 %3553  ;;  %v10217_v16 = vld [vmem:[#allocation128_spill] sm:$0xff] }
 0x411   : > { %4884 = vmatmul.msk.bf16.gmra.mxu2 %vm4221_vm7, %v4158_v23  ;;  %v4654_v12 = vadd.f32 %v4653_v48, %v8760_v6  ;;  %v4325_v57 = vpop.f32.mrf.mxu0  ;;  %v3834_v15 = vsel %vm3816_vm2, %v3761_v3, %v10215_v10  ;;  %v3660_v24 = vsel %vm3561_vm13, %v7782_v62, %v10217_v16  ;;  %v10220_v23 = vld [vmem:[#allocation67_spill] sm:$0xff]  ;;  %v10224_v10 = vld [vmem:[#allocation192_spill] sm:$0xff]  ;;  %v10227_v16 = vld [vmem:[#allocation70_spill] sm:$0xff] }
 0x412   : > { %v8926_v9 = vmax.f32 %v4390_v34, 0.0  ;;  %v4326_v43 = vadd.f32 %v8551_v60, %v4325_v57  ;;  %v3448_v4 = vpop.permute.xlu0 %3447  ;;  %v3907_v6 = vsel %vm3889_vm4, %v3834_v15, %v10216_v20  ;;  %v3736_v59 = vsel %vm3670_vm14, %v3660_v24, %v10218_v51  ;;  %v10222_v57 = vld [vmem:[#allocation161_spill] sm:$0xff]  ;;  %v10228_v51 = vld [vmem:[#allocation191_spill] sm:$0xff] }
 0x413   : > { %v4067_v26 = vsel %vm4035_vm5, %v3994_v38, %v3448_v4  ;;  %v3980_v42 = vsel %vm3962_vm3, %v3907_v6, %v8831_v63  ;;  %v3809_v50 = vsel %vm3743_vm15, %v3736_v59, %v10219_v2  ;;  %v10223_v38 = vld [vmem:[#allocation177_spill] sm:$0xff] }
 0x414   : > { %v4500_v19 = vpack.c.bf16 %v8926_v9, %v8926_v9  ;;  %v4452_v27 = vmax.f32 %v4326_v43, 0.0  ;;  %v4140_v14 = vsel %vm4108_vm6, %v4067_v26, %v3520_v40  ;;  %v4053_v18 = vsel %vm4035_vm5, %v3980_v42, %v8857_v55 }
 0x415   : > { %4875 = vmatmul.msk.bf16.gmra.mxu1 %vm4221_vm7, %v4140_v14  ;;  %v3882_v44 = vsel %vm3816_vm2, %v3809_v50, %v10220_v23 }
 0x416   : > { %v4353_v30 = vpop.f32.mrf.mxu1  ;;  %4532 = vst.msk [vmem:[%s8590_s9 + $0x54] sm:$0xf] %vm290_vm0, %v4500_v19  ;;  %v4484_v45 = vpack.c.bf16 %v4452_v27, %v4452_v27  ;;  %v4552_v56 = vsel %vm1864_vm9, %v4452_v27, 0.0  ;;  %v4619_v7 = vmul.f32 %v4452_v27, %v4452_v27 }
 0x417   : > { %v3506_v49 = vpop.permute.xlu1 %3505  ;;  %v8945_v32 = vadd.f32 %v4552_v56, %v4551_v58  ;;  %v10225_v56 = vld [vmem:[#allocation115_spill] sm:$0xff] }
 0x418   : > { %v4126_v36 = vsel %vm4108_vm6, %v4053_v18, %v3506_v49  ;;  %4516 = vst.msk [vmem:[%s8590_s9 + $0x14] sm:$0xf] %vm290_vm0, %v4484_v45  ;;  %v4655_v63 = vsel %vm1864_vm9, %v4619_v7, 0.0  ;;  %v3540_v46 = vpop.permute.xlu2 %3539  ;;  %v3612_v7 = vsel %vm3561_vm13, %v7632_v35, %v10225_v56  ;;  %v10229_v35 = vld [vmem:[#allocation198_spill] sm:$0xff] }
 0x419   : > { %4868 = vmatmul.msk.bf16.gmra.mxu0 %vm4221_vm7, %v4126_v36  ;;  %v8952_v40 = vadd.f32 %v4655_v63, %v4654_v12  ;;  %v3639_v12 = vsel %vm3561_vm13, %v7724_v1, %v10221_v29  ;;  %v10226_v36 = vld [vmem:[#allocation154_spill] sm:$0xff] }
 0x41a   : > { %v3338_v55 = vpop.permute.xlu0 %3337  ;;  %v3722_v31 = vsel %vm3670_vm14, %v3639_v12, %v10222_v57  ;;  %v3704_v63 = vsel %vm3670_vm14, %v3612_v7, %v10226_v36  ;;  %v10231_v57 = vld [vmem:[#allocation16_spill] sm:$0xff]  ;;  %v10237_v7 = vld [vmem:[#allocation119_spill] sm:$0xff] }
 0x41b   : > { %v3955_v8 = vsel %vm3889_vm4, %v3882_v44, %v3338_v55  ;;  %v3795_v43 = vsel %vm3743_vm15, %v3722_v31, %v10223_v38  ;;  %v3777_v24 = vsel %vm3743_vm15, %v3704_v63, %v10227_v16  ;;  %v10232_v38 = vld [vmem:[#allocation22_spill] sm:$0xff] }
 0x41c   : > { %v3868_v15 = vsel %vm3816_vm2, %v3795_v43, %v10224_v10  ;;  %v3850_v59 = vsel %vm3816_vm2, %v3777_v24, %v10228_v51 }
 0x41d   : > { %v3941_v20 = vsel %vm3889_vm4, %v3868_v15, %v8887_v21  ;;  %v3923_v2 = vsel %vm3889_vm4, %v3850_v59, %v10229_v35 }
 0x41f   : > { %v3410_v58 = vpop.permute.xlu1 %3409  ;;  %v4419_v37 = vpop.f32.mrf.mxu3 }
 0x420   : > { %v4420_v22 = vadd.f32 %v8551_v60, %v4419_v37  ;;  %v4028_v62 = vsel %vm3962_vm3, %v3955_v8, %v3410_v58  ;;  %v3340_v26 = vpop.permute.xlu2 %3339 }
 0x422   : > { %v8965_v13 = vmax.f32 %v4420_v22, 0.0  ;;  %v3482_v48 = vpop.permute.xlu0 %3481 }
 0x423   : > { %v4101_v34 = vsel %vm4035_vm5, %v4028_v62, %v3482_v48 }
 0x424   : > { %v4507_v53 = vpack.c.bf16 %v8965_v13, %v8965_v13  ;;  %v4174_v52 = vsel %vm4108_vm6, %v4101_v34, %v3554_v54 }
 0x425   : > { %4892 = vmatmul.msk.bf16.gmra.mxu3 %vm4221_vm7, %v4174_v52 }
 0x426   : > { %4539 = vst.msk [vmem:[%s8590_s9 + $0x70] sm:$0xf] %vm290_vm0, %v4507_v53 }
 0x427   : > { %v3396_v41 = vpop.permute.xlu1 %3395  ;;  %v4421_v3 = vpop.f32.mrf.mxu3 }
 0x428   : > { %v4422_v4 = vadd.f32 %v8551_v60, %v4421_v3  ;;  %v4014_v27 = vsel %vm3962_vm3, %v3941_v20, %v3396_v41  ;;  %v3484_v8 = vpop.permute.xlu2 %3483  ;;  %v10230_v41 = vld [vmem:[#allocation141_spill] sm:$0xff] }
 0x429   : > { %v3663_v29 = vsel %vm3561_vm13, %v7800_v28, %v10230_v41 }
 0x42a   : > { %v8987_v6 = vmax.f32 %v4422_v4, 0.0  ;;  %v4355_v19 = vpop.f32.mrf.mxu1  ;;  %v3468_v42 = vpop.permute.xlu0 %3467  ;;  %v3738_v31 = vsel %vm3670_vm14, %v3663_v29, %v10231_v57  ;;  %v10233_v4 = vld [vmem:[#allocation195_spill] sm:$0xff] }
 0x42b   : > { %v4356_v30 = vadd.f32 %v8551_v60, %v4355_v19  ;;  %v4087_v14 = vsel %vm4035_vm5, %v4014_v27, %v3468_v42  ;;  %v3811_v43 = vsel %vm3743_vm15, %v3738_v31, %v10232_v38  ;;  %v10234_v27 = vld [vmem:[#allocation120_spill] sm:$0xff] }
 0x42c   : > { %v4392_v1 = vpop.f32.mrf.mxu2  ;;  %v4508_v54 = vpack.c.bf16 %v8987_v6, %v8987_v6  ;;  %v4160_v21 = vsel %vm4108_vm6, %v4087_v14, %v3540_v46  ;;  %v3884_v10 = vsel %vm3816_vm2, %v3811_v43, %v10233_v4 }
 0x42d   : > { %v8994_v45 = vmax.f32 %v4356_v30, 0.0  ;;  %4885 = vmatmul.msk.bf16.gmra.mxu2 %vm4221_vm7, %v4160_v21  ;;  %v3957_v15 = vsel %vm3889_vm4, %v3884_v10, %v3340_v26  ;;  %v3642_v30 = vsel %vm3561_vm13, %v10066_v5, %v10234_v27 }
 0x42e   : > { %v4328_v49 = vpop.f32.mrf.mxu0  ;;  %4540 = vst.msk [vmem:[%s8590_s9 + $0x74] sm:$0xf] %vm290_vm0, %v4508_v54  ;;  %v10235_v54 = vld [vmem:[#allocation44_spill] sm:$0xff] }
 0x42f   : > { %v3378_v18 = vpop.permute.xlu1 %3377  ;;  %v4491_v55 = vpack.c.bf16 %v8994_v45, %v8994_v45  ;;  %v3724_v49 = vsel %vm3670_vm14, %v3642_v30, %v10235_v54 }
 0x430   : > { %v3996_v23 = vsel %vm3962_vm3, %v3923_v2, %v3378_v18  ;;  %v3470_v3 = vpop.permute.xlu2 %3469  ;;  %v10236_v18 = vld [vmem:[#allocation71_spill] sm:$0xff] }
 0x431   : > { %4523 = vst.msk [vmem:[%s8590_s9 + $0x30] sm:$0xf] %vm290_vm0, %v4491_v55  ;;  %v3797_v26 = vsel %vm3743_vm15, %v3724_v49, %v10236_v18 }
 0x432   : > { %v4357_v58 = vpop.f32.mrf.mxu1  ;;  %v3450_v46 = vpop.permute.xlu0 %3449  ;;  %v3870_v36 = vsel %vm3816_vm2, %v3797_v26, %v10237_v7 }
 0x433   : > { %v4358_v44 = vadd.f32 %v8551_v60, %v4357_v58  ;;  %v4069_v22 = vsel %vm4035_vm5, %v3996_v23, %v3450_v46 }
 0x434   : > { %v4393_v50 = vpop.f32.mrf.mxu2 }
 0x435   : > { %v9018_v48 = vmax.f32 %v4358_v44, 0.0  ;;  %v10238_v44 = vld [vmem:[#allocation142_spill] sm:$0xff] }
 0x436   : > { %v4329_v37 = vpop.f32.mrf.mxu0  ;;  %v3666_v46 = vsel %vm3561_vm13, %v10092_v47, %v10238_v44 }
 0x437   : > { %v3522_v62 = vpop.permute.xlu1 %3521  ;;  %v4492_v53 = vpack.c.bf16 %v9018_v48, %v9018_v48 }
 0x438   : > { %v4142_v34 = vsel %vm4108_vm6, %v4069_v22, %v3522_v62  ;;  %v3414_v16 = vpop.permute.xlu2 %3413  ;;  %v10239_v22 = vld [vmem:[#allocation17_spill] sm:$0xff] }
 0x439   : > { %4876 = vmatmul.msk.bf16.gmra.mxu1 %vm4221_vm7, %v4142_v34  ;;  %4524 = vst.msk [vmem:[%s8590_s9 + $0x34] sm:$0xf] %vm290_vm0, %v4492_v53  ;;  %v3740_v62 = vsel %vm3670_vm14, %v3666_v46, %v10239_v22  ;;  %v10247_v46 = vld [vmem:[#allocation148_spill] sm:$0xff] }
 0x43a   : > { %v3412_v52 = vpop.permute.xlu0 %3411 }
 0x43b   : > { %v4030_v1 = vsel %vm3962_vm3, %v3957_v15, %v3412_v52  ;;  %v10240_v52 = vld [vmem:[#allocation23_spill] sm:$0xff] }
 0x43c   : > { %v4103_v56 = vsel %vm4035_vm5, %v4030_v1, %v3484_v8  ;;  %v3813_v41 = vsel %vm3743_vm15, %v3740_v62, %v10240_v52  ;;  %v10248_v62 = vld [vmem:[#allocation47_spill] sm:$0xff]  ;;  %v10249_v52 = vld [vmem:[#allocation110_spill] sm:$0xff] }
 0x43f   : > { %v3326_v12 = vpop.permute.xlu1 %3325 }
 0x440   : > { %v3943_v55 = vsel %vm3889_vm4, %v3870_v36, %v3326_v12  ;;  %v10241_v12 = vld [vmem:[#allocation196_spill] sm:$0xff]  ;;  %v3344_v15 = vpop.permute.xlu2 %3343 }
 0x441   : > { %v4395_v20 = vpop.f32.mrf.mxu2  ;;  %v3886_v47 = vsel %vm3816_vm2, %v3813_v41, %v10241_v12  ;;  %v10242_v36 = vld [vmem:[#allocation132_spill] sm:$0xff] }
 0x442   : > { %v4396_v28 = vadd.f32 %v8551_v60, %v4395_v20  ;;  %v3398_v42 = vpop.permute.xlu0 %3397 }
 0x443   : > { %v4016_v24 = vsel %vm3962_vm3, %v3943_v55, %v3398_v42  ;;  %v10243_v55 = vld [vmem:[#allocation162_spill] sm:$0xff] }
 0x444   : > { %v4424_v19 = vpop.f32.mrf.mxu3  ;;  %v9043_v14 = vmax.f32 %v4396_v28, 0.0  ;;  %v4089_v23 = vsel %vm4035_vm5, %v4016_v24, %v3470_v3 }
 0x446   : > { %v4501_v63 = vpack.c.bf16 %v9043_v14, %v9043_v14 }
 0x447   : > { %v3556_v21 = vpop.permute.xlu1 %3555 }
 0x448   : > { %v4176_v5 = vsel %vm4108_vm6, %v4103_v56, %v3556_v21  ;;  %4533 = vst.msk [vmem:[%s8590_s9 + $0x58] sm:$0xf] %vm290_vm0, %v4501_v63  ;;  %v3669_v63 = vsel %vm3561_vm13, %v10118_v25, %v10242_v36  ;;  %v3560_v24 = vpop.permute.xlu2 %3559 }
 0x449   : > { %4893 = vmatmul.msk.bf16.gmra.mxu3 %vm4221_vm7, %v4176_v5  ;;  %v4397_v51 = vpop.f32.mrf.mxu2 }
 0x44a   : > { %v4398_v35 = vadd.f32 %v8551_v60, %v4397_v51  ;;  %v4331_v2 = vpop.f32.mrf.mxu0  ;;  %v3542_v50 = vpop.permute.xlu0 %3541  ;;  %v10244_v51 = vld [vmem:[#allocation178_spill] sm:$0xff] }
 0x44b   : > { %v4332_v58 = vadd.f32 %v8551_v60, %v4331_v2  ;;  %v4162_v37 = vsel %vm4108_vm6, %v4089_v23, %v3542_v50  ;;  %v10245_v2 = vld [vmem:[#allocation193_spill] sm:$0xff] }
 0x44c   : > { %v4425_v59 = vpop.f32.mrf.mxu3  ;;  %v9064_v8 = vmax.f32 %v4398_v35, 0.0  ;;  %4886 = vmatmul.msk.bf16.gmra.mxu2 %vm4221_vm7, %v4162_v37 }
 0x44d   : > { %v4453_v53 = vmax.f32 %v4332_v58, 0.0  ;;  %v10246_v58 = vld [vmem:[#allocation108_spill] sm:$0xff] }
 0x44e   : > { %v4502_v29 = vpack.c.bf16 %v9064_v8, %v9064_v8  ;;  %v3615_v23 = vsel %vm3561_vm13, %v10078_v61, %v10246_v58 }
 0x44f   : > { %v3342_v34 = vpop.permute.xlu1 %3341  ;;  %v4485_v57 = vpack.c.bf16 %v4453_v53, %v4453_v53  ;;  %v4554_v31 = vsel %vm1864_vm9, %v4453_v53, 0.0  ;;  %v4620_v3 = vmul.f32 %v4453_v53, %v4453_v53  ;;  %v3706_v25 = vsel %vm3670_vm14, %v3615_v23, %v10247_v46 }
 0x450   : > { %4534 = vst.msk [vmem:[%s8590_s9 + $0x5c] sm:$0xf] %vm290_vm0, %v4502_v29  ;;  %v3959_v38 = vsel %vm3889_vm4, %v3886_v47, %v3342_v34  ;;  %v4555_v43 = vadd.f32 %v4554_v31, %v8945_v32  ;;  %v3779_v34 = vsel %vm3743_vm15, %v3706_v25, %v10248_v62  ;;  %v10250_v29 = vld [vmem:[#allocation130_spill] sm:$0xff] }
 0x451   : > { %4517 = vst.msk [vmem:[%s8590_s9 + $0x18] sm:$0xf] %vm290_vm0, %v4485_v57  ;;  %v4657_v4 = vsel %vm1864_vm9, %v4620_v3, 0.0  ;;  %v4360_v10 = vpop.f32.mrf.mxu1  ;;  %v4032_v19 = vsel %vm3962_vm3, %v3959_v38, %v3414_v16  ;;  %v3742_v16 = vsel %vm3670_vm14, %v3669_v63, %v10243_v55  ;;  %v3852_v41 = vsel %vm3816_vm2, %v3779_v34, %v10249_v52 }
 0x452   : > { %v4658_v20 = vadd.f32 %v4657_v4, %v8952_v40  ;;  %v4333_v1 = vpop.f32.mrf.mxu0  ;;  %v3486_v28 = vpop.permute.xlu0 %3485  ;;  %v3815_v59 = vsel %vm3743_vm15, %v3742_v16, %v10244_v51  ;;  %v3925_v61 = vsel %vm3889_vm4, %v3852_v41, %v10250_v29 }
 0x453   : > { %v4334_v27 = vadd.f32 %v8551_v60, %v4333_v1  ;;  %v4105_v30 = vsel %vm4035_vm5, %v4032_v19, %v3486_v28  ;;  %v3888_v50 = vsel %vm3816_vm2, %v3815_v59, %v10245_v2 }
 0x454   : > { %v3961_v44 = vsel %vm3889_vm4, %v3888_v50, %v3344_v15 }
 0x455   : > { %v4454_v54 = vmax.f32 %v4334_v27, 0.0 }
 0x457   : > { %v3558_v42 = vpop.permute.xlu1 %3557  ;;  %v4486_v49 = vpack.c.bf16 %v4454_v54, %v4454_v54  ;;  %v4556_v18 = vsel %vm1864_vm9, %v4454_v54, 0.0  ;;  %v4621_v26 = vmul.f32 %v4454_v54, %v4454_v54 }
 0x458   : > { %v4178_v32 = vsel %vm4108_vm6, %v4105_v30, %v3558_v42  ;;  %v9091_v21 = vadd.f32 %v4556_v18, %v4555_v43  ;;  %v3524_v43 = vpop.permute.xlu2 %3523 }
 0x459   : > { %4894 = vmatmul.msk.bf16.gmra.mxu3 %vm4221_vm7, %v4178_v32  ;;  %4518 = vst.msk [vmem:[%s8590_s9 + $0x1c] sm:$0xf] %vm290_vm0, %v4486_v49  ;;  %v4659_v40 = vsel %vm1864_vm9, %v4621_v26, 0.0  ;;  %v4361_v56 = vpop.f32.mrf.mxu1 }
 0x45a   : > { %v9096_v7 = vadd.f32 %v4659_v40, %v4658_v20  ;;  %v3416_v5 = vpop.permute.xlu0 %3415 }
 0x45b   : > { %v4034_v37 = vsel %vm3962_vm3, %v3961_v44, %v3416_v5 }
 0x45f   : > { %v3488_v35 = vpop.permute.xlu1 %3487 }
 0x460   : > { %v4427_v22 = vpop.f32.mrf.mxu3  ;;  %v4107_v57 = vsel %vm4035_vm5, %v4034_v37, %v3488_v35 }
 0x461   : > { %v4428_v53 = vadd.f32 %v8551_v60, %v4427_v22  ;;  %v4180_v4 = vsel %vm4108_vm6, %v4107_v57, %v3560_v24 }
 0x462   : > { %v3380_v47 = vpop.permute.xlu0 %3379 }
 0x463   : > { %v9121_v12 = vmax.f32 %v4428_v53, 0.0  ;;  %v3998_v31 = vsel %vm3962_vm3, %v3925_v61, %v3380_v47  ;;  %v4624_v47 = vmul.f32 %v8804_v33, %v8804_v33 }
 0x465   : > { %v4509_v3 = vpack.c.bf16 %v9121_v12, %v9121_v12 }
 0x467   : > { %v3452_v38 = vpop.permute.xlu1 %3451  ;;  %4541 = vst.msk [vmem:[%s8590_s9 + $0x78] sm:$0xf] %vm290_vm0, %v4509_v3 }
 0x468   : > { %v4071_v10 = vsel %vm4035_vm5, %v3998_v31, %v3452_v38  ;;  %v4429_v20 = vpop.f32.mrf.mxu3 }
 0x469   : > { %4895 = vmatmul.msk.bf16.gmra.mxu3 %vm4221_vm7, %v4180_v4  ;;  %v4144_v15 = vsel %vm4108_vm6, %v4071_v10, %v3524_v43  ;;  %v4430_v1 = vadd.f32 %v8551_v60, %v4429_v20  ;;  %v4562_v43 = vsel %vm1864_vm9, %v8804_v33, 0.0  ;;  %v4625_v4 = vmul.f32 %v8844_v0, %v8844_v0 }
 0x46a   : > { %4877 = vmatmul.msk.bf16.gmra.mxu1 %vm4221_vm7, %v4144_v15  ;;  %v4665_v20 = vsel %vm1864_vm9, %v4624_v47, 0.0 }
 0x46b   : > { %v9135_v19 = vmax.f32 %v4430_v1, 0.0  ;;  %v4564_v1 = vsel %vm1864_vm9, %v8844_v0, 0.0  ;;  %v4667_v33 = vsel %vm1864_vm9, %v4625_v4, 0.0  ;;  %v4568_v0 = vsel %vm1864_vm9, %v9018_v48, 0.0 }
 0x46c   : > { %v4578_v4 = vsel %vm1864_vm9, %v8678_v11, 0.0 }
 0x46d   : > { %v4510_v28 = vpack.c.bf16 %v9135_v19, %v9135_v19 }
 0x46f   : > { %4542 = vst.msk [vmem:[%s8590_s9 + $0x7c] sm:$0xf] %vm290_vm0, %v4510_v28  ;;  %v4400_v27 = vpop.f32.mrf.mxu2 }
 0x471   : > { %v4336_v30 = vpop.f32.mrf.mxu0 }
 0x472   : > { %v4566_v30 = vsel %vm1864_vm9, %v8994_v45, 0.0 }
 0x476   : > { %v4363_v42 = vpop.f32.mrf.mxu1 }
 0x477   : > { %v4364_v54 = vadd.f32 %v8551_v60, %v4363_v42  ;;  %v4401_v49 = vpop.f32.mrf.mxu2  ;;  %v4627_v42 = vmul.f32 %v9018_v48, %v9018_v48 }
 0x479   : > { %v9142_v32 = vmax.f32 %v4364_v54, 0.0  ;;  %v4337_v26 = vpop.f32.mrf.mxu0 }
 0x47b   : > { %v4493_v18 = vpack.c.bf16 %v9142_v32, %v9142_v32 }
 0x47d   : > { %4525 = vst.msk [vmem:[%s8590_s9 + $0x38] sm:$0xf] %vm290_vm0, %v4493_v18 }
 0x47e   : > { %v4365_v40 = vpop.f32.mrf.mxu1 }
 0x47f   : > { %v4366_v56 = vadd.f32 %v8551_v60, %v4365_v40  ;;  %v4628_v40 = vmul.f32 %v9142_v32, %v9142_v32 }
 0x481   : > { %v9149_v36 = vmax.f32 %v4366_v56, 0.0 }
 0x483   : > { %v4494_v63 = vpack.c.bf16 %v9149_v36, %v9149_v36  ;;  %v4572_v48 = vsel %vm1864_vm9, %v9149_v36, 0.0 }
 0x485   : > { %4526 = vst.msk [vmem:[%s8590_s9 + $0x3c] sm:$0xf] %vm290_vm0, %v4494_v63 }
 0x487   : > { %v4432_v5 = vpop.f32.mrf.mxu3 }
 0x488   : > { %v4671_v5 = vsel %vm1864_vm9, %v4627_v42, 0.0  ;;  %v4635_v42 = vmul.f32 %v8926_v9, %v8926_v9 }
 0x48f   : > { %v4433_v55 = vpop.f32.mrf.mxu3 }
 0x490   : > { %v4629_v55 = vmul.f32 %v9149_v36, %v9149_v36 }
 0x492   : > { %v4368_v24 = vpop.f32.mrf.mxu1 }
 0x494   : > { %v4403_v16 = vpop.f32.mrf.mxu2 }
 0x495   : > { %v4404_v51 = vadd.f32 %v8551_v60, %v4403_v16 }
 0x496   : > { %v4339_v59 = vpop.f32.mrf.mxu0 }
 0x497   : > { %v9156_v35 = vmax.f32 %v4404_v51, 0.0  ;;  %v4340_v2 = vadd.f32 %v8551_v60, %v4339_v59  ;;  %v4673_v51 = vsel %vm1864_vm9, %v4628_v40, 0.0 }
 0x499   : > { %v4503_v50 = vpack.c.bf16 %v9156_v35, %v9156_v35  ;;  %v4455_v58 = vmax.f32 %v4340_v2, 0.0 }
 0x49a   : > { %v4369_v46 = vpop.f32.mrf.mxu1 }
 0x49b   : > { %4535 = vst.msk [vmem:[%s8590_s9 + $0x60] sm:$0xf] %vm290_vm0, %v4503_v50  ;;  %v4487_v23 = vpack.c.bf16 %v4455_v58, %v4455_v58  ;;  %v4622_v25 = vmul.f32 %v4455_v58, %v4455_v58  ;;  %v4558_v62 = vsel %vm1864_vm9, %v4455_v58, 0.0  ;;  %v4675_v50 = vsel %vm1864_vm9, %v4629_v55, 0.0 }
 0x49c   : > { %v4405_v44 = vpop.f32.mrf.mxu2  ;;  %v4559_v61 = vadd.f32 %v4558_v62, %v9091_v21 }
 0x49d   : > { %4519 = vst.msk [vmem:[%s8590_s9 + $0x20] sm:$0xf] %vm290_vm0, %v4487_v23  ;;  %v4406_v37 = vadd.f32 %v8551_v60, %v4405_v44  ;;  %v4661_v52 = vsel %vm1864_vm9, %v4622_v25, 0.0 }
 0x49e   : > { %v4341_v22 = vpop.f32.mrf.mxu0  ;;  %v4662_v38 = vadd.f32 %v4661_v52, %v9096_v7  ;;  %v4626_v7 = vmul.f32 %v8994_v45, %v8994_v45  ;;  %v4570_v45 = vsel %vm1864_vm9, %v9142_v32, 0.0  ;;  %v9214_v32 = vld [vmem:[%s9312_s3] ss:$0 sm:$0xff] }
 0x49f   : > { %v9167_v34 = vmax.f32 %v4406_v37, 0.0  ;;  %v4342_v53 = vadd.f32 %v8551_v60, %v4341_v22 }
 0x4a0   : > { %v4669_v26 = vsel %vm1864_vm9, %v4626_v7, 0.0  ;;  %v4580_v7 = vsel %vm1864_vm9, %v8711_v17, 0.0 }
 0x4a1   : > { %v4504_v41 = vpack.c.bf16 %v9167_v34, %v9167_v34  ;;  %v4456_v29 = vmax.f32 %v4342_v53, 0.0 }
 0x4a3   : > { %4536 = vst.msk [vmem:[%s8590_s9 + $0x64] sm:$0xf] %vm290_vm0, %v4504_v41  ;;  %v4488_v57 = vpack.c.bf16 %v4456_v29, %v4456_v29  ;;  %v4560_v31 = vsel %vm1864_vm9, %v4456_v29, 0.0  ;;  %v4623_v3 = vmul.f32 %v4456_v29, %v4456_v29 }
 0x4a4   : > { %v4561_v60 = vadd.f32 %v4560_v31, %v4559_v61 }
 0x4a5   : > { %4520 = vst.msk [vmem:[%s8590_s9 + $0x24] sm:$0xf] %vm290_vm0, %v4488_v57  ;;  %v4663_v21 = vsel %vm1864_vm9, %v4623_v3, 0.0  ;;  %v4632_v57 = vmul.f32 %v8678_v11, %v8678_v11 }
 0x4a6   : > { %v4563_v10 = vadd.f32 %v4562_v43, %v4561_v60  ;;  %v4664_v15 = vadd.f32 %v4663_v21, %v4662_v38  ;;  %v4633_v21 = vmul.f32 %v8711_v17, %v8711_v17  ;;  %v4584_v17 = vsel %vm1864_vm9, %v8926_v9, 0.0 }
 0x4a7   : > { %v4588_v9 = vsel %vm1864_vm9, %v9064_v8, 0.0 }
 0x4a8   : > { %v4565_v28 = vadd.f32 %v4564_v1, %v4563_v10  ;;  %v4666_v27 = vadd.f32 %v4665_v20, %v4664_v15  ;;  %v4435_v54 = vpop.f32.mrf.mxu3  ;;  %v4681_v1 = vsel %vm1864_vm9, %v4632_v57, 0.0  ;;  %v4683_v11 = vsel %vm1864_vm9, %v4633_v21, 0.0 }
 0x4aa   : > { %v4567_v49 = vadd.f32 %v4566_v30, %v4565_v28  ;;  %v4668_v18 = vadd.f32 %v4667_v33, %v4666_v27  ;;  %v4634_v28 = vmul.f32 %v8882_v39, %v8882_v39  ;;  %v4582_v30 = vsel %vm1864_vm9, %v8882_v39, 0.0 }
 0x4ab   : > { %v4586_v39 = vsel %vm1864_vm9, %v9043_v14, 0.0 }
 0x4ac   : > { %v4670_v56 = vadd.f32 %v4669_v26, %v4668_v18  ;;  %v4569_v63 = vadd.f32 %v4568_v0, %v4567_v49  ;;  %v4685_v18 = vsel %vm1864_vm9, %v4634_v28, 0.0  ;;  %v4636_v26 = vmul.f32 %v9043_v14, %v9043_v14 }
 0x4ad   : > { %v4590_v14 = vsel %vm1864_vm9, %v9156_v35, 0.0  ;;  %v4600_v28 = vsel %vm1864_vm9, %v8987_v6, 0.0 }
 0x4ae   : > { %v4571_v16 = vadd.f32 %v4570_v45, %v4569_v63  ;;  %v4672_v24 = vadd.f32 %v4671_v5, %v4670_v56  ;;  %v4687_v63 = vsel %vm1864_vm9, %v4635_v42, 0.0  ;;  %v4637_v5 = vmul.f32 %v9064_v8, %v9064_v8 }
 0x4af   : > { %v4602_v42 = vsel %vm1864_vm9, %v9121_v12, 0.0 }
 0x4b0   : > { %v4573_v59 = vadd.f32 %v4572_v48, %v4571_v16  ;;  %v4674_v2 = vadd.f32 %v4673_v51, %v4672_v24  ;;  %v4436_v58 = vpop.f32.mrf.mxu3  ;;  %v4408_v23 = vpop.f32.mrf.mxu2  ;;  %v4689_v16 = vsel %vm1864_vm9, %v4636_v26, 0.0  ;;  %v4638_v24 = vmul.f32 %v9156_v35, %v9156_v35 }
 0x4b1   : > { %v4592_v35 = vsel %vm1864_vm9, %v9167_v34, 0.0 }
 0x4b2   : > { %v4676_v44 = vadd.f32 %v4675_v50, %v4674_v2  ;;  %v4693_v23 = vsel %vm1864_vm9, %v4638_v24, 0.0 }
 0x4b6   : > { %v4371_v46 = vpop.f32.mrf.mxu1 }
 0x4b7   : > { %v4372_v25 = vadd.f32 %v9214_v32, %v4371_v46 }
 0x4b8   : > { %v4409_v62 = vpop.f32.mrf.mxu2 }
 0x4b9   : > { %v4463_v37 = vmax.f32 %v4372_v25, 0.0 }
 0x4bb   : > { %v4495_v22 = vpack.c.bf16 %v4463_v37, %v4463_v37  ;;  %v4630_v36 = vmul.f32 %v4463_v37, %v4463_v37  ;;  %v4574_v52 = vsel %vm1864_vm9, %v4463_v37, 0.0 }
 0x4bc   : > { %v4575_v47 = vadd.f32 %v4574_v52, %v4573_v59  ;;  %v4691_v59 = vsel %vm1864_vm9, %v4637_v5, 0.0 }
 0x4bd   : > { %4527 = vst.msk [vmem:[%s8590_s9 + $0x40] sm:$0xf] %vm290_vm0, %v4495_v22  ;;  %v4677_v29 = vsel %vm1864_vm9, %v4630_v36, 0.0  ;;  %v4639_v22 = vmul.f32 %v9167_v34, %v9167_v34 }
 0x4be   : > { %v4373_v53 = vpop.f32.mrf.mxu1  ;;  %v4678_v60 = vadd.f32 %v4677_v29, %v4676_v44 }
 0x4bf   : > { %v4374_v41 = vadd.f32 %v9214_v32, %v4373_v53 }
 0x4c1   : > { %v4464_v61 = vmax.f32 %v4374_v41, 0.0 }
 0x4c3   : > { %v4496_v31 = vpack.c.bf16 %v4464_v61, %v4464_v61  ;;  %v4576_v3 = vsel %vm1864_vm9, %v4464_v61, 0.0  ;;  %v4631_v38 = vmul.f32 %v4464_v61, %v4464_v61  ;;  %v4695_v61 = vsel %vm1864_vm9, %v4639_v22, 0.0 }
 0x4c4   : > { %v4577_v43 = vadd.f32 %v4576_v3, %v4575_v47 }
 0x4c5   : > { %4528 = vst.msk [vmem:[%s8590_s9 + $0x44] sm:$0xf] %vm290_vm0, %v4496_v31  ;;  %v4679_v10 = vsel %vm1864_vm9, %v4631_v38, 0.0  ;;  %v4642_v38 = vmul.f32 %v8965_v13, %v8965_v13 }
 0x4c6   : > { %v4579_v15 = vadd.f32 %v4578_v4, %v4577_v43  ;;  %v4680_v20 = vadd.f32 %v4679_v10, %v4678_v60  ;;  %v4643_v10 = vmul.f32 %v8987_v6, %v8987_v6  ;;  %v4604_v6 = vsel %vm1864_vm9, %v9135_v19, 0.0 }
 0x4c8   : > { %v4581_v27 = vadd.f32 %v4580_v7, %v4579_v15  ;;  %v4682_v33 = vadd.f32 %v4681_v1, %v4680_v20  ;;  %v4701_v7 = vsel %vm1864_vm9, %v4642_v38, 0.0 }
 0x4ca   : > { %v4583_v54 = vadd.f32 %v4582_v30, %v4581_v27  ;;  %v4684_v49 = vadd.f32 %v4683_v11, %v4682_v33  ;;  %v4644_v27 = vmul.f32 %v9121_v12, %v9121_v12  ;;  %v4703_v30 = vsel %vm1864_vm9, %v4643_v10, 0.0 }
 0x4cc   : > { %v4585_v0 = vadd.f32 %v4584_v17, %v4583_v54  ;;  %v4686_v40 = vadd.f32 %v4685_v18, %v4684_v49  ;;  %v4438_v56 = vpop.f32.mrf.mxu3  ;;  %v4645_v54 = vmul.f32 %v9135_v19, %v9135_v19  ;;  %v4705_v17 = vsel %vm1864_vm9, %v4644_v27, 0.0 }
 0x4ce   : > { %v4688_v45 = vadd.f32 %v4687_v63, %v4686_v40  ;;  %v4587_v55 = vadd.f32 %v4586_v39, %v4585_v0  ;;  %v4707_v56 = vsel %vm1864_vm9, %v4645_v54, 0.0 }
 0x4cf   : > { %v4411_v2 = vpop.f32.mrf.mxu2 }
 0x4d0   : > { %v4589_v51 = vadd.f32 %v4588_v9, %v4587_v55  ;;  %v4690_v48 = vadd.f32 %v4689_v16, %v4688_v45  ;;  %v4412_v44 = vadd.f32 %v9214_v32, %v4411_v2 }
 0x4d2   : > { %v4591_v50 = vadd.f32 %v4590_v14, %v4589_v51  ;;  %v4692_v58 = vadd.f32 %v4691_v59, %v4690_v48  ;;  %v4473_v25 = vmax.f32 %v4412_v44, 0.0 }
 0x4d4   : > { %v4694_v46 = vadd.f32 %v4693_v23, %v4692_v58  ;;  %v4439_v8 = vpop.f32.mrf.mxu3  ;;  %v4505_v37 = vpack.c.bf16 %v4473_v25, %v4473_v25  ;;  %v4640_v62 = vmul.f32 %v4473_v25, %v4473_v25  ;;  %v4594_v53 = vsel %vm1864_vm9, %v4473_v25, 0.0 }
 0x4d5   : > { %v4593_v41 = vadd.f32 %v4592_v35, %v4591_v50 }
 0x4d6   : > { %4537 = vst.msk [vmem:[%s8590_s9 + $0x68] sm:$0xf] %vm290_vm0, %v4505_v37  ;;  %v4697_v47 = vsel %vm1864_vm9, %v4640_v62, 0.0  ;;  %v4696_v3 = vadd.f32 %v4695_v61, %v4694_v46 }
 0x4d7   : > { %v4413_v36 = vpop.f32.mrf.mxu2  ;;  %v4595_v31 = vadd.f32 %v4594_v53, %v4593_v41 }
 0x4d8   : > { %v4414_v52 = vadd.f32 %v9214_v32, %v4413_v36  ;;  %v4698_v4 = vadd.f32 %v4697_v47, %v4696_v3  ;;  %v4598_v32 = vsel %vm1864_vm9, %v8965_v13, 0.0 }
 0x4da   : > { %v4474_v57 = vmax.f32 %v4414_v52, 0.0 }
 0x4dc   : > { %v4441_v29 = vpop.f32.mrf.mxu3  ;;  %v4506_v60 = vpack.c.bf16 %v4474_v57, %v4474_v57  ;;  %v4596_v34 = vsel %vm1864_vm9, %v4474_v57, 0.0  ;;  %v4641_v43 = vmul.f32 %v4474_v57, %v4474_v57 }
 0x4dd   : > { %v4597_v21 = vadd.f32 %v4596_v34, %v4595_v31 }
 0x4de   : > { %4538 = vst.msk [vmem:[%s8590_s9 + $0x6c] sm:$0xf] %vm290_vm0, %v4506_v60  ;;  %v4699_v15 = vsel %vm1864_vm9, %v4641_v43, 0.0 }
 0x4df   : > { %v4599_v20 = vadd.f32 %v4598_v32, %v4597_v21  ;;  %v4700_v1 = vadd.f32 %v4699_v15, %v4698_v4 }
 0x4e1   : > { %v4601_v33 = vadd.f32 %v4600_v28, %v4599_v20  ;;  %v4702_v11 = vadd.f32 %v4701_v7, %v4700_v1 }
 0x4e3   : > { %v4603_v49 = vadd.f32 %v4602_v42, %v4601_v33  ;;  %v4704_v18 = vadd.f32 %v4703_v30, %v4702_v11 }
 0x4e4   : > { %v4442_v13 = vpop.f32.mrf.mxu3 }
 0x4e5   : > { %v4605_v0 = vadd.f32 %v4604_v6, %v4603_v49  ;;  %v4706_v40 = vadd.f32 %v4705_v17, %v4704_v18 }
 0x4e7   : > { %v4376_v26 = vpop.f32.mrf.mxu1  ;;  %v4606_v63 = vrot.slane %v4605_v0, 4  ;;  %v4708_v39 = vadd.f32 %v4707_v56, %v4706_v40 }
 0x4e9   : > { %v4607_v12 = vadd.f32 %v4606_v63, %v4605_v0  ;;  %v4709_v5 = vrot.slane %v4708_v39, 4 }
 0x4eb   : > { %v4608_v55 = vrot.slane %v4607_v12, 2  ;;  %v4710_v16 = vadd.f32 %v4709_v5, %v4708_v39 }
 0x4ec   : > { %v4444_v45 = vpop.f32.mrf.mxu3 }
 0x4ed   : > { %v4609_v24 = vadd.f32 %v4608_v55, %v4607_v12  ;;  %v4711_v51 = vrot.slane %v4710_v16, 2 }
 0x4ef   : > { %v4377_v9 = vpop.f32.mrf.mxu1  ;;  %v4610_v48 = vrot.slane %v4609_v24, 1  ;;  %v4712_v59 = vadd.f32 %v4711_v51, %v4710_v16 }
 0x4f1   : > { %v4611_v19 = vadd.f32 %v4610_v48, %v4609_v24  ;;  %v4713_v14 = vrot.slane %v4712_v59, 1 }
 0x4f3   : > { %4613 = vst.msk [vmem:[%s285_s13] sm:$0x1] %vm300_vm1, %v4611_v19  ;;  %v4714_v50 = vadd.f32 %v4713_v14, %v4712_v59 }
 0x4f4   : > { %v4445_v2 = vpop.f32.mrf.mxu3 }
 0x4f5   : > { %4715 = vst.msk [vmem:[%s288_s16] sm:$0x1] %vm300_vm1, %v4714_v50 }
 0x4f6 PF: > { %s17_s21 = sadd.s32 1, %s5484_s21  }
 0x4f7   : > { %p14_p4 = scmp.ge.s32.totalorder %s17_s21, 4  }
 0x4f9   :  { %16 = sbr.rel (!%p14_p4) target bundleno = 1 (0x1), region = 97 }

</bundles_post_ra>
